<compile_context>
chip_gen: v7x
topology: tpu7x:2x2x1
jax: 0.10.0
libtpu: 0.0.40
codegen_flags: <defaults>
</compile_context>

<pallas_src>
import math
from functools import partial

import jax
import jax.numpy as jnp
from jax import lax
from jax.experimental import pallas as pl
from jax.experimental.pallas import tpu as pltpu


def _round_up(x, m):
    return ((x + m - 1) // m) * m


# ----------------------------------------------------------------------------------
# Pallas kernels:  out = relu_maybe((A @ B) * scale + shift)
# A/B blocks are bf16 (MXU operands), accumulation is f32.
# ----------------------------------------------------------------------------------
def _gemm_bn_single_k_kernel(a_ref, b_ref, st_ref, o_ref, *, relu):
    # Whole K reduction in one MXU pass; epilogue on the register value, single store.
    acc = jnp.dot(a_ref[...], b_ref[...], preferred_element_type=jnp.float32)
    st = st_ref[...]
    y = acc * st[0:1, :] + st[1:2, :]
    if relu:
        y = jnp.maximum(y, 0.0)
    o_ref[...] = y.astype(o_ref.dtype)


def _gemm_bn_multi_k_kernel(a_ref, b_ref, st_ref, o_ref, acc_ref, *, relu):
    # Generic multi-K-step path (not exercised at the shapes in __main__):
    # f32 VMEM scratch accumulator, first step writes (no zero-init round trip),
    # epilogue + single output store on the last step.
    k = pl.program_id(2)
    part = jnp.dot(a_ref[...], b_ref[...], preferred_element_type=jnp.float32)

    @pl.when(k == 0)
    def _():
        acc_ref[...] = part

    @pl.when(k != 0)
    def _():
        acc_ref[...] += part

    @pl.when(k == pl.num_programs(2) - 1)
    def _():
        st = st_ref[...]
        y = acc_ref[...] * st[0:1, :] + st[1:2, :]
        if relu:
            y = jnp.maximum(y, 0.0)
        o_ref[...] = y.astype(o_ref.dtype)


def fused_gemm(a, b, scale, shift, *, relu, out_dtype=jnp.bfloat16):
    """relu_maybe((a @ b) * scale + shift), bf16 MXU operands, f32 accumulation.

    a: (M, K)   b: (K, N)   scale/shift: (N,) f32   ->   (M, N) out_dtype
    """
    M, K = a.shape
    K2, N = b.shape
    assert K == K2

    tn = 128                               # cout is small here; 256-wide tiles buy nothing
    Np = _round_up(N, tn)

    TK_MAX = 2048
    if K <= TK_MAX:
        Kp = _round_up(K, 16)              # single reduction step, minimal padding
        tk = Kp
    else:
        tk = TK_MAX
        Kp = _round_up(K, tk)
    n_k = Kp // tk

    # 1 M grid step for small M, >=2 for larger M (keeps both v7x TensorCores busy
    # while costing only ~0.35us extra on single-core v5e/v6e).
    n_m = 2 if M >= 512 else 1
    tm = min(_round_up(-(-M // n_m), 8), 2048)
    Mp = _round_up(M, tm)

    out_bytes = 2 if out_dtype == jnp.bfloat16 else 4
    est_vmem = (2 * (tm * tk + tk * tn) * 2          # double-buffered bf16 A/B tiles
                + 2 * tm * tn * out_bytes            # double-buffered output tile
                + tm * tn * 4                        # f32 scratch (multi-K path only)
                + 2 * 2 * tn * 4)                    # packed scale/shift tile
    assert est_vmem < (40 << 20), f"tile set too large for v7x VMEM: {est_vmem}"

    a_p = jnp.pad(a.astype(jnp.bfloat16), ((0, Mp - M), (0, Kp - K)))
    b_p = jnp.pad(b.astype(jnp.bfloat16), ((0, Kp - K), (0, Np - N)))
    st = jnp.stack([jnp.pad(scale.astype(jnp.float32), (0, Np - N)),
                    jnp.pad(shift.astype(jnp.float32), (0, Np - N))])   # (2, Np)

    cparams = pltpu.CompilerParams(
        dimension_semantics=(("parallel", "parallel") if n_k == 1
                             else ("parallel", "parallel", "arbitrary")),
        vmem_limit_bytes=min(max(2 * est_vmem, 32 << 20), 48 << 20),
    )

    if n_k == 1:
        out = pl.pallas_call(
            partial(_gemm_bn_single_k_kernel, relu=relu),
            out_shape=jax.ShapeDtypeStruct((Mp, Np), out_dtype),
            grid_spec=pltpu.PrefetchScalarGridSpec(
                num_scalar_prefetch=0,
                grid=(Mp // tm, Np // tn),
                in_specs=[
                    pl.BlockSpec((tm, tk), lambda i, j: (i, 0)),
                    pl.BlockSpec((tk, tn), lambda i, j: (0, j)),
                    pl.BlockSpec((2, tn), lambda i, j: (0, j)),
                ],
                out_specs=pl.BlockSpec((tm, tn), lambda i, j: (i, j)),
            ),
            compiler_params=cparams,
        )(a_p, b_p, st)
    else:
        out = pl.pallas_call(
            partial(_gemm_bn_multi_k_kernel, relu=relu),
            out_shape=jax.ShapeDtypeStruct((Mp, Np), out_dtype),
            grid_spec=pltpu.PrefetchScalarGridSpec(
                num_scalar_prefetch=0,
                grid=(Mp // tm, Np // tn, n_k),
                in_specs=[
                    pl.BlockSpec((tm, tk), lambda i, j, k: (i, k)),
                    pl.BlockSpec((tk, tn), lambda i, j, k: (k, j)),
                    pl.BlockSpec((2, tn), lambda i, j, k: (0, j)),
                ],
                out_specs=pl.BlockSpec((tm, tn), lambda i, j, k: (i, j)),
                scratch_shapes=[pltpu.VMEM((tm, tn), jnp.float32)],
            ),
            compiler_params=cparams,
        )(a_p, b_p, st)
    return out[:M, :N]


# ----------------------------------------------------------------------------------
# Glue: im2col + conv / conv-transpose wrappers (NHWC internally, bf16 activations)
# ----------------------------------------------------------------------------------
def _im2col(xp, kh, kw):
    """Stride-1 patch extraction on an already spatially padded NHWC tensor."""
    n, h, w, c = xp.shape
    ho, wo = h - kh + 1, w - kw + 1
    cols = [xp[:, ky:ky + ho, kx:kx + wo, :] for ky in range(kh) for kx in range(kw)]
    p = jnp.stack(cols, axis=3)                      # (n, ho, wo, kh*kw, c)
    return p.reshape(n * ho * wo, kh * kw * c), (n, ho, wo)


def conv2d_fused(x_nhwc, w_oihw, bias, scale, shift, *, relu,
                 out_dtype=jnp.bfloat16, padding=1):
    """Conv2d(k=3, stride=1, padding=1, bias) + BN affine + optional ReLU."""
    cout, cin, kh, kw = w_oihw.shape
    xp = jnp.pad(x_nhwc.astype(jnp.bfloat16),
                 ((0, 0), (padding, padding), (padding, padding), (0, 0)))
    a, (n, ho, wo) = _im2col(xp, kh, kw)
    # weight -> (kh*kw*cin, cout), matching the (ky, kx, cin) K ordering of the patches
    b = jnp.transpose(w_oihw, (2, 3, 1, 0)).reshape(kh * kw * cin, cout)
    eff_shift = shift + scale * bias                 # fold conv bias into the BN shift
    y = fused_gemm(a, b, scale, eff_shift, relu=relu, out_dtype=out_dtype)
    return y.reshape(n, ho, wo, cout)


# Per output parity r (per spatial axis), tap dy in {0,1} reads original ConvTranspose
# kernel index _TAPS[r][dy]  (derived from kernel flip + stride-2 zero insertion).
_TAPS = ((3, 1), (2, 0))


def conv_transpose2d_fused(x_nhwc, w_iohw, scale, shift, *, relu,
                           out_dtype=jnp.bfloat16):
    """ConvTranspose2d(k=4, s=2, p=1, bias=False) + BN affine + optional ReLU.

    All 4 output parities are merged into ONE GEMM: a single 3x3 im2col A
    (K = 9*cin) against a tap-selected weight (9*cin, 4*cout) -> lane-dense N = 128.
    """
    cin, cout, kh, kw = w_iohw.shape
    assert (kh, kw) == (4, 4)
    n, h, w, _ = x_nhwc.shape
    xp = jnp.pad(x_nhwc.astype(jnp.bfloat16), ((0, 0), (1, 1), (1, 1), (0, 0)))

    # Single 3x3 im2col over the padded input; K ordering = (ty, tx, cin).
    cols = [xp[:, ty:ty + h, tx:tx + w, :] for ty in range(3) for tx in range(3)]
    A = jnp.stack(cols, axis=3).reshape(n * h * w, 9 * cin)

    # Tap-selected merged weight: zeros at taps a given parity does not use.
    Bw = jnp.zeros((3, 3, cin, 2, 2, cout), jnp.float32)
    for ry in (0, 1):
        for rx in (0, 1):
            for dy in (0, 1):
                for dx in (0, 1):
                    Bw = Bw.at[ry + dy, rx + dx, :, ry, rx, :].set(
                        w_iohw[:, :, _TAPS[ry][dy], _TAPS[rx][dx]])
    B = Bw.reshape(9 * cin, 4 * cout)                 # columns ordered (ry, rx, cout)

    sc4 = jnp.tile(scale, 4)
    sh4 = jnp.tile(shift, 4)
    y = fused_gemm(A, B, sc4, sh4, relu=relu, out_dtype=out_dtype)   # (n*h*w, 4*cout)
    y = y.reshape(n, h, w, 2, 2, cout)                # (n, qy, qx, ry, rx, co)
    # out[n, 2*qy+ry, 2*qx+rx, co] -> depth-to-space
    y = jnp.transpose(y, (0, 1, 3, 2, 4, 5))          # (n, qy, ry, qx, rx, co)
    return y.reshape(n, 2 * h, 2 * w, cout)


# ----------------------------------------------------------------------------------
# Generator_block: parameters + forward (mirrors the PyTorch module, inference BN)
# ----------------------------------------------------------------------------------
def init_params(key, in_layers, out_layers):
    def bn_params(k, c):
        k1, k2, k3, k4 = jax.random.split(k, 4)
        gamma = 1.0 + 0.1 * jax.random.normal(k1, (c,), jnp.float32)
        beta = 0.1 * jax.random.normal(k2, (c,), jnp.float32)
        mean = 0.1 * jax.random.normal(k3, (c,), jnp.float32)
        var = jax.random.uniform(k4, (c,), jnp.float32, 0.5, 1.5)
        scale = gamma / jnp.sqrt(var + 1e-5)
        shift = beta - mean * scale
        return scale, shift

    k_ct, k_b0, k_c1, k_c1b, k_b1, k_c2, k_c2b, k_b2 = jax.random.split(key, 8)
    ct_w = jax.random.normal(k_ct, (in_layers, out_layers, 4, 4), jnp.float32) \
        / math.sqrt(in_layers * 16)
    c1_w = jax.random.normal(k_c1, (out_layers, out_layers, 3, 3), jnp.float32) \
        / math.sqrt(out_layers * 9)
    c1_b = 0.05 * jax.random.normal(k_c1b, (out_layers,), jnp.float32)
    c2_w = jax.random.normal(k_c2, (out_layers, out_layers, 3, 3), jnp.float32) \
        / math.sqrt(out_layers * 9)
    c2_b = 0.05 * jax.random.normal(k_c2b, (out_layers,), jnp.float32)
    return dict(ct_w=ct_w, bn0=bn_params(k_b0, out_layers),
                conv1_w=c1_w, conv1_b=c1_b, bn1=bn_params(k_b1, out_layers),
                conv2_w=c2_w, conv2_b=c2_b, bn2=bn_params(k_b2, out_layers))


def generator_block_forward(params, x_nchw):
    # NCHW -> NHWC, cast to bf16 once at entry (all im2col / intermediates stay bf16)
    x = jnp.transpose(x_nchw, (0, 2, 3, 1)).astype(jnp.bfloat16)
    x = conv_transpose2d_fused(x, params["ct_w"], *params["bn0"], relu=True)
    x = conv2d_fused(x, params["conv1_w"], params["conv1_b"], *params["bn1"], relu=True)
    x = conv2d_fused(x, params["conv2_w"], params["conv2_b"], *params["bn2"], relu=True,
                     out_dtype=jnp.float32)
    return jnp.transpose(x, (0, 3, 1, 2))             # NHWC -> NCHW, f32


# ----------------------------------------------------------------------------------
# Pure-JAX reference (lax convs, same bf16-operand / f32-accumulate precision)
# ----------------------------------------------------------------------------------
def _ref_conv_t(x_nhwc, w_iohw, stride=2, padding=1):
    kh = w_iohw.shape[2]
    p = kh - 1 - padding
    w_conv = jnp.transpose(w_iohw[:, :, ::-1, ::-1], (1, 0, 2, 3))
    w_hwio = jnp.transpose(w_conv, (2, 3, 1, 0))
    return lax.conv_general_dilated(
        x_nhwc.astype(jnp.bfloat16), w_hwio.astype(jnp.bfloat16),
        window_strides=(1, 1), padding=[(p, p), (p, p)],
        lhs_dilation=(stride, stride),
        dimension_numbers=("NHWC", "HWIO", "NHWC"),
        preferred_element_type=jnp.float32)


def _ref_conv(x_nhwc, w_oihw, padding=1):
    w_hwio = jnp.transpose(w_oihw, (2, 3, 1, 0))
    return lax.conv_general_dilated(
        x_nhwc.astype(jnp.bfloat16), w_hwio.astype(jnp.bfloat16),
        (1, 1), [(padding, padding), (padding, padding)],
        dimension_numbers=("NHWC", "HWIO", "NHWC"),
        preferred_element_type=jnp.float32)


def reference_forward(params, x_nchw):
    x = jnp.transpose(x_nchw, (0, 2, 3, 1)).astype(jnp.float32)
    s, t = params["bn0"]
    x = jnp.maximum(_ref_conv_t(x, params["ct_w"]) * s + t, 0.0)
    s, t = params["bn1"]
    x = jnp.maximum(_ref_conv(x, params["conv1_w"]) * s + (t + s * params["conv1_b"]), 0.0)
    s, t = params["bn2"]
    x = jnp.maximum(_ref_conv(x, params["conv2_w"]) * s + (t + s * params["conv2_b"]), 0.0)
    return jnp.transpose(x, (0, 3, 1, 2))


# ----------------------------------------------------------------------------------
if __name__ == "__main__":
    in_layers, out_layers = 64, 32
    batch, spatial = 2, 16

    key = jax.random.PRNGKey(0)
    pkey, xkey = jax.random.split(key)
    params = init_params(pkey, in_layers, out_layers)
    x = jax.random.normal(xkey, (batch, in_layers, spatial, spatial), jnp.float32)

    out = jax.jit(generator_block_forward)(params, x)
    out = jax.block_until_ready(out)
    assert out.shape == (batch, out_layers, 2 * spatial, 2 * spatial), out.shape

    ref = jax.block_until_ready(reference_forward(params, x))
    max_err = float(jnp.max(jnp.abs(out - ref)))
    assert jnp.allclose(out, ref, atol=2e-2, rtol=2e-2), f"max_err={max_err}"

    print("KERNEL_OK")
</pallas_src>

<mosaic_0001>
module attributes {stable_mosaic.version = 11 : i64} {
  func.func @_gemm_bn_single_k_kernel(%arg0: i32, %arg1: i32, %arg2: memref<256x576xbf16, #tpu.memory_space<vmem>>, %arg3: memref<576x128xbf16, #tpu.memory_space<vmem>>, %arg4: memref<2x128xf32, #tpu.memory_space<vmem>>, %arg5: memref<256x128xbf16, #tpu.memory_space<vmem>>) attributes {dimension_semantics = [#tpu.dimension_semantics<parallel>, #tpu.dimension_semantics<parallel>], iteration_bounds = array<i64: 2, 1>, scalar_prefetch = 0 : i64, scratch_operands = 0 : i64, tpu.core_type = #tpu.core_type<tc>, window_params = [{transform_indices = @transform_0, window_bounds = array<i64: 256, 576>}, {transform_indices = @transform_1, window_bounds = array<i64: 576, 128>}, {transform_indices = @transform_2, window_bounds = array<i64: 2, 128>}, {transform_indices = @transform_3, window_bounds = array<i64: 256, 128>}]} {
    %c0 = arith.constant 0 : index
    %c0_0 = arith.constant 0 : index
    %0 = vector.load %arg2[%c0, %c0_0] : memref<256x576xbf16, #tpu.memory_space<vmem>>, vector<256x576xbf16>
    %c0_1 = arith.constant 0 : index
    %c0_2 = arith.constant 0 : index
    %1 = vector.load %arg3[%c0_1, %c0_2] : memref<576x128xbf16, #tpu.memory_space<vmem>>, vector<576x128xbf16>
    %cst = arith.constant dense<0.000000e+00> : vector<256x128xf32>
    %2 = tpu.matmul %0, %1, %cst {dimension_numbers = #tpu.dot_dimension_numbers<[1], [0], [0], [1], [0, 0, 1, 1], [], []>} : vector<256x576xbf16>, vector<576x128xbf16>, vector<256x128xf32> -> vector<256x128xf32>
    %c0_3 = arith.constant 0 : index
    %c0_4 = arith.constant 0 : index
    %3 = vector.load %arg4[%c0_3, %c0_4] : memref<2x128xf32, #tpu.memory_space<vmem>>, vector<2x128xf32>
    %4 = vector.extract_strided_slice %3 {offsets = [0, 0], sizes = [1, 128], strides = [1, 1]} : vector<2x128xf32> to vector<1x128xf32>
    %5 = vector.broadcast %4 : vector<1x128xf32> to vector<256x128xf32>
    %6 = arith.mulf %2, %5 : vector<256x128xf32>
    %7 = vector.extract_strided_slice %3 {offsets = [1, 0], sizes = [1, 128], strides = [1, 1]} : vector<2x128xf32> to vector<1x128xf32>
    %8 = vector.broadcast %7 : vector<1x128xf32> to vector<256x128xf32>
    %9 = arith.addf %6, %8 : vector<256x128xf32>
    %cst_5 = arith.constant 0.000000e+00 : f32
    %10 = vector.broadcast %cst_5 : f32 to vector<256x128xf32>
    %11 = arith.maximumf %9, %10 : vector<256x128xf32>
    %12 = arith.truncf %11 : vector<256x128xf32> to vector<256x128xbf16>
    %c0_6 = arith.constant 0 : index
    %c0_7 = arith.constant 0 : index
    %13 = vector.load %arg5[%c0_6, %c0_7] : memref<256x128xbf16, #tpu.memory_space<vmem>>, vector<256x128xbf16>
    tpu.vector_store %arg5[%c0_6, %c0_7], %12 {strides = array<i32>} : memref<256x128xbf16, #tpu.memory_space<vmem>>, vector<256x128xbf16>,
    return
  }
  func.func @transform_0(%arg0: i32, %arg1: i32) -> (i32, i32) {
    %c0_i32 = arith.constant 0 : i32
    %c0_i32_0 = arith.constant 0 : i32
    return %arg0, %c0_i32 : i32, i32
  }
  func.func @transform_1(%arg0: i32, %arg1: i32) -> (i32, i32) {
    %c0_i32 = arith.constant 0 : i32
    %c0_i32_0 = arith.constant 0 : i32
    return %c0_i32, %arg1 : i32, i32
  }
  func.func @transform_2(%arg0: i32, %arg1: i32) -> (i32, i32) {
    %c0_i32 = arith.constant 0 : i32
    %c0_i32_0 = arith.constant 0 : i32
    return %c0_i32, %arg1 : i32, i32
  }
  func.func @transform_3(%arg0: i32, %arg1: i32) -> (i32, i32) {
    %c0_i32 = arith.constant 0 : i32
    return %arg0, %arg1 : i32, i32
  }
}

module attributes {stable_mosaic.version = 11 : i64} {
  func.func @_gemm_bn_single_k_kernel(%arg0: i32, %arg1: i32, %arg2: memref<1024x288xbf16, #tpu.memory_space<vmem>>, %arg3: memref<288x128xbf16, #tpu.memory_space<vmem>>, %arg4: memref<2x128xf32, #tpu.memory_space<vmem>>, %arg5: memref<1024x128xbf16, #tpu.memory_space<vmem>>) attributes {dimension_semantics = [#tpu.dimension_semantics<parallel>, #tpu.dimension_semantics<parallel>], iteration_bounds = array<i64: 2, 1>, scalar_prefetch = 0 : i64, scratch_operands = 0 : i64, tpu.core_type = #tpu.core_type<tc>, window_params = [{transform_indices = @transform_0, window_bounds = array<i64: 1024, 288>}, {transform_indices = @transform_1, window_bounds = array<i64: 288, 128>}, {transform_indices = @transform_2, window_bounds = array<i64: 2, 128>}, {transform_indices = @transform_3, window_bounds = array<i64: 1024, 128>}]} {
    %c0 = arith.constant 0 : index
    %c0_0 = arith.constant 0 : index
    %0 = vector.load %arg2[%c0, %c0_0] : memref<1024x288xbf16, #tpu.memory_space<vmem>>, vector<1024x288xbf16>
    %c0_1 = arith.constant 0 : index
    %c0_2 = arith.constant 0 : index
    %1 = vector.load %arg3[%c0_1, %c0_2] : memref<288x128xbf16, #tpu.memory_space<vmem>>, vector<288x128xbf16>
    %cst = arith.constant dense<0.000000e+00> : vector<1024x128xf32>
    %2 = tpu.matmul %0, %1, %cst {dimension_numbers = #tpu.dot_dimension_numbers<[1], [0], [0], [1], [0, 0, 1, 1], [], []>} : vector<1024x288xbf16>, vector<288x128xbf16>, vector<1024x128xf32> -> vector<1024x128xf32>
    %c0_3 = arith.constant 0 : index
    %c0_4 = arith.constant 0 : index
    %3 = vector.load %arg4[%c0_3, %c0_4] : memref<2x128xf32, #tpu.memory_space<vmem>>, vector<2x128xf32>
    %4 = vector.extract_strided_slice %3 {offsets = [0, 0], sizes = [1, 128], strides = [1, 1]} : vector<2x128xf32> to vector<1x128xf32>
    %5 = vector.broadcast %4 : vector<1x128xf32> to vector<1024x128xf32>
    %6 = arith.mulf %2, %5 : vector<1024x128xf32>
    %7 = vector.extract_strided_slice %3 {offsets = [1, 0], sizes = [1, 128], strides = [1, 1]} : vector<2x128xf32> to vector<1x128xf32>
    %8 = vector.broadcast %7 : vector<1x128xf32> to vector<1024x128xf32>
    %9 = arith.addf %6, %8 : vector<1024x128xf32>
    %cst_5 = arith.constant 0.000000e+00 : f32
    %10 = vector.broadcast %cst_5 : f32 to vector<1024x128xf32>
    %11 = arith.maximumf %9, %10 : vector<1024x128xf32>
    %12 = arith.truncf %11 : vector<1024x128xf32> to vector<1024x128xbf16>
    %c0_6 = arith.constant 0 : index
    %c0_7 = arith.constant 0 : index
    %13 = vector.load %arg5[%c0_6, %c0_7] : memref<1024x128xbf16, #tpu.memory_space<vmem>>, vector<1024x128xbf16>
    tpu.vector_store %arg5[%c0_6, %c0_7], %12 {strides = array<i32>} : memref<1024x128xbf16, #tpu.memory_space<vmem>>, vector<1024x128xbf16>,
    return
  }
  func.func @transform_0(%arg0: i32, %arg1: i32) -> (i32, i32) {
    %c0_i32 = arith.constant 0 : i32
    %c0_i32_0 = arith.constant 0 : i32
    return %arg0, %c0_i32 : i32, i32
  }
  func.func @transform_1(%arg0: i32, %arg1: i32) -> (i32, i32) {
    %c0_i32 = arith.constant 0 : i32
    %c0_i32_0 = arith.constant 0 : i32
    return %c0_i32, %arg1 : i32, i32
  }
  func.func @transform_2(%arg0: i32, %arg1: i32) -> (i32, i32) {
    %c0_i32 = arith.constant 0 : i32
    %c0_i32_0 = arith.constant 0 : i32
    return %c0_i32, %arg1 : i32, i32
  }
  func.func @transform_3(%arg0: i32, %arg1: i32) -> (i32, i32) {
    %c0_i32 = arith.constant 0 : i32
    return %arg0, %arg1 : i32, i32
  }
}

module attributes {stable_mosaic.version = 11 : i64} {
  func.func @_gemm_bn_single_k_kernel(%arg0: i32, %arg1: i32, %arg2: memref<1024x288xbf16, #tpu.memory_space<vmem>>, %arg3: memref<288x128xbf16, #tpu.memory_space<vmem>>, %arg4: memref<2x128xf32, #tpu.memory_space<vmem>>, %arg5: memref<1024x128xf32, #tpu.memory_space<vmem>>) attributes {dimension_semantics = [#tpu.dimension_semantics<parallel>, #tpu.dimension_semantics<parallel>], iteration_bounds = array<i64: 2, 1>, scalar_prefetch = 0 : i64, scratch_operands = 0 : i64, tpu.core_type = #tpu.core_type<tc>, window_params = [{transform_indices = @transform_0, window_bounds = array<i64: 1024, 288>}, {transform_indices = @transform_1, window_bounds = array<i64: 288, 128>}, {transform_indices = @transform_2, window_bounds = array<i64: 2, 128>}, {transform_indices = @transform_3, window_bounds = array<i64: 1024, 128>}]} {
    %c0 = arith.constant 0 : index
    %c0_0 = arith.constant 0 : index
    %0 = vector.load %arg2[%c0, %c0_0] : memref<1024x288xbf16, #tpu.memory_space<vmem>>, vector<1024x288xbf16>
    %c0_1 = arith.constant 0 : index
    %c0_2 = arith.constant 0 : index
    %1 = vector.load %arg3[%c0_1, %c0_2] : memref<288x128xbf16, #tpu.memory_space<vmem>>, vector<288x128xbf16>
    %cst = arith.constant dense<0.000000e+00> : vector<1024x128xf32>
    %2 = tpu.matmul %0, %1, %cst {dimension_numbers = #tpu.dot_dimension_numbers<[1], [0], [0], [1], [0, 0, 1, 1], [], []>} : vector<1024x288xbf16>, vector<288x128xbf16>, vector<1024x128xf32> -> vector<1024x128xf32>
    %c0_3 = arith.constant 0 : index
    %c0_4 = arith.constant 0 : index
    %3 = vector.load %arg4[%c0_3, %c0_4] : memref<2x128xf32, #tpu.memory_space<vmem>>, vector<2x128xf32>
    %4 = vector.extract_strided_slice %3 {offsets = [0, 0], sizes = [1, 128], strides = [1, 1]} : vector<2x128xf32> to vector<1x128xf32>
    %5 = vector.broadcast %4 : vector<1x128xf32> to vector<1024x128xf32>
    %6 = arith.mulf %2, %5 : vector<1024x128xf32>
    %7 = vector.extract_strided_slice %3 {offsets = [1, 0], sizes = [1, 128], strides = [1, 1]} : vector<2x128xf32> to vector<1x128xf32>
    %8 = vector.broadcast %7 : vector<1x128xf32> to vector<1024x128xf32>
    %9 = arith.addf %6, %8 : vector<1024x128xf32>
    %cst_5 = arith.constant 0.000000e+00 : f32
    %10 = vector.broadcast %cst_5 : f32 to vector<1024x128xf32>
    %11 = arith.maximumf %9, %10 : vector<1024x128xf32>
    %c0_6 = arith.constant 0 : index
    %c0_7 = arith.constant 0 : index
    %12 = vector.load %arg5[%c0_6, %c0_7] : memref<1024x128xf32, #tpu.memory_space<vmem>>, vector<1024x128xf32>
    tpu.vector_store %arg5[%c0_6, %c0_7], %11 {strides = array<i32>} : memref<1024x128xf32, #tpu.memory_space<vmem>>, vector<1024x128xf32>,
    return
  }
  func.func @transform_0(%arg0: i32, %arg1: i32) -> (i32, i32) {
    %c0_i32 = arith.constant 0 : i32
    %c0_i32_0 = arith.constant 0 : i32
    return %arg0, %c0_i32 : i32, i32
  }
  func.func @transform_1(%arg0: i32, %arg1: i32) -> (i32, i32) {
    %c0_i32 = arith.constant 0 : i32
    %c0_i32_0 = arith.constant 0 : i32
    return %c0_i32, %arg1 : i32, i32
  }
  func.func @transform_2(%arg0: i32, %arg1: i32) -> (i32, i32) {
    %c0_i32 = arith.constant 0 : i32
    %c0_i32_0 = arith.constant 0 : i32
    return %c0_i32, %arg1 : i32, i32
  }
  func.func @transform_3(%arg0: i32, %arg1: i32) -> (i32, i32) {
    %c0_i32 = arith.constant 0 : i32
    return %arg0, %arg1 : i32, i32
  }
}

</mosaic_0001>

<bundles_post_ra>
// kernel: tile.13
= control target key start
LH: loop header
LB: loop body
LE: loop exit
PB: predicated region body
PF: predicated region fallthrough
CT: control target
= control target key end

     0   :  { %s22_s0 = inlined_call_operand.vmem [shape: f32[32], index: 0, kind: input, shape index: {}]   ;;  %s23_s1 = inlined_call_operand.vmem [shape: f32[4,32], index: 1, kind: output, shape index: {}]  }
   0x1   :  { %v4_v0 = vld [vmem:[%s22_s0] ss:$0 sm:$0xff] }
   0x2   :  { %5 = vst [vmem:[%s23_s1] sm:$0xf] %v4_v0 }

// kernel: generator_block_forward.3
= control target key start
LH: loop header
LB: loop body
LE: loop exit
PB: predicated region body
PF: predicated region fallthrough
CT: control target
= control target key end

     0   :  { %s2739_s12 = smov 0   ;;  %s2741_s13 = smov 0   ;;  %s3194_s0 = inlined_call_operand.vmem [shape: bf16[512,576], index: 0, kind: input, shape index: {}]   ;;  %s3195_s1 = inlined_call_operand.vmem [shape: bf16[576,128], index: 1, kind: input, shape index: {}]   ;;  %s3196_s2 = inlined_call_operand.vmem [shape: f32[2,128], index: 2, kind: input, shape index: {}]   ;;  %s3197_s3 = inlined_call_operand.vmem [shape: bf16[512,128], index: 3, kind: output, shape index: {}]  }
   0x1   :  { %s2743_s14 = smov 0  }
   0x2 LB: > { %s25_s15 = sadd.s32 1, %s2713_s13  ;;  %p1924_p0 = scmp.ge.s32.totalorder %s2717_s14, 1  ;;  %s2717_s14 = sphi %s2743_s14, %s13_s14   ;;  %s2713_s13 = sphi %s2741_s13, %s3199_s13   ;;  %s2709_s12 = sphi %s2739_s12, %s3198_s12  }
   0x3   : > { %p27_p1 = scmp.ge.s32.totalorder %s25_s15, 2  ;;  %p171_p2 = scmp.lt.s32.totalorder %s2717_s14, 3 }
   0x5   : > { %s3201_s15 = smov (%p27_p1, %s25_s15), 0  ;;  %p172_p3 = pnand %p1924_p0, %p171_p2 }
   0x6   : > { %v2547_v0 = vld [vmem:[%s3195_s1 + $0x40] sm:$0xff] (!%p172_p3)   ;;  %s1925_s18 = sshll.u32 (!%p172_p3), %s2709_s12, 5  ;;  %v2549_v2 = vld [vmem:[%s3195_s1 + $0x48] sm:$0xff] (!%p172_p3)   ;;  %v2551_v4 = vld [vmem:[%s3195_s1 + $0x50] sm:$0xff] (!%p172_p3)   ;;  %vm1016_vm0 = vcmask (!%p172_p3), 523264  }
   0x7   : > { %175 = sbr.rel (%p172_p3) target bundleno = 421 (0x1a5), region = 32  ;;  %v2548_v1 = vld [vmem:[%s3195_s1] sm:$0xff] (!%p172_p3)   ;;  %2222 = vmatprep.subr.bf16.mxu0 (!%p172_p3), %v2547_v0  ;;  %2506 = vmatprep.subr.bf16.mxu1 (!%p172_p3), %v2547_v0  ;;  %p208_p4 = scmp.lt.s32.totalorder (!%p172_p3), %s1925_s18, 63  ;;  %v2550_v3 = vld [vmem:[%s3195_s1 + $0x8] sm:$0xff] (!%p172_p3)   ;;  %v2552_v5 = vld [vmem:[%s3195_s1 + $0x10] sm:$0xff] (!%p172_p3)  }
   0x8   : > { %2223 = vmatpush3.bf16.msra.mxu0 (!%p172_p3), %v2548_v1  ;;  %2514 = vmatpush3.bf16.msra.mxu1 (!%p172_p3), %v2548_v1  ;;  %v2553_v6 = vld [vmem:[%s3195_s1 + $0x58] sm:$0xff] (!%p172_p3)   ;;  %v2555_v8 = vld [vmem:[%s3195_s1 + $0x60] sm:$0xff] (!%p172_p3)   ;;  %v2557_v10 = vld [vmem:[%s3195_s1 + $0x68] sm:$0xff] (!%p172_p3)  }
   0x9   : > { %2224 = vmatprep.subr.bf16.mxu0 (!%p172_p3), %v2549_v2  ;;  %2507 = vmatprep.subr.bf16.mxu1 (!%p172_p3), %v2549_v2  ;;  %v2554_v7 = vld [vmem:[%s3195_s1 + $0x18] sm:$0xff] (!%p172_p3)   ;;  %v2556_v9 = vld [vmem:[%s3195_s1 + $0x20] sm:$0xff] (!%p172_p3)   ;;  %v2558_v13 = vld [vmem:[%s3195_s1 + $0x28] sm:$0xff] (!%p172_p3)  }
   0xa   : > { %v2559_v14 = vld [vmem:[%s3195_s1 + $0x70] sm:$0xff] (!%p172_p3)   ;;  %v2561_v16 = vld [vmem:[%s3195_s1 + $0x78] sm:$0xff] (!%p172_p3)   ;;  %v2569_v18 = vld [vmem:[%s3195_s1 + $0xc0] sm:$0xff] (!%p172_p3)  }
   0xb   : > { %v2560_v15 = vld [vmem:[%s3195_s1 + $0x30] sm:$0xff] (!%p172_p3)   ;;  %v2562_v17 = vld [vmem:[%s3195_s1 + $0x38] sm:$0xff] (!%p172_p3)   ;;  %v2572_v19 = vld [vmem:[%s3195_s1 + $0x100] sm:$0xff] (!%p172_p3)  }
   0xc   : > { %2225 = vmatpush3.bf16.msra.mxu0 (!%p172_p3), %v2550_v3  ;;  %2515 = vmatpush3.bf16.msra.mxu1 (!%p172_p3), %v2550_v3  ;;  %v2570_v22 = vld [vmem:[%s3195_s1 + $0x80] sm:$0xff] (!%p172_p3)   ;;  %v2571_v23 = vld [vmem:[%s3195_s1 + $0xc8] sm:$0xff] (!%p172_p3)   ;;  %v2580_v28 = vld [vmem:[%s3195_s1 + $0xd0] sm:$0xff] (!%p172_p3)  }
   0xd   : > { %2226 = vmatprep.subr.bf16.mxu0 (!%p172_p3), %v2551_v4  ;;  %2508 = vmatprep.subr.bf16.mxu1 (!%p172_p3), %v2551_v4  ;;  %v2573_v26 = vld [vmem:[%s3195_s1 + $0x88] sm:$0xff] (!%p172_p3)   ;;  %v2581_v30 = vld [vmem:[%s3195_s1 + $0x90] sm:$0xff] (!%p172_p3)   ;;  %v2582_v31 = vld [vmem:[%s3195_s1 + $0xd8] sm:$0xff] (!%p172_p3)  }
   0xe   : > { %s3203_s18 = smov (!%p208_p4, %s1925_s18), 63  ;;  %v2583_v34 = vld [vmem:[%s3195_s1 + $0x98] sm:$0xff]   ;;  %v2603_v35 = vld [vmem:[%s3195_s1 + $0x108] sm:$0xff]   ;;  %v2590_v37 = vld [vmem:[%s3195_s1 + $0xe0] sm:$0xff]  }
   0xf   : > { %s2522_s4 = smul.u32 20, %s3203_s18  ;;  %v2591_v39 = vld [vmem:[%s3195_s1 + $0xa0] sm:$0xff]   ;;  %v2592_v40 = vld [vmem:[%s3195_s1 + $0xe8] sm:$0xff]   ;;  %v2600_v46 = vld [vmem:[%s3195_s1 + $0xf0] sm:$0xff]   ;;  %s1928_s27 = sshll.u32 %s3203_s18, 2 }
  0x10   : > { %2227 = vmatpush3.bf16.msra.mxu0 %v2552_v5  ;;  %2516 = vmatpush3.bf16.msra.mxu1 %v2552_v5  ;;  %v2593_v43 = vld [vmem:[%s3195_s1 + $0xa8] sm:$0xff]   ;;  %v2623_v47 = vld [vmem:[%s3195_s1 + $0x110] sm:$0xff]   ;;  %v2602_v49 = vld [vmem:[%s3195_s1 + $0xf8] sm:$0xff]   ;;  %s3072_s30 = scalar_lea.vmem %s3197_s3, %s1928_s27 }
  0x11   : > { %2228 = vmatprep.subr.bf16.mxu0 %v2553_v6  ;;  %2509 = vmatprep.subr.bf16.mxu1 %v2553_v6  ;;  %s2790_s11 = scalar_lea.vmem %s3194_s0, %s2522_s4  ;;  %v2601_v48 = vld [vmem:[%s3195_s1 + $0xb0] sm:$0xff]   ;;  %v2604_v52 = vld [vmem:[%s3195_s1 + $0xb8] sm:$0xff]  }
  0x12   : > { %v2565_v11 = vld [vmem:[%s2790_s11 + $0x4] ss:$20 sps:$4 sm:$0xff]   ;;  %v2563_v20 = vld [vmem:[%s2790_s11] ss:$20 sps:$4 sm:$0xff]   ;;  %v2578_v27 = vld [vmem:[%s2790_s11 + $0x28] ss:$20 sps:$4 sm:$0xff]  }
  0x13   : > { %v2568_v12 = vld [vmem:[%s2790_s11 + $0x1e4] ss:$20 sps:$4 sm:$0xff]   ;;  %1097 = vmatprep.mubr.bf16.mxu0 %v2565_v11  ;;  %v2566_v21 = vld [vmem:[%s2790_s11 + $0x1e0] ss:$20 sps:$4 sm:$0xff]   ;;  %v2579_v29 = vld [vmem:[%s2790_s11 + $0x208] ss:$20 sps:$4 sm:$0xff]  }
  0x14   : > { %2229 = vmatpush3.bf16.msra.mxu0 %v2554_v7  ;;  %2517 = vmatpush3.bf16.msra.mxu1 %v2554_v7  ;;  %v2574_v24 = vld [vmem:[%s2790_s11 + $0x2c] ss:$20 sps:$4 sm:$0xff]   ;;  %v2584_v32 = vld [vmem:[%s2790_s11 + $0x54] ss:$20 sps:$4 sm:$0xff]   ;;  %v2588_v36 = vld [vmem:[%s2790_s11 + $0x50] ss:$20 sps:$4 sm:$0xff]  }
  0x15   : > { %2230 = vmatprep.subr.bf16.mxu0 %v2555_v8  ;;  %2510 = vmatprep.subr.bf16.mxu1 %v2555_v8  ;;  %v2576_v25 = vld [vmem:[%s2790_s11 + $0x20c] ss:$20 sps:$4 sm:$0xff]   ;;  %v2586_v33 = vld [vmem:[%s2790_s11 + $0x234] ss:$20 sps:$4 sm:$0xff]   ;;  %v2589_v38 = vld [vmem:[%s2790_s11 + $0x230] ss:$20 sps:$4 sm:$0xff]  }
  0x16   : > { %1193 = vmatprep.mubr.bf16.mxu1 %v2568_v12  ;;  %v2594_v41 = vld [vmem:[%s2790_s11 + $0x7c] ss:$20 sps:$4 sm:$0xff]   ;;  %v2598_v44 = vld [vmem:[%s2790_s11 + $0x78] ss:$20 sps:$4 sm:$0xff]   ;;  %v2610_v54 = vld [vmem:[%s2790_s11 + $0xa0] ss:$20 sps:$4 sm:$0xff]  }
  0x17   : > { %v2596_v42 = vld [vmem:[%s2790_s11 + $0x25c] ss:$20 sps:$4 sm:$0xff]   ;;  %v2599_v45 = vld [vmem:[%s2790_s11 + $0x258] ss:$20 sps:$4 sm:$0xff]   ;;  %v2613_v57 = vld [vmem:[%s2790_s11 + $0x34] ss:$20 sps:$4 sm:$0xff]  }
  0x18   : > { %2231 = vmatpush3.bf16.msra.mxu0 %v2556_v9  ;;  %2518 = vmatpush3.bf16.msra.mxu1 %v2556_v9  ;;  %v2605_v50 = vld [vmem:[%s2790_s11 + $0xa4] ss:$20 sps:$4 sm:$0xff]   ;;  %v2609_v51 = vld [vmem:[%s2790_s11 + $0xc] ss:$20 sps:$4 sm:$0xff]   ;;  %v2607_v53 = vld [vmem:[%s2790_s11 + $0x8] ss:$20 sps:$4 sm:$0xff]  }
  0x19   : > { %2232 = vmatprep.subr.bf16.mxu0 %v2557_v10  ;;  %2511 = vmatprep.subr.bf16.mxu1 %v2557_v10  ;;  %v2611_v55 = vld [vmem:[%s2790_s11 + $0xcc] ss:$20 sps:$4 sm:$0xff]   ;;  %v2642_v56 = vld [vmem:[%s3195_s1 + $0x118] sm:$0xff]   ;;  %v2616_v59 = vld [vmem:[%s2790_s11 + $0x30] ss:$20 sps:$4 sm:$0xff]  }
  0x1a   : > { %v2615_v58 = vld [vmem:[%s2790_s11 + $0xc8] ss:$20 sps:$4 sm:$0xff]   ;;  %v2621_v62 = vld [vmem:[%s2790_s11 + $0xf0] ss:$20 sps:$4 sm:$0xff]   ;;  %v2622_v63 = vld [vmem:[%s2790_s11 + $0x58] ss:$20 sps:$4 sm:$0xff]  }
  0x1b   : > { %v2617_v60 = vld [vmem:[%s2790_s11 + $0xf4] ss:$20 sps:$4 sm:$0xff]   ;;  %v2619_v61 = vld [vmem:[%s2790_s11 + $0x5c] ss:$20 sps:$4 sm:$0xff]   ;;  %v2626_v1 = vld [vmem:[%s2790_s11 + $0x84] ss:$20 sps:$4 sm:$0xff]  }
  0x1c   : > { %2233 = vmatpush3.bf16.msra.mxu0 %v2558_v13  ;;  %2519 = vmatpush3.bf16.msra.mxu1 %v2558_v13  ;;  %v2624_v0 = vld [vmem:[%s2790_s11 + $0x11c] ss:$20 sps:$4 sm:$0xff]   ;;  %v2628_v2 = vld [vmem:[%s2790_s11 + $0x118] ss:$20 sps:$4 sm:$0xff]   ;;  %v2629_v3 = vld [vmem:[%s2790_s11 + $0x80] ss:$20 sps:$4 sm:$0xff]  }
  0x1d   : > { %2234 = vmatprep.subr.bf16.mxu0 %v2559_v14  ;;  %2512 = vmatprep.subr.bf16.mxu1 %v2559_v14  ;;  %v2630_v4 = vld [vmem:[%s2790_s11 + $0x144] ss:$20 sps:$4 sm:$0xff]   ;;  %v2632_v5 = vld [vmem:[%s2790_s11 + $0xac] ss:$20 sps:$4 sm:$0xff]   ;;  %v2635_v7 = vld [vmem:[%s2790_s11 + $0xa8] ss:$20 sps:$4 sm:$0xff]  }
  0x1e   : > { %v2634_v6 = vld [vmem:[%s2790_s11 + $0x140] ss:$20 sps:$4 sm:$0xff]   ;;  %v2640_v10 = vld [vmem:[%s2790_s11 + $0x168] ss:$20 sps:$4 sm:$0xff]   ;;  %v2641_v11 = vld [vmem:[%s2790_s11 + $0xd0] ss:$20 sps:$4 sm:$0xff]  }
  0x1f   : > { %v2636_v8 = vld [vmem:[%s2790_s11 + $0x16c] ss:$20 sps:$4 sm:$0xff]   ;;  %v2638_v9 = vld [vmem:[%s2790_s11 + $0xd4] ss:$20 sps:$4 sm:$0xff]   ;;  %v2645_v13 = vld [vmem:[%s2790_s11 + $0xfc] ss:$20 sps:$4 sm:$0xff]  }
  0x20   : > { %2235 = vmatpush3.bf16.msra.mxu0 %v2560_v15  ;;  %2520 = vmatpush3.bf16.msra.mxu1 %v2560_v15  ;;  %v2643_v12 = vld [vmem:[%s2790_s11 + $0x194] ss:$20 sps:$4 sm:$0xff]   ;;  %v2647_v14 = vld [vmem:[%s2790_s11 + $0x190] ss:$20 sps:$4 sm:$0xff]   ;;  %v2648_v15 = vld [vmem:[%s2790_s11 + $0xf8] ss:$20 sps:$4 sm:$0xff]  }
  0x21   : > { %2236 = vmatprep.subr.bf16.mxu0 %v2561_v16  ;;  %2513 = vmatprep.subr.bf16.mxu1 %v2561_v16  ;;  %v2649_v16 = vld [vmem:[%s2790_s11 + $0x1bc] ss:$20 sps:$4 sm:$0xff]  }
  0x24   : > { %2237 = vmatpush3.bf16.msra.mxu0 %v2562_v17  ;;  %2521 = vmatpush3.bf16.msra.mxu1 %v2562_v17  ;;  %v2651_v17 = vld [vmem:[%s2790_s11 + $0x124] ss:$20 sps:$4 sm:$0xff]  }
  0x25   : > { %2334 = vmatprep.subr.bf16.mxu1 %v2569_v18  ;;  %2466 = vmatprep.subr.bf16.mxu0 %v2572_v19  ;;  %v2653_v18 = vld [vmem:[%s2790_s11 + $0x1b8] ss:$20 sps:$4 sm:$0xff]  }
  0x27   : > { %1098 = vmatmul.mubr.bf16.vlgmr.msra.gmra.mrb[0].mxu0 %v2563_v20  ;;  %1194 = vmatmul.mubr.bf16.vlgmr.msra.gmra.mrb[0].mxu1 %v2566_v21  ;;  %v2655_v20 = vld [vmem:[%s2790_s11 + $0x14c] ss:$20 sps:$4 sm:$0xff]   ;;  %v2657_v21 = vld [vmem:[%s2790_s11 + $0x10] ss:$20 sps:$4 sm:$0xff]  }
  0x28   : > { %2335 = vmatpush3.bf16.msra.mxu1 %v2570_v22  ;;  %2467 = vmatpush3.bf16.msra.mxu0 %v2572_v19  ;;  %v2654_v19 = vld [vmem:[%s2790_s11 + $0x120] ss:$20 sps:$4 sm:$0xff]   ;;  %v2658_v22 = vld [vmem:[%s2790_s11 + $0x148] ss:$20 sps:$4 sm:$0xff]  }
  0x29   : > { %2336 = vmatprep.subr.bf16.mxu1 %v2571_v23  ;;  %1105 = vmatprep.mubr.bf16.mxu0 %v2574_v24  ;;  %v2659_v23 = vld [vmem:[%s2790_s11 + $0x38] ss:$20 sps:$4 sm:$0xff]   ;;  %v2660_v24 = vld [vmem:[%s2790_s11 + $0x174] ss:$20 sps:$4 sm:$0xff]  }
  0x2a   : > { %1201 = vmatprep.mubr.bf16.mxu1 %v2576_v25  ;;  %2468 = vmatprep.subr.bf16.mxu0 %v2603_v35  ;;  %v2662_v25 = vld [vmem:[%s2790_s11 + $0x60] ss:$20 sps:$4 sm:$0xff]  }
  0x2c   : > { %2337 = vmatpush3.bf16.msra.mxu1 %v2573_v26  ;;  %2469 = vmatpush3.bf16.msra.mxu0 %v2603_v35  ;;  %v2663_v26 = vld [vmem:[%s2790_s11 + $0x170] ss:$20 sps:$4 sm:$0xff]   ;;  %v2674_v35 = vld [vmem:[%s2790_s11 + $0x128] ss:$20 sps:$4 sm:$0xff]  }
  0x2d   : > { %2338 = vmatprep.subr.bf16.mxu1 %v2580_v28  ;;  %2470 = vmatprep.subr.bf16.mxu0 %v2623_v47  ;;  %v2665_v28 = vld [vmem:[%s2790_s11 + $0x19c] ss:$20 sps:$4 sm:$0xff]  }
  0x2f   : > { %1106 = vmatmul.mubr.bf16.gmra.mrb[4].mxu0 %v2578_v27  ;;  %1202 = vmatmul.mubr.bf16.gmra.mrb[4].mxu1 %v2579_v29  ;;  %v2664_v27 = vld [vmem:[%s2790_s11 + $0x88] ss:$20 sps:$4 sm:$0xff]   ;;  %v2667_v29 = vld [vmem:[%s2790_s11 + $0xb0] ss:$20 sps:$4 sm:$0xff]  }
  0x30   : > { %2339 = vmatpush3.bf16.msra.mxu1 %v2581_v30  ;;  %1113 = vmatprep.mubr.bf16.mxu0 %v2584_v32  ;;  %v2668_v30 = vld [vmem:[%s2790_s11 + $0x198] ss:$20 sps:$4 sm:$0xff]  }
  0x31   : > { %2340 = vmatprep.subr.bf16.mxu1 %v2582_v31  ;;  %1209 = vmatprep.mubr.bf16.mxu1 %v2586_v33  ;;  %v2669_v31 = vld [vmem:[%s2790_s11 + $0xd8] ss:$20 sps:$4 sm:$0xff]   ;;  %v2672_v33 = vld [vmem:[%s2790_s11 + $0x100] ss:$20 sps:$4 sm:$0xff]  }
  0x32   : > { %2471 = vmatpush3.bf16.msra.mxu0 %v2623_v47  ;;  %v2670_v32 = vld [vmem:[%s2790_s11 + $0x1c4] ss:$20 sps:$4 sm:$0xff]  }
  0x33   : > { %2472 = vmatprep.subr.bf16.mxu0 %v2642_v56  ;;  %v2689_v47 = vld [vmem:[%s2790_s11 + $0x218] ss:$20 sps:$4 sm:$0xff]  }
  0x34   : > { %2341 = vmatpush3.bf16.msra.mxu1 %v2583_v34  ;;  %v2673_v34 = vld [vmem:[%s2790_s11 + $0x1c0] ss:$20 sps:$4 sm:$0xff]  }
  0x35   : > { %2342 = vmatprep.subr.bf16.mxu1 %v2590_v37  ;;  %v2677_v37 = vld [vmem:[%s2790_s11 + $0x150] ss:$20 sps:$4 sm:$0xff]  }
  0x36   : > { %2473 = vmatpush3.bf16.msra.mxu0 %v2642_v56 }
  0x37   : > { %1114 = vmatmul.mubr.bf16.gmra.mrb[8].mxu0 %v2588_v36  ;;  %1210 = vmatmul.mubr.bf16.gmra.mrb[8].mxu1 %v2589_v38  ;;  %v2675_v36 = vld [vmem:[%s2790_s11 + $0x1ec] ss:$20 sps:$4 sm:$0xff]   ;;  %v2678_v38 = vld [vmem:[%s2790_s11 + $0x1e8] ss:$20 sps:$4 sm:$0xff]  }
  0x38   : > { %2343 = vmatpush3.bf16.msra.mxu1 %v2591_v39  ;;  %1121 = vmatprep.mubr.bf16.mxu0 %v2594_v41  ;;  %v2679_v39 = vld [vmem:[%s2790_s11 + $0x178] ss:$20 sps:$4 sm:$0xff]   ;;  %v2682_v41 = vld [vmem:[%s2790_s11 + $0x1a0] ss:$20 sps:$4 sm:$0xff]  }
  0x39   : > { %2344 = vmatprep.subr.bf16.mxu1 %v2592_v40  ;;  %1217 = vmatprep.mubr.bf16.mxu1 %v2596_v42  ;;  %v2680_v40 = vld [vmem:[%s2790_s11 + $0x214] ss:$20 sps:$4 sm:$0xff]   ;;  %v2683_v42 = vld [vmem:[%s2790_s11 + $0x210] ss:$20 sps:$4 sm:$0xff]  }
  0x3c   : > { %2345 = vmatpush3.bf16.msra.mxu1 %v2593_v43  ;;  %v2684_v43 = vld [vmem:[%s2790_s11 + $0x1c8] ss:$20 sps:$4 sm:$0xff]  }
  0x3d   : > { %2346 = vmatprep.subr.bf16.mxu1 %v2600_v46  ;;  %v2688_v46 = vld [vmem:[%s2790_s11 + $0x238] ss:$20 sps:$4 sm:$0xff]  }
  0x3f   : > { %1122 = vmatmul.mubr.bf16.gmra.mrb[12].mxu0 %v2598_v44  ;;  %1218 = vmatmul.mubr.bf16.gmra.mrb[12].mxu1 %v2599_v45  ;;  %v2685_v44 = vld [vmem:[%s2790_s11 + $0x23c] ss:$20 sps:$4 sm:$0xff]  }
  0x40   : > { %2347 = vmatpush3.bf16.msra.mxu1 %v2601_v48  ;;  %1129 = vmatprep.mubr.bf16.mxu0 %v2605_v50  ;;  %v2687_v45 = vld [vmem:[%s2790_s11 + $0x1f0] ss:$20 sps:$4 sm:$0xff]   ;;  %v2693_v50 = vld [vmem:[%s2790_s11 + $0x260] ss:$20 sps:$4 sm:$0xff]  }
  0x41   : > { %2348 = vmatprep.subr.bf16.mxu1 %v2602_v49  ;;  %1258 = vmatprep.mubr.bf16.mxu1 %v2609_v51  ;;  %v2690_v48 = vld [vmem:[%s2790_s11 + $0x264] ss:$20 sps:$4 sm:$0xff]   ;;  %v2692_v49 = vld [vmem:[%s2790_s11 + $0x240] ss:$20 sps:$4 sm:$0xff]   ;;  %v2694_v51 = vld [vmem:[%s2790_s11 + $0x268] ss:$20 sps:$4 sm:$0xff]  }
  0x44   : > { %2349 = vmatpush3.bf16.msra.mxu1 %v2604_v52 }
  0x47   : > { %1130 = vmatmul.mubr.bf16.gmra.mrb[16].mxu0 %v2610_v54  ;;  %1259 = vmatmul.mubr.bf16.vlgmr.msra.gmra.mrb[16].mxu1 %v2607_v53 }
  0x48   : > { %1137 = vmatprep.mubr.bf16.mxu0 %v2611_v55  ;;  %1266 = vmatprep.mubr.bf16.mxu1 %v2613_v57 }
  0x4f   : > { %1138 = vmatmul.mubr.bf16.gmra.mrb[20].mxu0 %v2615_v58  ;;  %1267 = vmatmul.mubr.bf16.gmra.mrb[20].mxu1 %v2616_v59 }
  0x50   : > { %1145 = vmatprep.mubr.bf16.mxu0 %v2617_v60  ;;  %1274 = vmatprep.mubr.bf16.mxu1 %v2619_v61 }
  0x57   : > { %1146 = vmatmul.mubr.bf16.gmra.mrb[24].mxu0 %v2621_v62  ;;  %1275 = vmatmul.mubr.bf16.gmra.mrb[24].mxu1 %v2622_v63 }
  0x58   : > { %1153 = vmatprep.mubr.bf16.mxu0 %v2624_v0  ;;  %1282 = vmatprep.mubr.bf16.mxu1 %v2626_v1 }
  0x5f   : > { %1154 = vmatmul.mubr.bf16.gmra.mrb[28].mxu0 %v2628_v2  ;;  %1283 = vmatmul.mubr.bf16.gmra.mrb[28].mxu1 %v2629_v3 }
  0x60   : > { %1161 = vmatprep.mubr.bf16.mxu0 %v2630_v4  ;;  %1290 = vmatprep.mubr.bf16.mxu1 %v2632_v5 }
  0x67   : > { %1162 = vmatmul.mubr.bf16.gmra.mrb[32].mxu0 %v2634_v6  ;;  %1291 = vmatmul.mubr.bf16.gmra.mrb[32].mxu1 %v2635_v7 }
  0x68   : > { %1169 = vmatprep.mubr.bf16.mxu0 %v2636_v8  ;;  %1298 = vmatprep.mubr.bf16.mxu1 %v2638_v9 }
  0x6f   : > { %1170 = vmatmul.mubr.bf16.gmra.mrb[36].mxu0 %v2640_v10  ;;  %1299 = vmatmul.mubr.bf16.gmra.mrb[36].mxu1 %v2641_v11 }
  0x70   : > { %1177 = vmatprep.mubr.bf16.mxu0 %v2643_v12  ;;  %1306 = vmatprep.mubr.bf16.mxu1 %v2645_v13 }
  0x77   : > { %1178 = vmatmul.mubr.bf16.gmra.mrb[40].mxu0 %v2647_v14  ;;  %1307 = vmatmul.mubr.bf16.gmra.mrb[40].mxu1 %v2648_v15 }
  0x78   : > { %1185 = vmatprep.mubr.bf16.mxu0 %v2649_v16  ;;  %1314 = vmatprep.mubr.bf16.mxu1 %v2651_v17 }
  0x7f   : > { %1186 = vmatmul.mubr.bf16.gmra.mrb[44].mxu0 %v2653_v18  ;;  %1315 = vmatmul.mubr.bf16.gmra.mrb[44].mxu1 %v2654_v19 }
  0x80   : > { %1322 = vmatprep.mubr.bf16.mxu1 %v2655_v20  ;;  %2474 = vmatprep.mubr.msk.bf16.mxu0 %vm1016_vm0, %v2657_v21 }
  0x87   : > { %1323 = vmatmul.mubr.bf16.gmra.mrb[48].mxu1 %v2658_v22  ;;  %2475 = vmatmul.mubr.msk.bf16.vlgmr.msra.gmra.mrb[48].mxu0 %vm1016_vm0, %v2659_v23 }
  0x88   : > { %1330 = vmatprep.mubr.bf16.mxu1 %v2660_v24  ;;  %2478 = vmatprep.mubr.msk.bf16.mxu0 %vm1016_vm0, %v2662_v25 }
  0x8f   : > { %1331 = vmatmul.mubr.bf16.gmra.mrb[52].mxu1 %v2663_v26  ;;  %2479 = vmatmul.mubr.msk.bf16.gmra.mrb[52].mxu0 %vm1016_vm0, %v2664_v27 }
  0x90   : > { %1338 = vmatprep.mubr.bf16.mxu1 %v2665_v28  ;;  %2482 = vmatprep.mubr.msk.bf16.mxu0 %vm1016_vm0, %v2667_v29 }
  0x97   : > { %1339 = vmatmul.mubr.bf16.gmra.mrb[56].mxu1 %v2668_v30  ;;  %2483 = vmatmul.mubr.msk.bf16.gmra.mrb[56].mxu0 %vm1016_vm0, %v2669_v31 }
  0x98   : > { %1346 = vmatprep.mubr.bf16.mxu1 %v2670_v32  ;;  %2486 = vmatprep.mubr.msk.bf16.mxu0 %vm1016_vm0, %v2672_v33 }
  0x9f   : > { %1347 = vmatmul.mubr.bf16.gmra.mrb[60].mxu1 %v2673_v34  ;;  %2487 = vmatmul.mubr.msk.bf16.gmra.mrb[60].mxu0 %vm1016_vm0, %v2674_v35 }
  0xa0   : > { %1354 = vmatprep.mubr.bf16.mxu1 %v2675_v36  ;;  %2490 = vmatprep.mubr.msk.bf16.mxu0 %vm1016_vm0, %v2677_v37 }
  0xa7   : > { %1355 = vmatmul.mubr.bf16.gmra.mrb[64].mxu1 %v2678_v38  ;;  %2491 = vmatmul.mubr.msk.bf16.gmra.mrb[64].mxu0 %vm1016_vm0, %v2679_v39 }
  0xa8   : > { %1362 = vmatprep.mubr.bf16.mxu1 %v2680_v40  ;;  %2494 = vmatprep.mubr.msk.bf16.mxu0 %vm1016_vm0, %v2682_v41 }
  0xaf   : > { %1363 = vmatmul.mubr.bf16.gmra.mrb[68].mxu1 %v2683_v42  ;;  %2495 = vmatmul.mubr.msk.bf16.gmra.mrb[68].mxu0 %vm1016_vm0, %v2684_v43 }
  0xb0   : > { %1370 = vmatprep.mubr.bf16.mxu1 %v2685_v44  ;;  %2498 = vmatprep.mubr.msk.bf16.mxu0 %vm1016_vm0, %v2687_v45 }
  0xb7   : > { %1371 = vmatmul.mubr.bf16.gmra.mrb[72].mxu1 %v2688_v46  ;;  %2499 = vmatmul.mubr.msk.bf16.gmra.mrb[72].mxu0 %vm1016_vm0, %v2689_v47 }
  0xb8   : > { %1378 = vmatprep.mubr.bf16.mxu1 %v2690_v48  ;;  %2502 = vmatprep.mubr.msk.bf16.mxu0 %vm1016_vm0, %v2692_v49 }
  0xbf   : > { %1379 = vmatmul.mubr.bf16.gmra.mrb[76].mxu1 %v2693_v50  ;;  %2503 = vmatmul.mubr.msk.bf16.gmra.mrb[76].mxu0 %vm1016_vm0, %v2694_v51 }
  0xfa   : > { %v2310_v52 = vpop.f32.mrb[0].mxu1  ;;  %v2238_v53 = vpop.f32.mrb[0].mxu0 }
  0xfb   : > { %v2311_v54 = vpop.f32.mrb[1].mxu1  ;;  %v2239_v55 = vpop.f32.mrb[1].mxu0 }
  0xfc   : > { %v2969_v56 = vadd.f32 %v2311_v54, %v2310_v52  ;;  %v2313_v57 = vpop.f32.mrb[2].mxu1  ;;  %v2240_v58 = vadd.f32 %v2239_v55, %v2238_v53  ;;  %v2241_v59 = vpop.f32.mrb[2].mxu0 }
  0xfd   : > { %v2314_v60 = vpop.f32.mrb[3].mxu1  ;;  %v2242_v61 = vpop.f32.mrb[3].mxu0 }
  0xfe   : > { %v2971_v62 = vadd.f32 %v2314_v60, %v2313_v57  ;;  %v2243_v63 = vadd.f32 %v2242_v61, %v2241_v59 }
 0x102   : > { %v2316_v0 = vpop.f32.mrb[4].mxu1  ;;  %v2244_v1 = vpop.f32.mrb[4].mxu0 }
 0x103   : > { %v2317_v2 = vpop.f32.mrb[5].mxu1  ;;  %v2245_v3 = vpop.f32.mrb[5].mxu0 }
 0x104   : > { %v2973_v4 = vadd.f32 %v2317_v2, %v2316_v0  ;;  %v2319_v5 = vpop.f32.mrb[6].mxu1  ;;  %v2246_v6 = vadd.f32 %v2245_v3, %v2244_v1  ;;  %v2247_v7 = vpop.f32.mrb[6].mxu0 }
 0x105   : > { %v2320_v8 = vpop.f32.mrb[7].mxu1  ;;  %v2248_v9 = vpop.f32.mrb[7].mxu0 }
 0x106   : > { %v2975_v10 = vadd.f32 %v2320_v8, %v2319_v5  ;;  %v2249_v11 = vadd.f32 %v2248_v9, %v2247_v7 }
 0x10a   : > { %v2322_v12 = vpop.f32.mrb[8].mxu1  ;;  %v2250_v13 = vpop.f32.mrb[8].mxu0 }
 0x10b   : > { %v2323_v14 = vpop.f32.mrb[9].mxu1  ;;  %v2251_v15 = vpop.f32.mrb[9].mxu0 }
 0x10c   : > { %v2977_v16 = vadd.f32 %v2323_v14, %v2322_v12  ;;  %v2325_v17 = vpop.f32.mrb[10].mxu1  ;;  %v2252_v18 = vadd.f32 %v2251_v15, %v2250_v13  ;;  %v2253_v19 = vpop.f32.mrb[10].mxu0 }
 0x10d   : > { %v2326_v20 = vpop.f32.mrb[11].mxu1  ;;  %v2254_v21 = vpop.f32.mrb[11].mxu0 }
 0x10e   : > { %v2979_v22 = vadd.f32 %v2326_v20, %v2325_v17  ;;  %v2255_v23 = vadd.f32 %v2254_v21, %v2253_v19 }
 0x112   : > { %v2328_v24 = vpop.f32.mrb[12].mxu1  ;;  %v2256_v25 = vpop.f32.mrb[12].mxu0 }
 0x113   : > { %v2329_v26 = vpop.f32.mrb[13].mxu1  ;;  %v2257_v27 = vpop.f32.mrb[13].mxu0 }
 0x114   : > { %v2981_v28 = vadd.f32 %v2329_v26, %v2328_v24  ;;  %v2331_v29 = vpop.f32.mrb[14].mxu1  ;;  %v2258_v30 = vadd.f32 %v2257_v27, %v2256_v25  ;;  %v2259_v31 = vpop.f32.mrb[14].mxu0 }
 0x115   : > { %v2332_v32 = vpop.f32.mrb[15].mxu1  ;;  %v2260_v33 = vpop.f32.mrb[15].mxu0 }
 0x116   : > { %v2983_v34 = vadd.f32 %v2332_v32, %v2331_v29  ;;  %v2261_v35 = vadd.f32 %v2260_v33, %v2259_v31 }
 0x11a   : > { %v2350_v36 = vpop.f32.mrb[16].mxu1  ;;  %v2262_v37 = vpop.f32.mrb[16].mxu0 }
 0x11b   : > { %v2351_v38 = vpop.f32.mrb[17].mxu1  ;;  %v2263_v39 = vpop.f32.mrb[17].mxu0 }
 0x11c   : > { %v2352_v40 = vadd.f32 %v2351_v38, %v2350_v36  ;;  %v2353_v41 = vpop.f32.mrb[18].mxu1  ;;  %v2264_v42 = vadd.f32 %v2263_v39, %v2262_v37  ;;  %v2265_v43 = vpop.f32.mrb[18].mxu0 }
 0x11d   : > { %v2354_v44 = vpop.f32.mrb[19].mxu1  ;;  %v2266_v45 = vpop.f32.mrb[19].mxu0 }
 0x11e   : > { %v2355_v46 = vadd.f32 %v2354_v44, %v2353_v41  ;;  %v2267_v47 = vadd.f32 %v2266_v45, %v2265_v43  ;;  %v2985_v48 = vadd.f32 %v2352_v40, %v2240_v58 }
 0x120   : > { %v2987_v49 = vadd.f32 %v2355_v46, %v2243_v63 }
 0x122   : > { %v2356_v50 = vpop.f32.mrb[20].mxu1  ;;  %v2268_v51 = vpop.f32.mrb[20].mxu0 }
 0x123   : > { %v2357_v52 = vpop.f32.mrb[21].mxu1  ;;  %v2269_v53 = vpop.f32.mrb[21].mxu0 }
 0x124   : > { %v2358_v54 = vadd.f32 %v2357_v52, %v2356_v50  ;;  %v2359_v55 = vpop.f32.mrb[22].mxu1  ;;  %v2270_v57 = vadd.f32 %v2269_v53, %v2268_v51  ;;  %v2271_v59 = vpop.f32.mrb[22].mxu0 }
 0x125   : > { %v2360_v60 = vpop.f32.mrb[23].mxu1  ;;  %v2272_v61 = vpop.f32.mrb[23].mxu0 }
 0x126   : > { %v2361_v0 = vadd.f32 %v2360_v60, %v2359_v55  ;;  %v2273_v1 = vadd.f32 %v2272_v61, %v2271_v59  ;;  %v2989_v2 = vadd.f32 %v2358_v54, %v2246_v6 }
 0x128   : > { %v2991_v3 = vadd.f32 %v2361_v0, %v2249_v11 }
 0x12a   : > { %v2362_v58 = vpop.f32.mrb[24].mxu1  ;;  %v2274_v5 = vpop.f32.mrb[24].mxu0 }
 0x12b   : > { %v2363_v63 = vpop.f32.mrb[25].mxu1  ;;  %v2275_v7 = vpop.f32.mrb[25].mxu0 }
 0x12c   : > { %v2364_v8 = vadd.f32 %v2363_v63, %v2362_v58  ;;  %v2365_v9 = vpop.f32.mrb[26].mxu1  ;;  %v2993_v12 = vadd.f32 %v2275_v7, %v2274_v5  ;;  %v2277_v13 = vpop.f32.mrb[26].mxu0 }
 0x12d   : > { %v2366_v14 = vpop.f32.mrb[27].mxu1  ;;  %v2278_v15 = vpop.f32.mrb[27].mxu0 }
 0x12e   : > { %v2367_v17 = vadd.f32 %v2366_v14, %v2365_v9  ;;  %v2279_v19 = vadd.f32 %v2278_v15, %v2277_v13  ;;  %v2995_v20 = vadd.f32 %v2364_v8, %v2252_v18 }
 0x130   : > { %v2997_v21 = vadd.f32 %v2367_v17, %v2255_v23 }
 0x132   : > { %v2368_v6 = vpop.f32.mrb[28].mxu1  ;;  %v2280_v11 = vpop.f32.mrb[28].mxu0 }
 0x133   : > { %v2369_v24 = vpop.f32.mrb[29].mxu1  ;;  %v2281_v25 = vpop.f32.mrb[29].mxu0 }
 0x134   : > { %v2370_v26 = vadd.f32 %v2369_v24, %v2368_v6  ;;  %v2371_v27 = vpop.f32.mrb[30].mxu1  ;;  %v2999_v29 = vadd.f32 %v2281_v25, %v2280_v11  ;;  %v2283_v31 = vpop.f32.mrb[30].mxu0 }
 0x135   : > { %v2372_v32 = vpop.f32.mrb[31].mxu1  ;;  %v2284_v33 = vpop.f32.mrb[31].mxu0 }
 0x136   : > { %v2373_v36 = vadd.f32 %v2372_v32, %v2371_v27  ;;  %v3001_v37 = vadd.f32 %v2284_v33, %v2283_v31  ;;  %v3003_v38 = vadd.f32 %v2370_v26, %v2258_v30  ;;  %v1549_v31 = vlaneseq }
 0x138   : > { %v3005_v18 = vadd.f32 %v2373_v36, %v2261_v35  ;;  %v1550_v36 = vshrl.u32 %v1549_v31, 7 }
 0x13a   : > { %v2374_v23 = vpop.f32.mrb[32].mxu1  ;;  %v2286_v39 = vpop.f32.mrb[32].mxu0 }
 0x13b   : > { %v2375_v40 = vpop.f32.mrb[33].mxu1  ;;  %v2287_v41 = vpop.f32.mrb[33].mxu0 }
 0x13c   : > { %v2376_v43 = vadd.f32 %v2375_v40, %v2374_v23  ;;  %v2377_v44 = vpop.f32.mrb[34].mxu1  ;;  %v3007_v45 = vadd.f32 %v2287_v41, %v2286_v39  ;;  %v2289_v46 = vpop.f32.mrb[34].mxu0 }
 0x13d   : > { %v2378_v50 = vpop.f32.mrb[35].mxu1  ;;  %v2290_v51 = vpop.f32.mrb[35].mxu0 }
 0x13e   : > { %v2379_v52 = vadd.f32 %v2378_v50, %v2377_v44  ;;  %v3009_v53 = vadd.f32 %v2290_v51, %v2289_v46  ;;  %v3011_v54 = vadd.f32 %v2376_v43, %v2264_v42 }
 0x140   : > { %v3013_v30 = vadd.f32 %v2379_v52, %v2267_v47 }
 0x142   : > { %v2380_v35 = vpop.f32.mrb[36].mxu1  ;;  %v2292_v55 = vpop.f32.mrb[36].mxu0 }
 0x143   : > { %v2381_v59 = vpop.f32.mrb[37].mxu1  ;;  %v2293_v60 = vpop.f32.mrb[37].mxu0 }
 0x144   : > { %v2382_v61 = vadd.f32 %v2381_v59, %v2380_v35  ;;  %v2383_v0 = vpop.f32.mrb[38].mxu1  ;;  %v3015_v58 = vadd.f32 %v2293_v60, %v2292_v55  ;;  %v2295_v5 = vpop.f32.mrb[38].mxu0  ;;  %v1551_v35 = vsub.s32 0, %v1550_v36  ;;  %v1587_v60 = vsub.s32 1, %v1550_v36 }
 0x145   : > { %v2384_v63 = vpop.f32.mrb[39].mxu1  ;;  %v2296_v7 = vpop.f32.mrb[39].mxu0 }
 0x146   : > { %v2385_v8 = vadd.f32 %v2384_v63, %v2383_v0  ;;  %v3017_v9 = vadd.f32 %v2296_v7, %v2295_v5  ;;  %v3019_v13 = vadd.f32 %v2382_v61, %v2270_v57 }
 0x148   : > { %v3021_v42 = vadd.f32 %v2385_v8, %v2273_v1 }
 0x14a   : > { %v2386_v47 = vpop.f32.mrb[40].mxu1  ;;  %v2298_v14 = vpop.f32.mrb[40].mxu0 }
 0x14b   : > { %v2387_v15 = vpop.f32.mrb[41].mxu1  ;;  %v2299_v17 = vpop.f32.mrb[41].mxu0 }
 0x14c   : > { %v2388_v6 = vadd.f32 %v2387_v15, %v2386_v47  ;;  %v2389_v11 = vpop.f32.mrb[42].mxu1  ;;  %v3023_v24 = vadd.f32 %v2299_v17, %v2298_v14  ;;  %v2301_v25 = vpop.f32.mrb[42].mxu0 }
 0x14d   : > { %v2390_v26 = vpop.f32.mrb[43].mxu1  ;;  %v2302_v27 = vpop.f32.mrb[43].mxu0 }
 0x14e   : > { %v2391_v32 = vadd.f32 %v2390_v26, %v2389_v11  ;;  %v3025_v33 = vadd.f32 %v2302_v27, %v2301_v25  ;;  %v3028_v57 = vadd.f32 %v2388_v6, %v2993_v12  ;;  %v1548_v12 = vld [vmem:[%s3196_s2] sm:$0x3] }
 0x14f   : > { %v3045_v0 = vrot.slane %v1548_v12, %v1551_v35  ;;  %v3048_v8 = vrot.slane %v1548_v12, %v1587_v60 }
 0x150   : > { %v3030_v1 = vadd.f32 %v2391_v32, %v2279_v19 }
 0x152   : > { %v2392_v23 = vpop.f32.mrb[44].mxu1  ;;  %v2304_v39 = vpop.f32.mrb[44].mxu0 }
 0x153   : > { %v2393_v40 = vpop.f32.mrb[45].mxu1  ;;  %v2305_v41 = vpop.f32.mrb[45].mxu0 }
 0x154   : > { %v2394_v43 = vadd.f32 %v2393_v40, %v2392_v23  ;;  %v2395_v44 = vpop.f32.mrb[46].mxu1  ;;  %v3032_v46 = vadd.f32 %v2305_v41, %v2304_v39  ;;  %v2307_v50 = vpop.f32.mrb[46].mxu0 }
 0x155   : > { %v2396_v51 = vpop.f32.mrb[47].mxu1  ;;  %v2308_v52 = vpop.f32.mrb[47].mxu0 }
 0x156   : > { %v2397_v55 = vadd.f32 %v2396_v51, %v2395_v44  ;;  %v3034_v59 = vadd.f32 %v2308_v52, %v2307_v50  ;;  %v3040_v19 = vadd.f32 %v2394_v43, %v2999_v29 }
 0x158   : > { %v3043_v61 = vadd.f32 %v2397_v55, %v3001_v37 }
 0x15a   : > { %v2398_v5 = vpop.f32.mrb[48].mxu1  ;;  %v2476_v63 = vpop.f32.mrb[48].mxu0 }
 0x15b   : > { %v1430_v7 = vadd.f32 %v2476_v63, %v2989_v2  ;;  %v2399_v47 = vpop.f32.mrb[49].mxu1  ;;  %v1421_v14 = vpop.f32.mrb[49].mxu0 }
 0x15c   : > { %v2400_v15 = vadd.f32 %v2399_v47, %v2398_v5  ;;  %v1422_v17 = vadd.f32 %v1421_v14, %v2985_v48  ;;  %v2401_v29 = vpop.f32.mrb[50].mxu1  ;;  %v2477_v6 = vpop.f32.mrb[50].mxu0 }
 0x15d   : > { %v1555_v11 = vmul.f32 %v3045_v0, %v1430_v7  ;;  %v1433_v37 = vadd.f32 %v2477_v6, %v2991_v3  ;;  %v2402_v25 = vpop.f32.mrb[51].mxu1  ;;  %v1424_v26 = vpop.f32.mrb[51].mxu0 }
 0x15e   : > { %v1553_v27 = vmul.f32 %v3045_v0, %v1422_v17  ;;  %v2403_v31 = vadd.f32 %v2402_v25, %v2401_v29  ;;  %v1425_v2 = vadd.f32 %v1424_v26, %v2987_v49  ;;  %v3056_v32 = vadd.f32 %v2400_v15, %v3007_v45 }
 0x15f   : > { %v1591_v36 = vadd.f32 %v3048_v8, %v1555_v11  ;;  %v1556_v48 = vmul.f32 %v3045_v0, %v1433_v37 }
 0x160   : > { %v1589_v23 = vadd.f32 %v3048_v8, %v1553_v27  ;;  %v1554_v39 = vmul.f32 %v3045_v0, %v1425_v2  ;;  %v3063_v3 = vadd.f32 %v2403_v31, %v3009_v53 }
 0x161   : > { %v1592_v40 = vadd.f32 %v3048_v8, %v1556_v48  ;;  %v1623_v45 = vmax.f32 %v1591_v36, 0.0 }
 0x162   : > { %v1590_v41 = vadd.f32 %v3048_v8, %v1554_v39  ;;  %v2404_v49 = vpop.f32.mrb[52].mxu1  ;;  %v2480_v43 = vpop.f32.mrb[52].mxu0  ;;  %v1621_v35 = vmax.f32 %v1589_v23, 0.0 }
 0x163   : > { %v1624_v44 = vmax.f32 %v1592_v40, 0.0  ;;  %v1446_v50 = vadd.f32 %v2480_v43, %v3003_v38  ;;  %v2405_v51 = vpop.f32.mrb[53].mxu1  ;;  %v1437_v52 = vpop.f32.mrb[53].mxu0 }
 0x164   : > { %v1622_v53 = vmax.f32 %v1590_v41, 0.0  ;;  %v2406_v55 = vadd.f32 %v2405_v51, %v2404_v49  ;;  %v1438_v12 = vadd.f32 %v1437_v52, %v2995_v20  ;;  %v2407_v60 = vpop.f32.mrb[54].mxu1  ;;  %v2481_v5 = vpop.f32.mrb[54].mxu0 }
 0x165   : > { %v2135_v63 = vpack.c.bf16 %v1624_v44, %v1623_v45  ;;  %v1559_v7 = vmul.f32 %v3045_v0, %v1446_v50  ;;  %v1449_v38 = vadd.f32 %v2481_v5, %v3005_v18  ;;  %v2408_v47 = vpop.f32.mrb[55].mxu1  ;;  %v1440_v14 = vpop.f32.mrb[55].mxu0 }
 0x166   : > { %v2130_v15 = vpack.c.bf16 %v1622_v53, %v1621_v35  ;;  %v1557_v17 = vmul.f32 %v3045_v0, %v1438_v12  ;;  %v2409_v29 = vadd.f32 %v2408_v47, %v2407_v60  ;;  %v1441_v6 = vadd.f32 %v1440_v14, %v2997_v21 }
 0x167   : > { %2207 = vst [vmem:[%s3072_s30 + $0x8] sm:$0xff] %v2135_v63   ;;  %v1595_v11 = vadd.f32 %v3048_v8, %v1559_v7  ;;  %v1560_v20 = vmul.f32 %v3045_v0, %v1449_v38  ;;  %v3083_v37 = vadd.f32 %v2406_v55, %v3015_v58 }
 0x168   : > { %2131 = vst [vmem:[%s3072_s30] sm:$0xff] %v2130_v15   ;;  %v1593_v25 = vadd.f32 %v3048_v8, %v1557_v17  ;;  %v1558_v18 = vmul.f32 %v3045_v0, %v1441_v6  ;;  %v3089_v26 = vadd.f32 %v2409_v29, %v3017_v9 }
 0x169   : > { %v1596_v27 = vadd.f32 %v3048_v8, %v1560_v20  ;;  %v1627_v36 = vmax.f32 %v1595_v11, 0.0 }
 0x16a   : > { %v1594_v21 = vadd.f32 %v3048_v8, %v1558_v18  ;;  %v2410_v31 = vpop.f32.mrb[56].mxu1  ;;  %v2484_v2 = vpop.f32.mrb[56].mxu0  ;;  %v1625_v40 = vmax.f32 %v1593_v25, 0.0 }
 0x16b   : > { %v1628_v48 = vmax.f32 %v1596_v27, 0.0  ;;  %v1462_v23 = vadd.f32 %v2484_v2, %v3019_v13  ;;  %v2411_v58 = vpop.f32.mrb[57].mxu1  ;;  %v1453_v39 = vpop.f32.mrb[57].mxu0 }
 0x16c   : > { %v1626_v41 = vmax.f32 %v1594_v21, 0.0  ;;  %v2412_v49 = vadd.f32 %v2411_v58, %v2410_v31  ;;  %v1454_v43 = vadd.f32 %v1453_v39, %v3011_v54  ;;  %v2413_v9 = vpop.f32.mrb[58].mxu1  ;;  %v2485_v45 = vpop.f32.mrb[58].mxu0 }
 0x16d   : > { %v2145_v44 = vpack.c.bf16 %v1628_v48, %v1627_v36  ;;  %v1563_v50 = vmul.f32 %v3045_v0, %v1462_v23  ;;  %v1465_v51 = vadd.f32 %v2485_v45, %v3021_v42  ;;  %v2414_v52 = vpop.f32.mrb[59].mxu1  ;;  %v1456_v35 = vpop.f32.mrb[59].mxu0 }
 0x16e   : > { %v2140_v53 = vpack.c.bf16 %v1626_v41, %v1625_v40  ;;  %v1561_v13 = vmul.f32 %v3045_v0, %v1454_v43  ;;  %v2415_v55 = vadd.f32 %v2414_v52, %v2413_v9  ;;  %v1457_v12 = vadd.f32 %v1456_v35, %v3013_v30 }
 0x16f   : > { %2209 = vst [vmem:[%s3072_s30 + $0x18] sm:$0xff] %v2145_v44   ;;  %v1599_v60 = vadd.f32 %v3048_v8, %v1563_v50  ;;  %v1564_v54 = vmul.f32 %v3045_v0, %v1465_v51  ;;  %v3103_v5 = vadd.f32 %v2412_v49, %v3023_v24 }
 0x170   : > { %2208 = vst [vmem:[%s3072_s30 + $0x10] sm:$0xff] %v2140_v53   ;;  %v1597_v63 = vadd.f32 %v3048_v8, %v1561_v13  ;;  %v1562_v42 = vmul.f32 %v3045_v0, %v1457_v12  ;;  %v3109_v7 = vadd.f32 %v2415_v55, %v3025_v33 }
 0x171   : > { %v1600_v38 = vadd.f32 %v3048_v8, %v1564_v54  ;;  %v1631_v15 = vmax.f32 %v1599_v60, 0.0 }
 0x172   : > { %v1598_v30 = vadd.f32 %v3048_v8, %v1562_v42  ;;  %v2416_v47 = vpop.f32.mrb[60].mxu1  ;;  %v2488_v14 = vpop.f32.mrb[60].mxu0  ;;  %v1629_v11 = vmax.f32 %v1597_v63, 0.0 }
 0x173   : > { %v1632_v17 = vmax.f32 %v1600_v38, 0.0  ;;  %v1478_v29 = vadd.f32 %v2488_v14, %v3040_v19  ;;  %v2417_v24 = vpop.f32.mrb[61].mxu1  ;;  %v1469_v6 = vpop.f32.mrb[61].mxu0 }
 0x174   : > { %v1630_v20 = vmax.f32 %v1598_v30, 0.0  ;;  %v2418_v25 = vadd.f32 %v2417_v24, %v2416_v47  ;;  %v1470_v18 = vadd.f32 %v1469_v6, %v3028_v57  ;;  %v2419_v33 = vpop.f32.mrb[62].mxu1  ;;  %v2489_v27 = vpop.f32.mrb[62].mxu0 }
 0x175   : > { %v2155_v21 = vpack.c.bf16 %v1632_v17, %v1631_v15  ;;  %v1567_v31 = vmul.f32 %v3045_v0, %v1478_v29  ;;  %v1481_v2 = vadd.f32 %v2489_v27, %v3043_v61  ;;  %v2420_v36 = vpop.f32.mrb[63].mxu1  ;;  %v1472_v48 = vpop.f32.mrb[63].mxu0 }
 0x176   : > { %v2150_v23 = vpack.c.bf16 %v1630_v20, %v1629_v11  ;;  %v1565_v19 = vmul.f32 %v3045_v0, %v1470_v18  ;;  %v2421_v58 = vadd.f32 %v2420_v36, %v2419_v33  ;;  %v1473_v39 = vadd.f32 %v1472_v48, %v3030_v1 }
 0x177   : > { %2211 = vst [vmem:[%s3072_s30 + $0x28] sm:$0xff] %v2155_v21   ;;  %v1603_v40 = vadd.f32 %v3048_v8, %v1567_v31  ;;  %v1568_v57 = vmul.f32 %v3045_v0, %v1481_v2  ;;  %v1349_v41 = vadd.f32 %v2418_v25, %v3032_v46 }
 0x178   : > { %2210 = vst [vmem:[%s3072_s30 + $0x20] sm:$0xff] %v2150_v23   ;;  %v1601_v49 = vadd.f32 %v3048_v8, %v1565_v19  ;;  %v1566_v61 = vmul.f32 %v3045_v0, %v1473_v39  ;;  %v1352_v43 = vadd.f32 %v2421_v58, %v3034_v59 }
 0x179   : > { %v1604_v9 = vadd.f32 %v3048_v8, %v1568_v57  ;;  %v1635_v50 = vmax.f32 %v1603_v40, 0.0 }
 0x17a   : > { %v1602_v45 = vadd.f32 %v3048_v8, %v1566_v61  ;;  %v2422_v44 = vpop.f32.mrb[64].mxu1  ;;  %v2492_v1 = vpop.f32.mrb[64].mxu0  ;;  %v1633_v46 = vmax.f32 %v1601_v49, 0.0 }
 0x17b   : > { %v1636_v51 = vmax.f32 %v1604_v9, 0.0  ;;  %v1494_v52 = vadd.f32 %v2492_v1, %v3083_v37  ;;  %v2423_v35 = vpop.f32.mrb[65].mxu1  ;;  %v1485_v53 = vpop.f32.mrb[65].mxu0 }
 0x17c   : > { %v1634_v13 = vmax.f32 %v1602_v45, 0.0  ;;  %v2424_v55 = vadd.f32 %v2423_v35, %v2422_v44  ;;  %v1486_v12 = vadd.f32 %v1485_v53, %v3056_v32  ;;  %v2425_v59 = vpop.f32.mrb[66].mxu1  ;;  %v2493_v60 = vpop.f32.mrb[66].mxu0 }
 0x17d   : > { %v2165_v54 = vpack.c.bf16 %v1636_v51, %v1635_v50  ;;  %v1571_v63 = vmul.f32 %v3045_v0, %v1494_v52  ;;  %v1497_v42 = vadd.f32 %v2493_v60, %v3089_v26  ;;  %v2426_v38 = vpop.f32.mrb[67].mxu1  ;;  %v1488_v30 = vpop.f32.mrb[67].mxu0 }
 0x17e   : > { %v2160_v47 = vpack.c.bf16 %v1634_v13, %v1633_v46  ;;  %v1569_v37 = vmul.f32 %v3045_v0, %v1486_v12  ;;  %v2427_v14 = vadd.f32 %v2426_v38, %v2425_v59  ;;  %v1489_v15 = vadd.f32 %v1488_v30, %v3063_v3 }
 0x17f   : > { %2213 = vst [vmem:[%s3072_s30 + $0x38] sm:$0xff] %v2165_v54   ;;  %v1607_v17 = vadd.f32 %v3048_v8, %v1571_v63  ;;  %v1572_v32 = vmul.f32 %v3045_v0, %v1497_v42  ;;  %v1357_v29 = vadd.f32 %v2424_v55, %v2969_v56 }
 0x180   : > { %2212 = vst [vmem:[%s3072_s30 + $0x30] sm:$0xff] %v2160_v47   ;;  %v1605_v24 = vadd.f32 %v3048_v8, %v1569_v37  ;;  %v1570_v26 = vmul.f32 %v3045_v0, %v1489_v15  ;;  %v1360_v6 = vadd.f32 %v2427_v14, %v2971_v62 }
 0x181   : > { %v1608_v11 = vadd.f32 %v3048_v8, %v1572_v32  ;;  %v1639_v18 = vmax.f32 %v1607_v17, 0.0 }
 0x182   : > { %v1606_v20 = vadd.f32 %v3048_v8, %v1570_v26  ;;  %v2428_v25 = vpop.f32.mrb[68].mxu1  ;;  %v2496_v3 = vpop.f32.mrb[68].mxu0  ;;  %v1637_v56 = vmax.f32 %v1605_v24, 0.0 }
 0x183   : > { %v1640_v33 = vmax.f32 %v1608_v11, 0.0  ;;  %v1510_v27 = vadd.f32 %v2496_v3, %v1349_v41  ;;  %v2429_v21 = vpop.f32.mrb[69].mxu1  ;;  %v1501_v31 = vpop.f32.mrb[69].mxu0 }
 0x184   : > { %v1638_v2 = vmax.f32 %v1606_v20, 0.0  ;;  %v2430_v36 = vadd.f32 %v2429_v21, %v2428_v25  ;;  %v1502_v48 = vadd.f32 %v1501_v31, %v3103_v5  ;;  %v2431_v23 = vpop.f32.mrb[70].mxu1  ;;  %v2497_v62 = vpop.f32.mrb[70].mxu0 }
 0x185   : > { %v2175_v19 = vpack.c.bf16 %v1640_v33, %v1639_v18  ;;  %v1575_v58 = vmul.f32 %v3045_v0, %v1510_v27  ;;  %v1513_v39 = vadd.f32 %v2497_v62, %v1352_v43  ;;  %v2432_v40 = vpop.f32.mrb[71].mxu1  ;;  %v1504_v57 = vpop.f32.mrb[71].mxu0 }
 0x186   : > { %v2170_v49 = vpack.c.bf16 %v1638_v2, %v1637_v56  ;;  %v1573_v41 = vmul.f32 %v3045_v0, %v1502_v48  ;;  %v2433_v61 = vadd.f32 %v2432_v40, %v2431_v23  ;;  %v1505_v9 = vadd.f32 %v1504_v57, %v3109_v7 }
 0x187   : > { %2215 = vst [vmem:[%s3072_s30 + $0x48] sm:$0xff] %v2175_v19   ;;  %v1611_v45 = vadd.f32 %v3048_v8, %v1575_v58  ;;  %v1576_v5 = vmul.f32 %v3045_v0, %v1513_v39  ;;  %v1365_v44 = vadd.f32 %v2430_v36, %v2973_v4 }
 0x188   : > { %2214 = vst [vmem:[%s3072_s30 + $0x40] sm:$0xff] %v2170_v49   ;;  %v1609_v1 = vadd.f32 %v3048_v8, %v1573_v41  ;;  %v1574_v43 = vmul.f32 %v3045_v0, %v1505_v9  ;;  %v1368_v50 = vadd.f32 %v2433_v61, %v2975_v10 }
 0x189   : > { %v1612_v51 = vadd.f32 %v3048_v8, %v1576_v5  ;;  %v1643_v53 = vmax.f32 %v1611_v45, 0.0 }
 0x18a   : > { %v1610_v52 = vadd.f32 %v3048_v8, %v1574_v43  ;;  %v2434_v35 = vpop.f32.mrb[72].mxu1  ;;  %v2500_v7 = vpop.f32.mrb[72].mxu0  ;;  %v1641_v4 = vmax.f32 %v1609_v1, 0.0 }
 0x18b   : > { %v1644_v46 = vmax.f32 %v1612_v51, 0.0  ;;  %v1526_v13 = vadd.f32 %v2500_v7, %v1365_v44  ;;  %v2435_v55 = vpop.f32.mrb[73].mxu1  ;;  %v1517_v12 = vpop.f32.mrb[73].mxu0 }
 0x18c   : > { %v1642_v59 = vmax.f32 %v1610_v52, 0.0  ;;  %v2436_v60 = vadd.f32 %v2435_v55, %v2434_v35  ;;  %v1518_v54 = vadd.f32 %v1517_v12, %v1357_v29  ;;  %v2437_v63 = vpop.f32.mrb[74].mxu1  ;;  %v2501_v42 = vpop.f32.mrb[74].mxu0 }
 0x18d   : > { %v2185_v10 = vpack.c.bf16 %v1644_v46, %v1643_v53  ;;  %v1579_v38 = vmul.f32 %v3045_v0, %v1526_v13  ;;  %v1529_v30 = vadd.f32 %v2501_v42, %v1368_v50  ;;  %v2438_v47 = vpop.f32.mrb[75].mxu1  ;;  %v1520_v37 = vpop.f32.mrb[75].mxu0 }
 0x18e   : > { %v2180_v14 = vpack.c.bf16 %v1642_v59, %v1641_v4  ;;  %v1577_v15 = vmul.f32 %v3045_v0, %v1518_v54  ;;  %v2439_v17 = vadd.f32 %v2438_v47, %v2437_v63  ;;  %v1521_v32 = vadd.f32 %v1520_v37, %v1360_v6 }
 0x18f   : > { %2217 = vst [vmem:[%s3072_s30 + $0x58] sm:$0xff] %v2185_v10   ;;  %v1615_v24 = vadd.f32 %v3048_v8, %v1579_v38  ;;  %v1580_v26 = vmul.f32 %v3045_v0, %v1529_v30  ;;  %v1373_v29 = vadd.f32 %v2436_v60, %v2977_v16 }
 0x190   : > { %2216 = vst [vmem:[%s3072_s30 + $0x50] sm:$0xff] %v2180_v14   ;;  %v1613_v11 = vadd.f32 %v3048_v8, %v1577_v15  ;;  %v1578_v20 = vmul.f32 %v3045_v0, %v1521_v32  ;;  %v1376_v25 = vadd.f32 %v2439_v17, %v2979_v22 }
 0x191   : > { %v1616_v3 = vadd.f32 %v3048_v8, %v1580_v26  ;;  %v1647_v27 = vmax.f32 %v1615_v24, 0.0 }
 0x192   : > { %v1614_v18 = vadd.f32 %v3048_v8, %v1578_v20  ;;  %v2440_v33 = vpop.f32.mrb[76].mxu1  ;;  %v2504_v6 = vpop.f32.mrb[76].mxu0  ;;  %v1645_v16 = vmax.f32 %v1613_v11, 0.0 }
 0x193   : > { %v1648_v21 = vmax.f32 %v1616_v3, 0.0  ;;  %v2441_v31 = vpop.f32.mrb[77].mxu1  ;;  %v1533_v56 = vpop.f32.mrb[77].mxu0 }
 0x194   : > { %v1646_v2 = vmax.f32 %v1614_v18, 0.0  ;;  %v2442_v36 = vadd.f32 %v2441_v31, %v2440_v33  ;;  %v1534_v48 = vadd.f32 %v1533_v56, %v1373_v29  ;;  %v2443_v23 = vpop.f32.mrb[78].mxu1  ;;  %v2505_v62 = vpop.f32.mrb[78].mxu0 }
 0x195   : > { %v2195_v19 = vpack.c.bf16 %v1648_v21, %v1647_v27  ;;  %v2444_v22 = vpop.f32.mrb[79].mxu1  ;;  %v1536_v58 = vpop.f32.mrb[79].mxu0 }
 0x196   : > { %v2190_v39 = vpack.c.bf16 %v1646_v2, %v1645_v16  ;;  %v1381_v40 = vadd.f32 %v2442_v36, %v2981_v28  ;;  %v1581_v57 = vmul.f32 %v3045_v0, %v1534_v48  ;;  %v2445_v49 = vadd.f32 %v2444_v22, %v2443_v23 }
 0x197   : > { %2219 = vst [vmem:[%s3072_s30 + $0x68] sm:$0xff] %v2195_v19   ;;  %v1537_v41 = vadd.f32 %v1536_v58, %v1376_v25 }
 0x198   : > { %2218 = vst [vmem:[%s3072_s30 + $0x60] sm:$0xff] %v2190_v39   ;;  %v1542_v61 = vadd.f32 %v2504_v6, %v1381_v40  ;;  %v1384_v9 = vadd.f32 %v2445_v49, %v2983_v34  ;;  %v1617_v45 = vadd.f32 %v3048_v8, %v1581_v57 }
 0x199   : > { %v1582_v5 = vmul.f32 %v3045_v0, %v1537_v41 }
 0x19a   : > { %v1583_v44 = vmul.f32 %v3045_v0, %v1542_v61  ;;  %v1545_v1 = vadd.f32 %v2505_v62, %v1384_v9  ;;  %v1649_v51 = vmax.f32 %v1617_v45, 0.0 }
 0x19b   : > { %v1618_v28 = vadd.f32 %v3048_v8, %v1582_v5 }
 0x19c   : > { %v1619_v43 = vadd.f32 %v3048_v8, %v1583_v44  ;;  %v1584_v50 = vmul.f32 %v3045_v0, %v1545_v1 }
 0x19d   : > { %v1650_v52 = vmax.f32 %v1618_v28, 0.0 }
 0x19e   : > { %v1620_v35 = vadd.f32 %v3048_v8, %v1584_v50  ;;  %v1651_v34 = vmax.f32 %v1619_v43, 0.0 }
 0x19f   : > { %v2200_v7 = vpack.c.bf16 %v1650_v52, %v1649_v51 }
 0x1a0   : > { %v1652_v53 = vmax.f32 %v1620_v35, 0.0 }
 0x1a1   : > { %2220 = vst [vmem:[%s3072_s30 + $0x70] sm:$0xff] %v2200_v7  }
 0x1a2   : > { %v2205_v46 = vpack.c.bf16 %v1652_v53, %v1651_v34 }
 0x1a4   : > { %2221 = vst [vmem:[%s3072_s30 + $0x78] sm:$0xff] %v2205_v46  }
 0x1a5 PF: > { %s13_s14 = sadd.s32 1, %s2717_s14   ;;  %s3198_s12 = smov %s2713_s13 }
 0x1a6   : > { %p10_p5 = scmp.ge.s32.totalorder %s13_s14, 4   ;;  %s3199_s13 = smov %s3201_s15 }
 0x1a8   :  { %12 = sbr.rel (!%p10_p5) target bundleno = 2 (0x2), region = 68 }

// kernel: generator_block_forward.4
= control target key start
LH: loop header
LB: loop body
LE: loop exit
PB: predicated region body
PF: predicated region fallthrough
CT: control target
= control target key end

     0   :  { %s5514_s12 = smov 0   ;;  %s5516_s13 = smov 0   ;;  %s6542_s0 = inlined_call_operand.vmem [shape: bf16[2048,288], index: 0, kind: input, shape index: {}]   ;;  %s6543_s1 = inlined_call_operand.vmem [shape: bf16[288,128], index: 1, kind: input, shape index: {}]   ;;  %s6544_s2 = inlined_call_operand.vmem [shape: f32[2,128], index: 2, kind: input, shape index: {}]   ;;  %s6545_s3 = inlined_call_operand.vmem [shape: bf16[2048,128], index: 3, kind: output, shape index: {}]  }
   0x1   :  { %s5518_s14 = smov 0  }
   0x2 LB: > { %s25_s15 = sadd.s32 1, %s5487_s13  ;;  %p4019_p0 = scmp.ge.s32.totalorder %s5491_s14, 1  ;;  %s5491_s14 = sphi %s5518_s14, %s13_s14   ;;  %s5487_s13 = sphi %s5516_s13, %s6589_s13   ;;  %s5483_s12 = sphi %s5514_s12, %s6588_s12  }
   0x3   : > { %p27_p1 = scmp.ge.s32.totalorder %s25_s15, 2  ;;  %p171_p2 = scmp.lt.s32.totalorder %s5491_s14, 3 }
   0x5   : > { %s6591_s15 = smov (%p27_p1, %s25_s15), 0  ;;  %p172_p3 = pnand %p4019_p0, %p171_p2 }
   0x7   : > { %175 = sbr.rel (%p172_p3) target bundleno = 682 (0x2aa), region = 32 }
   0xe   : > { %v5195_v0 = vld [vmem:[%s6543_s1] sm:$0xff]   ;;  %v5493_v1 = vmov 0   ;;  %s4020_s18 = sshll.u32 %s5483_s12, 7  ;;  %v5196_v2 = vld [vmem:[%s6543_s1 + $0x8] sm:$0xff]   ;;  %v5197_v3 = vld [vmem:[%s6543_s1 + $0x10] sm:$0xff]   ;;  %vm1592_vm0 = vcmask 261120  }
   0xf   : > { %1785 = vmatprep.subr.bf16.mxu0 %v5493_v1  ;;  %5137 = vmatprep.subr.bf16.mxu1 %v5493_v1  ;;  %p208_p4 = scmp.lt.s32.totalorder %s4020_s18, 255  ;;  %v5198_v4 = vld [vmem:[%s6543_s1 + $0x18] sm:$0xff]   ;;  %v5199_v5 = vld [vmem:[%s6543_s1 + $0x20] sm:$0xff]   ;;  %v5200_v7 = vld [vmem:[%s6543_s1 + $0x28] sm:$0xff]  }
  0x10   : > { %1786 = vmatpush1.bf16.msra.mxu0 %v5195_v0  ;;  %5153 = vmatpush1.bf16.msra.mxu1 %v5195_v0  ;;  %v5201_v9 = vld [vmem:[%s6543_s1 + $0x30] sm:$0xff]   ;;  %v5202_v10 = vld [vmem:[%s6543_s1 + $0x38] sm:$0xff]   ;;  %v5203_v11 = vld [vmem:[%s6543_s1 + $0x40] sm:$0xff]  }
  0x11   : > { %1787 = vmatprep.subr.bf16.mxu0 %v5493_v1  ;;  %5138 = vmatprep.subr.bf16.mxu1 %v5493_v1  ;;  %s6593_s18 = smov (!%p208_p4, %s4020_s18), 255  ;;  %v5204_v12 = vld [vmem:[%s6543_s1 + $0x48] sm:$0xff]   ;;  %v5205_v13 = vld [vmem:[%s6543_s1 + $0x50] sm:$0xff]   ;;  %v5206_v14 = vld [vmem:[%s6543_s1 + $0x58] sm:$0xff]  }
  0x12   : > { %s5169_s25 = smul.u32 12, %s6593_s18  ;;  %v5207_v15 = vld [vmem:[%s6543_s1 + $0x60] sm:$0xff]   ;;  %v5208_v16 = vld [vmem:[%s6543_s1 + $0x68] sm:$0xff]   ;;  %v5209_v17 = vld [vmem:[%s6543_s1 + $0x70] sm:$0xff]   ;;  %s4023_s10 = sshll.u32 %s6593_s18, 2 }
  0x13   : > { %v5210_v18 = vld [vmem:[%s6543_s1 + $0x78] sm:$0xff]   ;;  %v5217_v19 = vld [vmem:[%s6543_s1 + $0x80] sm:$0xff]   ;;  %v5266_v24 = vld [vmem:[%s6543_s1 + $0x88] sm:$0xff]   ;;  %s6022_s12 = scalar_lea.vmem %s6545_s3, %s4023_s10 }
  0x14   : > { %1788 = vmatpush1.bf16.msra.mxu0 %v5196_v2  ;;  %5154 = vmatpush1.bf16.msra.mxu1 %v5196_v2  ;;  %s5561_s30 = scalar_lea.vmem %s6542_s0, %s5169_s25 }
  0x15   : > { %1789 = vmatprep.subr.bf16.mxu0 %v5493_v1  ;;  %5139 = vmatprep.subr.bf16.mxu1 %v5493_v1  ;;  %v5213_v6 = vld [vmem:[%s5561_s30 + $0x4] ss:$12 sps:$4 sm:$0xff]   ;;  %v5211_v20 = vld [vmem:[%s5561_s30] ss:$12 sps:$4 sm:$0xff]   ;;  %v5218_v22 = vld [vmem:[%s5561_s30 + $0x1c] ss:$12 sps:$4 sm:$0xff]  }
  0x16   : > { %v5216_v8 = vld [vmem:[%s5561_s30 + $0x484] ss:$12 sps:$4 sm:$0xff]   ;;  %1817 = vmatprep.mubr.bf16.mxu0 %v5213_v6  ;;  %v5214_v21 = vld [vmem:[%s5561_s30 + $0x480] ss:$12 sps:$4 sm:$0xff]   ;;  %v5220_v23 = vld [vmem:[%s5561_s30 + $0x49c] ss:$12 sps:$4 sm:$0xff]  }
  0x17   : > { %2201 = vmatprep.mubr.bf16.mxu1 %v5216_v8  ;;  %v5222_v25 = vld [vmem:[%s5561_s30 + $0x18] ss:$12 sps:$4 sm:$0xff]   ;;  %v5224_v27 = vld [vmem:[%s5561_s30 + $0x34] ss:$12 sps:$4 sm:$0xff]   ;;  %v5228_v29 = vld [vmem:[%s5561_s30 + $0x30] ss:$12 sps:$4 sm:$0xff]  }
  0x18   : > { %1790 = vmatpush1.bf16.msra.mxu0 %v5197_v3  ;;  %5155 = vmatpush1.bf16.msra.mxu1 %v5197_v3  ;;  %v5223_v26 = vld [vmem:[%s5561_s30 + $0x498] ss:$12 sps:$4 sm:$0xff]   ;;  %v5226_v28 = vld [vmem:[%s5561_s30 + $0x4b4] ss:$12 sps:$4 sm:$0xff]   ;;  %v5229_v30 = vld [vmem:[%s5561_s30 + $0x4b0] ss:$12 sps:$4 sm:$0xff]  }
  0x19   : > { %1791 = vmatprep.subr.bf16.mxu0 %v5493_v1  ;;  %5140 = vmatprep.subr.bf16.mxu1 %v5493_v1  ;;  %v5230_v31 = vld [vmem:[%s5561_s30 + $0x4c] ss:$12 sps:$4 sm:$0xff]   ;;  %v5234_v33 = vld [vmem:[%s5561_s30 + $0x48] ss:$12 sps:$4 sm:$0xff]   ;;  %v5236_v35 = vld [vmem:[%s5561_s30 + $0x64] ss:$12 sps:$4 sm:$0xff]  }
  0x1a   : > { %v5232_v32 = vld [vmem:[%s5561_s30 + $0x4cc] ss:$12 sps:$4 sm:$0xff]   ;;  %v5235_v34 = vld [vmem:[%s5561_s30 + $0x4c8] ss:$12 sps:$4 sm:$0xff]   ;;  %v5238_v36 = vld [vmem:[%s5561_s30 + $0x4e4] ss:$12 sps:$4 sm:$0xff]  }
  0x1b   : > { %v5240_v37 = vld [vmem:[%s5561_s30 + $0x60] ss:$12 sps:$4 sm:$0xff]   ;;  %v5242_v39 = vld [vmem:[%s5561_s30 + $0x7c] ss:$12 sps:$4 sm:$0xff]   ;;  %v5246_v41 = vld [vmem:[%s5561_s30 + $0x78] ss:$12 sps:$4 sm:$0xff]  }
  0x1c   : > { %1792 = vmatpush1.bf16.msra.mxu0 %v5198_v4  ;;  %5156 = vmatpush1.bf16.msra.mxu1 %v5198_v4  ;;  %v5241_v38 = vld [vmem:[%s5561_s30 + $0x4e0] ss:$12 sps:$4 sm:$0xff]   ;;  %v5244_v40 = vld [vmem:[%s5561_s30 + $0x4fc] ss:$12 sps:$4 sm:$0xff]   ;;  %v5247_v42 = vld [vmem:[%s5561_s30 + $0x4f8] ss:$12 sps:$4 sm:$0xff]  }
  0x1d   : > { %1793 = vmatprep.subr.bf16.mxu0 %v5493_v1  ;;  %5141 = vmatprep.subr.bf16.mxu1 %v5493_v1  ;;  %v5248_v43 = vld [vmem:[%s5561_s30 + $0x94] ss:$12 sps:$4 sm:$0xff]   ;;  %v5252_v45 = vld [vmem:[%s5561_s30 + $0x90] ss:$12 sps:$4 sm:$0xff]   ;;  %v5254_v47 = vld [vmem:[%s5561_s30 + $0xac] ss:$12 sps:$4 sm:$0xff]  }
  0x1e   : > { %v5250_v44 = vld [vmem:[%s5561_s30 + $0x514] ss:$12 sps:$4 sm:$0xff]   ;;  %v5253_v46 = vld [vmem:[%s5561_s30 + $0x510] ss:$12 sps:$4 sm:$0xff]   ;;  %v5256_v48 = vld [vmem:[%s5561_s30 + $0x52c] ss:$12 sps:$4 sm:$0xff]  }
  0x1f   : > { %v5258_v49 = vld [vmem:[%s5561_s30 + $0xa8] ss:$12 sps:$4 sm:$0xff]   ;;  %v5260_v51 = vld [vmem:[%s5561_s30 + $0xc4] ss:$12 sps:$4 sm:$0xff]   ;;  %v5264_v53 = vld [vmem:[%s5561_s30 + $0xc0] ss:$12 sps:$4 sm:$0xff]  }
  0x20   : > { %1794 = vmatpush1.bf16.msra.mxu0 %v5199_v5  ;;  %5157 = vmatpush1.bf16.msra.mxu1 %v5199_v5  ;;  %v5259_v50 = vld [vmem:[%s5561_s30 + $0x528] ss:$12 sps:$4 sm:$0xff]   ;;  %v5262_v52 = vld [vmem:[%s5561_s30 + $0x544] ss:$12 sps:$4 sm:$0xff]   ;;  %v5265_v54 = vld [vmem:[%s5561_s30 + $0x540] ss:$12 sps:$4 sm:$0xff]  }
  0x21   : > { %1795 = vmatprep.subr.bf16.mxu0 %v5493_v1  ;;  %5142 = vmatprep.subr.bf16.mxu1 %v5493_v1  ;;  %v5267_v55 = vld [vmem:[%s5561_s30 + $0xdc] ss:$12 sps:$4 sm:$0xff]   ;;  %v5271_v57 = vld [vmem:[%s5561_s30 + $0xd8] ss:$12 sps:$4 sm:$0xff]   ;;  %v5273_v59 = vld [vmem:[%s5561_s30 + $0xf4] ss:$12 sps:$4 sm:$0xff]  }
  0x22   : > { %v5269_v56 = vld [vmem:[%s5561_s30 + $0x55c] ss:$12 sps:$4 sm:$0xff]   ;;  %v5272_v58 = vld [vmem:[%s5561_s30 + $0x558] ss:$12 sps:$4 sm:$0xff]   ;;  %v5275_v60 = vld [vmem:[%s5561_s30 + $0x574] ss:$12 sps:$4 sm:$0xff]  }
  0x23   : > { %v5277_v61 = vld [vmem:[%s5561_s30 + $0xf0] ss:$12 sps:$4 sm:$0xff]   ;;  %v5279_v63 = vld [vmem:[%s5561_s30 + $0x10c] ss:$12 sps:$4 sm:$0xff]   ;;  %v5284_v2 = vld [vmem:[%s5561_s30 + $0x588] ss:$12 sps:$4 sm:$0xff]  }
  0x24   : > { %1796 = vmatpush1.bf16.msra.mxu0 %v5200_v7  ;;  %5158 = vmatpush1.bf16.msra.mxu1 %v5200_v7  ;;  %v5278_v62 = vld [vmem:[%s5561_s30 + $0x570] ss:$12 sps:$4 sm:$0xff]   ;;  %v5281_v0 = vld [vmem:[%s5561_s30 + $0x58c] ss:$12 sps:$4 sm:$0xff]  }
  0x25   : > { %1797 = vmatprep.subr.bf16.mxu0 %v5493_v1  ;;  %5143 = vmatprep.subr.bf16.mxu1 %v5493_v1  ;;  %v5285_v3 = vld [vmem:[%s5561_s30 + $0x124] ss:$12 sps:$4 sm:$0xff]   ;;  %v5289_v5 = vld [vmem:[%s5561_s30 + $0x120] ss:$12 sps:$4 sm:$0xff]   ;;  %v5291_v7 = vld [vmem:[%s5561_s30 + $0x13c] ss:$12 sps:$4 sm:$0xff]  }
  0x26   : > { %v5287_v4 = vld [vmem:[%s5561_s30 + $0x5a4] ss:$12 sps:$4 sm:$0xff]   ;;  %v5290_v6 = vld [vmem:[%s5561_s30 + $0x5a0] ss:$12 sps:$4 sm:$0xff]   ;;  %v5293_v8 = vld [vmem:[%s5561_s30 + $0x5bc] ss:$12 sps:$4 sm:$0xff]  }
  0x28   : > { %1798 = vmatpush1.bf16.msra.mxu0 %v5201_v9  ;;  %5159 = vmatpush1.bf16.msra.mxu1 %v5201_v9  ;;  %v5295_v9 = vld [vmem:[%s5561_s30 + $0x138] ss:$12 sps:$4 sm:$0xff]  }
  0x29   : > { %1799 = vmatprep.subr.bf16.mxu0 %v5493_v1  ;;  %5144 = vmatprep.subr.bf16.mxu1 %v5493_v1 }
  0x2c   : > { %1800 = vmatpush1.bf16.msra.mxu0 %v5202_v10  ;;  %5160 = vmatpush1.bf16.msra.mxu1 %v5202_v10  ;;  %v5296_v10 = vld [vmem:[%s5561_s30 + $0x5b8] ss:$12 sps:$4 sm:$0xff]  }
  0x2d   : > { %1801 = vmatprep.subr.bf16.mxu0 %v5493_v1  ;;  %5145 = vmatprep.subr.bf16.mxu1 %v5493_v1 }
  0x30   : > { %1802 = vmatpush1.bf16.msra.mxu0 %v5203_v11  ;;  %5161 = vmatpush1.bf16.msra.mxu1 %v5203_v11  ;;  %v5297_v11 = vld [vmem:[%s5561_s30 + $0x154] ss:$12 sps:$4 sm:$0xff]  }
  0x31   : > { %1803 = vmatprep.subr.bf16.mxu0 %v5493_v1  ;;  %5146 = vmatprep.subr.bf16.mxu1 %v5493_v1 }
  0x34   : > { %1804 = vmatpush1.bf16.msra.mxu0 %v5204_v12  ;;  %5162 = vmatpush1.bf16.msra.mxu1 %v5204_v12  ;;  %v5299_v12 = vld [vmem:[%s5561_s30 + $0x5d4] ss:$12 sps:$4 sm:$0xff]  }
  0x35   : > { %1805 = vmatprep.subr.bf16.mxu0 %v5493_v1  ;;  %5147 = vmatprep.subr.bf16.mxu1 %v5493_v1 }
  0x38   : > { %1806 = vmatpush1.bf16.msra.mxu0 %v5205_v13  ;;  %5163 = vmatpush1.bf16.msra.mxu1 %v5205_v13  ;;  %v5301_v13 = vld [vmem:[%s5561_s30 + $0x150] ss:$12 sps:$4 sm:$0xff]  }
  0x39   : > { %1807 = vmatprep.subr.bf16.mxu0 %v5493_v1  ;;  %5148 = vmatprep.subr.bf16.mxu1 %v5493_v1 }
  0x3c   : > { %1808 = vmatpush1.bf16.msra.mxu0 %v5206_v14  ;;  %5164 = vmatpush1.bf16.msra.mxu1 %v5206_v14  ;;  %v5302_v14 = vld [vmem:[%s5561_s30 + $0x5d0] ss:$12 sps:$4 sm:$0xff]  }
  0x3d   : > { %1809 = vmatprep.subr.bf16.mxu0 %v5493_v1  ;;  %5149 = vmatprep.subr.bf16.mxu1 %v5493_v1 }
  0x40   : > { %1810 = vmatpush1.bf16.msra.mxu0 %v5207_v15  ;;  %5165 = vmatpush1.bf16.msra.mxu1 %v5207_v15  ;;  %v5303_v15 = vld [vmem:[%s5561_s30 + $0x16c] ss:$12 sps:$4 sm:$0xff]  }
  0x41   : > { %1811 = vmatprep.subr.bf16.mxu0 %v5493_v1  ;;  %5150 = vmatprep.subr.bf16.mxu1 %v5493_v1 }
  0x44   : > { %1812 = vmatpush1.bf16.msra.mxu0 %v5208_v16  ;;  %5166 = vmatpush1.bf16.msra.mxu1 %v5208_v16  ;;  %v5305_v16 = vld [vmem:[%s5561_s30 + $0x5ec] ss:$12 sps:$4 sm:$0xff]  }
  0x45   : > { %1813 = vmatprep.subr.bf16.mxu0 %v5493_v1  ;;  %5151 = vmatprep.subr.bf16.mxu1 %v5493_v1 }
  0x48   : > { %1814 = vmatpush1.bf16.msra.mxu0 %v5209_v17  ;;  %5167 = vmatpush1.bf16.msra.mxu1 %v5209_v17  ;;  %v5307_v17 = vld [vmem:[%s5561_s30 + $0x168] ss:$12 sps:$4 sm:$0xff]  }
  0x49   : > { %1815 = vmatprep.subr.bf16.mxu0 %v5493_v1  ;;  %5152 = vmatprep.subr.bf16.mxu1 %v5493_v1  ;;  %v5283_v1 = vld [vmem:[%s5561_s30 + $0x108] ss:$12 sps:$4 sm:$0xff]  }
  0x4c   : > { %1816 = vmatpush1.bf16.msra.mxu0 %v5210_v18  ;;  %5168 = vmatpush1.bf16.msra.mxu1 %v5210_v18  ;;  %v5308_v18 = vld [vmem:[%s5561_s30 + $0x5e8] ss:$12 sps:$4 sm:$0xff]  }
  0x4d   : > { %5005 = vmatprep.subr.bf16.mxu1 %v5217_v19 }
  0x4f   : > { %1818 = vmatmul.mubr.bf16.vlgmr.msra.gmra.mrb[0].mxu0 %v5211_v20  ;;  %2202 = vmatmul.mubr.bf16.vlgmr.msra.gmra.mrb[0].mxu1 %v5214_v21  ;;  %v5311_v20 = vld [vmem:[%s5561_s30 + $0x8] ss:$12 sps:$4 sm:$0xff]   ;;  %v5312_v21 = vld [vmem:[%s5561_s30 + $0x180] ss:$12 sps:$4 sm:$0xff]  }
  0x50   : > { %5006 = vmatpush3.bf16.msra.mxu1 %v5217_v19  ;;  %1825 = vmatprep.mubr.bf16.mxu0 %v5218_v22  ;;  %v5309_v19 = vld [vmem:[%s5561_s30 + $0x184] ss:$12 sps:$4 sm:$0xff]   ;;  %v5313_v22 = vld [vmem:[%s5561_s30 + $0x20] ss:$12 sps:$4 sm:$0xff]  }
  0x51   : > { %2209 = vmatprep.mubr.bf16.mxu1 %v5220_v23  ;;  %5007 = vmatprep.subr.bf16.mxu1 %v5266_v24  ;;  %v5314_v23 = vld [vmem:[%s5561_s30 + $0x19c] ss:$12 sps:$4 sm:$0xff]  }
  0x54   : > { %5008 = vmatpush3.bf16.msra.mxu1 %v5266_v24  ;;  %v5316_v24 = vld [vmem:[%s5561_s30 + $0x38] ss:$12 sps:$4 sm:$0xff]  }
  0x57   : > { %1826 = vmatmul.mubr.bf16.gmra.mrb[4].mxu0 %v5222_v25  ;;  %2210 = vmatmul.mubr.bf16.gmra.mrb[4].mxu1 %v5223_v26  ;;  %v5317_v25 = vld [vmem:[%s5561_s30 + $0x198] ss:$12 sps:$4 sm:$0xff]   ;;  %v5318_v26 = vld [vmem:[%s5561_s30 + $0x50] ss:$12 sps:$4 sm:$0xff]  }
  0x58   : > { %1833 = vmatprep.mubr.bf16.mxu0 %v5224_v27  ;;  %2217 = vmatprep.mubr.bf16.mxu1 %v5226_v28  ;;  %v5319_v27 = vld [vmem:[%s5561_s30 + $0x1b4] ss:$12 sps:$4 sm:$0xff]  }
  0x59   : > { %v5321_v28 = vld [vmem:[%s5561_s30 + $0x68] ss:$12 sps:$4 sm:$0xff]  }
  0x5f   : > { %1834 = vmatmul.mubr.bf16.gmra.mrb[8].mxu0 %v5228_v29  ;;  %2218 = vmatmul.mubr.bf16.gmra.mrb[8].mxu1 %v5229_v30  ;;  %v5322_v29 = vld [vmem:[%s5561_s30 + $0x1b0] ss:$12 sps:$4 sm:$0xff]   ;;  %v5323_v30 = vld [vmem:[%s5561_s30 + $0x80] ss:$12 sps:$4 sm:$0xff]  }
  0x60   : > { %1841 = vmatprep.mubr.bf16.mxu0 %v5230_v31  ;;  %2225 = vmatprep.mubr.bf16.mxu1 %v5232_v32  ;;  %v5324_v31 = vld [vmem:[%s5561_s30 + $0x1cc] ss:$12 sps:$4 sm:$0xff]  }
  0x61   : > { %v5326_v32 = vld [vmem:[%s5561_s30 + $0x98] ss:$12 sps:$4 sm:$0xff]  }
  0x67   : > { %1842 = vmatmul.mubr.bf16.gmra.mrb[12].mxu0 %v5234_v33  ;;  %2226 = vmatmul.mubr.bf16.gmra.mrb[12].mxu1 %v5235_v34  ;;  %v5327_v33 = vld [vmem:[%s5561_s30 + $0x1c8] ss:$12 sps:$4 sm:$0xff]   ;;  %v5328_v34 = vld [vmem:[%s5561_s30 + $0xb0] ss:$12 sps:$4 sm:$0xff]  }
  0x68   : > { %1849 = vmatprep.mubr.bf16.mxu0 %v5236_v35  ;;  %2233 = vmatprep.mubr.bf16.mxu1 %v5238_v36  ;;  %v5329_v35 = vld [vmem:[%s5561_s30 + $0x1e4] ss:$12 sps:$4 sm:$0xff]   ;;  %v5331_v36 = vld [vmem:[%s5561_s30 + $0xc8] ss:$12 sps:$4 sm:$0xff]  }
  0x6f   : > { %1850 = vmatmul.mubr.bf16.gmra.mrb[16].mxu0 %v5240_v37  ;;  %2234 = vmatmul.mubr.bf16.gmra.mrb[16].mxu1 %v5241_v38  ;;  %v5332_v37 = vld [vmem:[%s5561_s30 + $0x1e0] ss:$12 sps:$4 sm:$0xff]  }
  0x70   : > { %1857 = vmatprep.mubr.bf16.mxu0 %v5242_v39  ;;  %2241 = vmatprep.mubr.bf16.mxu1 %v5244_v40  ;;  %v5333_v38 = vld [vmem:[%s5561_s30 + $0xe0] ss:$12 sps:$4 sm:$0xff]   ;;  %v5334_v39 = vld [vmem:[%s5561_s30 + $0x1fc] ss:$12 sps:$4 sm:$0xff]   ;;  %v5336_v40 = vld [vmem:[%s5561_s30 + $0xf8] ss:$12 sps:$4 sm:$0xff]  }
  0x77   : > { %1858 = vmatmul.mubr.bf16.gmra.mrb[20].mxu0 %v5246_v41  ;;  %2242 = vmatmul.mubr.bf16.gmra.mrb[20].mxu1 %v5247_v42  ;;  %v5337_v41 = vld [vmem:[%s5561_s30 + $0x1f8] ss:$12 sps:$4 sm:$0xff]   ;;  %v5338_v42 = vld [vmem:[%s5561_s30 + $0x110] ss:$12 sps:$4 sm:$0xff]  }
  0x78   : > { %1865 = vmatprep.mubr.bf16.mxu0 %v5248_v43  ;;  %2249 = vmatprep.mubr.bf16.mxu1 %v5250_v44  ;;  %v5339_v43 = vld [vmem:[%s5561_s30 + $0x214] ss:$12 sps:$4 sm:$0xff]  }
  0x79   : > { %v5341_v44 = vld [vmem:[%s5561_s30 + $0x128] ss:$12 sps:$4 sm:$0xff]  }
  0x7f   : > { %1866 = vmatmul.mubr.bf16.gmra.mrb[24].mxu0 %v5252_v45  ;;  %2250 = vmatmul.mubr.bf16.gmra.mrb[24].mxu1 %v5253_v46  ;;  %v5342_v45 = vld [vmem:[%s5561_s30 + $0x210] ss:$12 sps:$4 sm:$0xff]   ;;  %v5343_v46 = vld [vmem:[%s5561_s30 + $0x140] ss:$12 sps:$4 sm:$0xff]  }
  0x80   : > { %1873 = vmatprep.mubr.bf16.mxu0 %v5254_v47  ;;  %2257 = vmatprep.mubr.bf16.mxu1 %v5256_v48  ;;  %v5344_v47 = vld [vmem:[%s5561_s30 + $0x22c] ss:$12 sps:$4 sm:$0xff]  }
  0x81   : > { %v5346_v48 = vld [vmem:[%s5561_s30 + $0x158] ss:$12 sps:$4 sm:$0xff]  }
  0x87   : > { %1874 = vmatmul.mubr.bf16.gmra.mrb[28].mxu0 %v5258_v49  ;;  %2258 = vmatmul.mubr.bf16.gmra.mrb[28].mxu1 %v5259_v50  ;;  %v5347_v49 = vld [vmem:[%s5561_s30 + $0x228] ss:$12 sps:$4 sm:$0xff]   ;;  %v5348_v50 = vld [vmem:[%s5561_s30 + $0x170] ss:$12 sps:$4 sm:$0xff]  }
  0x88   : > { %1881 = vmatprep.mubr.bf16.mxu0 %v5260_v51  ;;  %2265 = vmatprep.mubr.bf16.mxu1 %v5262_v52  ;;  %v5349_v51 = vld [vmem:[%s5561_s30 + $0x244] ss:$12 sps:$4 sm:$0xff]   ;;  %v5351_v52 = vld [vmem:[%s5561_s30 + $0x188] ss:$12 sps:$4 sm:$0xff]  }
  0x8f   : > { %1882 = vmatmul.mubr.bf16.gmra.mrb[32].mxu0 %v5264_v53  ;;  %2266 = vmatmul.mubr.bf16.gmra.mrb[32].mxu1 %v5265_v54  ;;  %v5352_v53 = vld [vmem:[%s5561_s30 + $0x240] ss:$12 sps:$4 sm:$0xff]  }
  0x90   : > { %1889 = vmatprep.mubr.bf16.mxu0 %v5267_v55  ;;  %2273 = vmatprep.mubr.bf16.mxu1 %v5269_v56  ;;  %v5353_v54 = vld [vmem:[%s5561_s30 + $0x1a0] ss:$12 sps:$4 sm:$0xff]   ;;  %v5354_v55 = vld [vmem:[%s5561_s30 + $0x25c] ss:$12 sps:$4 sm:$0xff]   ;;  %v5356_v56 = vld [vmem:[%s5561_s30 + $0x1b8] ss:$12 sps:$4 sm:$0xff]  }
  0x97   : > { %1890 = vmatmul.mubr.bf16.gmra.mrb[36].mxu0 %v5271_v57  ;;  %2274 = vmatmul.mubr.bf16.gmra.mrb[36].mxu1 %v5272_v58  ;;  %v5357_v57 = vld [vmem:[%s5561_s30 + $0x258] ss:$12 sps:$4 sm:$0xff]   ;;  %v5358_v58 = vld [vmem:[%s5561_s30 + $0x1d0] ss:$12 sps:$4 sm:$0xff]  }
  0x98   : > { %1897 = vmatprep.mubr.bf16.mxu0 %v5273_v59  ;;  %2281 = vmatprep.mubr.bf16.mxu1 %v5275_v60  ;;  %v5359_v59 = vld [vmem:[%s5561_s30 + $0x274] ss:$12 sps:$4 sm:$0xff]  }
  0x99   : > { %v5361_v60 = vld [vmem:[%s5561_s30 + $0x1e8] ss:$12 sps:$4 sm:$0xff]  }
  0x9f   : > { %1898 = vmatmul.mubr.bf16.gmra.mrb[40].mxu0 %v5277_v61  ;;  %2282 = vmatmul.mubr.bf16.gmra.mrb[40].mxu1 %v5278_v62  ;;  %v5362_v61 = vld [vmem:[%s5561_s30 + $0x270] ss:$12 sps:$4 sm:$0xff]   ;;  %v5363_v62 = vld [vmem:[%s5561_s30 + $0x200] ss:$12 sps:$4 sm:$0xff]  }
  0xa0   : > { %1905 = vmatprep.mubr.bf16.mxu0 %v5279_v63  ;;  %2289 = vmatprep.mubr.bf16.mxu1 %v5281_v0  ;;  %v5364_v63 = vld [vmem:[%s5561_s30 + $0x28c] ss:$12 sps:$4 sm:$0xff]  }
  0xa1   : > { %v5366_v0 = vld [vmem:[%s5561_s30 + $0x218] ss:$12 sps:$4 sm:$0xff]  }
  0xa7   : > { %1906 = vmatmul.mubr.bf16.gmra.mrb[44].mxu0 %v5283_v1  ;;  %2290 = vmatmul.mubr.bf16.gmra.mrb[44].mxu1 %v5284_v2 }
  0xa8   : > { %1913 = vmatprep.mubr.bf16.mxu0 %v5285_v3  ;;  %2297 = vmatprep.mubr.bf16.mxu1 %v5287_v4 }
  0xaf   : > { %1914 = vmatmul.mubr.bf16.gmra.mrb[48].mxu0 %v5289_v5  ;;  %2298 = vmatmul.mubr.bf16.gmra.mrb[48].mxu1 %v5290_v6  ;;  %v5367_v5 = vld [vmem:[%s5561_s30 + $0x288] ss:$12 sps:$4 sm:$0xff]   ;;  %v5368_v6 = vld [vmem:[%s5561_s30 + $0x230] ss:$12 sps:$4 sm:$0xff]  }
  0xb0   : > { %1921 = vmatprep.mubr.bf16.mxu0 %v5291_v7  ;;  %2305 = vmatprep.mubr.bf16.mxu1 %v5293_v8 }
  0xb7   : > { %1922 = vmatmul.mubr.bf16.gmra.mrb[52].mxu0 %v5295_v9  ;;  %2306 = vmatmul.mubr.bf16.gmra.mrb[52].mxu1 %v5296_v10  ;;  %v5369_v9 = vld [vmem:[%s5561_s30 + $0x2a4] ss:$12 sps:$4 sm:$0xff]   ;;  %v5371_v10 = vld [vmem:[%s5561_s30 + $0x248] ss:$12 sps:$4 sm:$0xff]  }
  0xb8   : > { %1929 = vmatprep.mubr.bf16.mxu0 %v5297_v11  ;;  %2313 = vmatprep.mubr.bf16.mxu1 %v5299_v12 }
  0xbf   : > { %1930 = vmatmul.mubr.bf16.gmra.mrb[56].mxu0 %v5301_v13  ;;  %2314 = vmatmul.mubr.bf16.gmra.mrb[56].mxu1 %v5302_v14 }
  0xc0   : > { %1937 = vmatprep.mubr.bf16.mxu0 %v5303_v15  ;;  %2321 = vmatprep.mubr.bf16.mxu1 %v5305_v16 }
  0xc7   : > { %1938 = vmatmul.mubr.bf16.gmra.mrb[60].mxu0 %v5307_v17  ;;  %2322 = vmatmul.mubr.bf16.gmra.mrb[60].mxu1 %v5308_v18  ;;  %v5372_v17 = vld [vmem:[%s5561_s30 + $0x2a0] ss:$12 sps:$4 sm:$0xff]  }
  0xc8   : > { %1945 = vmatprep.mubr.bf16.mxu0 %v5309_v19  ;;  %5009 = vmatprep.mubr.msk.bf16.mxu1 %vm1592_vm0, %v5311_v20  ;;  %v5373_v18 = vld [vmem:[%s5561_s30 + $0x260] ss:$12 sps:$4 sm:$0xff]  }
  0xcf   : > { %1946 = vmatmul.mubr.bf16.gmra.mrb[64].mxu0 %v5312_v21  ;;  %5010 = vmatmul.mubr.msk.bf16.vlgmr.msra.gmra.mrb[64].mxu1 %vm1592_vm0, %v5313_v22  ;;  %v5374_v21 = vld [vmem:[%s5561_s30 + $0x2bc] ss:$12 sps:$4 sm:$0xff]   ;;  %v5376_v22 = vld [vmem:[%s5561_s30 + $0x278] ss:$12 sps:$4 sm:$0xff]  }
  0xd0   : > { %1953 = vmatprep.mubr.bf16.mxu0 %v5314_v23  ;;  %5013 = vmatprep.mubr.msk.bf16.mxu1 %vm1592_vm0, %v5316_v24 }
  0xd7   : > { %1954 = vmatmul.mubr.bf16.gmra.mrb[68].mxu0 %v5317_v25  ;;  %5014 = vmatmul.mubr.msk.bf16.gmra.mrb[68].mxu1 %vm1592_vm0, %v5318_v26 }
  0xd8   : > { %1961 = vmatprep.mubr.bf16.mxu0 %v5319_v27  ;;  %5017 = vmatprep.mubr.msk.bf16.mxu1 %vm1592_vm0, %v5321_v28 }
  0xdf   : > { %1962 = vmatmul.mubr.bf16.gmra.mrb[72].mxu0 %v5322_v29  ;;  %5018 = vmatmul.mubr.msk.bf16.gmra.mrb[72].mxu1 %vm1592_vm0, %v5323_v30  ;;  %v5377_v29 = vld [vmem:[%s5561_s30 + $0x2b8] ss:$12 sps:$4 sm:$0xff]   ;;  %v5378_v30 = vld [vmem:[%s5561_s30 + $0x290] ss:$12 sps:$4 sm:$0xff]  }
  0xe0   : > { %1969 = vmatprep.mubr.bf16.mxu0 %v5324_v31  ;;  %5021 = vmatprep.mubr.msk.bf16.mxu1 %vm1592_vm0, %v5326_v32 }
  0xe7   : > { %1970 = vmatmul.mubr.bf16.gmra.mrb[76].mxu0 %v5327_v33  ;;  %5022 = vmatmul.mubr.msk.bf16.gmra.mrb[76].mxu1 %vm1592_vm0, %v5328_v34  ;;  %v5379_v33 = vld [vmem:[%s5561_s30 + $0x2d4] ss:$12 sps:$4 sm:$0xff]  }
  0xe8   : > { %1977 = vmatprep.mubr.bf16.mxu0 %v5329_v35  ;;  %5025 = vmatprep.mubr.msk.bf16.mxu1 %vm1592_vm0, %v5331_v36  ;;  %v5381_v34 = vld [vmem:[%s5561_s30 + $0x2a8] ss:$12 sps:$4 sm:$0xff]  }
  0xef   : > { %1978 = vmatmul.mubr.bf16.gmra.mrb[80].mxu0 %v5332_v37  ;;  %5026 = vmatmul.mubr.msk.bf16.gmra.mrb[80].mxu1 %vm1592_vm0, %v5333_v38 }
  0xf0   : > { %1985 = vmatprep.mubr.bf16.mxu0 %v5334_v39  ;;  %5029 = vmatprep.mubr.msk.bf16.mxu1 %vm1592_vm0, %v5336_v40 }
  0xf7   : > { %1986 = vmatmul.mubr.bf16.gmra.mrb[84].mxu0 %v5337_v41  ;;  %5030 = vmatmul.mubr.msk.bf16.gmra.mrb[84].mxu1 %vm1592_vm0, %v5338_v42  ;;  %v5382_v41 = vld [vmem:[%s5561_s30 + $0x2d0] ss:$12 sps:$4 sm:$0xff]   ;;  %v5383_v42 = vld [vmem:[%s5561_s30 + $0x2c0] ss:$12 sps:$4 sm:$0xff]  }
  0xf8   : > { %1993 = vmatprep.mubr.bf16.mxu0 %v5339_v43  ;;  %5033 = vmatprep.mubr.msk.bf16.mxu1 %vm1592_vm0, %v5341_v44 }
  0xff   : > { %1994 = vmatmul.mubr.bf16.gmra.mrb[88].mxu0 %v5342_v45  ;;  %5034 = vmatmul.mubr.msk.bf16.gmra.mrb[88].mxu1 %vm1592_vm0, %v5343_v46  ;;  %v5384_v45 = vld [vmem:[%s5561_s30 + $0x2ec] ss:$12 sps:$4 sm:$0xff]  }
 0x100   : > { %2001 = vmatprep.mubr.bf16.mxu0 %v5344_v47  ;;  %5037 = vmatprep.mubr.msk.bf16.mxu1 %vm1592_vm0, %v5346_v48  ;;  %v5386_v46 = vld [vmem:[%s5561_s30 + $0x2d8] ss:$12 sps:$4 sm:$0xff]  }
 0x107   : > { %2002 = vmatmul.mubr.bf16.gmra.mrb[92].mxu0 %v5347_v49  ;;  %5038 = vmatmul.mubr.msk.bf16.gmra.mrb[92].mxu1 %vm1592_vm0, %v5348_v50 }
 0x108   : > { %2009 = vmatprep.mubr.bf16.mxu0 %v5349_v51  ;;  %5041 = vmatprep.mubr.msk.bf16.mxu1 %vm1592_vm0, %v5351_v52 }
 0x10f   : > { %2010 = vmatmul.mubr.bf16.gmra.mrb[96].mxu0 %v5352_v53  ;;  %5042 = vmatmul.mubr.msk.bf16.gmra.mrb[96].mxu1 %vm1592_vm0, %v5353_v54  ;;  %v5387_v53 = vld [vmem:[%s5561_s30 + $0x2e8] ss:$12 sps:$4 sm:$0xff]   ;;  %v5388_v54 = vld [vmem:[%s5561_s30 + $0x2f0] ss:$12 sps:$4 sm:$0xff]  }
 0x110   : > { %2017 = vmatprep.mubr.bf16.mxu0 %v5354_v55  ;;  %5045 = vmatprep.mubr.msk.bf16.mxu1 %vm1592_vm0, %v5356_v56 }
 0x117   : > { %2018 = vmatmul.mubr.bf16.gmra.mrb[100].mxu0 %v5357_v57  ;;  %5046 = vmatmul.mubr.msk.bf16.gmra.mrb[100].mxu1 %vm1592_vm0, %v5358_v58  ;;  %v5389_v57 = vld [vmem:[%s5561_s30 + $0x304] ss:$12 sps:$4 sm:$0xff]   ;;  %v5391_v58 = vld [vmem:[%s5561_s30 + $0x308] ss:$12 sps:$4 sm:$0xff]  }
 0x118   : > { %2025 = vmatprep.mubr.bf16.mxu0 %v5359_v59  ;;  %5049 = vmatprep.mubr.msk.bf16.mxu1 %vm1592_vm0, %v5361_v60 }
 0x11f   : > { %2026 = vmatmul.mubr.bf16.gmra.mrb[104].mxu0 %v5362_v61  ;;  %5050 = vmatmul.mubr.msk.bf16.gmra.mrb[104].mxu1 %vm1592_vm0, %v5363_v62 }
 0x120   : > { %2033 = vmatprep.mubr.bf16.mxu0 %v5364_v63  ;;  %5053 = vmatprep.mubr.msk.bf16.mxu1 %vm1592_vm0, %v5366_v0 }
 0x122   : > { %v5759_v1 = vpop.f32.mrb[0].mxu0  ;;  %v5761_v2 = vpop.f32.mrb[0].mxu1 }
 0x123   : > { %v1821_v3 = vpop.f32.mrb[1].mxu0  ;;  %v2205_v4 = vpop.f32.mrb[1].mxu1 }
 0x124   : > { %v5765_v7 = vpop.f32.mrb[2].mxu0  ;;  %v5767_v8 = vpop.f32.mrb[2].mxu1  ;;  %v5392_v3 = vld [vmem:[%s5561_s30 + $0x300] ss:$12 sps:$4 sm:$0xff]  }
 0x125   : > { %v1824_v11 = vpop.f32.mrb[3].mxu0  ;;  %v2208_v12 = vpop.f32.mrb[3].mxu1  ;;  %v5393_v4 = vld [vmem:[%s5561_s30 + $0x320] ss:$12 sps:$4 sm:$0xff]  }
 0x127   : > { %2034 = vmatmul.mubr.bf16.gmra.mrb[108].mxu0 %v5367_v5  ;;  %5054 = vmatmul.mubr.msk.bf16.gmra.mrb[108].mxu1 %vm1592_vm0, %v5368_v6 }
 0x128   : > { %2041 = vmatprep.mubr.bf16.mxu0 %v5369_v9  ;;  %5057 = vmatprep.mubr.msk.bf16.mxu1 %vm1592_vm0, %v5371_v10  ;;  %v5394_v9 = vld [vmem:[%s5561_s30 + $0x31c] ss:$12 sps:$4 sm:$0xff]   ;;  %v5396_v10 = vld [vmem:[%s5561_s30 + $0x338] ss:$12 sps:$4 sm:$0xff]  }
 0x12a   : > { %v5773_v13 = vpop.f32.mrb[4].mxu0  ;;  %v5775_v14 = vpop.f32.mrb[4].mxu1 }
 0x12b   : > { %v1829_v15 = vpop.f32.mrb[5].mxu0  ;;  %v2213_v16 = vpop.f32.mrb[5].mxu1 }
 0x12c   : > { %v5779_v19 = vpop.f32.mrb[6].mxu0  ;;  %v5781_v20 = vpop.f32.mrb[6].mxu1 }
 0x12d   : > { %v1832_v23 = vpop.f32.mrb[7].mxu0  ;;  %v2216_v24 = vpop.f32.mrb[7].mxu1 }
 0x12f   : > { %2042 = vmatmul.mubr.bf16.gmra.mrb[112].mxu0 %v5372_v17  ;;  %5058 = vmatmul.mubr.msk.bf16.gmra.mrb[112].mxu1 %vm1592_vm0, %v5373_v18 }
 0x130   : > { %2049 = vmatprep.mubr.bf16.mxu0 %v5374_v21  ;;  %5061 = vmatprep.mubr.msk.bf16.mxu1 %vm1592_vm0, %v5376_v22  ;;  %v5397_v21 = vld [vmem:[%s5561_s30 + $0x318] ss:$12 sps:$4 sm:$0xff]   ;;  %v5398_v22 = vld [vmem:[%s5561_s30 + $0x350] ss:$12 sps:$4 sm:$0xff]  }
 0x132   : > { %v5787_v25 = vpop.f32.mrb[8].mxu0  ;;  %v5789_v26 = vpop.f32.mrb[8].mxu1 }
 0x133   : > { %v1837_v27 = vpop.f32.mrb[9].mxu0  ;;  %v2221_v28 = vpop.f32.mrb[9].mxu1 }
 0x134   : > { %v5793_v31 = vpop.f32.mrb[10].mxu0  ;;  %v5795_v32 = vpop.f32.mrb[10].mxu1  ;;  %v5399_v27 = vld [vmem:[%s5561_s30 + $0x334] ss:$12 sps:$4 sm:$0xff]  }
 0x135   : > { %v1840_v35 = vpop.f32.mrb[11].mxu0  ;;  %v2224_v36 = vpop.f32.mrb[11].mxu1  ;;  %v5401_v28 = vld [vmem:[%s5561_s30 + $0x368] ss:$12 sps:$4 sm:$0xff]  }
 0x137   : > { %2050 = vmatmul.mubr.bf16.gmra.mrb[116].mxu0 %v5377_v29  ;;  %5062 = vmatmul.mubr.msk.bf16.gmra.mrb[116].mxu1 %vm1592_vm0, %v5378_v30 }
 0x138   : > { %2057 = vmatprep.mubr.bf16.mxu0 %v5379_v33  ;;  %5065 = vmatprep.mubr.msk.bf16.mxu1 %vm1592_vm0, %v5381_v34 }
 0x13a   : > { %v5801_v37 = vpop.f32.mrb[12].mxu0  ;;  %v5803_v38 = vpop.f32.mrb[12].mxu1 }
 0x13b   : > { %v1845_v39 = vpop.f32.mrb[13].mxu0  ;;  %v2229_v40 = vpop.f32.mrb[13].mxu1 }
 0x13c   : > { %v5807_v43 = vpop.f32.mrb[14].mxu0  ;;  %v5809_v44 = vpop.f32.mrb[14].mxu1  ;;  %v5402_v39 = vld [vmem:[%s5561_s30 + $0x330] ss:$12 sps:$4 sm:$0xff]   ;;  %v5403_v40 = vld [vmem:[%s5561_s30 + $0x380] ss:$12 sps:$4 sm:$0xff]  }
 0x13d   : > { %v1848_v47 = vpop.f32.mrb[15].mxu0  ;;  %v2232_v48 = vpop.f32.mrb[15].mxu1 }
 0x13f   : > { %2058 = vmatmul.mubr.bf16.gmra.mrb[120].mxu0 %v5382_v41  ;;  %5066 = vmatmul.mubr.msk.bf16.gmra.mrb[120].mxu1 %vm1592_vm0, %v5383_v42 }
 0x140   : > { %2065 = vmatprep.mubr.bf16.mxu0 %v5384_v45  ;;  %5069 = vmatprep.mubr.msk.bf16.mxu1 %vm1592_vm0, %v5386_v46  ;;  %v5404_v45 = vld [vmem:[%s5561_s30 + $0x34c] ss:$12 sps:$4 sm:$0xff]  }
 0x141   : > { %v5406_v46 = vld [vmem:[%s5561_s30 + $0x398] ss:$12 sps:$4 sm:$0xff]  }
 0x142   : > { %v5815_v49 = vpop.f32.mrb[16].mxu0  ;;  %v5817_v50 = vpop.f32.mrb[16].mxu1 }
 0x143   : > { %v1853_v51 = vpop.f32.mrb[17].mxu0  ;;  %v2237_v52 = vpop.f32.mrb[17].mxu1 }
 0x144   : > { %v5821_v55 = vpop.f32.mrb[18].mxu0  ;;  %v5823_v56 = vpop.f32.mrb[18].mxu1 }
 0x145   : > { %6546 = vst [vmem:[#allocation2_spill] sm:$0xff] %v5823_v56  ;;  %v1856_v59 = vpop.f32.mrb[19].mxu0  ;;  %v2240_v60 = vpop.f32.mrb[19].mxu1 }
 0x147   : > { %2066 = vmatmul.mubr.bf16.gmra.mrb[124].mxu0 %v5387_v53  ;;  %5070 = vmatmul.mubr.msk.bf16.gmra.mrb[124].mxu1 %vm1592_vm0, %v5388_v54 }
 0x148   : > { %2073 = vmatprep.mubr.bf16.mxu0 %v5389_v57  ;;  %5073 = vmatprep.mubr.msk.bf16.mxu1 %vm1592_vm0, %v5391_v58  ;;  %v5407_v57 = vld [vmem:[%s5561_s30 + $0x348] ss:$12 sps:$4 sm:$0xff]   ;;  %v5408_v58 = vld [vmem:[%s5561_s30 + $0x3b0] ss:$12 sps:$4 sm:$0xff]  }
 0x14a   : > { %v5829_v61 = vpop.f32.mrb[20].mxu0  ;;  %v5831_v62 = vpop.f32.mrb[20].mxu1 }
 0x14b   : > { %v1861_v63 = vpop.f32.mrb[21].mxu0  ;;  %v2245_v0 = vpop.f32.mrb[21].mxu1 }
 0x14c   : > { %v5835_v5 = vpop.f32.mrb[22].mxu0  ;;  %v5837_v6 = vpop.f32.mrb[22].mxu1  ;;  %v5409_v63 = vld [vmem:[%s5561_s30 + $0x364] ss:$12 sps:$4 sm:$0xff]   ;;  %v5411_v0 = vld [vmem:[%s5561_s30 + $0x3c8] ss:$12 sps:$4 sm:$0xff]  }
 0x14d   : > { %v1864_v11 = vpop.f32.mrb[23].mxu0  ;;  %v2248_v12 = vpop.f32.mrb[23].mxu1 }
 0x14f   : > { %2074 = vmatmul.mubr.bf16.gmra.mrb[128].mxu0 %v5392_v3  ;;  %5074 = vmatmul.mubr.msk.bf16.gmra.mrb[128].mxu1 %vm1592_vm0, %v5393_v4 }
 0x150   : > { %2081 = vmatprep.mubr.bf16.mxu0 %v5394_v9  ;;  %5077 = vmatprep.mubr.msk.bf16.mxu1 %vm1592_vm0, %v5396_v10 }
 0x152   : > { %v5843_v15 = vpop.f32.mrb[24].mxu0  ;;  %v5845_v16 = vpop.f32.mrb[24].mxu1 }
 0x153   : > { %6547 = vst [vmem:[#allocation3_spill] sm:$0xff] %v5845_v16  ;;  %v1869_v17 = vpop.f32.mrb[25].mxu0  ;;  %v2253_v18 = vpop.f32.mrb[25].mxu1 }
 0x154   : > { %v5849_v23 = vpop.f32.mrb[26].mxu0  ;;  %v5851_v24 = vpop.f32.mrb[26].mxu1  ;;  %v5412_v17 = vld [vmem:[%s5561_s30 + $0x360] ss:$12 sps:$4 sm:$0xff]  }
 0x155   : > { %6548 = vst [vmem:[#allocation4_spill] sm:$0xff] %v5851_v24  ;;  %v1872_v29 = vpop.f32.mrb[27].mxu0  ;;  %v2256_v30 = vpop.f32.mrb[27].mxu1  ;;  %v5413_v18 = vld [vmem:[%s5561_s30 + $0x3e0] ss:$12 sps:$4 sm:$0xff]  }
 0x156   : > { %v5449_v24 = vld [vmem:[%s5561_s30 + $0x424] ss:$12 sps:$4 sm:$0xff]  }
 0x157   : > { %2082 = vmatmul.mubr.bf16.gmra.mrb[132].mxu0 %v5397_v21  ;;  %5078 = vmatmul.mubr.msk.bf16.gmra.mrb[132].mxu1 %vm1592_vm0, %v5398_v22 }
 0x158   : > { %2089 = vmatprep.mubr.bf16.mxu0 %v5399_v27  ;;  %5081 = vmatprep.mubr.msk.bf16.mxu1 %vm1592_vm0, %v5401_v28  ;;  %v5414_v27 = vld [vmem:[%s5561_s30 + $0x37c] ss:$12 sps:$4 sm:$0xff]   ;;  %v5416_v28 = vld [vmem:[%s5561_s30 + $0x3f8] ss:$12 sps:$4 sm:$0xff]  }
 0x15a   : > { %v5857_v33 = vpop.f32.mrb[28].mxu0  ;;  %v5859_v34 = vpop.f32.mrb[28].mxu1 }
 0x15b   : > { %6549 = vst [vmem:[#allocation5_spill] sm:$0xff] %v5859_v34  ;;  %v1877_v35 = vpop.f32.mrb[29].mxu0  ;;  %v2261_v36 = vpop.f32.mrb[29].mxu1 }
 0x15c   : > { %v5863_v41 = vpop.f32.mrb[30].mxu0  ;;  %v5865_v42 = vpop.f32.mrb[30].mxu1 }
 0x15d   : > { %6550 = vst [vmem:[#allocation6_spill] sm:$0xff] %v5865_v42  ;;  %v1880_v47 = vpop.f32.mrb[31].mxu0  ;;  %v2264_v48 = vpop.f32.mrb[31].mxu1 }
 0x15f   : > { %2090 = vmatmul.mubr.bf16.gmra.mrb[136].mxu0 %v5402_v39  ;;  %5082 = vmatmul.mubr.msk.bf16.gmra.mrb[136].mxu1 %vm1592_vm0, %v5403_v40 }
 0x160   : > { %2097 = vmatprep.mubr.bf16.mxu0 %v5404_v45  ;;  %5085 = vmatprep.mubr.msk.bf16.mxu1 %vm1592_vm0, %v5406_v46  ;;  %v5417_v45 = vld [vmem:[%s5561_s30 + $0x378] ss:$12 sps:$4 sm:$0xff]   ;;  %v5418_v46 = vld [vmem:[%s5561_s30 + $0x410] ss:$12 sps:$4 sm:$0xff]  }
 0x162   : > { %v5871_v51 = vpop.f32.mrb[32].mxu0  ;;  %v5873_v52 = vpop.f32.mrb[32].mxu1 }
 0x163   : > { %6551 = vst [vmem:[#allocation7_spill] sm:$0xff] %v5873_v52  ;;  %v1885_v53 = vpop.f32.mrb[33].mxu0  ;;  %v2269_v54 = vpop.f32.mrb[33].mxu1 }
 0x164   : > { %v5877_v59 = vpop.f32.mrb[34].mxu0  ;;  %v5879_v60 = vpop.f32.mrb[34].mxu1  ;;  %v5419_v53 = vld [vmem:[%s5561_s30 + $0x394] ss:$12 sps:$4 sm:$0xff]  }
 0x165   : > { %6552 = vst [vmem:[#allocation8_spill] sm:$0xff] %v5879_v60  ;;  %v1888_v3 = vpop.f32.mrb[35].mxu0  ;;  %v2272_v4 = vpop.f32.mrb[35].mxu1  ;;  %v5421_v54 = vld [vmem:[%s5561_s30 + $0x428] ss:$12 sps:$4 sm:$0xff]  }
 0x166   : > { %v5444_v60 = vld [vmem:[%s5561_s30 + $0x40c] ss:$12 sps:$4 sm:$0xff]  }
 0x167   : > { %2098 = vmatmul.mubr.bf16.gmra.mrb[140].mxu0 %v5407_v57  ;;  %5086 = vmatmul.mubr.msk.bf16.gmra.mrb[140].mxu1 %vm1592_vm0, %v5408_v58 }
 0x168   : > { %2105 = vmatprep.mubr.bf16.mxu0 %v5409_v63  ;;  %5089 = vmatprep.mubr.msk.bf16.mxu1 %vm1592_vm0, %v5411_v0 }
 0x16a   : > { %v5885_v9 = vpop.f32.mrb[36].mxu0  ;;  %v5887_v10 = vpop.f32.mrb[36].mxu1 }
 0x16b   : > { %6553 = vst [vmem:[#allocation9_spill] sm:$0xff] %v5887_v10  ;;  %v1893_v11 = vpop.f32.mrb[37].mxu0  ;;  %v2277_v12 = vpop.f32.mrb[37].mxu1  ;;  %v5448_v10 = vld [vmem:[%s5561_s30 + $0x530] ss:$12 sps:$4 sm:$0xff]  }
 0x16c   : > { %v5891_v21 = vpop.f32.mrb[38].mxu0  ;;  %v5893_v22 = vpop.f32.mrb[38].mxu1  ;;  %v5422_v11 = vld [vmem:[%s5561_s30 + $0x390] ss:$12 sps:$4 sm:$0xff]   ;;  %v5423_v12 = vld [vmem:[%s5561_s30 + $0x440] ss:$12 sps:$4 sm:$0xff]  }
 0x16d   : > { %6554 = vst [vmem:[#allocation10_spill] sm:$0xff] %v5893_v22  ;;  %v1896_v29 = vpop.f32.mrb[39].mxu0  ;;  %v2280_v30 = vpop.f32.mrb[39].mxu1 }
 0x16f   : > { %2106 = vmatmul.mubr.bf16.gmra.mrb[144].mxu0 %v5412_v17  ;;  %5090 = vmatmul.mubr.msk.bf16.gmra.mrb[144].mxu1 %vm1592_vm0, %v5413_v18 }
 0x170   : > { %2113 = vmatprep.mubr.bf16.mxu0 %v5414_v27  ;;  %5093 = vmatprep.mubr.msk.bf16.mxu1 %vm1592_vm0, %v5416_v28  ;;  %v5424_v27 = vld [vmem:[%s5561_s30 + $0x3ac] ss:$12 sps:$4 sm:$0xff]  }
 0x171   : > { %v5426_v28 = vld [vmem:[%s5561_s30 + $0x458] ss:$12 sps:$4 sm:$0xff]  }
 0x172   : > { %v5899_v35 = vpop.f32.mrb[40].mxu0  ;;  %v5901_v36 = vpop.f32.mrb[40].mxu1 }
 0x173   : > { %6555 = vst [vmem:[#allocation11_spill] sm:$0xff] %v5901_v36  ;;  %v1901_v39 = vpop.f32.mrb[41].mxu0  ;;  %v2285_v40 = vpop.f32.mrb[41].mxu1  ;;  %v5442_v36 = vld [vmem:[%s5561_s30 + $0x3f0] ss:$12 sps:$4 sm:$0xff]  }
 0x174   : > { %v5905_v47 = vpop.f32.mrb[42].mxu0  ;;  %v5907_v48 = vpop.f32.mrb[42].mxu1 }
 0x175   : > { %6556 = vst [vmem:[#allocation12_spill] sm:$0xff] %v5907_v48  ;;  %v1904_v57 = vpop.f32.mrb[43].mxu0  ;;  %v2288_v58 = vpop.f32.mrb[43].mxu1 }
 0x177   : > { %2114 = vmatmul.mubr.bf16.gmra.mrb[148].mxu0 %v5417_v45  ;;  %5094 = vmatmul.mubr.msk.bf16.gmra.mrb[148].mxu1 %vm1592_vm0, %v5418_v46 }
 0x178   : > { %2121 = vmatprep.mubr.bf16.mxu0 %v5419_v53  ;;  %5097 = vmatprep.mubr.msk.bf16.mxu1 %vm1592_vm0, %v5421_v54  ;;  %v5427_v53 = vld [vmem:[%s5561_s30 + $0x3a8] ss:$12 sps:$4 sm:$0xff]   ;;  %v5428_v54 = vld [vmem:[%s5561_s30 + $0x470] ss:$12 sps:$4 sm:$0xff]  }
 0x17a   : > { %v5913_v63 = vpop.f32.mrb[44].mxu0  ;;  %v5915_v0 = vpop.f32.mrb[44].mxu1 }
 0x17b   : > { %6557 = vst [vmem:[#allocation13_spill] sm:$0xff] %v5915_v0  ;;  %v1909_v3 = vpop.f32.mrb[45].mxu0  ;;  %v2293_v4 = vpop.f32.mrb[45].mxu1  ;;  %v5443_v0 = vld [vmem:[%s5561_s30 + $0x500] ss:$12 sps:$4 sm:$0xff]  }
 0x17c   : > { %v5919_v17 = vpop.f32.mrb[46].mxu0  ;;  %v5921_v18 = vpop.f32.mrb[46].mxu1  ;;  %v5429_v3 = vld [vmem:[%s5561_s30 + $0x3c4] ss:$12 sps:$4 sm:$0xff]   ;;  %v5431_v4 = vld [vmem:[%s5561_s30 + $0x488] ss:$12 sps:$4 sm:$0xff]  }
 0x17d   : > { %6558 = vst [vmem:[#allocation14_spill] sm:$0xff] %v5921_v18  ;;  %v1912_v29 = vpop.f32.mrb[47].mxu0  ;;  %v2296_v30 = vpop.f32.mrb[47].mxu1 }
 0x17f   : > { %2122 = vmatmul.mubr.bf16.gmra.mrb[152].mxu0 %v5422_v11  ;;  %5098 = vmatmul.mubr.msk.bf16.gmra.mrb[152].mxu1 %vm1592_vm0, %v5423_v12 }
 0x180   : > { %2129 = vmatprep.mubr.bf16.mxu0 %v5424_v27  ;;  %5101 = vmatprep.mubr.msk.bf16.mxu1 %vm1592_vm0, %v5426_v28 }
 0x182   : > { %v5927_v39 = vpop.f32.mrb[48].mxu0  ;;  %v5929_v40 = vpop.f32.mrb[48].mxu1 }
 0x183   : > { %6559 = vst [vmem:[#allocation15_spill] sm:$0xff] %v5929_v40  ;;  %v1917_v45 = vpop.f32.mrb[49].mxu0  ;;  %v2301_v46 = vpop.f32.mrb[49].mxu1 }
 0x184   : > { %v5933_v57 = vpop.f32.mrb[50].mxu0  ;;  %v5935_v58 = vpop.f32.mrb[50].mxu1  ;;  %v5432_v45 = vld [vmem:[%s5561_s30 + $0x3c0] ss:$12 sps:$4 sm:$0xff]  }
 0x185   : > { %6560 = vst [vmem:[#allocation16_spill] sm:$0xff] %v5935_v58  ;;  %v1920_v11 = vpop.f32.mrb[51].mxu0  ;;  %v2304_v12 = vpop.f32.mrb[51].mxu1  ;;  %v5433_v46 = vld [vmem:[%s5561_s30 + $0x4a0] ss:$12 sps:$4 sm:$0xff]  }
 0x187   : > { %2130 = vmatmul.mubr.bf16.gmra.mrb[156].mxu0 %v5427_v53  ;;  %5102 = vmatmul.mubr.msk.bf16.gmra.mrb[156].mxu1 %vm1592_vm0, %v5428_v54  ;;  %v5434_v53 = vld [vmem:[%s5561_s30 + $0x3dc] ss:$12 sps:$4 sm:$0xff]   ;;  %v5436_v54 = vld [vmem:[%s5561_s30 + $0x4b8] ss:$12 sps:$4 sm:$0xff]  }
 0x188   : > { %2137 = vmatprep.mubr.bf16.mxu0 %v5429_v3  ;;  %5105 = vmatprep.mubr.msk.bf16.mxu1 %vm1592_vm0, %v5431_v4 }
 0x18a   : > { %v5941_v27 = vpop.f32.mrb[52].mxu0  ;;  %v5943_v28 = vpop.f32.mrb[52].mxu1 }
 0x18b   : > { %6561 = vst [vmem:[#allocation17_spill] sm:$0xff] %v5943_v28  ;;  %v1925_v29 = vpop.f32.mrb[53].mxu0  ;;  %v2309_v30 = vpop.f32.mrb[53].mxu1  ;;  %v5437_v28 = vld [vmem:[%s5561_s30 + $0x3d8] ss:$12 sps:$4 sm:$0xff]  }
 0x18c   : > { %v5947_v58 = vpop.f32.mrb[54].mxu0  ;;  %v5949_v11 = vpop.f32.mrb[54].mxu1 }
 0x18d   : > { %6562 = vst [vmem:[#allocation18_spill] sm:$0xff] %v5949_v11  ;;  %v1928_v3 = vpop.f32.mrb[55].mxu0  ;;  %v2312_v4 = vpop.f32.mrb[55].mxu1  ;;  %v5438_v11 = vld [vmem:[%s5561_s30 + $0x4d0] ss:$12 sps:$4 sm:$0xff]  }
 0x18e   : > { %v5441_v3 = vld [vmem:[%s5561_s30 + $0x4e8] ss:$12 sps:$4 sm:$0xff]  }
 0x18f   : > { %2138 = vmatmul.mubr.bf16.gmra.mrb[160].mxu0 %v5432_v45  ;;  %5106 = vmatmul.mubr.msk.bf16.gmra.mrb[160].mxu1 %vm1592_vm0, %v5433_v46  ;;  %v5439_v45 = vld [vmem:[%s5561_s30 + $0x3f4] ss:$12 sps:$4 sm:$0xff]  }
 0x190   : > { %2145 = vmatprep.mubr.bf16.mxu0 %v5434_v53  ;;  %5109 = vmatprep.mubr.msk.bf16.mxu1 %vm1592_vm0, %v5436_v54  ;;  %v2876_v54 = vlaneseq }
 0x192   : > { %v5955_v12 = vpop.f32.mrb[56].mxu0  ;;  %v5957_v29 = vpop.f32.mrb[56].mxu1 }
 0x193   : > { %6563 = vst [vmem:[#allocation19_spill] sm:$0xff] %v5957_v29  ;;  %v1933_v30 = vpop.f32.mrb[57].mxu0  ;;  %v2317_v40 = vpop.f32.mrb[57].mxu1 }
 0x194   : > { %v5961_v48 = vpop.f32.mrb[58].mxu0  ;;  %v5963_v18 = vpop.f32.mrb[58].mxu1  ;;  %v2877_v40 = vshrl.u32 %v2876_v54, 7 }
 0x195   : > { %6564 = vst [vmem:[#allocation20_spill] sm:$0xff] %v5963_v18  ;;  %v1936_v46 = vpop.f32.mrb[59].mxu0  ;;  %v2320_v53 = vpop.f32.mrb[59].mxu1 }
 0x197   : > { %2146 = vmatmul.mubr.bf16.gmra.mrb[164].mxu0 %v5437_v28  ;;  %5110 = vmatmul.mubr.msk.bf16.gmra.mrb[164].mxu1 %vm1592_vm0, %v5438_v11  ;;  %v5446_v28 = vld [vmem:[%s5561_s30 + $0x518] ss:$12 sps:$4 sm:$0xff]  }
 0x198   : > { %2153 = vmatprep.mubr.bf16.mxu0 %v5439_v45  ;;  %5113 = vmatprep.mubr.msk.bf16.mxu1 %vm1592_vm0, %v5441_v3  ;;  %v2878_v45 = vsub.s32 0, %v2877_v40  ;;  %v2875_v3 = vld [vmem:[%s6544_s2] sm:$0x3] }
 0x19a   : > { %v5969_v4 = vpop.f32.mrb[60].mxu0  ;;  %v5971_v30 = vpop.f32.mrb[60].mxu1 }
 0x19b   : > { %6565 = vst [vmem:[#allocation21_spill] sm:$0xff] %v5971_v30  ;;  %v1941_v18 = vpop.f32.mrb[61].mxu0  ;;  %v2325_v29 = vpop.f32.mrb[61].mxu1 }
 0x19c   : > { %v5975_v46 = vpop.f32.mrb[62].mxu0  ;;  %v5977_v53 = vpop.f32.mrb[62].mxu1  ;;  %v3010_v18 = vsub.s32 1, %v2877_v40  ;;  %v5986_v29 = vrot.slane %v2875_v3, %v2878_v45 }
 0x19d   : > { %6566 = vst [vmem:[#allocation22_spill] sm:$0xff] %v5977_v53  ;;  %v1944_v22 = vpop.f32.mrb[63].mxu0  ;;  %v2328_v11 = vpop.f32.mrb[63].mxu1 }
 0x19e   : > { %v5991_v53 = vrot.slane %v2875_v3, %v3010_v18 }
 0x19f   : > { %2154 = vmatmul.mubr.bf16.gmra.mrb[168].mxu0 %v5442_v36  ;;  %5114 = vmatmul.mubr.msk.bf16.gmra.mrb[168].mxu1 %vm1592_vm0, %v5443_v0  ;;  %v5447_v36 = vld [vmem:[%s5561_s30 + $0x408] ss:$12 sps:$4 sm:$0xff]  }
 0x1a0   : > { %2161 = vmatprep.mubr.bf16.mxu0 %v5444_v60  ;;  %5117 = vmatprep.mubr.msk.bf16.mxu1 %vm1592_vm0, %v5446_v28  ;;  %v5451_v28 = vld [vmem:[%s5561_s30 + $0x548] ss:$12 sps:$4 sm:$0xff]  }
 0x1a2   : > { %v5988_v22 = vpop.f32.mrb[64].mxu0  ;;  %v5011_v54 = vpop.f32.mrb[64].mxu1 }
 0x1a3   : > { %v2373_v11 = vadd.f32 %v5011_v54, %v5773_v13  ;;  %v1949_v30 = vpop.f32.mrb[65].mxu0  ;;  %v2364_v52 = vpop.f32.mrb[65].mxu1 }
 0x1a4   : > { %v2365_v0 = vadd.f32 %v2364_v52, %v5759_v1  ;;  %v5996_v40 = vpop.f32.mrb[66].mxu0  ;;  %v5012_v60 = vpop.f32.mrb[66].mxu1 }
 0x1a5   : > { %v2882_v45 = vmul.f32 %v5986_v29, %v2373_v11  ;;  %v2376_v42 = vadd.f32 %v5012_v60, %v5779_v19  ;;  %v1952_v16 = vpop.f32.mrb[67].mxu0  ;;  %v2367_v13 = vpop.f32.mrb[67].mxu1  ;;  %v5452_v11 = vld [vmem:[%s5561_s30 + $0x420] ss:$12 sps:$4 sm:$0xff]  }
 0x1a6   : > { %v2880_v30 = vmul.f32 %v5986_v29, %v2365_v0  ;;  %v2368_v3 = vadd.f32 %v2367_v13, %v5765_v7 }
 0x1a7   : > { %v3014_v1 = vadd.f32 %v5991_v53, %v2882_v45  ;;  %v2883_v52 = vmul.f32 %v5986_v29, %v2376_v42  ;;  %2162 = vmatmul.mubr.bf16.gmra.mrb[172].mxu0 %v5447_v36  ;;  %5118 = vmatmul.mubr.msk.bf16.gmra.mrb[172].mxu1 %vm1592_vm0, %v5448_v10  ;;  %v5453_v36 = vld [vmem:[%s5561_s30 + $0x560] ss:$12 sps:$4 sm:$0xff]  }
 0x1a8   : > { %v3012_v18 = vadd.f32 %v5991_v53, %v2880_v30  ;;  %v2881_v19 = vmul.f32 %v5986_v29, %v2368_v3  ;;  %2169 = vmatprep.mubr.bf16.mxu0 %v5449_v24  ;;  %5121 = vmatprep.mubr.msk.bf16.mxu1 %vm1592_vm0, %v5451_v28  ;;  %v5454_v24 = vld [vmem:[%s5561_s30 + $0x43c] ss:$12 sps:$4 sm:$0xff]  }
 0x1a9   : > { %v3015_v16 = vadd.f32 %v5991_v53, %v2883_v52  ;;  %v3142_v10 = vmax.f32 %v3014_v1, 0.0 }
 0x1aa   : > { %v3013_v7 = vadd.f32 %v5991_v53, %v2881_v19  ;;  %v6013_v54 = vpop.f32.mrb[68].mxu0  ;;  %v5015_v42 = vpop.f32.mrb[68].mxu1  ;;  %v3140_v30 = vmax.f32 %v3012_v18, 0.0  ;;  %v5456_v19 = vld [vmem:[%s5561_s30 + $0x578] ss:$12 sps:$4 sm:$0xff]  }
 0x1ab   : > { %v3143_v0 = vmax.f32 %v3015_v16, 0.0  ;;  %v2389_v60 = vadd.f32 %v5015_v42, %v5801_v37  ;;  %v1957_v45 = vpop.f32.mrb[69].mxu0  ;;  %v2380_v13 = vpop.f32.mrb[69].mxu1 }
 0x1ac   : > { %v3141_v28 = vmax.f32 %v3013_v7, 0.0  ;;  %v2381_v3 = vadd.f32 %v2380_v13, %v5787_v25  ;;  %v6025_v52 = vpop.f32.mrb[70].mxu0  ;;  %v5016_v1 = vpop.f32.mrb[70].mxu1 }
 0x1ad   : > { %v4564_v16 = vpack.c.bf16 %v3143_v0, %v3142_v10  ;;  %v2886_v37 = vmul.f32 %v5986_v29, %v2389_v60  ;;  %v2392_v42 = vadd.f32 %v5016_v1, %v5807_v43  ;;  %v1960_v18 = vpop.f32.mrb[71].mxu0  ;;  %v2383_v45 = vpop.f32.mrb[71].mxu1 }
 0x1ae   : > { %v4559_v34 = vpack.c.bf16 %v3141_v28, %v3140_v30  ;;  %v2884_v56 = vmul.f32 %v5986_v29, %v2381_v3  ;;  %v2384_v7 = vadd.f32 %v2383_v45, %v5793_v31  ;;  %v5458_v28 = vld [vmem:[%s5561_s30 + $0x590] ss:$12 sps:$4 sm:$0xff]   ;;  %v5461_v45 = vld [vmem:[%s5561_s30 + $0x5a8] ss:$12 sps:$4 sm:$0xff]  }
 0x1af   : > { %4876 = vst [vmem:[%s6022_s12 + $0x8] sm:$0xff] %v4564_v16   ;;  %v3018_v25 = vadd.f32 %v5991_v53, %v2886_v37  ;;  %v2887_v13 = vmul.f32 %v5986_v29, %v2392_v42  ;;  %2170 = vmatmul.mubr.bf16.gmra.mrb[176].mxu0 %v5452_v11  ;;  %5122 = vmatmul.mubr.msk.bf16.gmra.mrb[176].mxu1 %vm1592_vm0, %v5453_v36  ;;  %v5457_v11 = vld [vmem:[%s5561_s30 + $0x438] ss:$12 sps:$4 sm:$0xff]  }
 0x1b0   : > { %4560 = vst [vmem:[%s6022_s12] sm:$0xff] %v4559_v34   ;;  %v3016_v43 = vadd.f32 %v5991_v53, %v2884_v56  ;;  %v2885_v10 = vmul.f32 %v5986_v29, %v2384_v7  ;;  %2177 = vmatprep.mubr.bf16.mxu0 %v5454_v24  ;;  %5125 = vmatprep.mubr.msk.bf16.mxu1 %vm1592_vm0, %v5456_v19  ;;  %v5459_v24 = vld [vmem:[%s5561_s30 + $0x454] ss:$12 sps:$4 sm:$0xff]  }
 0x1b1   : > { %v3019_v31 = vadd.f32 %v5991_v53, %v2887_v13  ;;  %v3146_v36 = vmax.f32 %v3018_v25, 0.0 }
 0x1b2   : > { %v3017_v0 = vadd.f32 %v5991_v53, %v2885_v10  ;;  %v6042_v60 = vpop.f32.mrb[72].mxu0  ;;  %v5019_v30 = vpop.f32.mrb[72].mxu1  ;;  %v3144_v16 = vmax.f32 %v3016_v43, 0.0 }
 0x1b3   : > { %v3147_v34 = vmax.f32 %v3019_v31, 0.0  ;;  %v2405_v3 = vadd.f32 %v5019_v30, %v5829_v61  ;;  %v1965_v56 = vpop.f32.mrb[73].mxu0  ;;  %v2396_v1 = vpop.f32.mrb[73].mxu1 }
 0x1b4   : > { %v3145_v19 = vmax.f32 %v3017_v0, 0.0  ;;  %v2397_v37 = vadd.f32 %v2396_v1, %v5815_v49  ;;  %v6049_v42 = vpop.f32.mrb[74].mxu0  ;;  %v5020_v18 = vpop.f32.mrb[74].mxu1  ;;  %v5463_v1 = vld [vmem:[%s5561_s30 + $0x5c0] ss:$12 sps:$4 sm:$0xff]  }
 0x1b5   : > { %v4574_v7 = vpack.c.bf16 %v3147_v34, %v3146_v36  ;;  %v2890_v13 = vmul.f32 %v5986_v29, %v2405_v3  ;;  %v2408_v25 = vadd.f32 %v5020_v18, %v5835_v5  ;;  %v1968_v10 = vpop.f32.mrb[75].mxu0  ;;  %v2399_v61 = vpop.f32.mrb[75].mxu1 }
 0x1b6   : > { %v4569_v31 = vpack.c.bf16 %v3145_v19, %v3144_v16  ;;  %v2888_v30 = vmul.f32 %v5986_v29, %v2397_v37  ;;  %v2400_v43 = vadd.f32 %v2399_v61, %v5821_v55  ;;  %v5466_v61 = vld [vmem:[%s5561_s30 + $0x5d8] ss:$12 sps:$4 sm:$0xff]  }
 0x1b7   : > { %4878 = vst [vmem:[%s6022_s12 + $0x18] sm:$0xff] %v4574_v7   ;;  %v3022_v49 = vadd.f32 %v5991_v53, %v2890_v13  ;;  %v2891_v0 = vmul.f32 %v5986_v29, %v2408_v25  ;;  %2178 = vmatmul.mubr.bf16.gmra.mrb[180].mxu0 %v5457_v11  ;;  %5126 = vmatmul.mubr.msk.bf16.gmra.mrb[180].mxu1 %vm1592_vm0, %v5458_v28  ;;  %v5462_v11 = vld [vmem:[%s5561_s30 + $0x450] ss:$12 sps:$4 sm:$0xff]  }
 0x1b8   : > { %4877 = vst [vmem:[%s6022_s12 + $0x10] sm:$0xff] %v4569_v31   ;;  %v3020_v5 = vadd.f32 %v5991_v53, %v2888_v30  ;;  %v2889_v36 = vmul.f32 %v5986_v29, %v2400_v43  ;;  %2185 = vmatprep.mubr.bf16.mxu0 %v5459_v24  ;;  %5129 = vmatprep.mubr.msk.bf16.mxu1 %vm1592_vm0, %v5461_v45  ;;  %v5464_v24 = vld [vmem:[%s5561_s30 + $0x46c] ss:$12 sps:$4 sm:$0xff]  }
 0x1b9   : > { %v3023_v55 = vadd.f32 %v5991_v53, %v2891_v0  ;;  %v3150_v28 = vmax.f32 %v3022_v49, 0.0 }
 0x1ba   : > { %v3021_v34 = vadd.f32 %v5991_v53, %v2889_v36  ;;  %v6066_v3 = vpop.f32.mrb[76].mxu0  ;;  %v5023_v56 = vpop.f32.mrb[76].mxu1  ;;  %v3148_v7 = vmax.f32 %v3020_v5, 0.0 }
 0x1bb   : > { %v3151_v16 = vmax.f32 %v3023_v55, 0.0  ;;  %v2421_v19 = vadd.f32 %v5023_v56, %v5857_v33  ;;  %v1973_v37 = vpop.f32.mrb[77].mxu0  ;;  %v2412_v18 = vpop.f32.mrb[77].mxu1 }
 0x1bc   : > { %v3149_v45 = vmax.f32 %v3021_v34, 0.0  ;;  %v2413_v13 = vadd.f32 %v2412_v18, %v5843_v15  ;;  %v6073_v25 = vpop.f32.mrb[78].mxu0  ;;  %v5024_v10 = vpop.f32.mrb[78].mxu1 }
 0x1bd   : > { %v4584_v31 = vpack.c.bf16 %v3151_v16, %v3150_v28  ;;  %v2894_v30 = vmul.f32 %v5986_v29, %v2421_v19  ;;  %v2424_v43 = vadd.f32 %v5024_v10, %v5863_v41  ;;  %v1976_v49 = vpop.f32.mrb[79].mxu0  ;;  %v2415_v33 = vpop.f32.mrb[79].mxu1  ;;  %v5467_v19 = vld [vmem:[%s5561_s30 + $0x468] ss:$12 sps:$4 sm:$0xff]  }
 0x1be   : > { %v4579_v0 = vpack.c.bf16 %v3149_v45, %v3148_v7  ;;  %v2892_v36 = vmul.f32 %v5986_v29, %v2413_v13  ;;  %v2416_v5 = vadd.f32 %v2415_v33, %v5849_v23  ;;  %v5468_v45 = vld [vmem:[%s5561_s30 + $0x5f0] ss:$12 sps:$4 sm:$0xff]  }
 0x1bf   : > { %4880 = vst [vmem:[%s6022_s12 + $0x28] sm:$0xff] %v4584_v31   ;;  %v3026_v15 = vadd.f32 %v5991_v53, %v2894_v30  ;;  %v2895_v55 = vmul.f32 %v5986_v29, %v2424_v43  ;;  %2186 = vmatmul.mubr.bf16.gmra.mrb[184].mxu0 %v5462_v11  ;;  %5130 = vmatmul.mubr.msk.bf16.gmra.mrb[184].mxu1 %vm1592_vm0, %v5463_v1 }
 0x1c0   : > { %4879 = vst [vmem:[%s6022_s12 + $0x20] sm:$0xff] %v4579_v0   ;;  %v3024_v41 = vadd.f32 %v5991_v53, %v2892_v36  ;;  %v2893_v34 = vmul.f32 %v5986_v29, %v2416_v5  ;;  %2193 = vmatprep.mubr.bf16.mxu0 %v5464_v24  ;;  %5133 = vmatprep.mubr.msk.bf16.mxu1 %vm1592_vm0, %v5466_v61 }
 0x1c1   : > { %v3027_v56 = vadd.f32 %v5991_v53, %v2895_v55  ;;  %v3154_v11 = vmax.f32 %v3026_v15, 0.0 }
 0x1c2   : > { %v3025_v23 = vadd.f32 %v5991_v53, %v2893_v34  ;;  %v6090_v28 = vpop.f32.mrb[80].mxu0  ;;  %v5027_v16 = vpop.f32.mrb[80].mxu1  ;;  %v3152_v13 = vmax.f32 %v3024_v41, 0.0 }
 0x1c3   : > { %v3155_v37 = vmax.f32 %v3027_v56, 0.0  ;;  %v2437_v1 = vadd.f32 %v5027_v16, %v5885_v9  ;;  %v1981_v18 = vpop.f32.mrb[81].mxu0  ;;  %v2428_v7 = vpop.f32.mrb[81].mxu1 }
 0x1c4   : > { %v3153_v24 = vmax.f32 %v3025_v23, 0.0  ;;  %v2429_v10 = vadd.f32 %v2428_v7, %v5871_v51  ;;  %v6096_v61 = vpop.f32.mrb[82].mxu0  ;;  %v5028_v31 = vpop.f32.mrb[82].mxu1 }
 0x1c5   : > { %v4594_v30 = vpack.c.bf16 %v3155_v37, %v3154_v11  ;;  %v2898_v43 = vmul.f32 %v5986_v29, %v2437_v1  ;;  %v2440_v49 = vadd.f32 %v5028_v31, %v5891_v21  ;;  %v1984_v33 = vpop.f32.mrb[83].mxu0  ;;  %v2431_v0 = vpop.f32.mrb[83].mxu1 }
 0x1c6   : > { %v4589_v9 = vpack.c.bf16 %v3153_v24, %v3152_v13  ;;  %v2896_v36 = vmul.f32 %v5986_v29, %v2429_v10  ;;  %v2432_v5 = vadd.f32 %v2431_v0, %v5877_v59 }
 0x1c7   : > { %4882 = vst [vmem:[%s6022_s12 + $0x38] sm:$0xff] %v4594_v30   ;;  %v3030_v15 = vadd.f32 %v5991_v53, %v2898_v43  ;;  %v2899_v51 = vmul.f32 %v5986_v29, %v2440_v49  ;;  %2194 = vmatmul.mubr.bf16.gmra.mrb[188].mxu0 %v5467_v19  ;;  %5134 = vmatmul.mubr.msk.bf16.gmra.mrb[188].mxu1 %vm1592_vm0, %v5468_v45 }
 0x1c8   : > { %4881 = vst [vmem:[%s6022_s12 + $0x30] sm:$0xff] %v4589_v9   ;;  %v3028_v55 = vadd.f32 %v5991_v53, %v2896_v36  ;;  %v2897_v21 = vmul.f32 %v5986_v29, %v2432_v5 }
 0x1c9   : > { %v3031_v41 = vadd.f32 %v5991_v53, %v2899_v51  ;;  %v3158_v23 = vmax.f32 %v3030_v15, 0.0 }
 0x1ca   : > { %v3029_v34 = vadd.f32 %v5991_v53, %v2897_v21  ;;  %v6111_v56 = vpop.f32.mrb[84].mxu0  ;;  %v5031_v59 = vpop.f32.mrb[84].mxu1  ;;  %v3156_v1 = vmax.f32 %v3028_v55, 0.0 }
 0x1cb   : > { %v3159_v16 = vmax.f32 %v3031_v41, 0.0  ;;  %v2453_v11 = vadd.f32 %v5031_v59, %v5913_v63  ;;  %v1989_v19 = vpop.f32.mrb[85].mxu0  ;;  %v2444_v37 = vpop.f32.mrb[85].mxu1 }
 0x1cc   : > { %v3157_v18 = vmax.f32 %v3029_v34, 0.0  ;;  %v2445_v7 = vadd.f32 %v2444_v37, %v5899_v35  ;;  %v6115_v45 = vpop.f32.mrb[86].mxu0  ;;  %v5032_v13 = vpop.f32.mrb[86].mxu1 }
 0x1cd   : > { %v4604_v24 = vpack.c.bf16 %v3159_v16, %v3158_v23  ;;  %v2902_v10 = vmul.f32 %v5986_v29, %v2453_v11  ;;  %v2456_v31 = vadd.f32 %v5032_v13, %v5919_v17  ;;  %v1992_v30 = vpop.f32.mrb[87].mxu0  ;;  %v2447_v43 = vpop.f32.mrb[87].mxu1 }
 0x1ce   : > { %v4599_v49 = vpack.c.bf16 %v3157_v18, %v3156_v1  ;;  %v2900_v63 = vmul.f32 %v5986_v29, %v2445_v7  ;;  %v2448_v33 = vadd.f32 %v2447_v43, %v5905_v47 }
 0x1cf   : > { %4884 = vst [vmem:[%s6022_s12 + $0x48] sm:$0xff] %v4604_v24   ;;  %v3034_v0 = vadd.f32 %v5991_v53, %v2902_v10  ;;  %v2903_v35 = vmul.f32 %v5986_v29, %v2456_v31 }
 0x1d0   : > { %4883 = vst [vmem:[%s6022_s12 + $0x40] sm:$0xff] %v4599_v49   ;;  %v3032_v9 = vadd.f32 %v5991_v53, %v2900_v63  ;;  %v2901_v36 = vmul.f32 %v5986_v29, %v2448_v33 }
 0x1d1   : > { %v3035_v5 = vadd.f32 %v5991_v53, %v2903_v35  ;;  %v3162_v55 = vmax.f32 %v3034_v0, 0.0 }
 0x1d2   : > { %v3033_v17 = vadd.f32 %v5991_v53, %v2901_v36  ;;  %v6129_v15 = vpop.f32.mrb[88].mxu0  ;;  %v5035_v51 = vpop.f32.mrb[88].mxu1  ;;  %v3160_v59 = vmax.f32 %v3032_v9, 0.0 }
 0x1d3   : > { %v3163_v21 = vmax.f32 %v3035_v5, 0.0  ;;  %v2469_v47 = vadd.f32 %v5035_v51, %v5941_v27  ;;  %v1997_v41 = vpop.f32.mrb[89].mxu0  ;;  %v2460_v34 = vpop.f32.mrb[89].mxu1 }
 0x1d4   : > { %v3161_v23 = vmax.f32 %v3033_v17, 0.0  ;;  %v2461_v16 = vadd.f32 %v2460_v34, %v5927_v39  ;;  %v6133_v11 = vpop.f32.mrb[90].mxu0  ;;  %v5036_v19 = vpop.f32.mrb[90].mxu1 }
 0x1d5   : > { %v4614_v37 = vpack.c.bf16 %v3163_v21, %v3162_v55  ;;  %v2906_v1 = vmul.f32 %v5986_v29, %v2469_v47  ;;  %v2472_v18 = vadd.f32 %v5036_v19, %v5947_v58  ;;  %v2000_v7 = vpop.f32.mrb[91].mxu0  ;;  %v2463_v13 = vpop.f32.mrb[91].mxu1 }
 0x1d6   : > { %v4609_v24 = vpack.c.bf16 %v3161_v23, %v3160_v59  ;;  %v2904_v27 = vmul.f32 %v5986_v29, %v2461_v16  ;;  %v2464_v10 = vadd.f32 %v2463_v13, %v5933_v57 }
 0x1d7   : > { %4886 = vst [vmem:[%s6022_s12 + $0x58] sm:$0xff] %v4614_v37   ;;  %v3038_v31 = vadd.f32 %v5991_v53, %v2906_v1  ;;  %v2907_v39 = vmul.f32 %v5986_v29, %v2472_v18 }
 0x1d8   : > { %4885 = vst [vmem:[%s6022_s12 + $0x50] sm:$0xff] %v4609_v24   ;;  %v3036_v30 = vadd.f32 %v5991_v53, %v2904_v27  ;;  %v2905_v43 = vmul.f32 %v5986_v29, %v2464_v10 }
 0x1d9   : > { %v3039_v49 = vadd.f32 %v5991_v53, %v2907_v39  ;;  %v3166_v0 = vmax.f32 %v3038_v31, 0.0 }
 0x1da   : > { %v3037_v58 = vadd.f32 %v5991_v53, %v2905_v43  ;;  %v6147_v63 = vpop.f32.mrb[92].mxu0  ;;  %v5039_v33 = vpop.f32.mrb[92].mxu1  ;;  %v3164_v5 = vmax.f32 %v3036_v30, 0.0 }
 0x1db   : > { %v3167_v35 = vmax.f32 %v3039_v49, 0.0  ;;  %v2485_v57 = vadd.f32 %v5039_v33, %v5969_v4  ;;  %v2005_v9 = vpop.f32.mrb[93].mxu0  ;;  %v2476_v36 = vpop.f32.mrb[93].mxu1 }
 0x1dc   : > { %v3165_v17 = vmax.f32 %v3037_v58, 0.0  ;;  %v2477_v51 = vadd.f32 %v2476_v36, %v5955_v12  ;;  %v6151_v55 = vpop.f32.mrb[94].mxu0  ;;  %v5040_v21 = vpop.f32.mrb[94].mxu1 }
 0x1dd   : > { %v4624_v47 = vpack.c.bf16 %v3167_v35, %v3166_v0  ;;  %v2910_v41 = vmul.f32 %v5986_v29, %v2485_v57  ;;  %v2488_v34 = vadd.f32 %v5040_v21, %v5975_v46  ;;  %v2008_v59 = vpop.f32.mrb[95].mxu0  ;;  %v2479_v23 = vpop.f32.mrb[95].mxu1 }
 0x1de   : > { %v4619_v16 = vpack.c.bf16 %v3165_v17, %v3164_v5  ;;  %v2908_v4 = vmul.f32 %v5986_v29, %v2477_v51  ;;  %v2480_v19 = vadd.f32 %v2479_v23, %v5961_v48 }
 0x1df   : > { %4888 = vst [vmem:[%s6022_s12 + $0x68] sm:$0xff] %v4624_v47   ;;  %v3042_v37 = vadd.f32 %v5991_v53, %v2910_v41  ;;  %v2911_v12 = vmul.f32 %v5986_v29, %v2488_v34 }
 0x1e0   : > { %4887 = vst [vmem:[%s6022_s12 + $0x60] sm:$0xff] %v4619_v16   ;;  %v3040_v1 = vadd.f32 %v5991_v53, %v2908_v4  ;;  %v2909_v18 = vmul.f32 %v5986_v29, %v2480_v19 }
 0x1e1   : > { %v3043_v7 = vadd.f32 %v5991_v53, %v2911_v12  ;;  %v3170_v27 = vmax.f32 %v3042_v37, 0.0 }
 0x1e2   : > { %v3041_v46 = vadd.f32 %v5991_v53, %v2909_v18  ;;  %v6165_v13 = vpop.f32.mrb[96].mxu0  ;;  %v5043_v24 = vpop.f32.mrb[96].mxu1  ;;  %v3168_v30 = vmax.f32 %v3040_v1, 0.0 }
 0x1e3   : > { %v3171_v10 = vmax.f32 %v3043_v7, 0.0  ;;  %v2501_v48 = vadd.f32 %v5043_v24, %v6013_v54  ;;  %v2013_v31 = vpop.f32.mrb[97].mxu0  ;;  %v2492_v39 = vpop.f32.mrb[97].mxu1 }
 0x1e4   : > { %v3169_v43 = vmax.f32 %v3041_v46, 0.0  ;;  %v2493_v49 = vadd.f32 %v2492_v39, %v5988_v22  ;;  %v6169_v58 = vpop.f32.mrb[98].mxu0  ;;  %v5044_v33 = vpop.f32.mrb[98].mxu1 }
 0x1e5   : > { %v4634_v0 = vpack.c.bf16 %v3171_v10, %v3170_v27  ;;  %v2914_v35 = vmul.f32 %v5986_v29, %v2501_v48  ;;  %v2504_v57 = vadd.f32 %v5044_v33, %v6025_v52  ;;  %v2016_v9 = vpop.f32.mrb[99].mxu0  ;;  %v2495_v36 = vpop.f32.mrb[99].mxu1 }
 0x1e6   : > { %v4629_v5 = vpack.c.bf16 %v3169_v43, %v3168_v30  ;;  %v2912_v54 = vmul.f32 %v5986_v29, %v2493_v49  ;;  %v2496_v17 = vadd.f32 %v2495_v36, %v5996_v40 }
 0x1e7   : > { %4890 = vst [vmem:[%s6022_s12 + $0x78] sm:$0xff] %v4634_v0   ;;  %v3046_v51 = vadd.f32 %v5991_v53, %v2914_v35  ;;  %v2915_v22 = vmul.f32 %v5986_v29, %v2504_v57 }
 0x1e8   : > { %4889 = vst [vmem:[%s6022_s12 + $0x70] sm:$0xff] %v4629_v5   ;;  %v3044_v21 = vadd.f32 %v5991_v53, %v2912_v54  ;;  %v2913_v47 = vmul.f32 %v5986_v29, %v2496_v17 }
 0x1e9   : > { %v3047_v41 = vadd.f32 %v5991_v53, %v2915_v22  ;;  %v3174_v23 = vmax.f32 %v3046_v51, 0.0 }
 0x1ea   : > { %v3045_v52 = vadd.f32 %v5991_v53, %v2913_v47  ;;  %v6183_v34 = vpop.f32.mrb[100].mxu0  ;;  %v5047_v59 = vpop.f32.mrb[100].mxu1  ;;  %v3172_v37 = vmax.f32 %v3044_v21, 0.0 }
 0x1eb   : > { %v3175_v16 = vmax.f32 %v3047_v41, 0.0  ;;  %v2517_v40 = vadd.f32 %v5047_v59, %v6066_v3  ;;  %v2021_v4 = vpop.f32.mrb[101].mxu0  ;;  %v2508_v19 = vpop.f32.mrb[101].mxu1 }
 0x1ec   : > { %v3173_v12 = vmax.f32 %v3045_v52, 0.0  ;;  %v2509_v1 = vadd.f32 %v2508_v19, %v6042_v60  ;;  %v6187_v18 = vpop.f32.mrb[102].mxu0  ;;  %v5048_v7 = vpop.f32.mrb[102].mxu1 }
 0x1ed   : > { %v4644_v46 = vpack.c.bf16 %v3175_v16, %v3174_v23  ;;  %v2918_v24 = vmul.f32 %v5986_v29, %v2517_v40  ;;  %v2520_v27 = vadd.f32 %v5048_v7, %v6073_v25  ;;  %v2024_v10 = vpop.f32.mrb[103].mxu0  ;;  %v2511_v48 = vpop.f32.mrb[103].mxu1 }
 0x1ee   : > { %v4639_v31 = vpack.c.bf16 %v3173_v12, %v3172_v37  ;;  %v2916_v3 = vmul.f32 %v5986_v29, %v2509_v1  ;;  %v2512_v39 = vadd.f32 %v2511_v48, %v6049_v42 }
 0x1ef   : > { %4892 = vst [vmem:[%s6022_s12 + $0x88] sm:$0xff] %v4644_v46   ;;  %v3050_v30 = vadd.f32 %v5991_v53, %v2918_v24  ;;  %v2919_v60 = vmul.f32 %v5986_v29, %v2520_v27 }
 0x1f0   : > { %4891 = vst [vmem:[%s6022_s12 + $0x80] sm:$0xff] %v4639_v31   ;;  %v3048_v43 = vadd.f32 %v5991_v53, %v2916_v3  ;;  %v2917_v49 = vmul.f32 %v5986_v29, %v2512_v39 }
 0x1f1   : > { %v3051_v33 = vadd.f32 %v5991_v53, %v2919_v60  ;;  %v3178_v57 = vmax.f32 %v3050_v30, 0.0 }
 0x1f2   : > { %v3049_v25 = vadd.f32 %v5991_v53, %v2917_v49  ;;  %v6201_v0 = vpop.f32.mrb[104].mxu0  ;;  %v5051_v35 = vpop.f32.mrb[104].mxu1  ;;  %v3176_v54 = vmax.f32 %v3048_v43, 0.0 }
 0x1f3   : > { %v3179_v9 = vmax.f32 %v3051_v33, 0.0  ;;  %v2533_v42 = vadd.f32 %v5051_v35, %v6111_v56  ;;  %v2029_v36 = vpop.f32.mrb[105].mxu0  ;;  %v2524_v5 = vpop.f32.mrb[105].mxu1 }
 0x1f4   : > { %v3177_v17 = vmax.f32 %v3049_v25, 0.0  ;;  %v2525_v51 = vadd.f32 %v2524_v5, %v6090_v28  ;;  %v6205_v22 = vpop.f32.mrb[106].mxu0  ;;  %v5052_v21 = vpop.f32.mrb[106].mxu1 }
 0x1f5   : > { %v4654_v47 = vpack.c.bf16 %v3179_v9, %v3178_v57  ;;  %v2922_v41 = vmul.f32 %v5986_v29, %v2533_v42  ;;  %v2536_v52 = vadd.f32 %v5052_v21, %v6115_v45  ;;  %v2032_v59 = vpop.f32.mrb[107].mxu0  ;;  %v2527_v23 = vpop.f32.mrb[107].mxu1 }
 0x1f6   : > { %v4649_v16 = vpack.c.bf16 %v3177_v17, %v3176_v54  ;;  %v2920_v56 = vmul.f32 %v5986_v29, %v2525_v51  ;;  %v2528_v40 = vadd.f32 %v2527_v23, %v6096_v61 }
 0x1f7   : > { %4894 = vst [vmem:[%s6022_s12 + $0x98] sm:$0xff] %v4654_v47   ;;  %v3054_v4 = vadd.f32 %v5991_v53, %v2922_v41  ;;  %v2923_v28 = vmul.f32 %v5986_v29, %v2536_v52 }
 0x1f8   : > { %4893 = vst [vmem:[%s6022_s12 + $0x90] sm:$0xff] %v4649_v16   ;;  %v3052_v19 = vadd.f32 %v5991_v53, %v2920_v56  ;;  %v2921_v37 = vmul.f32 %v5986_v29, %v2528_v40 }
 0x1f9   : > { %v3055_v12 = vadd.f32 %v5991_v53, %v2923_v28  ;;  %v3182_v46 = vmax.f32 %v3054_v4, 0.0 }
 0x1fa   : > { %v3053_v45 = vadd.f32 %v5991_v53, %v2921_v37  ;;  %v2035_v1 = vpop.f32.mrb[108].mxu0  ;;  %v5055_v7 = vpop.f32.mrb[108].mxu1  ;;  %v3180_v48 = vmax.f32 %v3052_v19, 0.0 }
 0x1fb   : > { %v3183_v24 = vmax.f32 %v3055_v12, 0.0  ;;  %v2549_v61 = vadd.f32 %v5055_v7, %v6147_v63  ;;  %v2037_v27 = vpop.f32.mrb[109].mxu0  ;;  %v2540_v10 = vpop.f32.mrb[109].mxu1 }
 0x1fc   : > { %v3181_v31 = vmax.f32 %v3053_v45, 0.0  ;;  %v2541_v3 = vadd.f32 %v2540_v10, %v6129_v15  ;;  %v2038_v39 = vpop.f32.mrb[110].mxu0  ;;  %v5056_v30 = vpop.f32.mrb[110].mxu1 }
 0x1fd   : > { %v4664_v60 = vpack.c.bf16 %v3183_v24, %v3182_v46  ;;  %v2926_v43 = vmul.f32 %v5986_v29, %v2549_v61  ;;  %v2552_v49 = vadd.f32 %v5056_v30, %v6151_v55  ;;  %v2040_v33 = vpop.f32.mrb[111].mxu0  ;;  %v2543_v25 = vpop.f32.mrb[111].mxu1 }
 0x1fe   : > { %v4659_v35 = vpack.c.bf16 %v3181_v31, %v3180_v48  ;;  %v2924_v63 = vmul.f32 %v5986_v29, %v2541_v3  ;;  %v2544_v57 = vadd.f32 %v2543_v25, %v6133_v11 }
 0x1ff   : > { %4896 = vst [vmem:[%s6022_s12 + $0xa8] sm:$0xff] %v4664_v60   ;;  %v3058_v9 = vadd.f32 %v5991_v53, %v2926_v43  ;;  %v2927_v42 = vmul.f32 %v5986_v29, %v2552_v49 }
 0x200   : > { %4895 = vst [vmem:[%s6022_s12 + $0xa0] sm:$0xff] %v4659_v35   ;;  %v3056_v15 = vadd.f32 %v5991_v53, %v2924_v63  ;;  %v2925_v36 = vmul.f32 %v5986_v29, %v2544_v57 }
 0x201   : > { %v3059_v5 = vadd.f32 %v5991_v53, %v2927_v42  ;;  %v3186_v51 = vmax.f32 %v3058_v9, 0.0 }
 0x202   : > { %v3057_v55 = vadd.f32 %v5991_v53, %v2925_v36  ;;  %v6233_v54 = vpop.f32.mrb[112].mxu0  ;;  %v5059_v17 = vpop.f32.mrb[112].mxu1  ;;  %v3184_v52 = vmax.f32 %v3056_v15, 0.0 }
 0x203   : > { %v3187_v21 = vmax.f32 %v3059_v5, 0.0  ;;  %v2565_v11 = vadd.f32 %v5059_v17, %v6183_v34  ;;  %v2045_v47 = vpop.f32.mrb[113].mxu0  ;;  %v2556_v41 = vpop.f32.mrb[113].mxu1 }
 0x204   : > { %v3185_v59 = vmax.f32 %v3057_v55, 0.0  ;;  %v2557_v23 = vadd.f32 %v2556_v41, %v6165_v13  ;;  %v6237_v16 = vpop.f32.mrb[114].mxu0  ;;  %v5060_v56 = vpop.f32.mrb[114].mxu1 }
 0x205   : > { %v4674_v40 = vpack.c.bf16 %v3187_v21, %v3186_v51  ;;  %v2930_v4 = vmul.f32 %v5986_v29, %v2565_v11  ;;  %v2568_v28 = vadd.f32 %v5060_v56, %v6187_v18  ;;  %v2048_v19 = vpop.f32.mrb[115].mxu0  ;;  %v2559_v37 = vpop.f32.mrb[115].mxu1 }
 0x206   : > { %v4669_v12 = vpack.c.bf16 %v3185_v59, %v3184_v52  ;;  %v2928_v34 = vmul.f32 %v5986_v29, %v2557_v23  ;;  %v2560_v45 = vadd.f32 %v2559_v37, %v6169_v58 }
 0x207   : > { %4898 = vst [vmem:[%s6022_s12 + $0xb8] sm:$0xff] %v4674_v40   ;;  %v3062_v7 = vadd.f32 %v5991_v53, %v2930_v4  ;;  %v2931_v13 = vmul.f32 %v5986_v29, %v2568_v28 }
 0x208   : > { %4897 = vst [vmem:[%s6022_s12 + $0xb0] sm:$0xff] %v4669_v12   ;;  %v3060_v46 = vadd.f32 %v5991_v53, %v2928_v34  ;;  %v2929_v24 = vmul.f32 %v5986_v29, %v2560_v45 }
 0x209   : > { %v3063_v61 = vadd.f32 %v5991_v53, %v2931_v13  ;;  %v3190_v48 = vmax.f32 %v3062_v7, 0.0 }
 0x20a   : > { %v3061_v18 = vadd.f32 %v5991_v53, %v2929_v24  ;;  %v2051_v27 = vpop.f32.mrb[116].mxu0  ;;  %v5063_v10 = vpop.f32.mrb[116].mxu1  ;;  %v3188_v60 = vmax.f32 %v3060_v46, 0.0 }
 0x20b   : > { %v3191_v31 = vmax.f32 %v3063_v61, 0.0  ;;  %v2581_v3 = vadd.f32 %v5063_v10, %v2035_v1  ;;  %v2053_v58 = vpop.f32.mrb[117].mxu0  ;;  %v2572_v30 = vpop.f32.mrb[117].mxu1 }
 0x20c   : > { %v3189_v43 = vmax.f32 %v3061_v18, 0.0  ;;  %v2573_v49 = vadd.f32 %v2572_v30, %v6201_v0  ;;  %v2054_v33 = vpop.f32.mrb[118].mxu0  ;;  %v5064_v25 = vpop.f32.mrb[118].mxu1 }
 0x20d   : > { %v4684_v35 = vpack.c.bf16 %v3191_v31, %v3190_v48  ;;  %v2934_v63 = vmul.f32 %v5986_v29, %v2581_v3  ;;  %v2584_v57 = vadd.f32 %v5064_v25, %v2038_v39  ;;  %v2056_v9 = vpop.f32.mrb[119].mxu0  ;;  %v2575_v42 = vpop.f32.mrb[119].mxu1 }
 0x20e   : > { %v4679_v15 = vpack.c.bf16 %v3189_v43, %v3188_v60  ;;  %v2932_v36 = vmul.f32 %v5986_v29, %v2573_v49  ;;  %v2576_v1 = vadd.f32 %v2575_v42, %v6205_v22 }
 0x20f   : > { %4900 = vst [vmem:[%s6022_s12 + $0xc8] sm:$0xff] %v4684_v35   ;;  %v3066_v5 = vadd.f32 %v5991_v53, %v2934_v63  ;;  %v2935_v55 = vmul.f32 %v5986_v29, %v2584_v57 }
 0x210   : > { %4899 = vst [vmem:[%s6022_s12 + $0xc0] sm:$0xff] %v4679_v15   ;;  %v3064_v0 = vadd.f32 %v5991_v53, %v2932_v36  ;;  %v2933_v17 = vmul.f32 %v5986_v29, %v2576_v1 }
 0x211   : > { %v3067_v51 = vadd.f32 %v5991_v53, %v2935_v55  ;;  %v3194_v47 = vmax.f32 %v3066_v5, 0.0 }
 0x212   : > { %v3065_v39 = vadd.f32 %v5991_v53, %v2933_v17  ;;  %v2059_v21 = vpop.f32.mrb[120].mxu0  ;;  %v5067_v11 = vpop.f32.mrb[120].mxu1  ;;  %v3192_v23 = vmax.f32 %v3064_v0, 0.0 }
 0x213   : > { %v3195_v41 = vmax.f32 %v3067_v51, 0.0  ;;  %v2597_v52 = vadd.f32 %v5067_v11, %v2051_v27  ;;  %v2061_v22 = vpop.f32.mrb[121].mxu0  ;;  %v2588_v59 = vpop.f32.mrb[121].mxu1 }
 0x214   : > { %v3193_v56 = vmax.f32 %v3065_v39, 0.0  ;;  %v2589_v40 = vadd.f32 %v2588_v59, %v6233_v54  ;;  %v2062_v4 = vpop.f32.mrb[122].mxu0  ;;  %v5068_v28 = vpop.f32.mrb[122].mxu1 }
 0x215   : > { %v4694_v19 = vpack.c.bf16 %v3195_v41, %v3194_v47  ;;  %v2938_v37 = vmul.f32 %v5986_v29, %v2597_v52  ;;  %v2600_v12 = vadd.f32 %v5068_v28, %v2054_v33  ;;  %v2064_v34 = vpop.f32.mrb[123].mxu0  ;;  %v2591_v45 = vpop.f32.mrb[123].mxu1 }
 0x216   : > { %v4689_v7 = vpack.c.bf16 %v3193_v56, %v3192_v23  ;;  %v2936_v13 = vmul.f32 %v5986_v29, %v2589_v40  ;;  %v2592_v46 = vadd.f32 %v2591_v45, %v6237_v16 }
 0x217   : > { %4902 = vst [vmem:[%s6022_s12 + $0xd8] sm:$0xff] %v4694_v19   ;;  %v3070_v24 = vadd.f32 %v5991_v53, %v2938_v37  ;;  %v2939_v61 = vmul.f32 %v5986_v29, %v2600_v12 }
 0x218   : > { %4901 = vst [vmem:[%s6022_s12 + $0xd0] sm:$0xff] %v4689_v7   ;;  %v3068_v54 = vadd.f32 %v5991_v53, %v2936_v13  ;;  %v2937_v18 = vmul.f32 %v5986_v29, %v2592_v46 }
 0x219   : > { %v3071_v27 = vadd.f32 %v5991_v53, %v2939_v61  ;;  %v3198_v3 = vmax.f32 %v3070_v24, 0.0 }
 0x21a   : > { %v3069_v10 = vadd.f32 %v5991_v53, %v2937_v18  ;;  %v2067_v48 = vpop.f32.mrb[124].mxu0  ;;  %v5071_v31 = vpop.f32.mrb[124].mxu1  ;;  %v3196_v43 = vmax.f32 %v3068_v54, 0.0 }
 0x21b   : > { %v3199_v58 = vmax.f32 %v3071_v27, 0.0  ;;  %v2613_v30 = vadd.f32 %v5071_v31, %v2067_v48  ;;  %v2069_v16 = vpop.f32.mrb[125].mxu0  ;;  %v2604_v60 = vpop.f32.mrb[125].mxu1 }
 0x21c   : > { %v3197_v49 = vmax.f32 %v3069_v10, 0.0  ;;  %v2605_v33 = vadd.f32 %v2604_v60, %v2059_v21  ;;  %v2070_v25 = vpop.f32.mrb[126].mxu0  ;;  %v5072_v35 = vpop.f32.mrb[126].mxu1 }
 0x21d   : > { %v4704_v63 = vpack.c.bf16 %v3199_v58, %v3198_v3  ;;  %v2942_v57 = vmul.f32 %v5986_v29, %v2613_v30  ;;  %v2616_v9 = vadd.f32 %v5072_v35, %v2070_v25  ;;  %v2072_v42 = vpop.f32.mrb[127].mxu0  ;;  %v2607_v15 = vpop.f32.mrb[127].mxu1 }
 0x21e   : > { %v4699_v36 = vpack.c.bf16 %v3197_v49, %v3196_v43  ;;  %v2940_v1 = vmul.f32 %v5986_v29, %v2605_v33  ;;  %v2608_v5 = vadd.f32 %v2607_v15, %v2062_v4 }
 0x21f   : > { %4904 = vst [vmem:[%s6022_s12 + $0xe8] sm:$0xff] %v4704_v63   ;;  %v3074_v55 = vadd.f32 %v5991_v53, %v2942_v57  ;;  %v2943_v0 = vmul.f32 %v5986_v29, %v2616_v9 }
 0x220   : > { %4903 = vst [vmem:[%s6022_s12 + $0xe0] sm:$0xff] %v4699_v36   ;;  %v3072_v17 = vadd.f32 %v5991_v53, %v2940_v1  ;;  %v2941_v51 = vmul.f32 %v5986_v29, %v2608_v5 }
 0x221   : > { %v3075_v39 = vadd.f32 %v5991_v53, %v2943_v0  ;;  %v3202_v41 = vmax.f32 %v3074_v55, 0.0 }
 0x222   : > { %v3073_v21 = vadd.f32 %v5991_v53, %v2941_v51  ;;  %v2075_v11 = vpop.f32.mrb[128].mxu0  ;;  %v5075_v47 = vpop.f32.mrb[128].mxu1  ;;  %v3200_v23 = vmax.f32 %v3072_v17, 0.0 }
 0x223   : > { %v3203_v52 = vmax.f32 %v3075_v39, 0.0  ;;  %v2077_v22 = vpop.f32.mrb[129].mxu0  ;;  %v2620_v59 = vpop.f32.mrb[129].mxu1 }
 0x224   : > { %v3201_v56 = vmax.f32 %v3073_v21, 0.0  ;;  %v2621_v40 = vadd.f32 %v2620_v59, %v2075_v11  ;;  %v2078_v4 = vpop.f32.mrb[130].mxu0  ;;  %v5076_v28 = vpop.f32.mrb[130].mxu1 }
 0x225   : > { %v4714_v19 = vpack.c.bf16 %v3203_v52, %v3202_v41  ;;  %v2080_v37 = vpop.f32.mrb[131].mxu0  ;;  %v2623_v12 = vpop.f32.mrb[131].mxu1 }
 0x226   : > { %v4709_v34 = vpack.c.bf16 %v3201_v56, %v3200_v23  ;;  %v2944_v45 = vmul.f32 %v5986_v29, %v2621_v40  ;;  %v2624_v7 = vadd.f32 %v2623_v12, %v2078_v4 }
 0x227   : > { %4906 = vst [vmem:[%s6022_s12 + $0xf8] sm:$0xff] %v4714_v19  }
 0x228   : > { %4905 = vst [vmem:[%s6022_s12 + $0xf0] sm:$0xff] %v4709_v34   ;;  %v3076_v13 = vadd.f32 %v5991_v53, %v2944_v45  ;;  %v2945_v46 = vmul.f32 %v5986_v29, %v2624_v7 }
 0x22a   : > { %v3077_v24 = vadd.f32 %v5991_v53, %v2945_v46  ;;  %v2083_v61 = vpop.f32.mrb[132].mxu0  ;;  %v5079_v54 = vpop.f32.mrb[132].mxu1  ;;  %v3204_v48 = vmax.f32 %v3076_v13, 0.0 }
 0x22b   : > { %v2629_v18 = vadd.f32 %v5075_v47, %v2083_v61  ;;  %v2085_v27 = vpop.f32.mrb[133].mxu0  ;;  %v2636_v10 = vpop.f32.mrb[133].mxu1 }
 0x22c   : > { %v3205_v31 = vmax.f32 %v3077_v24, 0.0  ;;  %v2086_v3 = vpop.f32.mrb[134].mxu0  ;;  %v5080_v58 = vpop.f32.mrb[134].mxu1 }
 0x22d   : > { %v2946_v30 = vmul.f32 %v5986_v29, %v2629_v18  ;;  %v2632_v16 = vadd.f32 %v5076_v28, %v2086_v3  ;;  %v2088_v60 = vpop.f32.mrb[135].mxu0  ;;  %v2639_v43 = vpop.f32.mrb[135].mxu1 }
 0x22e   : > { %v4719_v49 = vpack.c.bf16 %v3205_v31, %v3204_v48 }
 0x22f   : > { %v3078_v33 = vadd.f32 %v5991_v53, %v2946_v30  ;;  %v2947_v25 = vmul.f32 %v5986_v29, %v2632_v16 }
 0x230   : > { %4907 = vst [vmem:[%s6022_s12 + $0x100] sm:$0xff] %v4719_v49  }
 0x231   : > { %v3079_v35 = vadd.f32 %v5991_v53, %v2947_v25  ;;  %v3206_v9 = vmax.f32 %v3078_v33, 0.0 }
 0x232   : > { %v2091_v63 = vpop.f32.mrb[136].mxu0  ;;  %v5083_v57 = vpop.f32.mrb[136].mxu1 }
 0x233   : > { %v3207_v42 = vmax.f32 %v3079_v35, 0.0  ;;  %v2637_v15 = vadd.f32 %v2636_v10, %v2091_v63  ;;  %v2093_v36 = vpop.f32.mrb[137].mxu0  ;;  %v2652_v1 = vpop.f32.mrb[137].mxu1 }
 0x234   : > { %v2094_v5 = vpop.f32.mrb[138].mxu0  ;;  %v5084_v55 = vpop.f32.mrb[138].mxu1 }
 0x235   : > { %v4724_v0 = vpack.c.bf16 %v3207_v42, %v3206_v9  ;;  %v2948_v17 = vmul.f32 %v5986_v29, %v2637_v15  ;;  %v2640_v51 = vadd.f32 %v2639_v43, %v2094_v5  ;;  %v2096_v39 = vpop.f32.mrb[139].mxu0  ;;  %v2655_v21 = vpop.f32.mrb[139].mxu1 }
 0x237   : > { %4908 = vst [vmem:[%s6022_s12 + $0x108] sm:$0xff] %v4724_v0   ;;  %v3080_v11 = vadd.f32 %v5991_v53, %v2948_v17  ;;  %v2949_v47 = vmul.f32 %v5986_v29, %v2640_v51 }
 0x239   : > { %v3081_v41 = vadd.f32 %v5991_v53, %v2949_v47  ;;  %v3208_v59 = vmax.f32 %v3080_v11, 0.0 }
 0x23a   : > { %v2099_v52 = vpop.f32.mrb[140].mxu0  ;;  %v6301_v22 = vpop.f32.mrb[140].mxu1 }
 0x23b   : > { %v3209_v23 = vmax.f32 %v3081_v41, 0.0  ;;  %v2645_v56 = vadd.f32 %v5079_v54, %v2099_v52  ;;  %v2101_v40 = vpop.f32.mrb[141].mxu0  ;;  %v2668_v4 = vpop.f32.mrb[141].mxu1 }
 0x23c   : > { %v2102_v28 = vpop.f32.mrb[142].mxu0  ;;  %v6303_v19 = vpop.f32.mrb[142].mxu1 }
 0x23d   : > { %v4729_v37 = vpack.c.bf16 %v3209_v23, %v3208_v59  ;;  %v2950_v12 = vmul.f32 %v5986_v29, %v2645_v56  ;;  %v2648_v34 = vadd.f32 %v5080_v58, %v2102_v28  ;;  %v2104_v45 = vpop.f32.mrb[143].mxu0  ;;  %v2671_v7 = vpop.f32.mrb[143].mxu1 }
 0x23f   : > { %4909 = vst [vmem:[%s6022_s12 + $0x110] sm:$0xff] %v4729_v37   ;;  %v3082_v13 = vadd.f32 %v5991_v53, %v2950_v12  ;;  %v2951_v46 = vmul.f32 %v5986_v29, %v2648_v34 }
 0x241   : > { %v3083_v24 = vadd.f32 %v5991_v53, %v2951_v46  ;;  %v3210_v18 = vmax.f32 %v3082_v13, 0.0 }
 0x242   : > { %v2107_v61 = vpop.f32.mrb[144].mxu0  ;;  %v6310_v54 = vpop.f32.mrb[144].mxu1 }
 0x243   : > { %v3211_v27 = vmax.f32 %v3083_v24, 0.0  ;;  %v2653_v10 = vadd.f32 %v2652_v1, %v2107_v61  ;;  %v2109_v48 = vpop.f32.mrb[145].mxu0  ;;  %v6312_v31 = vpop.f32.mrb[145].mxu1 }
 0x244   : > { %v2110_v3 = vpop.f32.mrb[146].mxu0  ;;  %v6314_v58 = vpop.f32.mrb[146].mxu1 }
 0x245   : > { %v4734_v30 = vpack.c.bf16 %v3211_v27, %v3210_v18  ;;  %v2952_v16 = vmul.f32 %v5986_v29, %v2653_v10  ;;  %v2656_v60 = vadd.f32 %v2655_v21, %v2110_v3  ;;  %v2112_v43 = vpop.f32.mrb[147].mxu0  ;;  %v6317_v49 = vpop.f32.mrb[147].mxu1 }
 0x247   : > { %4910 = vst [vmem:[%s6022_s12 + $0x118] sm:$0xff] %v4734_v30   ;;  %v3084_v33 = vadd.f32 %v5991_v53, %v2952_v16  ;;  %v2953_v25 = vmul.f32 %v5986_v29, %v2656_v60 }
 0x249   : > { %v3085_v35 = vadd.f32 %v5991_v53, %v2953_v25  ;;  %v3212_v42 = vmax.f32 %v3084_v33, 0.0 }
 0x24a   : > { %v2115_v63 = vpop.f32.mrb[148].mxu0  ;;  %v6323_v9 = vpop.f32.mrb[148].mxu1 }
 0x24b   : > { %v3213_v15 = vmax.f32 %v3085_v35, 0.0  ;;  %v2661_v36 = vadd.f32 %v5083_v57, %v2115_v63  ;;  %v2117_v1 = vpop.f32.mrb[149].mxu0  ;;  %v6325_v5 = vpop.f32.mrb[149].mxu1 }
 0x24c   : > { %v2118_v0 = vpop.f32.mrb[150].mxu0  ;;  %v6327_v17 = vpop.f32.mrb[150].mxu1 }
 0x24d   : > { %v4739_v51 = vpack.c.bf16 %v3213_v15, %v3212_v42  ;;  %v2954_v39 = vmul.f32 %v5986_v29, %v2661_v36  ;;  %v2664_v21 = vadd.f32 %v5084_v55, %v2118_v0  ;;  %v2120_v11 = vpop.f32.mrb[151].mxu0  ;;  %v6330_v47 = vpop.f32.mrb[151].mxu1 }
 0x24f   : > { %4911 = vst [vmem:[%s6022_s12 + $0x120] sm:$0xff] %v4739_v51   ;;  %v3086_v41 = vadd.f32 %v5991_v53, %v2954_v39  ;;  %v2955_v52 = vmul.f32 %v5986_v29, %v2664_v21 }
 0x251   : > { %v3087_v57 = vadd.f32 %v5991_v53, %v2955_v52  ;;  %v3214_v56 = vmax.f32 %v3086_v41, 0.0 }
 0x252   : > { %v2123_v59 = vpop.f32.mrb[152].mxu0  ;;  %v6336_v23 = vpop.f32.mrb[152].mxu1 }
 0x253   : > { %v3215_v40 = vmax.f32 %v3087_v57, 0.0  ;;  %v2669_v28 = vadd.f32 %v2668_v4, %v2123_v59  ;;  %v2125_v37 = vpop.f32.mrb[153].mxu0  ;;  %v6338_v12 = vpop.f32.mrb[153].mxu1 }
 0x254   : > { %v2126_v55 = vpop.f32.mrb[154].mxu0  ;;  %v6340_v34 = vpop.f32.mrb[154].mxu1 }
 0x255   : > { %v4744_v45 = vpack.c.bf16 %v3215_v40, %v3214_v56  ;;  %v2956_v13 = vmul.f32 %v5986_v29, %v2669_v28  ;;  %v2672_v46 = vadd.f32 %v2671_v7, %v2126_v55  ;;  %v2128_v24 = vpop.f32.mrb[155].mxu0  ;;  %v6343_v61 = vpop.f32.mrb[155].mxu1 }
 0x257   : > { %4912 = vst [vmem:[%s6022_s12 + $0x128] sm:$0xff] %v4744_v45   ;;  %v3088_v18 = vadd.f32 %v5991_v53, %v2956_v13  ;;  %v2957_v27 = vmul.f32 %v5986_v29, %v2672_v46 }
 0x259   : > { %v3089_v4 = vadd.f32 %v5991_v53, %v2957_v27  ;;  %v3216_v3 = vmax.f32 %v3088_v18, 0.0 }
 0x25a   : > { %v2131_v10 = vpop.f32.mrb[156].mxu0  ;;  %v6349_v48 = vpop.f32.mrb[156].mxu1 }
 0x25b   : > { %v3217_v30 = vmax.f32 %v3089_v4, 0.0  ;;  %v2677_v16 = vadd.f32 %v6301_v22, %v2131_v10  ;;  %v2133_v60 = vpop.f32.mrb[157].mxu0  ;;  %v6352_v7 = vpop.f32.mrb[157].mxu1 }
 0x25c   : > { %v2134_v43 = vpop.f32.mrb[158].mxu0  ;;  %v6354_v33 = vpop.f32.mrb[158].mxu1 }
 0x25d   : > { %v4749_v25 = vpack.c.bf16 %v3217_v30, %v3216_v3  ;;  %v2958_v35 = vmul.f32 %v5986_v29, %v2677_v16  ;;  %v2680_v63 = vadd.f32 %v6303_v19, %v2134_v43  ;;  %v2136_v42 = vpop.f32.mrb[159].mxu0  ;;  %v6358_v15 = vpop.f32.mrb[159].mxu1 }
 0x25f   : > { %4913 = vst [vmem:[%s6022_s12 + $0x130] sm:$0xff] %v4749_v25   ;;  %v3090_v36 = vadd.f32 %v5991_v53, %v2958_v35  ;;  %v2959_v1 = vmul.f32 %v5986_v29, %v2680_v63 }
 0x261   : > { %v3091_v22 = vadd.f32 %v5991_v53, %v2959_v1  ;;  %v3218_v39 = vmax.f32 %v3090_v36, 0.0 }
 0x262   : > { %v2139_v0 = vpop.f32.mrb[160].mxu0  ;;  %v5107_v51 = vpop.f32.mrb[160].mxu1 }
 0x263   : > { %v3219_v21 = vmax.f32 %v3091_v22, 0.0  ;;  %v2685_v11 = vadd.f32 %v6312_v31, %v2139_v0  ;;  %v2757_v41 = vadd.f32 %v5107_v51, %v5775_v14  ;;  %v2141_v19 = vpop.f32.mrb[161].mxu0  ;;  %v2748_v52 = vpop.f32.mrb[161].mxu1 }
 0x264   : > { %v2749_v57 = vadd.f32 %v2748_v52, %v5761_v2  ;;  %v2142_v59 = vpop.f32.mrb[162].mxu0  ;;  %v5108_v56 = vpop.f32.mrb[162].mxu1 }
 0x265   : > { %v4754_v40 = vpack.c.bf16 %v3219_v21, %v3218_v39  ;;  %v2960_v28 = vmul.f32 %v5986_v29, %v2685_v11  ;;  %v2978_v37 = vmul.f32 %v5986_v29, %v2757_v41  ;;  %v2688_v55 = vadd.f32 %v6317_v49, %v2142_v59  ;;  %v2144_v45 = vpop.f32.mrb[163].mxu0  ;;  %v2751_v13 = vpop.f32.mrb[163].mxu1 }
 0x266   : > { %v2976_v31 = vmul.f32 %v5986_v29, %v2749_v57  ;;  %v2760_v46 = vadd.f32 %v5108_v56, %v5781_v20  ;;  %v2752_v14 = vadd.f32 %v2751_v13, %v5767_v8 }
 0x267   : > { %4914 = vst [vmem:[%s6022_s12 + $0x138] sm:$0xff] %v4754_v40   ;;  %v3092_v2 = vadd.f32 %v5991_v53, %v2960_v28  ;;  %v3110_v24 = vadd.f32 %v5991_v53, %v2978_v37  ;;  %v2961_v18 = vmul.f32 %v5986_v29, %v2688_v55 }
 0x268   : > { %v3108_v27 = vadd.f32 %v5991_v53, %v2976_v31  ;;  %v2979_v4 = vmul.f32 %v5986_v29, %v2760_v46  ;;  %v2977_v49 = vmul.f32 %v5986_v29, %v2752_v14 }
 0x269   : > { %v3093_v10 = vadd.f32 %v5991_v53, %v2961_v18  ;;  %v3220_v3 = vmax.f32 %v3092_v2, 0.0  ;;  %v3238_v60 = vmax.f32 %v3110_v24, 0.0 }
 0x26a   : > { %v3111_v20 = vadd.f32 %v5991_v53, %v2979_v4  ;;  %v3109_v8 = vadd.f32 %v5991_v53, %v2977_v49  ;;  %v2147_v30 = vpop.f32.mrb[164].mxu0  ;;  %v5111_v16 = vpop.f32.mrb[164].mxu1  ;;  %v3236_v36 = vmax.f32 %v3108_v27, 0.0 }
 0x26b   : > { %v3221_v43 = vmax.f32 %v3093_v10, 0.0  ;;  %v2693_v25 = vadd.f32 %v6310_v54, %v2147_v30  ;;  %v2773_v35 = vadd.f32 %v5111_v16, %v5803_v38  ;;  %v2149_v63 = vpop.f32.mrb[165].mxu0  ;;  %v2764_v42 = vpop.f32.mrb[165].mxu1 }
 0x26c   : > { %v3239_v1 = vmax.f32 %v3111_v20, 0.0  ;;  %v3237_v22 = vmax.f32 %v3109_v8, 0.0  ;;  %v2765_v0 = vadd.f32 %v2764_v42, %v5789_v26  ;;  %v2150_v51 = vpop.f32.mrb[166].mxu0  ;;  %v5112_v39 = vpop.f32.mrb[166].mxu1 }
 0x26d   : > { %v4759_v21 = vpack.c.bf16 %v3221_v43, %v3220_v3  ;;  %v2962_v11 = vmul.f32 %v5986_v29, %v2693_v25  ;;  %v2982_v41 = vmul.f32 %v5986_v29, %v2773_v35  ;;  %v2696_v54 = vadd.f32 %v6314_v58, %v2150_v51  ;;  %v2152_v38 = vpop.f32.mrb[167].mxu0  ;;  %v2767_v19 = vpop.f32.mrb[167].mxu1 }
 0x26e   : > { %v4804_v52 = vpack.c.bf16 %v3239_v1, %v3238_v60  ;;  %v4799_v57 = vpack.c.bf16 %v3237_v22, %v3236_v36  ;;  %v2980_v59 = vmul.f32 %v5986_v29, %v2765_v0  ;;  %v2776_v56 = vadd.f32 %v5112_v39, %v5809_v44  ;;  %v6567_v0 = vld [vmem:[#allocation2_spill] sm:$0xff] }
 0x26f   : > { %4915 = vst [vmem:[%s6022_s12 + $0x140] sm:$0xff] %v4759_v21   ;;  %v3094_v26 = vadd.f32 %v5991_v53, %v2962_v11  ;;  %v2963_v40 = vmul.f32 %v5986_v29, %v2696_v54  ;;  %v2768_v28 = vadd.f32 %v2767_v19, %v5795_v32  ;;  %v3114_v37 = vadd.f32 %v5991_v53, %v2982_v41 }
 0x270   : > { %4924 = vst [vmem:[%s6022_s12 + $0x188] sm:$0xff] %v4804_v52   ;;  %4923 = vst [vmem:[%s6022_s12 + $0x180] sm:$0xff] %v4799_v57   ;;  %v3112_v58 = vadd.f32 %v5991_v53, %v2980_v59  ;;  %v2983_v55 = vmul.f32 %v5986_v29, %v2776_v56  ;;  %v6568_v56 = vld [vmem:[#allocation5_spill] sm:$0xff] }
 0x271   : > { %v3095_v45 = vadd.f32 %v5991_v53, %v2963_v40  ;;  %v2981_v13 = vmul.f32 %v5986_v29, %v2768_v28  ;;  %v3222_v44 = vmax.f32 %v3094_v26, 0.0  ;;  %v3242_v49 = vmax.f32 %v3114_v37, 0.0 }
 0x272   : > { %v3115_v31 = vadd.f32 %v5991_v53, %v2983_v55  ;;  %v2155_v46 = vpop.f32.mrb[168].mxu0  ;;  %v5115_v14 = vpop.f32.mrb[168].mxu1  ;;  %v3240_v10 = vmax.f32 %v3112_v58, 0.0 }
 0x273   : > { %v3223_v2 = vmax.f32 %v3095_v45, 0.0  ;;  %v3113_v32 = vadd.f32 %v5991_v53, %v2981_v13  ;;  %v2701_v24 = vadd.f32 %v6325_v5, %v2155_v46  ;;  %v2789_v18 = vadd.f32 %v5115_v14, %v5831_v62  ;;  %v2157_v27 = vpop.f32.mrb[169].mxu0  ;;  %v2780_v4 = vpop.f32.mrb[169].mxu1  ;;  %v6569_v45 = vld [vmem:[#allocation3_spill] sm:$0xff] }
 0x274   : > { %v3243_v3 = vmax.f32 %v3115_v31, 0.0  ;;  %v2781_v20 = vadd.f32 %v2780_v4, %v5817_v50  ;;  %v2158_v8 = vpop.f32.mrb[170].mxu0  ;;  %v5116_v30 = vpop.f32.mrb[170].mxu1 }
 0x275   : > { %v4764_v16 = vpack.c.bf16 %v3223_v2, %v3222_v44  ;;  %v3241_v60 = vmax.f32 %v3113_v32, 0.0  ;;  %v2964_v43 = vmul.f32 %v5986_v29, %v2701_v24  ;;  %v2986_v25 = vmul.f32 %v5986_v29, %v2789_v18  ;;  %v2160_v5 = vpop.f32.mrb[171].mxu0  ;;  %v2783_v62 = vpop.f32.mrb[171].mxu1 }
 0x276   : > { %v4814_v35 = vpack.c.bf16 %v3243_v3, %v3242_v49  ;;  %v2984_v63 = vmul.f32 %v5986_v29, %v2781_v20  ;;  %v2704_v42 = vadd.f32 %v6330_v47, %v2158_v8  ;;  %v2792_v36 = vadd.f32 %v5116_v30, %v5837_v6  ;;  %v6570_v49 = vld [vmem:[#allocation6_spill] sm:$0xff] }
 0x277   : > { %4916 = vst [vmem:[%s6022_s12 + $0x148] sm:$0xff] %v4764_v16   ;;  %v4809_v50 = vpack.c.bf16 %v3241_v60, %v3240_v10  ;;  %v3096_v1 = vadd.f32 %v5991_v53, %v2964_v43  ;;  %v3118_v22 = vadd.f32 %v5991_v53, %v2986_v25  ;;  %v2784_v51 = vadd.f32 %v2783_v62, %v6567_v0  ;;  %v6571_v60 = vld [vmem:[#allocation4_spill] sm:$0xff] }
 0x278   : > { %4926 = vst [vmem:[%s6022_s12 + $0x198] sm:$0xff] %v4814_v35   ;;  %v3116_v39 = vadd.f32 %v5991_v53, %v2984_v63  ;;  %v2965_v21 = vmul.f32 %v5986_v29, %v2704_v42  ;;  %v2987_v11 = vmul.f32 %v5986_v29, %v2792_v36 }
 0x279   : > { %4925 = vst [vmem:[%s6022_s12 + $0x190] sm:$0xff] %v4809_v50   ;;  %v2985_v47 = vmul.f32 %v5986_v29, %v2784_v51  ;;  %v3224_v41 = vmax.f32 %v3096_v1, 0.0  ;;  %v3246_v52 = vmax.f32 %v3118_v22, 0.0  ;;  %v6572_v22 = vld [vmem:[#allocation9_spill] sm:$0xff] }
 0x27a   : > { %v3097_v6 = vadd.f32 %v5991_v53, %v2965_v21  ;;  %v3119_v54 = vadd.f32 %v5991_v53, %v2987_v11  ;;  %v2163_v38 = vpop.f32.mrb[172].mxu0  ;;  %v5119_v19 = vpop.f32.mrb[172].mxu1  ;;  %v3244_v37 = vmax.f32 %v3116_v39, 0.0 }
 0x27b   : > { %v3117_v57 = vadd.f32 %v5991_v53, %v2985_v47  ;;  %v2709_v59 = vadd.f32 %v6323_v9, %v2163_v38  ;;  %v2805_v26 = vadd.f32 %v5119_v19, %v6568_v56  ;;  %v2165_v40 = vpop.f32.mrb[173].mxu0  ;;  %v2796_v28 = vpop.f32.mrb[173].mxu1 }
 0x27c   : > { %v3225_v58 = vmax.f32 %v3097_v6, 0.0  ;;  %v3247_v55 = vmax.f32 %v3119_v54, 0.0  ;;  %v2797_v13 = vadd.f32 %v2796_v28, %v6569_v45  ;;  %v2166_v44 = vpop.f32.mrb[174].mxu0  ;;  %v5120_v31 = vpop.f32.mrb[174].mxu1 }
 0x27d   : > { %v3245_v46 = vmax.f32 %v3117_v57, 0.0  ;;  %v2966_v14 = vmul.f32 %v5986_v29, %v2709_v59  ;;  %v2990_v2 = vmul.f32 %v5986_v29, %v2805_v26  ;;  %v2712_v9 = vadd.f32 %v6327_v17, %v2166_v44  ;;  %v2168_v32 = vpop.f32.mrb[175].mxu0  ;;  %v2799_v24 = vpop.f32.mrb[175].mxu1 }
 0x27e   : > { %v4769_v18 = vpack.c.bf16 %v3225_v58, %v3224_v41  ;;  %v4824_v27 = vpack.c.bf16 %v3247_v55, %v3246_v52  ;;  %v2988_v4 = vmul.f32 %v5986_v29, %v2797_v13  ;;  %v2808_v10 = vadd.f32 %v5120_v31, %v6570_v49  ;;  %v6573_v41 = vld [vmem:[#allocation7_spill] sm:$0xff]  ;;  %v6575_v13 = vld [vmem:[#allocation8_spill] sm:$0xff] }
 0x27f   : > { %v4819_v3 = vpack.c.bf16 %v3245_v46, %v3244_v37  ;;  %v3098_v20 = vadd.f32 %v5991_v53, %v2966_v14  ;;  %v3122_v8 = vadd.f32 %v5991_v53, %v2990_v2  ;;  %v2967_v30 = vmul.f32 %v5986_v29, %v2712_v9  ;;  %v6574_v37 = vld [vmem:[#allocation10_spill] sm:$0xff] }
 0x280   : > { %4917 = vst [vmem:[%s6022_s12 + $0x150] sm:$0xff] %v4769_v18   ;;  %4928 = vst [vmem:[%s6022_s12 + $0x1a8] sm:$0xff] %v4824_v27   ;;  %v3120_v17 = vadd.f32 %v5991_v53, %v2988_v4  ;;  %v2991_v16 = vmul.f32 %v5986_v29, %v2808_v10  ;;  %v2800_v43 = vadd.f32 %v2799_v24, %v6571_v60 }
 0x281   : > { %4927 = vst [vmem:[%s6022_s12 + $0x1a0] sm:$0xff] %v4819_v3   ;;  %v3099_v25 = vadd.f32 %v5991_v53, %v2967_v30  ;;  %v3226_v5 = vmax.f32 %v3098_v20, 0.0  ;;  %v3250_v36 = vmax.f32 %v3122_v8, 0.0  ;;  %v6576_v3 = vld [vmem:[#allocation13_spill] sm:$0xff] }
 0x282   : > { %v3123_v62 = vadd.f32 %v5991_v53, %v2991_v16  ;;  %v2989_v35 = vmul.f32 %v5986_v29, %v2800_v43  ;;  %v2171_v63 = vpop.f32.mrb[176].mxu0  ;;  %v5123_v42 = vpop.f32.mrb[176].mxu1  ;;  %v3248_v21 = vmax.f32 %v3120_v17, 0.0  ;;  %v6577_v43 = vld [vmem:[#allocation11_spill] sm:$0xff] }
 0x283   : > { %v3227_v50 = vmax.f32 %v3099_v25, 0.0  ;;  %v2717_v1 = vadd.f32 %v6338_v12, %v2171_v63  ;;  %v2821_v0 = vadd.f32 %v5123_v42, %v6572_v22  ;;  %v2173_v51 = vpop.f32.mrb[177].mxu0  ;;  %v2812_v39 = vpop.f32.mrb[177].mxu1 }
 0x284   : > { %v3251_v11 = vmax.f32 %v3123_v62, 0.0  ;;  %v3121_v47 = vadd.f32 %v5991_v53, %v2989_v35  ;;  %v2813_v6 = vadd.f32 %v2812_v39, %v6573_v41  ;;  %v2174_v54 = vpop.f32.mrb[178].mxu0  ;;  %v5124_v38 = vpop.f32.mrb[178].mxu1  ;;  %v6578_v51 = vld [vmem:[#allocation14_spill] sm:$0xff]  ;;  %v6579_v41 = vld [vmem:[#allocation12_spill] sm:$0xff] }
 0x285   : > { %v4774_v19 = vpack.c.bf16 %v3227_v50, %v3226_v5  ;;  %v2968_v52 = vmul.f32 %v5986_v29, %v2717_v1  ;;  %v2994_v57 = vmul.f32 %v5986_v29, %v2821_v0  ;;  %v2720_v12 = vadd.f32 %v6343_v61, %v2174_v54  ;;  %v2176_v59 = vpop.f32.mrb[179].mxu0  ;;  %v2815_v56 = vpop.f32.mrb[179].mxu1 }
 0x286   : > { %v4834_v26 = vpack.c.bf16 %v3251_v11, %v3250_v36  ;;  %v3249_v40 = vmax.f32 %v3121_v47, 0.0  ;;  %v2992_v28 = vmul.f32 %v5986_v29, %v2813_v6  ;;  %v2824_v58 = vadd.f32 %v5124_v38, %v6574_v37  ;;  %v6580_v37 = vld [vmem:[#allocation17_spill] sm:$0xff] }
 0x287   : > { %4918 = vst [vmem:[%s6022_s12 + $0x158] sm:$0xff] %v4774_v19   ;;  %v3100_v55 = vadd.f32 %v5991_v53, %v2968_v52  ;;  %v2969_v45 = vmul.f32 %v5986_v29, %v2720_v12  ;;  %v2816_v44 = vadd.f32 %v2815_v56, %v6575_v13  ;;  %v3126_v61 = vadd.f32 %v5991_v53, %v2994_v57 }
 0x288   : > { %4930 = vst [vmem:[%s6022_s12 + $0x1b8] sm:$0xff] %v4834_v26   ;;  %v4829_v31 = vpack.c.bf16 %v3249_v40, %v3248_v21  ;;  %v3124_v46 = vadd.f32 %v5991_v53, %v2992_v28  ;;  %v2995_v14 = vmul.f32 %v5986_v29, %v2824_v58 }
 0x289   : > { %v3101_v2 = vadd.f32 %v5991_v53, %v2969_v45  ;;  %v2993_v9 = vmul.f32 %v5986_v29, %v2816_v44  ;;  %v3228_v32 = vmax.f32 %v3100_v55, 0.0  ;;  %v3254_v17 = vmax.f32 %v3126_v61, 0.0  ;;  %v6581_v61 = vld [vmem:[#allocation15_spill] sm:$0xff] }
 0x28a   : > { %4929 = vst [vmem:[%s6022_s12 + $0x1b0] sm:$0xff] %v4829_v31   ;;  %v3127_v24 = vadd.f32 %v5991_v53, %v2995_v14  ;;  %v2179_v18 = vpop.f32.mrb[180].mxu0  ;;  %v5127_v27 = vpop.f32.mrb[180].mxu1  ;;  %v3252_v16 = vmax.f32 %v3124_v46, 0.0 }
 0x28b   : > { %v3229_v4 = vmax.f32 %v3101_v2, 0.0  ;;  %v3125_v49 = vadd.f32 %v5991_v53, %v2993_v9  ;;  %v2725_v10 = vadd.f32 %v6336_v23, %v2179_v18  ;;  %v2837_v20 = vadd.f32 %v5127_v27, %v6576_v3  ;;  %v2181_v8 = vpop.f32.mrb[181].mxu0  ;;  %v2828_v30 = vpop.f32.mrb[181].mxu1  ;;  %v6582_v3 = vld [vmem:[#allocation18_spill] sm:$0xff] }
 0x28c   : > { %v3255_v60 = vmax.f32 %v3127_v24, 0.0  ;;  %v2829_v25 = vadd.f32 %v2828_v30, %v6577_v43  ;;  %v2182_v5 = vpop.f32.mrb[182].mxu0  ;;  %v5128_v62 = vpop.f32.mrb[182].mxu1  ;;  %v6583_v43 = vld [vmem:[#allocation16_spill] sm:$0xff] }
 0x28d   : > { %v4779_v35 = vpack.c.bf16 %v3229_v4, %v3228_v32  ;;  %v3253_v63 = vmax.f32 %v3125_v49, 0.0  ;;  %v2970_v42 = vmul.f32 %v5986_v29, %v2725_v10  ;;  %v2998_v36 = vmul.f32 %v5986_v29, %v2837_v20  ;;  %v2184_v23 = vpop.f32.mrb[183].mxu0  ;;  %v2831_v50 = vpop.f32.mrb[183].mxu1 }
 0x28e   : > { %v4844_v1 = vpack.c.bf16 %v3255_v60, %v3254_v17  ;;  %v2996_v22 = vmul.f32 %v5986_v29, %v2829_v25  ;;  %v2728_v0 = vadd.f32 %v6340_v34, %v2182_v5  ;;  %v2840_v39 = vadd.f32 %v5128_v62, %v6578_v51 }
 0x28f   : > { %4919 = vst [vmem:[%s6022_s12 + $0x160] sm:$0xff] %v4779_v35   ;;  %v4839_v21 = vpack.c.bf16 %v3253_v63, %v3252_v16  ;;  %v3102_v11 = vadd.f32 %v5991_v53, %v2970_v42  ;;  %v3130_v47 = vadd.f32 %v5991_v53, %v2998_v36  ;;  %v2832_v6 = vadd.f32 %v2831_v50, %v6579_v41  ;;  %v6585_v41 = vld [vmem:[#allocation19_spill] sm:$0xff] }
 0x290   : > { %4932 = vst [vmem:[%s6022_s12 + $0x1c8] sm:$0xff] %v4844_v1   ;;  %v3128_v54 = vadd.f32 %v5991_v53, %v2996_v22  ;;  %v2971_v38 = vmul.f32 %v5986_v29, %v2728_v0  ;;  %v2999_v19 = vmul.f32 %v5986_v29, %v2840_v39  ;;  %v6584_v22 = vld [vmem:[#allocation21_spill] sm:$0xff] }
 0x291   : > { %4931 = vst [vmem:[%s6022_s12 + $0x1c0] sm:$0xff] %v4839_v21   ;;  %v2997_v34 = vmul.f32 %v5986_v29, %v2832_v6  ;;  %v3230_v52 = vmax.f32 %v3102_v11, 0.0  ;;  %v3258_v26 = vmax.f32 %v3130_v47, 0.0 }
 0x292   : > { %v3103_v57 = vadd.f32 %v5991_v53, %v2971_v38  ;;  %v3131_v12 = vadd.f32 %v5991_v53, %v2999_v19  ;;  %v2187_v59 = vpop.f32.mrb[184].mxu0  ;;  %v5131_v56 = vpop.f32.mrb[184].mxu1  ;;  %v3256_v13 = vmax.f32 %v3128_v54, 0.0 }
 0x293   : > { %v3129_v40 = vadd.f32 %v5991_v53, %v2997_v34  ;;  %v2733_v28 = vadd.f32 %v6352_v7, %v2187_v59  ;;  %v2853_v58 = vadd.f32 %v5131_v56, %v6580_v37  ;;  %v2189_v55 = vpop.f32.mrb[185].mxu0  ;;  %v2844_v45 = vpop.f32.mrb[185].mxu1 }
 0x294   : > { %v3231_v44 = vmax.f32 %v3103_v57, 0.0  ;;  %v3259_v31 = vmax.f32 %v3131_v12, 0.0  ;;  %v2845_v46 = vadd.f32 %v2844_v45, %v6581_v61  ;;  %v2190_v14 = vpop.f32.mrb[186].mxu0  ;;  %v5132_v2 = vpop.f32.mrb[186].mxu1  ;;  %v6587_v55 = vld [vmem:[#allocation20_spill] sm:$0xff] }
 0x295   : > { %v3257_v9 = vmax.f32 %v3129_v40, 0.0  ;;  %v2972_v32 = vmul.f32 %v5986_v29, %v2733_v28  ;;  %v3002_v24 = vmul.f32 %v5986_v29, %v2853_v58  ;;  %v2736_v7 = vadd.f32 %v6358_v15, %v2190_v14  ;;  %v2192_v18 = vpop.f32.mrb[187].mxu0  ;;  %v2847_v27 = vpop.f32.mrb[187].mxu1  ;;  %v6586_v40 = vld [vmem:[#allocation22_spill] sm:$0xff] }
 0x296   : > { %v4784_v4 = vpack.c.bf16 %v3231_v44, %v3230_v52  ;;  %v4854_v49 = vpack.c.bf16 %v3259_v31, %v3258_v26  ;;  %v3000_v10 = vmul.f32 %v5986_v29, %v2845_v46  ;;  %v2856_v20 = vadd.f32 %v5132_v2, %v6582_v3 }
 0x297   : > { %v4849_v8 = vpack.c.bf16 %v3257_v9, %v3256_v13  ;;  %v3104_v30 = vadd.f32 %v5991_v53, %v2972_v32  ;;  %v3134_v17 = vadd.f32 %v5991_v53, %v3002_v24  ;;  %v2973_v16 = vmul.f32 %v5986_v29, %v2736_v7 }
 0x298   : > { %4920 = vst [vmem:[%s6022_s12 + $0x168] sm:$0xff] %v4784_v4   ;;  %4934 = vst [vmem:[%s6022_s12 + $0x1d8] sm:$0xff] %v4854_v49   ;;  %v3132_v15 = vadd.f32 %v5991_v53, %v3000_v10  ;;  %v3003_v60 = vmul.f32 %v5986_v29, %v2856_v20  ;;  %v2848_v25 = vadd.f32 %v2847_v27, %v6583_v43 }
 0x299   : > { %4933 = vst [vmem:[%s6022_s12 + $0x1d0] sm:$0xff] %v4849_v8   ;;  %v3105_v5 = vadd.f32 %v5991_v53, %v2973_v16  ;;  %v3232_v62 = vmax.f32 %v3104_v30, 0.0  ;;  %v3262_v23 = vmax.f32 %v3134_v17, 0.0 }
 0x29a   : > { %v3135_v35 = vadd.f32 %v5991_v53, %v3003_v60  ;;  %v3001_v63 = vmul.f32 %v5986_v29, %v2848_v25  ;;  %v2195_v42 = vpop.f32.mrb[188].mxu0  ;;  %v5135_v36 = vpop.f32.mrb[188].mxu1  ;;  %v3260_v21 = vmax.f32 %v3132_v15, 0.0 }
 0x29b   : > { %v3233_v50 = vmax.f32 %v3105_v5, 0.0  ;;  %v2741_v1 = vadd.f32 %v6349_v48, %v2195_v42  ;;  %v2869_v0 = vadd.f32 %v5135_v36, %v6584_v22  ;;  %v2197_v51 = vpop.f32.mrb[189].mxu0  ;;  %v2860_v39 = vpop.f32.mrb[189].mxu1 }
 0x29c   : > { %v3263_v11 = vmax.f32 %v3135_v35, 0.0  ;;  %v3133_v47 = vadd.f32 %v5991_v53, %v3001_v63  ;;  %v2861_v6 = vadd.f32 %v2860_v39, %v6585_v41  ;;  %v2198_v54 = vpop.f32.mrb[190].mxu0  ;;  %v5136_v38 = vpop.f32.mrb[190].mxu1 }
 0x29d   : > { %v4789_v19 = vpack.c.bf16 %v3233_v50, %v3232_v62  ;;  %v2974_v34 = vmul.f32 %v5986_v29, %v2741_v1  ;;  %v3006_v52 = vmul.f32 %v5986_v29, %v2869_v0  ;;  %v2744_v48 = vadd.f32 %v6354_v33, %v2198_v54  ;;  %v2200_v57 = vpop.f32.mrb[191].mxu0  ;;  %v2863_v12 = vpop.f32.mrb[191].mxu1 }
 0x29e   : > { %v4864_v59 = vpack.c.bf16 %v3263_v11, %v3262_v23  ;;  %v3261_v56 = vmax.f32 %v3133_v47, 0.0  ;;  %v3004_v26 = vmul.f32 %v5986_v29, %v2861_v6  ;;  %v2872_v28 = vadd.f32 %v5136_v38, %v6586_v40 }
 0x29f   : > { %4921 = vst [vmem:[%s6022_s12 + $0x170] sm:$0xff] %v4789_v19   ;;  %v3106_v37 = vadd.f32 %v5991_v53, %v2974_v34  ;;  %v2975_v58 = vmul.f32 %v5986_v29, %v2744_v48  ;;  %v2864_v45 = vadd.f32 %v2863_v12, %v6587_v55  ;;  %v3138_v33 = vadd.f32 %v5991_v53, %v3006_v52 }
 0x2a0   : > { %4936 = vst [vmem:[%s6022_s12 + $0x1e8] sm:$0xff] %v4864_v59   ;;  %v4859_v13 = vpack.c.bf16 %v3261_v56, %v3260_v21  ;;  %v3007_v44 = vmul.f32 %v5986_v29, %v2872_v28  ;;  %v3136_v31 = vadd.f32 %v5991_v53, %v3004_v26 }
 0x2a1   : > { %v3107_v61 = vadd.f32 %v5991_v53, %v2975_v58  ;;  %v3005_v46 = vmul.f32 %v5986_v29, %v2864_v45  ;;  %v3234_v2 = vmax.f32 %v3106_v37, 0.0  ;;  %v3266_v24 = vmax.f32 %v3138_v33, 0.0 }
 0x2a2   : > { %4935 = vst [vmem:[%s6022_s12 + $0x1e0] sm:$0xff] %v4859_v13   ;;  %v3139_v14 = vadd.f32 %v5991_v53, %v3007_v44  ;;  %v3264_v18 = vmax.f32 %v3136_v31, 0.0 }
 0x2a3   : > { %v3235_v9 = vmax.f32 %v3107_v61, 0.0  ;;  %v3137_v32 = vadd.f32 %v5991_v53, %v3005_v46 }
 0x2a4   : > { %v3267_v7 = vmax.f32 %v3139_v14, 0.0 }
 0x2a5   : > { %v4794_v27 = vpack.c.bf16 %v3235_v9, %v3234_v2  ;;  %v3265_v4 = vmax.f32 %v3137_v32, 0.0 }
 0x2a6   : > { %v4874_v49 = vpack.c.bf16 %v3267_v7, %v3266_v24 }
 0x2a7   : > { %4922 = vst [vmem:[%s6022_s12 + $0x178] sm:$0xff] %v4794_v27   ;;  %v4869_v10 = vpack.c.bf16 %v3265_v4, %v3264_v18 }
 0x2a8   : > { %4938 = vst [vmem:[%s6022_s12 + $0x1f8] sm:$0xff] %v4874_v49  }
 0x2a9   : > { %4937 = vst [vmem:[%s6022_s12 + $0x1f0] sm:$0xff] %v4869_v10  }
 0x2aa PF: > { %s13_s14 = sadd.s32 1, %s5491_s14   ;;  %s6588_s12 = smov %s5487_s13 }
 0x2ab   : > { %p10_p5 = scmp.ge.s32.totalorder %s13_s14, 4   ;;  %s6589_s13 = smov %s6591_s15 }
 0x2ad   :  { %12 = sbr.rel (!%p10_p5) target bundleno = 2 (0x2), region = 68 }

// kernel: generator_block_forward.5
= control target key start
LH: loop header
LB: loop body
LE: loop exit
PB: predicated region body
PF: predicated region fallthrough
CT: control target
= control target key end

     0   :  { %s4363_s12 = smov 0   ;;  %s4365_s13 = smov 0   ;;  %s5455_s0 = inlined_call_operand.vmem [shape: bf16[2048,288], index: 0, kind: input, shape index: {}]   ;;  %s5456_s1 = inlined_call_operand.vmem [shape: bf16[288,128], index: 1, kind: input, shape index: {}]   ;;  %s5457_s2 = inlined_call_operand.vmem [shape: f32[2,128], index: 2, kind: input, shape index: {}]   ;;  %s5458_s3 = inlined_call_operand.vmem [shape: f32[2048,128], index: 3, kind: output, shape index: {}]  }
   0x1   :  { %s4367_s14 = smov 0  }
   0x2 LB: > { %s25_s15 = sadd.s32 1, %s4336_s13  ;;  %p3507_p0 = scmp.ge.s32.totalorder %s4340_s14, 1  ;;  %s4340_s14 = sphi %s4367_s14, %s13_s14   ;;  %s4336_s13 = sphi %s4365_s13, %s5500_s13   ;;  %s4332_s12 = sphi %s4363_s12, %s5499_s12  }
   0x3   : > { %p27_p1 = scmp.ge.s32.totalorder %s25_s15, 2  ;;  %p171_p2 = scmp.lt.s32.totalorder %s4340_s14, 3 }
   0x5   : > { %s5502_s15 = smov (%p27_p1, %s25_s15), 0  ;;  %p172_p3 = pnand %p3507_p0, %p171_p2 }
   0x7   : > { %175 = sbr.rel (%p172_p3) target bundleno = 679 (0x2a7), region = 32 }
   0xe   : > { %v4044_v0 = vld [vmem:[%s5456_s1] sm:$0xff]   ;;  %v4342_v1 = vmov 0   ;;  %s3508_s18 = sshll.u32 %s4332_s12, 7  ;;  %v4045_v2 = vld [vmem:[%s5456_s1 + $0x8] sm:$0xff]   ;;  %v4046_v3 = vld [vmem:[%s5456_s1 + $0x10] sm:$0xff]   ;;  %vm1592_vm0 = vcmask 261120  }
   0xf   : > { %1785 = vmatprep.subr.bf16.mxu0 %v4342_v1  ;;  %3986 = vmatprep.subr.bf16.mxu1 %v4342_v1  ;;  %p208_p4 = scmp.lt.s32.totalorder %s3508_s18, 255  ;;  %v4047_v4 = vld [vmem:[%s5456_s1 + $0x18] sm:$0xff]   ;;  %v4048_v5 = vld [vmem:[%s5456_s1 + $0x20] sm:$0xff]   ;;  %v4049_v7 = vld [vmem:[%s5456_s1 + $0x28] sm:$0xff]  }
  0x10   : > { %1786 = vmatpush1.bf16.msra.mxu0 %v4044_v0  ;;  %4002 = vmatpush1.bf16.msra.mxu1 %v4044_v0  ;;  %v4050_v9 = vld [vmem:[%s5456_s1 + $0x30] sm:$0xff]   ;;  %v4051_v10 = vld [vmem:[%s5456_s1 + $0x38] sm:$0xff]   ;;  %v4052_v11 = vld [vmem:[%s5456_s1 + $0x40] sm:$0xff]  }
  0x11   : > { %1787 = vmatprep.subr.bf16.mxu0 %v4342_v1  ;;  %3987 = vmatprep.subr.bf16.mxu1 %v4342_v1  ;;  %s5504_s18 = smov (!%p208_p4, %s3508_s18), 255  ;;  %v4053_v12 = vld [vmem:[%s5456_s1 + $0x48] sm:$0xff]   ;;  %v4054_v13 = vld [vmem:[%s5456_s1 + $0x50] sm:$0xff]   ;;  %v4055_v14 = vld [vmem:[%s5456_s1 + $0x58] sm:$0xff]  }
  0x12   : > { %s4018_s25 = smul.u32 12, %s5504_s18  ;;  %v4056_v15 = vld [vmem:[%s5456_s1 + $0x60] sm:$0xff]   ;;  %v4057_v16 = vld [vmem:[%s5456_s1 + $0x68] sm:$0xff]   ;;  %v4058_v17 = vld [vmem:[%s5456_s1 + $0x70] sm:$0xff]   ;;  %s3511_s10 = sshll.u32 %s5504_s18, 3 }
  0x13   : > { %v4059_v18 = vld [vmem:[%s5456_s1 + $0x78] sm:$0xff]   ;;  %v4066_v19 = vld [vmem:[%s5456_s1 + $0x80] sm:$0xff]   ;;  %v4115_v24 = vld [vmem:[%s5456_s1 + $0x88] sm:$0xff]   ;;  %s4860_s12 = scalar_lea.vmem %s5458_s3, %s3511_s10 }
  0x14   : > { %1788 = vmatpush1.bf16.msra.mxu0 %v4045_v2  ;;  %4003 = vmatpush1.bf16.msra.mxu1 %v4045_v2  ;;  %s4410_s30 = scalar_lea.vmem %s5455_s0, %s4018_s25 }
  0x15   : > { %1789 = vmatprep.subr.bf16.mxu0 %v4342_v1  ;;  %3988 = vmatprep.subr.bf16.mxu1 %v4342_v1  ;;  %v4062_v6 = vld [vmem:[%s4410_s30 + $0x4] ss:$12 sps:$4 sm:$0xff]   ;;  %v4060_v20 = vld [vmem:[%s4410_s30] ss:$12 sps:$4 sm:$0xff]   ;;  %v4067_v22 = vld [vmem:[%s4410_s30 + $0x1c] ss:$12 sps:$4 sm:$0xff]  }
  0x16   : > { %v4065_v8 = vld [vmem:[%s4410_s30 + $0x484] ss:$12 sps:$4 sm:$0xff]   ;;  %1817 = vmatprep.mubr.bf16.mxu0 %v4062_v6  ;;  %v4063_v21 = vld [vmem:[%s4410_s30 + $0x480] ss:$12 sps:$4 sm:$0xff]   ;;  %v4069_v23 = vld [vmem:[%s4410_s30 + $0x49c] ss:$12 sps:$4 sm:$0xff]  }
  0x17   : > { %2201 = vmatprep.mubr.bf16.mxu1 %v4065_v8  ;;  %v4071_v25 = vld [vmem:[%s4410_s30 + $0x18] ss:$12 sps:$4 sm:$0xff]   ;;  %v4073_v27 = vld [vmem:[%s4410_s30 + $0x34] ss:$12 sps:$4 sm:$0xff]   ;;  %v4077_v29 = vld [vmem:[%s4410_s30 + $0x30] ss:$12 sps:$4 sm:$0xff]  }
  0x18   : > { %1790 = vmatpush1.bf16.msra.mxu0 %v4046_v3  ;;  %4004 = vmatpush1.bf16.msra.mxu1 %v4046_v3  ;;  %v4072_v26 = vld [vmem:[%s4410_s30 + $0x498] ss:$12 sps:$4 sm:$0xff]   ;;  %v4075_v28 = vld [vmem:[%s4410_s30 + $0x4b4] ss:$12 sps:$4 sm:$0xff]   ;;  %v4078_v30 = vld [vmem:[%s4410_s30 + $0x4b0] ss:$12 sps:$4 sm:$0xff]  }
  0x19   : > { %1791 = vmatprep.subr.bf16.mxu0 %v4342_v1  ;;  %3989 = vmatprep.subr.bf16.mxu1 %v4342_v1  ;;  %v4079_v31 = vld [vmem:[%s4410_s30 + $0x4c] ss:$12 sps:$4 sm:$0xff]   ;;  %v4083_v33 = vld [vmem:[%s4410_s30 + $0x48] ss:$12 sps:$4 sm:$0xff]   ;;  %v4085_v35 = vld [vmem:[%s4410_s30 + $0x64] ss:$12 sps:$4 sm:$0xff]  }
  0x1a   : > { %v4081_v32 = vld [vmem:[%s4410_s30 + $0x4cc] ss:$12 sps:$4 sm:$0xff]   ;;  %v4084_v34 = vld [vmem:[%s4410_s30 + $0x4c8] ss:$12 sps:$4 sm:$0xff]   ;;  %v4087_v36 = vld [vmem:[%s4410_s30 + $0x4e4] ss:$12 sps:$4 sm:$0xff]  }
  0x1b   : > { %v4089_v37 = vld [vmem:[%s4410_s30 + $0x60] ss:$12 sps:$4 sm:$0xff]   ;;  %v4091_v39 = vld [vmem:[%s4410_s30 + $0x7c] ss:$12 sps:$4 sm:$0xff]   ;;  %v4095_v41 = vld [vmem:[%s4410_s30 + $0x78] ss:$12 sps:$4 sm:$0xff]  }
  0x1c   : > { %1792 = vmatpush1.bf16.msra.mxu0 %v4047_v4  ;;  %4005 = vmatpush1.bf16.msra.mxu1 %v4047_v4  ;;  %v4090_v38 = vld [vmem:[%s4410_s30 + $0x4e0] ss:$12 sps:$4 sm:$0xff]   ;;  %v4093_v40 = vld [vmem:[%s4410_s30 + $0x4fc] ss:$12 sps:$4 sm:$0xff]   ;;  %v4096_v42 = vld [vmem:[%s4410_s30 + $0x4f8] ss:$12 sps:$4 sm:$0xff]  }
  0x1d   : > { %1793 = vmatprep.subr.bf16.mxu0 %v4342_v1  ;;  %3990 = vmatprep.subr.bf16.mxu1 %v4342_v1  ;;  %v4097_v43 = vld [vmem:[%s4410_s30 + $0x94] ss:$12 sps:$4 sm:$0xff]   ;;  %v4101_v45 = vld [vmem:[%s4410_s30 + $0x90] ss:$12 sps:$4 sm:$0xff]   ;;  %v4103_v47 = vld [vmem:[%s4410_s30 + $0xac] ss:$12 sps:$4 sm:$0xff]  }
  0x1e   : > { %v4099_v44 = vld [vmem:[%s4410_s30 + $0x514] ss:$12 sps:$4 sm:$0xff]   ;;  %v4102_v46 = vld [vmem:[%s4410_s30 + $0x510] ss:$12 sps:$4 sm:$0xff]   ;;  %v4105_v48 = vld [vmem:[%s4410_s30 + $0x52c] ss:$12 sps:$4 sm:$0xff]  }
  0x1f   : > { %v4107_v49 = vld [vmem:[%s4410_s30 + $0xa8] ss:$12 sps:$4 sm:$0xff]   ;;  %v4109_v51 = vld [vmem:[%s4410_s30 + $0xc4] ss:$12 sps:$4 sm:$0xff]   ;;  %v4113_v53 = vld [vmem:[%s4410_s30 + $0xc0] ss:$12 sps:$4 sm:$0xff]  }
  0x20   : > { %1794 = vmatpush1.bf16.msra.mxu0 %v4048_v5  ;;  %4006 = vmatpush1.bf16.msra.mxu1 %v4048_v5  ;;  %v4108_v50 = vld [vmem:[%s4410_s30 + $0x528] ss:$12 sps:$4 sm:$0xff]   ;;  %v4111_v52 = vld [vmem:[%s4410_s30 + $0x544] ss:$12 sps:$4 sm:$0xff]   ;;  %v4114_v54 = vld [vmem:[%s4410_s30 + $0x540] ss:$12 sps:$4 sm:$0xff]  }
  0x21   : > { %1795 = vmatprep.subr.bf16.mxu0 %v4342_v1  ;;  %3991 = vmatprep.subr.bf16.mxu1 %v4342_v1  ;;  %v4116_v55 = vld [vmem:[%s4410_s30 + $0xdc] ss:$12 sps:$4 sm:$0xff]   ;;  %v4120_v57 = vld [vmem:[%s4410_s30 + $0xd8] ss:$12 sps:$4 sm:$0xff]   ;;  %v4122_v59 = vld [vmem:[%s4410_s30 + $0xf4] ss:$12 sps:$4 sm:$0xff]  }
  0x22   : > { %v4118_v56 = vld [vmem:[%s4410_s30 + $0x55c] ss:$12 sps:$4 sm:$0xff]   ;;  %v4121_v58 = vld [vmem:[%s4410_s30 + $0x558] ss:$12 sps:$4 sm:$0xff]   ;;  %v4124_v60 = vld [vmem:[%s4410_s30 + $0x574] ss:$12 sps:$4 sm:$0xff]  }
  0x23   : > { %v4126_v61 = vld [vmem:[%s4410_s30 + $0xf0] ss:$12 sps:$4 sm:$0xff]   ;;  %v4128_v63 = vld [vmem:[%s4410_s30 + $0x10c] ss:$12 sps:$4 sm:$0xff]   ;;  %v4133_v2 = vld [vmem:[%s4410_s30 + $0x588] ss:$12 sps:$4 sm:$0xff]  }
  0x24   : > { %1796 = vmatpush1.bf16.msra.mxu0 %v4049_v7  ;;  %4007 = vmatpush1.bf16.msra.mxu1 %v4049_v7  ;;  %v4127_v62 = vld [vmem:[%s4410_s30 + $0x570] ss:$12 sps:$4 sm:$0xff]   ;;  %v4130_v0 = vld [vmem:[%s4410_s30 + $0x58c] ss:$12 sps:$4 sm:$0xff]  }
  0x25   : > { %1797 = vmatprep.subr.bf16.mxu0 %v4342_v1  ;;  %3992 = vmatprep.subr.bf16.mxu1 %v4342_v1  ;;  %v4134_v3 = vld [vmem:[%s4410_s30 + $0x124] ss:$12 sps:$4 sm:$0xff]   ;;  %v4138_v5 = vld [vmem:[%s4410_s30 + $0x120] ss:$12 sps:$4 sm:$0xff]   ;;  %v4140_v7 = vld [vmem:[%s4410_s30 + $0x13c] ss:$12 sps:$4 sm:$0xff]  }
  0x26   : > { %v4136_v4 = vld [vmem:[%s4410_s30 + $0x5a4] ss:$12 sps:$4 sm:$0xff]   ;;  %v4139_v6 = vld [vmem:[%s4410_s30 + $0x5a0] ss:$12 sps:$4 sm:$0xff]   ;;  %v4142_v8 = vld [vmem:[%s4410_s30 + $0x5bc] ss:$12 sps:$4 sm:$0xff]  }
  0x28   : > { %1798 = vmatpush1.bf16.msra.mxu0 %v4050_v9  ;;  %4008 = vmatpush1.bf16.msra.mxu1 %v4050_v9  ;;  %v4144_v9 = vld [vmem:[%s4410_s30 + $0x138] ss:$12 sps:$4 sm:$0xff]  }
  0x29   : > { %1799 = vmatprep.subr.bf16.mxu0 %v4342_v1  ;;  %3993 = vmatprep.subr.bf16.mxu1 %v4342_v1 }
  0x2c   : > { %1800 = vmatpush1.bf16.msra.mxu0 %v4051_v10  ;;  %4009 = vmatpush1.bf16.msra.mxu1 %v4051_v10  ;;  %v4145_v10 = vld [vmem:[%s4410_s30 + $0x5b8] ss:$12 sps:$4 sm:$0xff]  }
  0x2d   : > { %1801 = vmatprep.subr.bf16.mxu0 %v4342_v1  ;;  %3994 = vmatprep.subr.bf16.mxu1 %v4342_v1 }
  0x30   : > { %1802 = vmatpush1.bf16.msra.mxu0 %v4052_v11  ;;  %4010 = vmatpush1.bf16.msra.mxu1 %v4052_v11  ;;  %v4146_v11 = vld [vmem:[%s4410_s30 + $0x154] ss:$12 sps:$4 sm:$0xff]  }
  0x31   : > { %1803 = vmatprep.subr.bf16.mxu0 %v4342_v1  ;;  %3995 = vmatprep.subr.bf16.mxu1 %v4342_v1 }
  0x34   : > { %1804 = vmatpush1.bf16.msra.mxu0 %v4053_v12  ;;  %4011 = vmatpush1.bf16.msra.mxu1 %v4053_v12  ;;  %v4148_v12 = vld [vmem:[%s4410_s30 + $0x5d4] ss:$12 sps:$4 sm:$0xff]  }
  0x35   : > { %1805 = vmatprep.subr.bf16.mxu0 %v4342_v1  ;;  %3996 = vmatprep.subr.bf16.mxu1 %v4342_v1 }
  0x38   : > { %1806 = vmatpush1.bf16.msra.mxu0 %v4054_v13  ;;  %4012 = vmatpush1.bf16.msra.mxu1 %v4054_v13  ;;  %v4150_v13 = vld [vmem:[%s4410_s30 + $0x150] ss:$12 sps:$4 sm:$0xff]  }
  0x39   : > { %1807 = vmatprep.subr.bf16.mxu0 %v4342_v1  ;;  %3997 = vmatprep.subr.bf16.mxu1 %v4342_v1 }
  0x3c   : > { %1808 = vmatpush1.bf16.msra.mxu0 %v4055_v14  ;;  %4013 = vmatpush1.bf16.msra.mxu1 %v4055_v14  ;;  %v4151_v14 = vld [vmem:[%s4410_s30 + $0x5d0] ss:$12 sps:$4 sm:$0xff]  }
  0x3d   : > { %1809 = vmatprep.subr.bf16.mxu0 %v4342_v1  ;;  %3998 = vmatprep.subr.bf16.mxu1 %v4342_v1 }
  0x40   : > { %1810 = vmatpush1.bf16.msra.mxu0 %v4056_v15  ;;  %4014 = vmatpush1.bf16.msra.mxu1 %v4056_v15  ;;  %v4152_v15 = vld [vmem:[%s4410_s30 + $0x16c] ss:$12 sps:$4 sm:$0xff]  }
  0x41   : > { %1811 = vmatprep.subr.bf16.mxu0 %v4342_v1  ;;  %3999 = vmatprep.subr.bf16.mxu1 %v4342_v1 }
  0x44   : > { %1812 = vmatpush1.bf16.msra.mxu0 %v4057_v16  ;;  %4015 = vmatpush1.bf16.msra.mxu1 %v4057_v16  ;;  %v4154_v16 = vld [vmem:[%s4410_s30 + $0x5ec] ss:$12 sps:$4 sm:$0xff]  }
  0x45   : > { %1813 = vmatprep.subr.bf16.mxu0 %v4342_v1  ;;  %4000 = vmatprep.subr.bf16.mxu1 %v4342_v1 }
  0x48   : > { %1814 = vmatpush1.bf16.msra.mxu0 %v4058_v17  ;;  %4016 = vmatpush1.bf16.msra.mxu1 %v4058_v17  ;;  %v4156_v17 = vld [vmem:[%s4410_s30 + $0x168] ss:$12 sps:$4 sm:$0xff]  }
  0x49   : > { %1815 = vmatprep.subr.bf16.mxu0 %v4342_v1  ;;  %4001 = vmatprep.subr.bf16.mxu1 %v4342_v1  ;;  %v4132_v1 = vld [vmem:[%s4410_s30 + $0x108] ss:$12 sps:$4 sm:$0xff]  }
  0x4c   : > { %1816 = vmatpush1.bf16.msra.mxu0 %v4059_v18  ;;  %4017 = vmatpush1.bf16.msra.mxu1 %v4059_v18  ;;  %v4157_v18 = vld [vmem:[%s4410_s30 + $0x5e8] ss:$12 sps:$4 sm:$0xff]  }
  0x4d   : > { %3854 = vmatprep.subr.bf16.mxu1 %v4066_v19 }
  0x4f   : > { %1818 = vmatmul.mubr.bf16.vlgmr.msra.gmra.mrb[0].mxu0 %v4060_v20  ;;  %2202 = vmatmul.mubr.bf16.vlgmr.msra.gmra.mrb[0].mxu1 %v4063_v21  ;;  %v4160_v20 = vld [vmem:[%s4410_s30 + $0x8] ss:$12 sps:$4 sm:$0xff]   ;;  %v4161_v21 = vld [vmem:[%s4410_s30 + $0x180] ss:$12 sps:$4 sm:$0xff]  }
  0x50   : > { %3855 = vmatpush3.bf16.msra.mxu1 %v4066_v19  ;;  %1825 = vmatprep.mubr.bf16.mxu0 %v4067_v22  ;;  %v4158_v19 = vld [vmem:[%s4410_s30 + $0x184] ss:$12 sps:$4 sm:$0xff]   ;;  %v4162_v22 = vld [vmem:[%s4410_s30 + $0x20] ss:$12 sps:$4 sm:$0xff]  }
  0x51   : > { %2209 = vmatprep.mubr.bf16.mxu1 %v4069_v23  ;;  %3856 = vmatprep.subr.bf16.mxu1 %v4115_v24  ;;  %v4163_v23 = vld [vmem:[%s4410_s30 + $0x19c] ss:$12 sps:$4 sm:$0xff]  }
  0x54   : > { %3857 = vmatpush3.bf16.msra.mxu1 %v4115_v24  ;;  %v4165_v24 = vld [vmem:[%s4410_s30 + $0x38] ss:$12 sps:$4 sm:$0xff]  }
  0x57   : > { %1826 = vmatmul.mubr.bf16.gmra.mrb[4].mxu0 %v4071_v25  ;;  %2210 = vmatmul.mubr.bf16.gmra.mrb[4].mxu1 %v4072_v26  ;;  %v4166_v25 = vld [vmem:[%s4410_s30 + $0x198] ss:$12 sps:$4 sm:$0xff]   ;;  %v4167_v26 = vld [vmem:[%s4410_s30 + $0x50] ss:$12 sps:$4 sm:$0xff]  }
  0x58   : > { %1833 = vmatprep.mubr.bf16.mxu0 %v4073_v27  ;;  %2217 = vmatprep.mubr.bf16.mxu1 %v4075_v28  ;;  %v4168_v27 = vld [vmem:[%s4410_s30 + $0x1b4] ss:$12 sps:$4 sm:$0xff]  }
  0x59   : > { %v4170_v28 = vld [vmem:[%s4410_s30 + $0x68] ss:$12 sps:$4 sm:$0xff]  }
  0x5f   : > { %1834 = vmatmul.mubr.bf16.gmra.mrb[8].mxu0 %v4077_v29  ;;  %2218 = vmatmul.mubr.bf16.gmra.mrb[8].mxu1 %v4078_v30  ;;  %v4171_v29 = vld [vmem:[%s4410_s30 + $0x1b0] ss:$12 sps:$4 sm:$0xff]   ;;  %v4172_v30 = vld [vmem:[%s4410_s30 + $0x80] ss:$12 sps:$4 sm:$0xff]  }
  0x60   : > { %1841 = vmatprep.mubr.bf16.mxu0 %v4079_v31  ;;  %2225 = vmatprep.mubr.bf16.mxu1 %v4081_v32  ;;  %v4173_v31 = vld [vmem:[%s4410_s30 + $0x1cc] ss:$12 sps:$4 sm:$0xff]  }
  0x61   : > { %v4175_v32 = vld [vmem:[%s4410_s30 + $0x98] ss:$12 sps:$4 sm:$0xff]  }
  0x67   : > { %1842 = vmatmul.mubr.bf16.gmra.mrb[12].mxu0 %v4083_v33  ;;  %2226 = vmatmul.mubr.bf16.gmra.mrb[12].mxu1 %v4084_v34  ;;  %v4176_v33 = vld [vmem:[%s4410_s30 + $0x1c8] ss:$12 sps:$4 sm:$0xff]   ;;  %v4177_v34 = vld [vmem:[%s4410_s30 + $0xb0] ss:$12 sps:$4 sm:$0xff]  }
  0x68   : > { %1849 = vmatprep.mubr.bf16.mxu0 %v4085_v35  ;;  %2233 = vmatprep.mubr.bf16.mxu1 %v4087_v36  ;;  %v4178_v35 = vld [vmem:[%s4410_s30 + $0x1e4] ss:$12 sps:$4 sm:$0xff]   ;;  %v4180_v36 = vld [vmem:[%s4410_s30 + $0xc8] ss:$12 sps:$4 sm:$0xff]  }
  0x6f   : > { %1850 = vmatmul.mubr.bf16.gmra.mrb[16].mxu0 %v4089_v37  ;;  %2234 = vmatmul.mubr.bf16.gmra.mrb[16].mxu1 %v4090_v38  ;;  %v4181_v37 = vld [vmem:[%s4410_s30 + $0x1e0] ss:$12 sps:$4 sm:$0xff]  }
  0x70   : > { %1857 = vmatprep.mubr.bf16.mxu0 %v4091_v39  ;;  %2241 = vmatprep.mubr.bf16.mxu1 %v4093_v40  ;;  %v4182_v38 = vld [vmem:[%s4410_s30 + $0xe0] ss:$12 sps:$4 sm:$0xff]   ;;  %v4183_v39 = vld [vmem:[%s4410_s30 + $0x1fc] ss:$12 sps:$4 sm:$0xff]   ;;  %v4185_v40 = vld [vmem:[%s4410_s30 + $0xf8] ss:$12 sps:$4 sm:$0xff]  }
  0x77   : > { %1858 = vmatmul.mubr.bf16.gmra.mrb[20].mxu0 %v4095_v41  ;;  %2242 = vmatmul.mubr.bf16.gmra.mrb[20].mxu1 %v4096_v42  ;;  %v4186_v41 = vld [vmem:[%s4410_s30 + $0x1f8] ss:$12 sps:$4 sm:$0xff]   ;;  %v4187_v42 = vld [vmem:[%s4410_s30 + $0x110] ss:$12 sps:$4 sm:$0xff]  }
  0x78   : > { %1865 = vmatprep.mubr.bf16.mxu0 %v4097_v43  ;;  %2249 = vmatprep.mubr.bf16.mxu1 %v4099_v44  ;;  %v4188_v43 = vld [vmem:[%s4410_s30 + $0x214] ss:$12 sps:$4 sm:$0xff]  }
  0x79   : > { %v4190_v44 = vld [vmem:[%s4410_s30 + $0x128] ss:$12 sps:$4 sm:$0xff]  }
  0x7f   : > { %1866 = vmatmul.mubr.bf16.gmra.mrb[24].mxu0 %v4101_v45  ;;  %2250 = vmatmul.mubr.bf16.gmra.mrb[24].mxu1 %v4102_v46  ;;  %v4191_v45 = vld [vmem:[%s4410_s30 + $0x210] ss:$12 sps:$4 sm:$0xff]   ;;  %v4192_v46 = vld [vmem:[%s4410_s30 + $0x140] ss:$12 sps:$4 sm:$0xff]  }
  0x80   : > { %1873 = vmatprep.mubr.bf16.mxu0 %v4103_v47  ;;  %2257 = vmatprep.mubr.bf16.mxu1 %v4105_v48  ;;  %v4193_v47 = vld [vmem:[%s4410_s30 + $0x22c] ss:$12 sps:$4 sm:$0xff]  }
  0x81   : > { %v4195_v48 = vld [vmem:[%s4410_s30 + $0x158] ss:$12 sps:$4 sm:$0xff]  }
  0x87   : > { %1874 = vmatmul.mubr.bf16.gmra.mrb[28].mxu0 %v4107_v49  ;;  %2258 = vmatmul.mubr.bf16.gmra.mrb[28].mxu1 %v4108_v50  ;;  %v4196_v49 = vld [vmem:[%s4410_s30 + $0x228] ss:$12 sps:$4 sm:$0xff]   ;;  %v4197_v50 = vld [vmem:[%s4410_s30 + $0x170] ss:$12 sps:$4 sm:$0xff]  }
  0x88   : > { %1881 = vmatprep.mubr.bf16.mxu0 %v4109_v51  ;;  %2265 = vmatprep.mubr.bf16.mxu1 %v4111_v52  ;;  %v4198_v51 = vld [vmem:[%s4410_s30 + $0x244] ss:$12 sps:$4 sm:$0xff]   ;;  %v4200_v52 = vld [vmem:[%s4410_s30 + $0x188] ss:$12 sps:$4 sm:$0xff]  }
  0x8f   : > { %1882 = vmatmul.mubr.bf16.gmra.mrb[32].mxu0 %v4113_v53  ;;  %2266 = vmatmul.mubr.bf16.gmra.mrb[32].mxu1 %v4114_v54  ;;  %v4201_v53 = vld [vmem:[%s4410_s30 + $0x240] ss:$12 sps:$4 sm:$0xff]  }
  0x90   : > { %1889 = vmatprep.mubr.bf16.mxu0 %v4116_v55  ;;  %2273 = vmatprep.mubr.bf16.mxu1 %v4118_v56  ;;  %v4202_v54 = vld [vmem:[%s4410_s30 + $0x1a0] ss:$12 sps:$4 sm:$0xff]   ;;  %v4203_v55 = vld [vmem:[%s4410_s30 + $0x25c] ss:$12 sps:$4 sm:$0xff]   ;;  %v4205_v56 = vld [vmem:[%s4410_s30 + $0x1b8] ss:$12 sps:$4 sm:$0xff]  }
  0x97   : > { %1890 = vmatmul.mubr.bf16.gmra.mrb[36].mxu0 %v4120_v57  ;;  %2274 = vmatmul.mubr.bf16.gmra.mrb[36].mxu1 %v4121_v58  ;;  %v4206_v57 = vld [vmem:[%s4410_s30 + $0x258] ss:$12 sps:$4 sm:$0xff]   ;;  %v4207_v58 = vld [vmem:[%s4410_s30 + $0x1d0] ss:$12 sps:$4 sm:$0xff]  }
  0x98   : > { %1897 = vmatprep.mubr.bf16.mxu0 %v4122_v59  ;;  %2281 = vmatprep.mubr.bf16.mxu1 %v4124_v60  ;;  %v4208_v59 = vld [vmem:[%s4410_s30 + $0x274] ss:$12 sps:$4 sm:$0xff]  }
  0x99   : > { %v4210_v60 = vld [vmem:[%s4410_s30 + $0x1e8] ss:$12 sps:$4 sm:$0xff]  }
  0x9f   : > { %1898 = vmatmul.mubr.bf16.gmra.mrb[40].mxu0 %v4126_v61  ;;  %2282 = vmatmul.mubr.bf16.gmra.mrb[40].mxu1 %v4127_v62  ;;  %v4211_v61 = vld [vmem:[%s4410_s30 + $0x270] ss:$12 sps:$4 sm:$0xff]   ;;  %v4212_v62 = vld [vmem:[%s4410_s30 + $0x200] ss:$12 sps:$4 sm:$0xff]  }
  0xa0   : > { %1905 = vmatprep.mubr.bf16.mxu0 %v4128_v63  ;;  %2289 = vmatprep.mubr.bf16.mxu1 %v4130_v0  ;;  %v4213_v63 = vld [vmem:[%s4410_s30 + $0x28c] ss:$12 sps:$4 sm:$0xff]  }
  0xa1   : > { %v4215_v0 = vld [vmem:[%s4410_s30 + $0x218] ss:$12 sps:$4 sm:$0xff]  }
  0xa7   : > { %1906 = vmatmul.mubr.bf16.gmra.mrb[44].mxu0 %v4132_v1  ;;  %2290 = vmatmul.mubr.bf16.gmra.mrb[44].mxu1 %v4133_v2 }
  0xa8   : > { %1913 = vmatprep.mubr.bf16.mxu0 %v4134_v3  ;;  %2297 = vmatprep.mubr.bf16.mxu1 %v4136_v4 }
  0xaf   : > { %1914 = vmatmul.mubr.bf16.gmra.mrb[48].mxu0 %v4138_v5  ;;  %2298 = vmatmul.mubr.bf16.gmra.mrb[48].mxu1 %v4139_v6  ;;  %v4216_v5 = vld [vmem:[%s4410_s30 + $0x288] ss:$12 sps:$4 sm:$0xff]   ;;  %v4217_v6 = vld [vmem:[%s4410_s30 + $0x230] ss:$12 sps:$4 sm:$0xff]  }
  0xb0   : > { %1921 = vmatprep.mubr.bf16.mxu0 %v4140_v7  ;;  %2305 = vmatprep.mubr.bf16.mxu1 %v4142_v8 }
  0xb7   : > { %1922 = vmatmul.mubr.bf16.gmra.mrb[52].mxu0 %v4144_v9  ;;  %2306 = vmatmul.mubr.bf16.gmra.mrb[52].mxu1 %v4145_v10  ;;  %v4218_v9 = vld [vmem:[%s4410_s30 + $0x2a4] ss:$12 sps:$4 sm:$0xff]   ;;  %v4220_v10 = vld [vmem:[%s4410_s30 + $0x248] ss:$12 sps:$4 sm:$0xff]  }
  0xb8   : > { %1929 = vmatprep.mubr.bf16.mxu0 %v4146_v11  ;;  %2313 = vmatprep.mubr.bf16.mxu1 %v4148_v12 }
  0xbf   : > { %1930 = vmatmul.mubr.bf16.gmra.mrb[56].mxu0 %v4150_v13  ;;  %2314 = vmatmul.mubr.bf16.gmra.mrb[56].mxu1 %v4151_v14 }
  0xc0   : > { %1937 = vmatprep.mubr.bf16.mxu0 %v4152_v15  ;;  %2321 = vmatprep.mubr.bf16.mxu1 %v4154_v16 }
  0xc7   : > { %1938 = vmatmul.mubr.bf16.gmra.mrb[60].mxu0 %v4156_v17  ;;  %2322 = vmatmul.mubr.bf16.gmra.mrb[60].mxu1 %v4157_v18  ;;  %v4221_v17 = vld [vmem:[%s4410_s30 + $0x2a0] ss:$12 sps:$4 sm:$0xff]  }
  0xc8   : > { %1945 = vmatprep.mubr.bf16.mxu0 %v4158_v19  ;;  %3858 = vmatprep.mubr.msk.bf16.mxu1 %vm1592_vm0, %v4160_v20  ;;  %v4222_v18 = vld [vmem:[%s4410_s30 + $0x260] ss:$12 sps:$4 sm:$0xff]  }
  0xcf   : > { %1946 = vmatmul.mubr.bf16.gmra.mrb[64].mxu0 %v4161_v21  ;;  %3859 = vmatmul.mubr.msk.bf16.vlgmr.msra.gmra.mrb[64].mxu1 %vm1592_vm0, %v4162_v22  ;;  %v4223_v21 = vld [vmem:[%s4410_s30 + $0x2bc] ss:$12 sps:$4 sm:$0xff]   ;;  %v4225_v22 = vld [vmem:[%s4410_s30 + $0x278] ss:$12 sps:$4 sm:$0xff]  }
  0xd0   : > { %1953 = vmatprep.mubr.bf16.mxu0 %v4163_v23  ;;  %3862 = vmatprep.mubr.msk.bf16.mxu1 %vm1592_vm0, %v4165_v24 }
  0xd7   : > { %1954 = vmatmul.mubr.bf16.gmra.mrb[68].mxu0 %v4166_v25  ;;  %3863 = vmatmul.mubr.msk.bf16.gmra.mrb[68].mxu1 %vm1592_vm0, %v4167_v26 }
  0xd8   : > { %1961 = vmatprep.mubr.bf16.mxu0 %v4168_v27  ;;  %3866 = vmatprep.mubr.msk.bf16.mxu1 %vm1592_vm0, %v4170_v28 }
  0xdf   : > { %1962 = vmatmul.mubr.bf16.gmra.mrb[72].mxu0 %v4171_v29  ;;  %3867 = vmatmul.mubr.msk.bf16.gmra.mrb[72].mxu1 %vm1592_vm0, %v4172_v30  ;;  %v4226_v29 = vld [vmem:[%s4410_s30 + $0x2b8] ss:$12 sps:$4 sm:$0xff]   ;;  %v4227_v30 = vld [vmem:[%s4410_s30 + $0x290] ss:$12 sps:$4 sm:$0xff]  }
  0xe0   : > { %1969 = vmatprep.mubr.bf16.mxu0 %v4173_v31  ;;  %3870 = vmatprep.mubr.msk.bf16.mxu1 %vm1592_vm0, %v4175_v32 }
  0xe7   : > { %1970 = vmatmul.mubr.bf16.gmra.mrb[76].mxu0 %v4176_v33  ;;  %3871 = vmatmul.mubr.msk.bf16.gmra.mrb[76].mxu1 %vm1592_vm0, %v4177_v34  ;;  %v4228_v33 = vld [vmem:[%s4410_s30 + $0x2d4] ss:$12 sps:$4 sm:$0xff]  }
  0xe8   : > { %1977 = vmatprep.mubr.bf16.mxu0 %v4178_v35  ;;  %3874 = vmatprep.mubr.msk.bf16.mxu1 %vm1592_vm0, %v4180_v36  ;;  %v4230_v34 = vld [vmem:[%s4410_s30 + $0x2a8] ss:$12 sps:$4 sm:$0xff]  }
  0xef   : > { %1978 = vmatmul.mubr.bf16.gmra.mrb[80].mxu0 %v4181_v37  ;;  %3875 = vmatmul.mubr.msk.bf16.gmra.mrb[80].mxu1 %vm1592_vm0, %v4182_v38 }
  0xf0   : > { %1985 = vmatprep.mubr.bf16.mxu0 %v4183_v39  ;;  %3878 = vmatprep.mubr.msk.bf16.mxu1 %vm1592_vm0, %v4185_v40 }
  0xf7   : > { %1986 = vmatmul.mubr.bf16.gmra.mrb[84].mxu0 %v4186_v41  ;;  %3879 = vmatmul.mubr.msk.bf16.gmra.mrb[84].mxu1 %vm1592_vm0, %v4187_v42  ;;  %v4231_v41 = vld [vmem:[%s4410_s30 + $0x2d0] ss:$12 sps:$4 sm:$0xff]   ;;  %v4232_v42 = vld [vmem:[%s4410_s30 + $0x2c0] ss:$12 sps:$4 sm:$0xff]  }
  0xf8   : > { %1993 = vmatprep.mubr.bf16.mxu0 %v4188_v43  ;;  %3882 = vmatprep.mubr.msk.bf16.mxu1 %vm1592_vm0, %v4190_v44 }
  0xff   : > { %1994 = vmatmul.mubr.bf16.gmra.mrb[88].mxu0 %v4191_v45  ;;  %3883 = vmatmul.mubr.msk.bf16.gmra.mrb[88].mxu1 %vm1592_vm0, %v4192_v46  ;;  %v4233_v45 = vld [vmem:[%s4410_s30 + $0x2ec] ss:$12 sps:$4 sm:$0xff]  }
 0x100   : > { %2001 = vmatprep.mubr.bf16.mxu0 %v4193_v47  ;;  %3886 = vmatprep.mubr.msk.bf16.mxu1 %vm1592_vm0, %v4195_v48  ;;  %v4235_v46 = vld [vmem:[%s4410_s30 + $0x2d8] ss:$12 sps:$4 sm:$0xff]  }
 0x107   : > { %2002 = vmatmul.mubr.bf16.gmra.mrb[92].mxu0 %v4196_v49  ;;  %3887 = vmatmul.mubr.msk.bf16.gmra.mrb[92].mxu1 %vm1592_vm0, %v4197_v50 }
 0x108   : > { %2009 = vmatprep.mubr.bf16.mxu0 %v4198_v51  ;;  %3890 = vmatprep.mubr.msk.bf16.mxu1 %vm1592_vm0, %v4200_v52 }
 0x10f   : > { %2010 = vmatmul.mubr.bf16.gmra.mrb[96].mxu0 %v4201_v53  ;;  %3891 = vmatmul.mubr.msk.bf16.gmra.mrb[96].mxu1 %vm1592_vm0, %v4202_v54  ;;  %v4236_v53 = vld [vmem:[%s4410_s30 + $0x2e8] ss:$12 sps:$4 sm:$0xff]   ;;  %v4237_v54 = vld [vmem:[%s4410_s30 + $0x2f0] ss:$12 sps:$4 sm:$0xff]  }
 0x110   : > { %2017 = vmatprep.mubr.bf16.mxu0 %v4203_v55  ;;  %3894 = vmatprep.mubr.msk.bf16.mxu1 %vm1592_vm0, %v4205_v56 }
 0x117   : > { %2018 = vmatmul.mubr.bf16.gmra.mrb[100].mxu0 %v4206_v57  ;;  %3895 = vmatmul.mubr.msk.bf16.gmra.mrb[100].mxu1 %vm1592_vm0, %v4207_v58  ;;  %v4238_v57 = vld [vmem:[%s4410_s30 + $0x304] ss:$12 sps:$4 sm:$0xff]   ;;  %v4240_v58 = vld [vmem:[%s4410_s30 + $0x308] ss:$12 sps:$4 sm:$0xff]  }
 0x118   : > { %2025 = vmatprep.mubr.bf16.mxu0 %v4208_v59  ;;  %3898 = vmatprep.mubr.msk.bf16.mxu1 %vm1592_vm0, %v4210_v60 }
 0x11f   : > { %2026 = vmatmul.mubr.bf16.gmra.mrb[104].mxu0 %v4211_v61  ;;  %3899 = vmatmul.mubr.msk.bf16.gmra.mrb[104].mxu1 %vm1592_vm0, %v4212_v62 }
 0x120   : > { %2033 = vmatprep.mubr.bf16.mxu0 %v4213_v63  ;;  %3902 = vmatprep.mubr.msk.bf16.mxu1 %vm1592_vm0, %v4215_v0 }
 0x122   : > { %v4608_v1 = vpop.f32.mrb[0].mxu0  ;;  %v4610_v2 = vpop.f32.mrb[0].mxu1 }
 0x123   : > { %v1821_v3 = vpop.f32.mrb[1].mxu0  ;;  %v2205_v4 = vpop.f32.mrb[1].mxu1 }
 0x124   : > { %v4614_v7 = vpop.f32.mrb[2].mxu0  ;;  %v4616_v8 = vpop.f32.mrb[2].mxu1  ;;  %v4241_v3 = vld [vmem:[%s4410_s30 + $0x300] ss:$12 sps:$4 sm:$0xff]  }
 0x125   : > { %v1824_v11 = vpop.f32.mrb[3].mxu0  ;;  %v2208_v12 = vpop.f32.mrb[3].mxu1  ;;  %v4242_v4 = vld [vmem:[%s4410_s30 + $0x320] ss:$12 sps:$4 sm:$0xff]  }
 0x127   : > { %2034 = vmatmul.mubr.bf16.gmra.mrb[108].mxu0 %v4216_v5  ;;  %3903 = vmatmul.mubr.msk.bf16.gmra.mrb[108].mxu1 %vm1592_vm0, %v4217_v6 }
 0x128   : > { %2041 = vmatprep.mubr.bf16.mxu0 %v4218_v9  ;;  %3906 = vmatprep.mubr.msk.bf16.mxu1 %vm1592_vm0, %v4220_v10  ;;  %v4243_v9 = vld [vmem:[%s4410_s30 + $0x31c] ss:$12 sps:$4 sm:$0xff]   ;;  %v4245_v10 = vld [vmem:[%s4410_s30 + $0x338] ss:$12 sps:$4 sm:$0xff]  }
 0x12a   : > { %v4622_v13 = vpop.f32.mrb[4].mxu0  ;;  %v4624_v14 = vpop.f32.mrb[4].mxu1 }
 0x12b   : > { %v1829_v15 = vpop.f32.mrb[5].mxu0  ;;  %v2213_v16 = vpop.f32.mrb[5].mxu1 }
 0x12c   : > { %v4628_v19 = vpop.f32.mrb[6].mxu0  ;;  %v4630_v20 = vpop.f32.mrb[6].mxu1 }
 0x12d   : > { %v1832_v23 = vpop.f32.mrb[7].mxu0  ;;  %v2216_v24 = vpop.f32.mrb[7].mxu1 }
 0x12f   : > { %2042 = vmatmul.mubr.bf16.gmra.mrb[112].mxu0 %v4221_v17  ;;  %3907 = vmatmul.mubr.msk.bf16.gmra.mrb[112].mxu1 %vm1592_vm0, %v4222_v18 }
 0x130   : > { %2049 = vmatprep.mubr.bf16.mxu0 %v4223_v21  ;;  %3910 = vmatprep.mubr.msk.bf16.mxu1 %vm1592_vm0, %v4225_v22  ;;  %v4246_v21 = vld [vmem:[%s4410_s30 + $0x318] ss:$12 sps:$4 sm:$0xff]   ;;  %v4247_v22 = vld [vmem:[%s4410_s30 + $0x350] ss:$12 sps:$4 sm:$0xff]  }
 0x132   : > { %v4636_v25 = vpop.f32.mrb[8].mxu0  ;;  %v4638_v26 = vpop.f32.mrb[8].mxu1 }
 0x133   : > { %v1837_v27 = vpop.f32.mrb[9].mxu0  ;;  %v2221_v28 = vpop.f32.mrb[9].mxu1 }
 0x134   : > { %v4642_v31 = vpop.f32.mrb[10].mxu0  ;;  %v4644_v32 = vpop.f32.mrb[10].mxu1  ;;  %v4248_v27 = vld [vmem:[%s4410_s30 + $0x334] ss:$12 sps:$4 sm:$0xff]  }
 0x135   : > { %v1840_v35 = vpop.f32.mrb[11].mxu0  ;;  %v2224_v36 = vpop.f32.mrb[11].mxu1  ;;  %v4250_v28 = vld [vmem:[%s4410_s30 + $0x368] ss:$12 sps:$4 sm:$0xff]  }
 0x137   : > { %2050 = vmatmul.mubr.bf16.gmra.mrb[116].mxu0 %v4226_v29  ;;  %3911 = vmatmul.mubr.msk.bf16.gmra.mrb[116].mxu1 %vm1592_vm0, %v4227_v30 }
 0x138   : > { %2057 = vmatprep.mubr.bf16.mxu0 %v4228_v33  ;;  %3914 = vmatprep.mubr.msk.bf16.mxu1 %vm1592_vm0, %v4230_v34 }
 0x13a   : > { %v4650_v37 = vpop.f32.mrb[12].mxu0  ;;  %v4652_v38 = vpop.f32.mrb[12].mxu1 }
 0x13b   : > { %v1845_v39 = vpop.f32.mrb[13].mxu0  ;;  %v2229_v40 = vpop.f32.mrb[13].mxu1 }
 0x13c   : > { %v4656_v43 = vpop.f32.mrb[14].mxu0  ;;  %v4658_v44 = vpop.f32.mrb[14].mxu1  ;;  %v4251_v39 = vld [vmem:[%s4410_s30 + $0x330] ss:$12 sps:$4 sm:$0xff]   ;;  %v4252_v40 = vld [vmem:[%s4410_s30 + $0x380] ss:$12 sps:$4 sm:$0xff]  }
 0x13d   : > { %v1848_v47 = vpop.f32.mrb[15].mxu0  ;;  %v2232_v48 = vpop.f32.mrb[15].mxu1 }
 0x13f   : > { %2058 = vmatmul.mubr.bf16.gmra.mrb[120].mxu0 %v4231_v41  ;;  %3915 = vmatmul.mubr.msk.bf16.gmra.mrb[120].mxu1 %vm1592_vm0, %v4232_v42 }
 0x140   : > { %2065 = vmatprep.mubr.bf16.mxu0 %v4233_v45  ;;  %3918 = vmatprep.mubr.msk.bf16.mxu1 %vm1592_vm0, %v4235_v46  ;;  %v4253_v45 = vld [vmem:[%s4410_s30 + $0x34c] ss:$12 sps:$4 sm:$0xff]  }
 0x141   : > { %v4255_v46 = vld [vmem:[%s4410_s30 + $0x398] ss:$12 sps:$4 sm:$0xff]  }
 0x142   : > { %v4664_v49 = vpop.f32.mrb[16].mxu0  ;;  %v4666_v50 = vpop.f32.mrb[16].mxu1 }
 0x143   : > { %v1853_v51 = vpop.f32.mrb[17].mxu0  ;;  %v2237_v52 = vpop.f32.mrb[17].mxu1 }
 0x144   : > { %v4670_v55 = vpop.f32.mrb[18].mxu0  ;;  %v4672_v56 = vpop.f32.mrb[18].mxu1 }
 0x145   : > { %v1856_v59 = vpop.f32.mrb[19].mxu0  ;;  %v2240_v60 = vpop.f32.mrb[19].mxu1 }
 0x147   : > { %2066 = vmatmul.mubr.bf16.gmra.mrb[124].mxu0 %v4236_v53  ;;  %3919 = vmatmul.mubr.msk.bf16.gmra.mrb[124].mxu1 %vm1592_vm0, %v4237_v54 }
 0x148   : > { %2073 = vmatprep.mubr.bf16.mxu0 %v4238_v57  ;;  %3922 = vmatprep.mubr.msk.bf16.mxu1 %vm1592_vm0, %v4240_v58  ;;  %v4256_v57 = vld [vmem:[%s4410_s30 + $0x348] ss:$12 sps:$4 sm:$0xff]   ;;  %v4257_v58 = vld [vmem:[%s4410_s30 + $0x3b0] ss:$12 sps:$4 sm:$0xff]  }
 0x14a   : > { %v4678_v61 = vpop.f32.mrb[20].mxu0  ;;  %v4680_v62 = vpop.f32.mrb[20].mxu1 }
 0x14b   : > { %v1861_v63 = vpop.f32.mrb[21].mxu0  ;;  %v2245_v0 = vpop.f32.mrb[21].mxu1 }
 0x14c   : > { %v4684_v5 = vpop.f32.mrb[22].mxu0  ;;  %v4686_v6 = vpop.f32.mrb[22].mxu1  ;;  %v4258_v63 = vld [vmem:[%s4410_s30 + $0x364] ss:$12 sps:$4 sm:$0xff]   ;;  %v4260_v0 = vld [vmem:[%s4410_s30 + $0x3c8] ss:$12 sps:$4 sm:$0xff]  }
 0x14d   : > { %v1864_v11 = vpop.f32.mrb[23].mxu0  ;;  %v2248_v12 = vpop.f32.mrb[23].mxu1 }
 0x14f   : > { %2074 = vmatmul.mubr.bf16.gmra.mrb[128].mxu0 %v4241_v3  ;;  %3923 = vmatmul.mubr.msk.bf16.gmra.mrb[128].mxu1 %vm1592_vm0, %v4242_v4 }
 0x150   : > { %2081 = vmatprep.mubr.bf16.mxu0 %v4243_v9  ;;  %3926 = vmatprep.mubr.msk.bf16.mxu1 %vm1592_vm0, %v4245_v10 }
 0x152   : > { %v4692_v15 = vpop.f32.mrb[24].mxu0  ;;  %v4694_v16 = vpop.f32.mrb[24].mxu1 }
 0x153   : > { %5459 = vst [vmem:[#allocation2_spill] sm:$0xff] %v4694_v16  ;;  %v1869_v17 = vpop.f32.mrb[25].mxu0  ;;  %v2253_v18 = vpop.f32.mrb[25].mxu1 }
 0x154   : > { %v4698_v23 = vpop.f32.mrb[26].mxu0  ;;  %v4700_v24 = vpop.f32.mrb[26].mxu1  ;;  %v4261_v17 = vld [vmem:[%s4410_s30 + $0x360] ss:$12 sps:$4 sm:$0xff]  }
 0x155   : > { %5460 = vst [vmem:[#allocation3_spill] sm:$0xff] %v4700_v24  ;;  %v1872_v29 = vpop.f32.mrb[27].mxu0  ;;  %v2256_v30 = vpop.f32.mrb[27].mxu1  ;;  %v4262_v18 = vld [vmem:[%s4410_s30 + $0x3e0] ss:$12 sps:$4 sm:$0xff]  }
 0x156   : > { %v4298_v24 = vld [vmem:[%s4410_s30 + $0x424] ss:$12 sps:$4 sm:$0xff]  }
 0x157   : > { %2082 = vmatmul.mubr.bf16.gmra.mrb[132].mxu0 %v4246_v21  ;;  %3927 = vmatmul.mubr.msk.bf16.gmra.mrb[132].mxu1 %vm1592_vm0, %v4247_v22 }
 0x158   : > { %2089 = vmatprep.mubr.bf16.mxu0 %v4248_v27  ;;  %3930 = vmatprep.mubr.msk.bf16.mxu1 %vm1592_vm0, %v4250_v28  ;;  %v4263_v27 = vld [vmem:[%s4410_s30 + $0x37c] ss:$12 sps:$4 sm:$0xff]   ;;  %v4265_v28 = vld [vmem:[%s4410_s30 + $0x3f8] ss:$12 sps:$4 sm:$0xff]  }
 0x15a   : > { %v4706_v33 = vpop.f32.mrb[28].mxu0  ;;  %v4708_v34 = vpop.f32.mrb[28].mxu1 }
 0x15b   : > { %5461 = vst [vmem:[#allocation4_spill] sm:$0xff] %v4708_v34  ;;  %v1877_v35 = vpop.f32.mrb[29].mxu0  ;;  %v2261_v36 = vpop.f32.mrb[29].mxu1 }
 0x15c   : > { %v4712_v41 = vpop.f32.mrb[30].mxu0  ;;  %v4714_v42 = vpop.f32.mrb[30].mxu1 }
 0x15d   : > { %5462 = vst [vmem:[#allocation5_spill] sm:$0xff] %v4714_v42  ;;  %v1880_v47 = vpop.f32.mrb[31].mxu0  ;;  %v2264_v48 = vpop.f32.mrb[31].mxu1 }
 0x15f   : > { %2090 = vmatmul.mubr.bf16.gmra.mrb[136].mxu0 %v4251_v39  ;;  %3931 = vmatmul.mubr.msk.bf16.gmra.mrb[136].mxu1 %vm1592_vm0, %v4252_v40 }
 0x160   : > { %2097 = vmatprep.mubr.bf16.mxu0 %v4253_v45  ;;  %3934 = vmatprep.mubr.msk.bf16.mxu1 %vm1592_vm0, %v4255_v46  ;;  %v4266_v45 = vld [vmem:[%s4410_s30 + $0x378] ss:$12 sps:$4 sm:$0xff]   ;;  %v4267_v46 = vld [vmem:[%s4410_s30 + $0x410] ss:$12 sps:$4 sm:$0xff]  }
 0x162   : > { %v4720_v51 = vpop.f32.mrb[32].mxu0  ;;  %v4722_v52 = vpop.f32.mrb[32].mxu1 }
 0x163   : > { %5463 = vst [vmem:[#allocation6_spill] sm:$0xff] %v4722_v52  ;;  %v1885_v53 = vpop.f32.mrb[33].mxu0  ;;  %v2269_v54 = vpop.f32.mrb[33].mxu1  ;;  %v4296_v52 = vld [vmem:[%s4410_s30 + $0x408] ss:$12 sps:$4 sm:$0xff]  }
 0x164   : > { %v4726_v59 = vpop.f32.mrb[34].mxu0  ;;  %v4728_v60 = vpop.f32.mrb[34].mxu1  ;;  %v4268_v53 = vld [vmem:[%s4410_s30 + $0x394] ss:$12 sps:$4 sm:$0xff]  }
 0x165   : > { %5464 = vst [vmem:[#allocation7_spill] sm:$0xff] %v4728_v60  ;;  %v1888_v3 = vpop.f32.mrb[35].mxu0  ;;  %v2272_v4 = vpop.f32.mrb[35].mxu1  ;;  %v4270_v54 = vld [vmem:[%s4410_s30 + $0x428] ss:$12 sps:$4 sm:$0xff]  }
 0x166   : > { %v4293_v60 = vld [vmem:[%s4410_s30 + $0x40c] ss:$12 sps:$4 sm:$0xff]  }
 0x167   : > { %2098 = vmatmul.mubr.bf16.gmra.mrb[140].mxu0 %v4256_v57  ;;  %3935 = vmatmul.mubr.msk.bf16.gmra.mrb[140].mxu1 %vm1592_vm0, %v4257_v58 }
 0x168   : > { %2105 = vmatprep.mubr.bf16.mxu0 %v4258_v63  ;;  %3938 = vmatprep.mubr.msk.bf16.mxu1 %vm1592_vm0, %v4260_v0 }
 0x16a   : > { %v4734_v9 = vpop.f32.mrb[36].mxu0  ;;  %v4736_v10 = vpop.f32.mrb[36].mxu1 }
 0x16b   : > { %5465 = vst [vmem:[#allocation8_spill] sm:$0xff] %v4736_v10  ;;  %v1893_v11 = vpop.f32.mrb[37].mxu0  ;;  %v2277_v12 = vpop.f32.mrb[37].mxu1 }
 0x16c   : > { %v4740_v21 = vpop.f32.mrb[38].mxu0  ;;  %v4742_v22 = vpop.f32.mrb[38].mxu1  ;;  %v4271_v11 = vld [vmem:[%s4410_s30 + $0x390] ss:$12 sps:$4 sm:$0xff]   ;;  %v4272_v12 = vld [vmem:[%s4410_s30 + $0x440] ss:$12 sps:$4 sm:$0xff]  }
 0x16d   : > { %5466 = vst [vmem:[#allocation9_spill] sm:$0xff] %v4742_v22  ;;  %v1896_v29 = vpop.f32.mrb[39].mxu0  ;;  %v2280_v30 = vpop.f32.mrb[39].mxu1 }
 0x16f   : > { %2106 = vmatmul.mubr.bf16.gmra.mrb[144].mxu0 %v4261_v17  ;;  %3939 = vmatmul.mubr.msk.bf16.gmra.mrb[144].mxu1 %vm1592_vm0, %v4262_v18 }
 0x170   : > { %2113 = vmatprep.mubr.bf16.mxu0 %v4263_v27  ;;  %3942 = vmatprep.mubr.msk.bf16.mxu1 %vm1592_vm0, %v4265_v28  ;;  %v4273_v27 = vld [vmem:[%s4410_s30 + $0x3ac] ss:$12 sps:$4 sm:$0xff]  }
 0x171   : > { %v4275_v28 = vld [vmem:[%s4410_s30 + $0x458] ss:$12 sps:$4 sm:$0xff]  }
 0x172   : > { %v4748_v35 = vpop.f32.mrb[40].mxu0  ;;  %v4750_v36 = vpop.f32.mrb[40].mxu1 }
 0x173   : > { %5467 = vst [vmem:[#allocation10_spill] sm:$0xff] %v4750_v36  ;;  %v1901_v39 = vpop.f32.mrb[41].mxu0  ;;  %v2285_v40 = vpop.f32.mrb[41].mxu1  ;;  %v4291_v36 = vld [vmem:[%s4410_s30 + $0x3f0] ss:$12 sps:$4 sm:$0xff]  }
 0x174   : > { %v4754_v47 = vpop.f32.mrb[42].mxu0  ;;  %v4756_v48 = vpop.f32.mrb[42].mxu1 }
 0x175   : > { %5468 = vst [vmem:[#allocation11_spill] sm:$0xff] %v4756_v48  ;;  %v1904_v57 = vpop.f32.mrb[43].mxu0  ;;  %v2288_v58 = vpop.f32.mrb[43].mxu1 }
 0x177   : > { %2114 = vmatmul.mubr.bf16.gmra.mrb[148].mxu0 %v4266_v45  ;;  %3943 = vmatmul.mubr.msk.bf16.gmra.mrb[148].mxu1 %vm1592_vm0, %v4267_v46 }
 0x178   : > { %2121 = vmatprep.mubr.bf16.mxu0 %v4268_v53  ;;  %3946 = vmatprep.mubr.msk.bf16.mxu1 %vm1592_vm0, %v4270_v54  ;;  %v4276_v53 = vld [vmem:[%s4410_s30 + $0x3a8] ss:$12 sps:$4 sm:$0xff]   ;;  %v4277_v54 = vld [vmem:[%s4410_s30 + $0x470] ss:$12 sps:$4 sm:$0xff]  }
 0x17a   : > { %v4762_v63 = vpop.f32.mrb[44].mxu0  ;;  %v4764_v0 = vpop.f32.mrb[44].mxu1 }
 0x17b   : > { %5469 = vst [vmem:[#allocation12_spill] sm:$0xff] %v4764_v0  ;;  %v1909_v3 = vpop.f32.mrb[45].mxu0  ;;  %v2293_v4 = vpop.f32.mrb[45].mxu1  ;;  %v4292_v0 = vld [vmem:[%s4410_s30 + $0x500] ss:$12 sps:$4 sm:$0xff]  }
 0x17c   : > { %v4768_v17 = vpop.f32.mrb[46].mxu0  ;;  %v4770_v18 = vpop.f32.mrb[46].mxu1  ;;  %v4278_v3 = vld [vmem:[%s4410_s30 + $0x3c4] ss:$12 sps:$4 sm:$0xff]   ;;  %v4280_v4 = vld [vmem:[%s4410_s30 + $0x488] ss:$12 sps:$4 sm:$0xff]  }
 0x17d   : > { %5470 = vst [vmem:[#allocation13_spill] sm:$0xff] %v4770_v18  ;;  %v1912_v29 = vpop.f32.mrb[47].mxu0  ;;  %v2296_v30 = vpop.f32.mrb[47].mxu1 }
 0x17f   : > { %2122 = vmatmul.mubr.bf16.gmra.mrb[152].mxu0 %v4271_v11  ;;  %3947 = vmatmul.mubr.msk.bf16.gmra.mrb[152].mxu1 %vm1592_vm0, %v4272_v12 }
 0x180   : > { %2129 = vmatprep.mubr.bf16.mxu0 %v4273_v27  ;;  %3950 = vmatprep.mubr.msk.bf16.mxu1 %vm1592_vm0, %v4275_v28 }
 0x182   : > { %v4776_v39 = vpop.f32.mrb[48].mxu0  ;;  %v4778_v40 = vpop.f32.mrb[48].mxu1 }
 0x183   : > { %5471 = vst [vmem:[#allocation14_spill] sm:$0xff] %v4778_v40  ;;  %v1917_v45 = vpop.f32.mrb[49].mxu0  ;;  %v2301_v46 = vpop.f32.mrb[49].mxu1 }
 0x184   : > { %v4782_v57 = vpop.f32.mrb[50].mxu0  ;;  %v4784_v58 = vpop.f32.mrb[50].mxu1  ;;  %v4281_v45 = vld [vmem:[%s4410_s30 + $0x3c0] ss:$12 sps:$4 sm:$0xff]  }
 0x185   : > { %5472 = vst [vmem:[#allocation15_spill] sm:$0xff] %v4784_v58  ;;  %v1920_v11 = vpop.f32.mrb[51].mxu0  ;;  %v2304_v12 = vpop.f32.mrb[51].mxu1  ;;  %v4282_v46 = vld [vmem:[%s4410_s30 + $0x4a0] ss:$12 sps:$4 sm:$0xff]  }
 0x187   : > { %2130 = vmatmul.mubr.bf16.gmra.mrb[156].mxu0 %v4276_v53  ;;  %3951 = vmatmul.mubr.msk.bf16.gmra.mrb[156].mxu1 %vm1592_vm0, %v4277_v54  ;;  %v4283_v53 = vld [vmem:[%s4410_s30 + $0x3dc] ss:$12 sps:$4 sm:$0xff]   ;;  %v4285_v54 = vld [vmem:[%s4410_s30 + $0x4b8] ss:$12 sps:$4 sm:$0xff]  }
 0x188   : > { %2137 = vmatprep.mubr.bf16.mxu0 %v4278_v3  ;;  %3954 = vmatprep.mubr.msk.bf16.mxu1 %vm1592_vm0, %v4280_v4 }
 0x18a   : > { %v4790_v27 = vpop.f32.mrb[52].mxu0  ;;  %v4792_v28 = vpop.f32.mrb[52].mxu1 }
 0x18b   : > { %5473 = vst [vmem:[#allocation16_spill] sm:$0xff] %v4792_v28  ;;  %v1925_v29 = vpop.f32.mrb[53].mxu0  ;;  %v2309_v30 = vpop.f32.mrb[53].mxu1  ;;  %v4286_v28 = vld [vmem:[%s4410_s30 + $0x3d8] ss:$12 sps:$4 sm:$0xff]  }
 0x18c   : > { %v4796_v58 = vpop.f32.mrb[54].mxu0  ;;  %v4798_v11 = vpop.f32.mrb[54].mxu1 }
 0x18d   : > { %5474 = vst [vmem:[#allocation17_spill] sm:$0xff] %v4798_v11  ;;  %v1928_v3 = vpop.f32.mrb[55].mxu0  ;;  %v2312_v4 = vpop.f32.mrb[55].mxu1  ;;  %v4287_v11 = vld [vmem:[%s4410_s30 + $0x4d0] ss:$12 sps:$4 sm:$0xff]  }
 0x18e   : > { %v4290_v3 = vld [vmem:[%s4410_s30 + $0x4e8] ss:$12 sps:$4 sm:$0xff]  }
 0x18f   : > { %2138 = vmatmul.mubr.bf16.gmra.mrb[160].mxu0 %v4281_v45  ;;  %3955 = vmatmul.mubr.msk.bf16.gmra.mrb[160].mxu1 %vm1592_vm0, %v4282_v46  ;;  %v4288_v45 = vld [vmem:[%s4410_s30 + $0x3f4] ss:$12 sps:$4 sm:$0xff]  }
 0x190   : > { %2145 = vmatprep.mubr.bf16.mxu0 %v4283_v53  ;;  %3958 = vmatprep.mubr.msk.bf16.mxu1 %vm1592_vm0, %v4285_v54  ;;  %v2876_v54 = vlaneseq }
 0x192   : > { %v4804_v12 = vpop.f32.mrb[56].mxu0  ;;  %v4806_v29 = vpop.f32.mrb[56].mxu1 }
 0x193   : > { %5475 = vst [vmem:[#allocation18_spill] sm:$0xff] %v4806_v29  ;;  %v1933_v30 = vpop.f32.mrb[57].mxu0  ;;  %v2317_v40 = vpop.f32.mrb[57].mxu1 }
 0x194   : > { %v4810_v48 = vpop.f32.mrb[58].mxu0  ;;  %v4812_v18 = vpop.f32.mrb[58].mxu1  ;;  %v2877_v40 = vshrl.u32 %v2876_v54, 7 }
 0x195   : > { %5476 = vst [vmem:[#allocation19_spill] sm:$0xff] %v4812_v18  ;;  %v1936_v46 = vpop.f32.mrb[59].mxu0  ;;  %v2320_v53 = vpop.f32.mrb[59].mxu1 }
 0x197   : > { %2146 = vmatmul.mubr.bf16.gmra.mrb[164].mxu0 %v4286_v28  ;;  %3959 = vmatmul.mubr.msk.bf16.gmra.mrb[164].mxu1 %vm1592_vm0, %v4287_v11  ;;  %v4295_v28 = vld [vmem:[%s4410_s30 + $0x518] ss:$12 sps:$4 sm:$0xff]  }
 0x198   : > { %2153 = vmatprep.mubr.bf16.mxu0 %v4288_v45  ;;  %3962 = vmatprep.mubr.msk.bf16.mxu1 %vm1592_vm0, %v4290_v3  ;;  %v2878_v45 = vsub.s32 0, %v2877_v40  ;;  %v2875_v3 = vld [vmem:[%s5457_s2] sm:$0x3] }
 0x19a   : > { %v4818_v4 = vpop.f32.mrb[60].mxu0  ;;  %v4820_v30 = vpop.f32.mrb[60].mxu1 }
 0x19b   : > { %5477 = vst [vmem:[#allocation20_spill] sm:$0xff] %v4820_v30  ;;  %v1941_v18 = vpop.f32.mrb[61].mxu0  ;;  %v2325_v29 = vpop.f32.mrb[61].mxu1 }
 0x19c   : > { %v4824_v46 = vpop.f32.mrb[62].mxu0  ;;  %v4826_v53 = vpop.f32.mrb[62].mxu1  ;;  %v3010_v18 = vsub.s32 1, %v2877_v40  ;;  %v4835_v29 = vrot.slane %v2875_v3, %v2878_v45 }
 0x19d   : > { %5478 = vst [vmem:[#allocation21_spill] sm:$0xff] %v4826_v53  ;;  %v1944_v22 = vpop.f32.mrb[63].mxu0  ;;  %v2328_v11 = vpop.f32.mrb[63].mxu1 }
 0x19e   : > { %v4840_v53 = vrot.slane %v2875_v3, %v3010_v18 }
 0x19f   : > { %2154 = vmatmul.mubr.bf16.gmra.mrb[168].mxu0 %v4291_v36  ;;  %3963 = vmatmul.mubr.msk.bf16.gmra.mrb[168].mxu1 %vm1592_vm0, %v4292_v0  ;;  %v4297_v0 = vld [vmem:[%s4410_s30 + $0x530] ss:$12 sps:$4 sm:$0xff]  }
 0x1a0   : > { %2161 = vmatprep.mubr.bf16.mxu0 %v4293_v60  ;;  %3966 = vmatprep.mubr.msk.bf16.mxu1 %vm1592_vm0, %v4295_v28  ;;  %v4300_v28 = vld [vmem:[%s4410_s30 + $0x548] ss:$12 sps:$4 sm:$0xff]  }
 0x1a2   : > { %v4837_v22 = vpop.f32.mrb[64].mxu0  ;;  %v3860_v54 = vpop.f32.mrb[64].mxu1 }
 0x1a3   : > { %v2373_v11 = vadd.f32 %v3860_v54, %v4622_v13  ;;  %v1949_v30 = vpop.f32.mrb[65].mxu0  ;;  %v2364_v36 = vpop.f32.mrb[65].mxu1 }
 0x1a4   : > { %v2365_v40 = vadd.f32 %v2364_v36, %v4608_v1  ;;  %v4845_v10 = vpop.f32.mrb[66].mxu0  ;;  %v3861_v60 = vpop.f32.mrb[66].mxu1 }
 0x1a5   : > { %v2882_v45 = vmul.f32 %v4835_v29, %v2373_v11  ;;  %v2376_v42 = vadd.f32 %v3861_v60, %v4628_v19  ;;  %v1952_v13 = vpop.f32.mrb[67].mxu0  ;;  %v2367_v3 = vpop.f32.mrb[67].mxu1 }
 0x1a6   : > { %v2880_v30 = vmul.f32 %v4835_v29, %v2365_v40  ;;  %v2368_v18 = vadd.f32 %v2367_v3, %v4614_v7 }
 0x1a7   : > { %v3014_v54 = vadd.f32 %v4840_v53, %v2882_v45  ;;  %v2883_v1 = vmul.f32 %v4835_v29, %v2376_v42  ;;  %2162 = vmatmul.mubr.bf16.gmra.mrb[172].mxu0 %v4296_v52  ;;  %3967 = vmatmul.mubr.msk.bf16.gmra.mrb[172].mxu1 %vm1592_vm0, %v4297_v0  ;;  %v4301_v52 = vld [vmem:[%s4410_s30 + $0x420] ss:$12 sps:$4 sm:$0xff]  }
 0x1a8   : > { %v3012_v19 = vadd.f32 %v4840_v53, %v2880_v30  ;;  %v2881_v11 = vmul.f32 %v4835_v29, %v2368_v18  ;;  %2169 = vmatprep.mubr.bf16.mxu0 %v4298_v24  ;;  %3970 = vmatprep.mubr.msk.bf16.mxu1 %vm1592_vm0, %v4300_v28  ;;  %v4302_v45 = vld [vmem:[%s4410_s30 + $0x560] ss:$12 sps:$4 sm:$0xff]   ;;  %v4303_v30 = vld [vmem:[%s4410_s30 + $0x43c] ss:$12 sps:$4 sm:$0xff]  }
 0x1a9   : > { %v3142_v7 = vmax.f32 %v3014_v54, 0.0  ;;  %v3015_v42 = vadd.f32 %v4840_v53, %v2883_v1 }
 0x1aa   : > { %v3140_v36 = vmax.f32 %v3012_v19, 0.0  ;;  %v3013_v0 = vadd.f32 %v4840_v53, %v2881_v11  ;;  %v4868_v40 = vpop.f32.mrb[68].mxu0  ;;  %v3864_v60 = vpop.f32.mrb[68].mxu1  ;;  %v4305_v11 = vld [vmem:[%s4410_s30 + $0x578] ss:$12 sps:$4 sm:$0xff]  }
 0x1ab   : > { %3270 = vst [vmem:[%s4860_s12 + $0x10] sm:$0xff] %v3142_v7  ;;  %v3143_v13 = vmax.f32 %v3015_v42, 0.0  ;;  %v2389_v24 = vadd.f32 %v3864_v60, %v4650_v37  ;;  %v1957_v3 = vpop.f32.mrb[69].mxu0  ;;  %v2380_v28 = vpop.f32.mrb[69].mxu1 }
 0x1ac   : > { %3268 = vst [vmem:[%s4860_s12] sm:$0xff] %v3140_v36  ;;  %v3141_v18 = vmax.f32 %v3013_v0, 0.0  ;;  %v2381_v54 = vadd.f32 %v2380_v28, %v4636_v25  ;;  %v4876_v1 = vpop.f32.mrb[70].mxu0  ;;  %v3865_v19 = vpop.f32.mrb[70].mxu1  ;;  %v4307_v3 = vld [vmem:[%s4410_s30 + $0x590] ss:$12 sps:$4 sm:$0xff]  }
 0x1ad   : > { %3271 = vst [vmem:[%s4860_s12 + $0x18] sm:$0xff] %v3143_v13  ;;  %v2886_v16 = vmul.f32 %v4835_v29, %v2389_v24  ;;  %v2392_v7 = vadd.f32 %v3865_v19, %v4656_v43  ;;  %v1960_v42 = vpop.f32.mrb[71].mxu0  ;;  %v2383_v34 = vpop.f32.mrb[71].mxu1  ;;  %v4308_v19 = vld [vmem:[%s4410_s30 + $0x454] ss:$12 sps:$4 sm:$0xff]  }
 0x1ae   : > { %3269 = vst [vmem:[%s4860_s12 + $0x8] sm:$0xff] %v3141_v18  ;;  %v2884_v37 = vmul.f32 %v4835_v29, %v2381_v54  ;;  %v2384_v36 = vadd.f32 %v2383_v34, %v4642_v31  ;;  %v4306_v34 = vld [vmem:[%s4410_s30 + $0x438] ss:$12 sps:$4 sm:$0xff]  }
 0x1af   : > { %v3018_v25 = vadd.f32 %v4840_v53, %v2886_v16  ;;  %v2887_v0 = vmul.f32 %v4835_v29, %v2392_v7  ;;  %2170 = vmatmul.mubr.bf16.gmra.mrb[176].mxu0 %v4301_v52  ;;  %3971 = vmatmul.mubr.msk.bf16.gmra.mrb[176].mxu1 %vm1592_vm0, %v4302_v45 }
 0x1b0   : > { %v3016_v60 = vadd.f32 %v4840_v53, %v2884_v37  ;;  %v2885_v43 = vmul.f32 %v4835_v29, %v2384_v36  ;;  %2177 = vmatprep.mubr.bf16.mxu0 %v4303_v30  ;;  %3974 = vmatprep.mubr.msk.bf16.mxu1 %vm1592_vm0, %v4305_v11  ;;  %v4310_v36 = vld [vmem:[%s4410_s30 + $0x5a8] ss:$12 sps:$4 sm:$0xff]  }
 0x1b1   : > { %v3146_v13 = vmax.f32 %v3018_v25, 0.0  ;;  %v3019_v31 = vadd.f32 %v4840_v53, %v2887_v0 }
 0x1b2   : > { %v3144_v16 = vmax.f32 %v3016_v60, 0.0  ;;  %v3017_v24 = vadd.f32 %v4840_v53, %v2885_v43  ;;  %v4894_v52 = vpop.f32.mrb[72].mxu0  ;;  %v3868_v45 = vpop.f32.mrb[72].mxu1 }
 0x1b3   : > { %3274 = vst [vmem:[%s4860_s12 + $0x30] sm:$0xff] %v3146_v13  ;;  %v3147_v28 = vmax.f32 %v3019_v31, 0.0  ;;  %v2405_v30 = vadd.f32 %v3868_v45, %v4678_v61  ;;  %v1965_v18 = vpop.f32.mrb[73].mxu0  ;;  %v2396_v54 = vpop.f32.mrb[73].mxu1  ;;  %v4311_v45 = vld [vmem:[%s4410_s30 + $0x450] ss:$12 sps:$4 sm:$0xff]  }
 0x1b4   : > { %3272 = vst [vmem:[%s4860_s12 + $0x20] sm:$0xff] %v3144_v16  ;;  %v3145_v11 = vmax.f32 %v3017_v24, 0.0  ;;  %v2397_v7 = vadd.f32 %v2396_v54, %v4664_v49  ;;  %v4902_v42 = vpop.f32.mrb[74].mxu0  ;;  %v3869_v37 = vpop.f32.mrb[74].mxu1  ;;  %v4312_v18 = vld [vmem:[%s4410_s30 + $0x5c0] ss:$12 sps:$4 sm:$0xff]  }
 0x1b5   : > { %3275 = vst [vmem:[%s4860_s12 + $0x38] sm:$0xff] %v3147_v28  ;;  %v2890_v25 = vmul.f32 %v4835_v29, %v2405_v30  ;;  %v2408_v0 = vadd.f32 %v3869_v37, %v4684_v5  ;;  %v1968_v60 = vpop.f32.mrb[75].mxu0  ;;  %v2399_v43 = vpop.f32.mrb[75].mxu1  ;;  %v4313_v37 = vld [vmem:[%s4410_s30 + $0x46c] ss:$12 sps:$4 sm:$0xff]  }
 0x1b6   : > { %3273 = vst [vmem:[%s4860_s12 + $0x28] sm:$0xff] %v3145_v11  ;;  %v2888_v61 = vmul.f32 %v4835_v29, %v2397_v7  ;;  %v2400_v13 = vadd.f32 %v2399_v43, %v4670_v55  ;;  %v4315_v43 = vld [vmem:[%s4410_s30 + $0x5d8] ss:$12 sps:$4 sm:$0xff]  }
 0x1b7   : > { %v3022_v49 = vadd.f32 %v4840_v53, %v2890_v25  ;;  %v2891_v31 = vmul.f32 %v4835_v29, %v2408_v0  ;;  %2178 = vmatmul.mubr.bf16.gmra.mrb[180].mxu0 %v4306_v34  ;;  %3975 = vmatmul.mubr.msk.bf16.gmra.mrb[180].mxu1 %vm1592_vm0, %v4307_v3 }
 0x1b8   : > { %v3020_v16 = vadd.f32 %v4840_v53, %v2888_v61  ;;  %v2889_v5 = vmul.f32 %v4835_v29, %v2400_v13  ;;  %2185 = vmatprep.mubr.bf16.mxu0 %v4308_v19  ;;  %3978 = vmatprep.mubr.msk.bf16.mxu1 %vm1592_vm0, %v4310_v36 }
 0x1b9   : > { %v3150_v24 = vmax.f32 %v3022_v49, 0.0  ;;  %v3023_v55 = vadd.f32 %v4840_v53, %v2891_v31 }
 0x1ba   : > { %v3148_v28 = vmax.f32 %v3020_v16, 0.0  ;;  %v3021_v30 = vadd.f32 %v4840_v53, %v2889_v5  ;;  %v4920_v34 = vpop.f32.mrb[76].mxu0  ;;  %v3872_v3 = vpop.f32.mrb[76].mxu1 }
 0x1bb   : > { %3278 = vst [vmem:[%s4860_s12 + $0x50] sm:$0xff] %v3150_v24  ;;  %v3151_v54 = vmax.f32 %v3023_v55, 0.0  ;;  %v2421_v19 = vadd.f32 %v3872_v3, %v4706_v33  ;;  %v1973_v11 = vpop.f32.mrb[77].mxu0  ;;  %v2412_v7 = vpop.f32.mrb[77].mxu1 }
 0x1bc   : > { %3276 = vst [vmem:[%s4860_s12 + $0x40] sm:$0xff] %v3148_v28  ;;  %v3149_v36 = vmax.f32 %v3021_v30, 0.0  ;;  %v2413_v25 = vadd.f32 %v2412_v7, %v4692_v15  ;;  %v4928_v0 = vpop.f32.mrb[78].mxu0  ;;  %v3873_v60 = vpop.f32.mrb[78].mxu1 }
 0x1bd   : > { %3279 = vst [vmem:[%s4860_s12 + $0x58] sm:$0xff] %v3151_v54  ;;  %v2894_v61 = vmul.f32 %v4835_v29, %v2421_v19  ;;  %v2424_v13 = vadd.f32 %v3873_v60, %v4712_v41  ;;  %v1976_v49 = vpop.f32.mrb[79].mxu0  ;;  %v2415_v31 = vpop.f32.mrb[79].mxu1 }
 0x1be   : > { %3277 = vst [vmem:[%s4860_s12 + $0x48] sm:$0xff] %v3149_v36  ;;  %v2892_v33 = vmul.f32 %v4835_v29, %v2413_v25  ;;  %v2416_v16 = vadd.f32 %v2415_v31, %v4698_v23 }
 0x1bf   : > { %v3026_v15 = vadd.f32 %v4840_v53, %v2894_v61  ;;  %v2895_v5 = vmul.f32 %v4835_v29, %v2424_v13  ;;  %2186 = vmatmul.mubr.bf16.gmra.mrb[184].mxu0 %v4311_v45  ;;  %3979 = vmatmul.mubr.msk.bf16.gmra.mrb[184].mxu1 %vm1592_vm0, %v4312_v18  ;;  %v4316_v18 = vld [vmem:[%s4410_s30 + $0x468] ss:$12 sps:$4 sm:$0xff]  }
 0x1c0   : > { %v3024_v24 = vadd.f32 %v4840_v53, %v2892_v33  ;;  %v2893_v41 = vmul.f32 %v4835_v29, %v2416_v16  ;;  %2193 = vmatprep.mubr.bf16.mxu0 %v4313_v37  ;;  %3982 = vmatprep.mubr.msk.bf16.mxu1 %vm1592_vm0, %v4315_v43  ;;  %v4317_v37 = vld [vmem:[%s4410_s30 + $0x5f0] ss:$12 sps:$4 sm:$0xff]  }
 0x1c1   : > { %v3154_v55 = vmax.f32 %v3026_v15, 0.0  ;;  %v3027_v23 = vadd.f32 %v4840_v53, %v2895_v5 }
 0x1c2   : > { %v3152_v28 = vmax.f32 %v3024_v24, 0.0  ;;  %v3025_v30 = vadd.f32 %v4840_v53, %v2893_v41  ;;  %v4945_v3 = vpop.f32.mrb[80].mxu0  ;;  %v3876_v45 = vpop.f32.mrb[80].mxu1 }
 0x1c3   : > { %3282 = vst [vmem:[%s4860_s12 + $0x70] sm:$0xff] %v3154_v55  ;;  %v3155_v54 = vmax.f32 %v3027_v23, 0.0  ;;  %v2437_v19 = vadd.f32 %v3876_v45, %v4734_v9  ;;  %v1981_v11 = vpop.f32.mrb[81].mxu0  ;;  %v2428_v7 = vpop.f32.mrb[81].mxu1 }
 0x1c4   : > { %3280 = vst [vmem:[%s4860_s12 + $0x60] sm:$0xff] %v3152_v28  ;;  %v3153_v36 = vmax.f32 %v3025_v30, 0.0  ;;  %v2429_v25 = vadd.f32 %v2428_v7, %v4720_v51  ;;  %v4953_v60 = vpop.f32.mrb[82].mxu0  ;;  %v3877_v43 = vpop.f32.mrb[82].mxu1 }
 0x1c5   : > { %3283 = vst [vmem:[%s4860_s12 + $0x78] sm:$0xff] %v3155_v54  ;;  %v2898_v61 = vmul.f32 %v4835_v29, %v2437_v19  ;;  %v2440_v13 = vadd.f32 %v3877_v43, %v4740_v21  ;;  %v1984_v49 = vpop.f32.mrb[83].mxu0  ;;  %v2431_v31 = vpop.f32.mrb[83].mxu1 }
 0x1c6   : > { %3281 = vst [vmem:[%s4860_s12 + $0x68] sm:$0xff] %v3153_v36  ;;  %v2896_v9 = vmul.f32 %v4835_v29, %v2429_v25  ;;  %v2432_v33 = vadd.f32 %v2431_v31, %v4726_v59 }
 0x1c7   : > { %v3030_v16 = vadd.f32 %v4840_v53, %v2898_v61  ;;  %v2899_v51 = vmul.f32 %v4835_v29, %v2440_v13  ;;  %2194 = vmatmul.mubr.bf16.gmra.mrb[188].mxu0 %v4316_v18  ;;  %3983 = vmatmul.mubr.msk.bf16.gmra.mrb[188].mxu1 %vm1592_vm0, %v4317_v37 }
 0x1c8   : > { %v3028_v15 = vadd.f32 %v4840_v53, %v2896_v9  ;;  %v2897_v21 = vmul.f32 %v4835_v29, %v2432_v33 }
 0x1c9   : > { %v3158_v5 = vmax.f32 %v3030_v16, 0.0  ;;  %v3031_v24 = vadd.f32 %v4840_v53, %v2899_v51 }
 0x1ca   : > { %v3156_v41 = vmax.f32 %v3028_v15, 0.0  ;;  %v3029_v55 = vadd.f32 %v4840_v53, %v2897_v21  ;;  %v4968_v59 = vpop.f32.mrb[84].mxu0  ;;  %v3880_v23 = vpop.f32.mrb[84].mxu1 }
 0x1cb   : > { %3286 = vst [vmem:[%s4860_s12 + $0x90] sm:$0xff] %v3158_v5  ;;  %v3159_v28 = vmax.f32 %v3031_v24, 0.0  ;;  %v2453_v30 = vadd.f32 %v3880_v23, %v4762_v63  ;;  %v1989_v45 = vpop.f32.mrb[85].mxu0  ;;  %v2444_v18 = vpop.f32.mrb[85].mxu1 }
 0x1cc   : > { %3284 = vst [vmem:[%s4860_s12 + $0x80] sm:$0xff] %v3156_v41  ;;  %v3157_v54 = vmax.f32 %v3029_v55, 0.0  ;;  %v2445_v19 = vadd.f32 %v2444_v18, %v4748_v35  ;;  %v4974_v11 = vpop.f32.mrb[86].mxu0  ;;  %v3881_v7 = vpop.f32.mrb[86].mxu1 }
 0x1cd   : > { %3287 = vst [vmem:[%s4860_s12 + $0x98] sm:$0xff] %v3159_v28  ;;  %v2902_v37 = vmul.f32 %v4835_v29, %v2453_v30  ;;  %v2456_v36 = vadd.f32 %v3881_v7, %v4768_v17  ;;  %v1992_v25 = vpop.f32.mrb[87].mxu0  ;;  %v2447_v43 = vpop.f32.mrb[87].mxu1 }
 0x1ce   : > { %3285 = vst [vmem:[%s4860_s12 + $0x88] sm:$0xff] %v3157_v54  ;;  %v2900_v63 = vmul.f32 %v4835_v29, %v2445_v19  ;;  %v2448_v61 = vadd.f32 %v2447_v43, %v4754_v47 }
 0x1cf   : > { %v3034_v13 = vadd.f32 %v4840_v53, %v2902_v37  ;;  %v2903_v35 = vmul.f32 %v4835_v29, %v2456_v36 }
 0x1d0   : > { %v3032_v49 = vadd.f32 %v4840_v53, %v2900_v63  ;;  %v2901_v31 = vmul.f32 %v4835_v29, %v2448_v61 }
 0x1d1   : > { %v3162_v9 = vmax.f32 %v3034_v13, 0.0  ;;  %v3035_v17 = vadd.f32 %v4840_v53, %v2903_v35 }
 0x1d2   : > { %v3160_v33 = vmax.f32 %v3032_v49, 0.0  ;;  %v3033_v16 = vadd.f32 %v4840_v53, %v2901_v31  ;;  %v4988_v51 = vpop.f32.mrb[88].mxu0  ;;  %v3884_v15 = vpop.f32.mrb[88].mxu1 }
 0x1d3   : > { %3290 = vst [vmem:[%s4860_s12 + $0xb0] sm:$0xff] %v3162_v9  ;;  %v3163_v47 = vmax.f32 %v3035_v17, 0.0  ;;  %v2469_v21 = vadd.f32 %v3884_v15, %v4790_v27  ;;  %v1997_v5 = vpop.f32.mrb[89].mxu0  ;;  %v2460_v24 = vpop.f32.mrb[89].mxu1 }
 0x1d4   : > { %3288 = vst [vmem:[%s4860_s12 + $0xa0] sm:$0xff] %v3160_v33  ;;  %v3161_v41 = vmax.f32 %v3033_v16, 0.0  ;;  %v2461_v55 = vadd.f32 %v2460_v24, %v4776_v39  ;;  %v4994_v23 = vpop.f32.mrb[90].mxu0  ;;  %v3885_v28 = vpop.f32.mrb[90].mxu1 }
 0x1d5   : > { %3291 = vst [vmem:[%s4860_s12 + $0xb8] sm:$0xff] %v3163_v47  ;;  %v2906_v30 = vmul.f32 %v4835_v29, %v2469_v21  ;;  %v2472_v45 = vadd.f32 %v3885_v28, %v4796_v58  ;;  %v2000_v18 = vpop.f32.mrb[91].mxu0  ;;  %v2463_v54 = vpop.f32.mrb[91].mxu1 }
 0x1d6   : > { %3289 = vst [vmem:[%s4860_s12 + $0xa8] sm:$0xff] %v3161_v41  ;;  %v2904_v27 = vmul.f32 %v4835_v29, %v2461_v55  ;;  %v2464_v19 = vadd.f32 %v2463_v54, %v4782_v57 }
 0x1d7   : > { %v3038_v7 = vadd.f32 %v4840_v53, %v2906_v30  ;;  %v2907_v39 = vmul.f32 %v4835_v29, %v2472_v45 }
 0x1d8   : > { %v3036_v37 = vadd.f32 %v4840_v53, %v2904_v27  ;;  %v2905_v36 = vmul.f32 %v4835_v29, %v2464_v19 }
 0x1d9   : > { %v3166_v25 = vmax.f32 %v3038_v7, 0.0  ;;  %v3039_v58 = vadd.f32 %v4840_v53, %v2907_v39 }
 0x1da   : > { %v3164_v43 = vmax.f32 %v3036_v37, 0.0  ;;  %v3037_v63 = vadd.f32 %v4840_v53, %v2905_v36  ;;  %v5008_v61 = vpop.f32.mrb[92].mxu0  ;;  %v3888_v13 = vpop.f32.mrb[92].mxu1 }
 0x1db   : > { %3294 = vst [vmem:[%s4860_s12 + $0xd0] sm:$0xff] %v3166_v25  ;;  %v3167_v57 = vmax.f32 %v3039_v58, 0.0  ;;  %v2485_v35 = vadd.f32 %v3888_v13, %v4818_v4  ;;  %v2005_v49 = vpop.f32.mrb[93].mxu0  ;;  %v2476_v31 = vpop.f32.mrb[93].mxu1 }
 0x1dc   : > { %3292 = vst [vmem:[%s4860_s12 + $0xc0] sm:$0xff] %v3164_v43  ;;  %v3165_v9 = vmax.f32 %v3037_v63, 0.0  ;;  %v2477_v17 = vadd.f32 %v2476_v31, %v4804_v12  ;;  %v5014_v33 = vpop.f32.mrb[94].mxu0  ;;  %v3889_v16 = vpop.f32.mrb[94].mxu1 }
 0x1dd   : > { %3295 = vst [vmem:[%s4860_s12 + $0xd8] sm:$0xff] %v3167_v57  ;;  %v2910_v15 = vmul.f32 %v4835_v29, %v2485_v35  ;;  %v2488_v47 = vadd.f32 %v3889_v16, %v4824_v46  ;;  %v2008_v21 = vpop.f32.mrb[95].mxu0  ;;  %v2479_v5 = vpop.f32.mrb[95].mxu1 }
 0x1de   : > { %3293 = vst [vmem:[%s4860_s12 + $0xc8] sm:$0xff] %v3165_v9  ;;  %v2908_v4 = vmul.f32 %v4835_v29, %v2477_v17  ;;  %v2480_v24 = vadd.f32 %v2479_v5, %v4810_v48 }
 0x1df   : > { %v3042_v41 = vadd.f32 %v4840_v53, %v2910_v15  ;;  %v2911_v12 = vmul.f32 %v4835_v29, %v2488_v47 }
 0x1e0   : > { %v3040_v55 = vadd.f32 %v4840_v53, %v2908_v4  ;;  %v2909_v28 = vmul.f32 %v4835_v29, %v2480_v24 }
 0x1e1   : > { %v3170_v30 = vmax.f32 %v3042_v41, 0.0  ;;  %v3043_v46 = vadd.f32 %v4840_v53, %v2911_v12 }
 0x1e2   : > { %v3168_v45 = vmax.f32 %v3040_v55, 0.0  ;;  %v3041_v18 = vadd.f32 %v4840_v53, %v2909_v28  ;;  %v5028_v54 = vpop.f32.mrb[96].mxu0  ;;  %v3892_v27 = vpop.f32.mrb[96].mxu1 }
 0x1e3   : > { %3298 = vst [vmem:[%s4860_s12 + $0xf0] sm:$0xff] %v3170_v30  ;;  %v3171_v48 = vmax.f32 %v3043_v46, 0.0  ;;  %v2501_v19 = vadd.f32 %v3892_v27, %v4868_v40  ;;  %v2013_v7 = vpop.f32.mrb[97].mxu0  ;;  %v2492_v39 = vpop.f32.mrb[97].mxu1 }
 0x1e4   : > { %3296 = vst [vmem:[%s4860_s12 + $0xe0] sm:$0xff] %v3168_v45  ;;  %v3169_v37 = vmax.f32 %v3041_v18, 0.0  ;;  %v2493_v36 = vadd.f32 %v2492_v39, %v4837_v22  ;;  %v5034_v25 = vpop.f32.mrb[98].mxu0  ;;  %v3893_v58 = vpop.f32.mrb[98].mxu1 }
 0x1e5   : > { %3299 = vst [vmem:[%s4860_s12 + $0xf8] sm:$0xff] %v3171_v48  ;;  %v2914_v43 = vmul.f32 %v4835_v29, %v2501_v19  ;;  %v2504_v63 = vadd.f32 %v3893_v58, %v4876_v1  ;;  %v2016_v13 = vpop.f32.mrb[99].mxu0  ;;  %v2495_v57 = vpop.f32.mrb[99].mxu1 }
 0x1e6   : > { %3297 = vst [vmem:[%s4860_s12 + $0xe8] sm:$0xff] %v3169_v37  ;;  %v2912_v40 = vmul.f32 %v4835_v29, %v2493_v36  ;;  %v2496_v35 = vadd.f32 %v2495_v57, %v4845_v10 }
 0x1e7   : > { %v3046_v49 = vadd.f32 %v4840_v53, %v2914_v43  ;;  %v2915_v22 = vmul.f32 %v4835_v29, %v2504_v63 }
 0x1e8   : > { %v3044_v31 = vadd.f32 %v4840_v53, %v2912_v40  ;;  %v2913_v9 = vmul.f32 %v4835_v29, %v2496_v35 }
 0x1e9   : > { %v3174_v17 = vmax.f32 %v3046_v49, 0.0  ;;  %v3047_v1 = vadd.f32 %v4840_v53, %v2915_v22 }
 0x1ea   : > { %v3172_v16 = vmax.f32 %v3044_v31, 0.0  ;;  %v3045_v15 = vadd.f32 %v4840_v53, %v2913_v9  ;;  %v5048_v47 = vpop.f32.mrb[100].mxu0  ;;  %v3896_v21 = vpop.f32.mrb[100].mxu1 }
 0x1eb   : > { %3302 = vst [vmem:[%s4860_s12 + $0x110] sm:$0xff] %v3174_v17  ;;  %v3175_v10 = vmax.f32 %v3047_v1, 0.0  ;;  %v2517_v5 = vadd.f32 %v3896_v21, %v4920_v34  ;;  %v2021_v4 = vpop.f32.mrb[101].mxu0  ;;  %v2508_v24 = vpop.f32.mrb[101].mxu1 }
 0x1ec   : > { %3300 = vst [vmem:[%s4860_s12 + $0x100] sm:$0xff] %v3172_v16  ;;  %v3173_v41 = vmax.f32 %v3045_v15, 0.0  ;;  %v2509_v12 = vadd.f32 %v2508_v24, %v4894_v52  ;;  %v5054_v55 = vpop.f32.mrb[102].mxu0  ;;  %v3897_v28 = vpop.f32.mrb[102].mxu1 }
 0x1ed   : > { %3303 = vst [vmem:[%s4860_s12 + $0x118] sm:$0xff] %v3175_v10  ;;  %v2918_v30 = vmul.f32 %v4835_v29, %v2517_v5  ;;  %v2520_v46 = vadd.f32 %v3897_v28, %v4928_v0  ;;  %v2024_v45 = vpop.f32.mrb[103].mxu0  ;;  %v2511_v18 = vpop.f32.mrb[103].mxu1 }
 0x1ee   : > { %3301 = vst [vmem:[%s4860_s12 + $0x108] sm:$0xff] %v3173_v41  ;;  %v2916_v34 = vmul.f32 %v4835_v29, %v2509_v12  ;;  %v2512_v27 = vadd.f32 %v2511_v18, %v4902_v42 }
 0x1ef   : > { %v3050_v48 = vadd.f32 %v4840_v53, %v2918_v30  ;;  %v2919_v52 = vmul.f32 %v4835_v29, %v2520_v46 }
 0x1f0   : > { %v3048_v19 = vadd.f32 %v4840_v53, %v2916_v34  ;;  %v2917_v7 = vmul.f32 %v4835_v29, %v2512_v27 }
 0x1f1   : > { %v3178_v39 = vmax.f32 %v3050_v48, 0.0  ;;  %v3051_v0 = vadd.f32 %v4840_v53, %v2919_v52 }
 0x1f2   : > { %v3176_v37 = vmax.f32 %v3048_v19, 0.0  ;;  %v3049_v36 = vadd.f32 %v4840_v53, %v2917_v7  ;;  %v5068_v58 = vpop.f32.mrb[104].mxu0  ;;  %v3900_v43 = vpop.f32.mrb[104].mxu1 }
 0x1f3   : > { %3306 = vst [vmem:[%s4860_s12 + $0x130] sm:$0xff] %v3178_v39  ;;  %v3179_v42 = vmax.f32 %v3051_v0, 0.0  ;;  %v2533_v63 = vadd.f32 %v3900_v43, %v4968_v59  ;;  %v2029_v13 = vpop.f32.mrb[105].mxu0  ;;  %v2524_v57 = vpop.f32.mrb[105].mxu1 }
 0x1f4   : > { %3304 = vst [vmem:[%s4860_s12 + $0x120] sm:$0xff] %v3176_v37  ;;  %v3177_v40 = vmax.f32 %v3049_v36, 0.0  ;;  %v2525_v35 = vadd.f32 %v2524_v57, %v4945_v3  ;;  %v5074_v49 = vpop.f32.mrb[106].mxu0  ;;  %v3901_v22 = vpop.f32.mrb[106].mxu1 }
 0x1f5   : > { %3307 = vst [vmem:[%s4860_s12 + $0x138] sm:$0xff] %v3179_v42  ;;  %v2922_v31 = vmul.f32 %v4835_v29, %v2533_v63  ;;  %v2536_v9 = vadd.f32 %v3901_v22, %v4974_v11  ;;  %v2032_v17 = vpop.f32.mrb[107].mxu0  ;;  %v2527_v1 = vpop.f32.mrb[107].mxu1 }
 0x1f6   : > { %3305 = vst [vmem:[%s4860_s12 + $0x128] sm:$0xff] %v3177_v40  ;;  %v2920_v59 = vmul.f32 %v4835_v29, %v2525_v35  ;;  %v2528_v16 = vadd.f32 %v2527_v1, %v4953_v60 }
 0x1f7   : > { %v3054_v15 = vadd.f32 %v4840_v53, %v2922_v31  ;;  %v2923_v3 = vmul.f32 %v4835_v29, %v2536_v9 }
 0x1f8   : > { %v3052_v21 = vadd.f32 %v4840_v53, %v2920_v59  ;;  %v2921_v10 = vmul.f32 %v4835_v29, %v2528_v16 }
 0x1f9   : > { %v3182_v5 = vmax.f32 %v3054_v15, 0.0  ;;  %v3055_v11 = vadd.f32 %v4840_v53, %v2923_v3 }
 0x1fa   : > { %v3180_v4 = vmax.f32 %v3052_v21, 0.0  ;;  %v3053_v24 = vadd.f32 %v4840_v53, %v2921_v10  ;;  %v2035_v41 = vpop.f32.mrb[108].mxu0  ;;  %v3904_v12 = vpop.f32.mrb[108].mxu1 }
 0x1fb   : > { %3310 = vst [vmem:[%s4860_s12 + $0x150] sm:$0xff] %v3182_v5  ;;  %v3183_v60 = vmax.f32 %v3055_v11, 0.0  ;;  %v2549_v28 = vadd.f32 %v3904_v12, %v5008_v61  ;;  %v2037_v30 = vpop.f32.mrb[109].mxu0  ;;  %v2540_v46 = vpop.f32.mrb[109].mxu1 }
 0x1fc   : > { %3308 = vst [vmem:[%s4860_s12 + $0x140] sm:$0xff] %v3180_v4  ;;  %v3181_v45 = vmax.f32 %v3053_v24, 0.0  ;;  %v2541_v18 = vadd.f32 %v2540_v46, %v4988_v51  ;;  %v2038_v34 = vpop.f32.mrb[110].mxu0  ;;  %v3905_v27 = vpop.f32.mrb[110].mxu1 }
 0x1fd   : > { %3311 = vst [vmem:[%s4860_s12 + $0x158] sm:$0xff] %v3183_v60  ;;  %v2926_v48 = vmul.f32 %v4835_v29, %v2549_v28  ;;  %v2552_v52 = vadd.f32 %v3905_v27, %v5014_v33  ;;  %v2040_v19 = vpop.f32.mrb[111].mxu0  ;;  %v2543_v7 = vpop.f32.mrb[111].mxu1 }
 0x1fe   : > { %3309 = vst [vmem:[%s4860_s12 + $0x148] sm:$0xff] %v3181_v45  ;;  %v2924_v39 = vmul.f32 %v4835_v29, %v2541_v18  ;;  %v2544_v61 = vadd.f32 %v2543_v7, %v4994_v23 }
 0x1ff   : > { %v3058_v0 = vadd.f32 %v4840_v53, %v2926_v48  ;;  %v2927_v51 = vmul.f32 %v4835_v29, %v2552_v52 }
 0x200   : > { %v3056_v37 = vadd.f32 %v4840_v53, %v2924_v39  ;;  %v2925_v36 = vmul.f32 %v4835_v29, %v2544_v61 }
 0x201   : > { %v3186_v43 = vmax.f32 %v3058_v0, 0.0  ;;  %v3059_v33 = vadd.f32 %v4840_v53, %v2927_v51 }
 0x202   : > { %v3184_v42 = vmax.f32 %v3056_v37, 0.0  ;;  %v3057_v63 = vadd.f32 %v4840_v53, %v2925_v36  ;;  %v5104_v13 = vpop.f32.mrb[112].mxu0  ;;  %v3908_v57 = vpop.f32.mrb[112].mxu1 }
 0x203   : > { %3314 = vst [vmem:[%s4860_s12 + $0x170] sm:$0xff] %v3186_v43  ;;  %v3187_v23 = vmax.f32 %v3059_v33, 0.0  ;;  %v2565_v40 = vadd.f32 %v3908_v57, %v5048_v47  ;;  %v2045_v35 = vpop.f32.mrb[113].mxu0  ;;  %v2556_v22 = vpop.f32.mrb[113].mxu1 }
 0x204   : > { %3312 = vst [vmem:[%s4860_s12 + $0x160] sm:$0xff] %v3184_v42  ;;  %v3185_v31 = vmax.f32 %v3057_v63, 0.0  ;;  %v2557_v9 = vadd.f32 %v2556_v22, %v5028_v54  ;;  %v5110_v17 = vpop.f32.mrb[114].mxu0  ;;  %v3909_v1 = vpop.f32.mrb[114].mxu1 }
 0x205   : > { %3315 = vst [vmem:[%s4860_s12 + $0x178] sm:$0xff] %v3187_v23  ;;  %v2930_v59 = vmul.f32 %v4835_v29, %v2565_v40  ;;  %v2568_v16 = vadd.f32 %v3909_v1, %v5054_v55  ;;  %v2048_v15 = vpop.f32.mrb[115].mxu0  ;;  %v2559_v3 = vpop.f32.mrb[115].mxu1 }
 0x206   : > { %3313 = vst [vmem:[%s4860_s12 + $0x168] sm:$0xff] %v3185_v31  ;;  %v2928_v47 = vmul.f32 %v4835_v29, %v2557_v9  ;;  %v2560_v21 = vadd.f32 %v2559_v3, %v5034_v25 }
 0x207   : > { %v3062_v10 = vadd.f32 %v4840_v53, %v2930_v59  ;;  %v2931_v54 = vmul.f32 %v4835_v29, %v2568_v16 }
 0x208   : > { %v3060_v5 = vadd.f32 %v4840_v53, %v2928_v47  ;;  %v2929_v11 = vmul.f32 %v4835_v29, %v2560_v21 }
 0x209   : > { %v3190_v4 = vmax.f32 %v3062_v10, 0.0  ;;  %v3063_v55 = vadd.f32 %v4840_v53, %v2931_v54 }
 0x20a   : > { %v3188_v24 = vmax.f32 %v3060_v5, 0.0  ;;  %v3061_v12 = vadd.f32 %v4840_v53, %v2929_v11  ;;  %v2051_v60 = vpop.f32.mrb[116].mxu0  ;;  %v3912_v28 = vpop.f32.mrb[116].mxu1 }
 0x20b   : > { %3318 = vst [vmem:[%s4860_s12 + $0x190] sm:$0xff] %v3190_v4  ;;  %v3191_v25 = vmax.f32 %v3063_v55, 0.0  ;;  %v2581_v30 = vadd.f32 %v3912_v28, %v2035_v41  ;;  %v2053_v46 = vpop.f32.mrb[117].mxu0  ;;  %v2572_v45 = vpop.f32.mrb[117].mxu1 }
 0x20c   : > { %3316 = vst [vmem:[%s4860_s12 + $0x180] sm:$0xff] %v3188_v24  ;;  %v3189_v18 = vmax.f32 %v3061_v12, 0.0  ;;  %v2573_v27 = vadd.f32 %v2572_v45, %v5068_v58  ;;  %v2054_v48 = vpop.f32.mrb[118].mxu0  ;;  %v3913_v52 = vpop.f32.mrb[118].mxu1 }
 0x20d   : > { %3319 = vst [vmem:[%s4860_s12 + $0x198] sm:$0xff] %v3191_v25  ;;  %v2934_v19 = vmul.f32 %v4835_v29, %v2581_v30  ;;  %v2584_v7 = vadd.f32 %v3913_v52, %v2038_v34  ;;  %v2056_v39 = vpop.f32.mrb[119].mxu0  ;;  %v2575_v61 = vpop.f32.mrb[119].mxu1 }
 0x20e   : > { %3317 = vst [vmem:[%s4860_s12 + $0x188] sm:$0xff] %v3189_v18  ;;  %v2932_v0 = vmul.f32 %v4835_v29, %v2573_v27  ;;  %v2576_v41 = vadd.f32 %v2575_v61, %v5074_v49 }
 0x20f   : > { %v3066_v51 = vadd.f32 %v4840_v53, %v2934_v19  ;;  %v2935_v37 = vmul.f32 %v4835_v29, %v2584_v7 }
 0x210   : > { %v3064_v58 = vadd.f32 %v4840_v53, %v2932_v0  ;;  %v2933_v36 = vmul.f32 %v4835_v29, %v2576_v41 }
 0x211   : > { %v3194_v43 = vmax.f32 %v3066_v51, 0.0  ;;  %v3067_v34 = vadd.f32 %v4840_v53, %v2935_v37 }
 0x212   : > { %v3192_v33 = vmax.f32 %v3064_v58, 0.0  ;;  %v3065_v42 = vadd.f32 %v4840_v53, %v2933_v36  ;;  %v2059_v63 = vpop.f32.mrb[120].mxu0  ;;  %v3916_v57 = vpop.f32.mrb[120].mxu1 }
 0x213   : > { %3322 = vst [vmem:[%s4860_s12 + $0x1b0] sm:$0xff] %v3194_v43  ;;  %v3195_v49 = vmax.f32 %v3067_v34, 0.0  ;;  %v2597_v23 = vadd.f32 %v3916_v57, %v2051_v60  ;;  %v2061_v40 = vpop.f32.mrb[121].mxu0  ;;  %v2588_v35 = vpop.f32.mrb[121].mxu1 }
 0x214   : > { %3320 = vst [vmem:[%s4860_s12 + $0x1a0] sm:$0xff] %v3192_v33  ;;  %v3193_v22 = vmax.f32 %v3065_v42, 0.0  ;;  %v2589_v31 = vadd.f32 %v2588_v35, %v5104_v13  ;;  %v2062_v9 = vpop.f32.mrb[122].mxu0  ;;  %v3917_v1 = vpop.f32.mrb[122].mxu1 }
 0x215   : > { %3323 = vst [vmem:[%s4860_s12 + $0x1b8] sm:$0xff] %v3195_v49  ;;  %v2938_v59 = vmul.f32 %v4835_v29, %v2597_v23  ;;  %v2600_v16 = vadd.f32 %v3917_v1, %v2054_v48  ;;  %v2064_v15 = vpop.f32.mrb[123].mxu0  ;;  %v2591_v3 = vpop.f32.mrb[123].mxu1 }
 0x216   : > { %3321 = vst [vmem:[%s4860_s12 + $0x1a8] sm:$0xff] %v3193_v22  ;;  %v2936_v47 = vmul.f32 %v4835_v29, %v2589_v31  ;;  %v2592_v21 = vadd.f32 %v2591_v3, %v5110_v17 }
 0x217   : > { %v3070_v10 = vadd.f32 %v4840_v53, %v2938_v59  ;;  %v2939_v54 = vmul.f32 %v4835_v29, %v2600_v16 }
 0x218   : > { %v3068_v13 = vadd.f32 %v4840_v53, %v2936_v47  ;;  %v2937_v5 = vmul.f32 %v4835_v29, %v2592_v21 }
 0x219   : > { %v3198_v11 = vmax.f32 %v3070_v10, 0.0  ;;  %v3071_v4 = vadd.f32 %v4840_v53, %v2939_v54 }
 0x21a   : > { %v3196_v55 = vmax.f32 %v3068_v13, 0.0  ;;  %v3069_v24 = vadd.f32 %v4840_v53, %v2937_v5  ;;  %v2067_v12 = vpop.f32.mrb[124].mxu0  ;;  %v3920_v60 = vpop.f32.mrb[124].mxu1 }
 0x21b   : > { %3326 = vst [vmem:[%s4860_s12 + $0x1d0] sm:$0xff] %v3198_v11  ;;  %v3199_v17 = vmax.f32 %v3071_v4, 0.0  ;;  %v2613_v28 = vadd.f32 %v3920_v60, %v2067_v12  ;;  %v2069_v25 = vpop.f32.mrb[125].mxu0  ;;  %v2604_v30 = vpop.f32.mrb[125].mxu1 }
 0x21c   : > { %3324 = vst [vmem:[%s4860_s12 + $0x1c0] sm:$0xff] %v3196_v55  ;;  %v3197_v46 = vmax.f32 %v3069_v24, 0.0  ;;  %v2605_v45 = vadd.f32 %v2604_v30, %v2059_v63  ;;  %v2070_v18 = vpop.f32.mrb[126].mxu0  ;;  %v3921_v27 = vpop.f32.mrb[126].mxu1 }
 0x21d   : > { %3327 = vst [vmem:[%s4860_s12 + $0x1d8] sm:$0xff] %v3199_v17  ;;  %v2942_v48 = vmul.f32 %v4835_v29, %v2613_v28  ;;  %v2616_v52 = vadd.f32 %v3921_v27, %v2070_v18  ;;  %v2072_v19 = vpop.f32.mrb[127].mxu0  ;;  %v2607_v7 = vpop.f32.mrb[127].mxu1 }
 0x21e   : > { %3325 = vst [vmem:[%s4860_s12 + $0x1c8] sm:$0xff] %v3197_v46  ;;  %v2940_v39 = vmul.f32 %v4835_v29, %v2605_v45  ;;  %v2608_v61 = vadd.f32 %v2607_v7, %v2062_v9 }
 0x21f   : > { %v3074_v0 = vadd.f32 %v4840_v53, %v2942_v48  ;;  %v2943_v41 = vmul.f32 %v4835_v29, %v2616_v52 }
 0x220   : > { %v3072_v51 = vadd.f32 %v4840_v53, %v2940_v39  ;;  %v2941_v37 = vmul.f32 %v4835_v29, %v2608_v61 }
 0x221   : > { %v3202_v58 = vmax.f32 %v3074_v0, 0.0  ;;  %v3075_v36 = vadd.f32 %v4840_v53, %v2943_v41 }
 0x222   : > { %v3200_v43 = vmax.f32 %v3072_v51, 0.0  ;;  %v3073_v34 = vadd.f32 %v4840_v53, %v2941_v37  ;;  %v2075_v33 = vpop.f32.mrb[128].mxu0  ;;  %v3924_v42 = vpop.f32.mrb[128].mxu1 }
 0x223   : > { %3330 = vst [vmem:[%s4860_s12 + $0x1f0] sm:$0xff] %v3202_v58  ;;  %v3203_v63 = vmax.f32 %v3075_v36, 0.0  ;;  %v2077_v57 = vpop.f32.mrb[129].mxu0  ;;  %v2620_v49 = vpop.f32.mrb[129].mxu1 }
 0x224   : > { %3328 = vst [vmem:[%s4860_s12 + $0x1e0] sm:$0xff] %v3200_v43  ;;  %v3201_v23 = vmax.f32 %v3073_v34, 0.0  ;;  %v2621_v40 = vadd.f32 %v2620_v49, %v2075_v33  ;;  %v2078_v35 = vpop.f32.mrb[130].mxu0  ;;  %v3925_v22 = vpop.f32.mrb[130].mxu1 }
 0x225   : > { %3331 = vst [vmem:[%s4860_s12 + $0x1f8] sm:$0xff] %v3203_v63  ;;  %v2080_v31 = vpop.f32.mrb[131].mxu0  ;;  %v2623_v9 = vpop.f32.mrb[131].mxu1 }
 0x226   : > { %3329 = vst [vmem:[%s4860_s12 + $0x1e8] sm:$0xff] %v3201_v23  ;;  %v2944_v1 = vmul.f32 %v4835_v29, %v2621_v40  ;;  %v2624_v59 = vadd.f32 %v2623_v9, %v2078_v35 }
 0x228   : > { %v3076_v16 = vadd.f32 %v4840_v53, %v2944_v1  ;;  %v2945_v15 = vmul.f32 %v4835_v29, %v2624_v59 }
 0x22a   : > { %v3204_v3 = vmax.f32 %v3076_v16, 0.0  ;;  %v3077_v47 = vadd.f32 %v4840_v53, %v2945_v15  ;;  %v2083_v21 = vpop.f32.mrb[132].mxu0  ;;  %v3928_v10 = vpop.f32.mrb[132].mxu1 }
 0x22b   : > { %v2629_v54 = vadd.f32 %v3924_v42, %v2083_v21  ;;  %v2085_v13 = vpop.f32.mrb[133].mxu0  ;;  %v2636_v5 = vpop.f32.mrb[133].mxu1 }
 0x22c   : > { %3332 = vst [vmem:[%s4860_s12 + $0x200] sm:$0xff] %v3204_v3  ;;  %v3205_v11 = vmax.f32 %v3077_v47, 0.0  ;;  %v2086_v4 = vpop.f32.mrb[134].mxu0  ;;  %v3929_v55 = vpop.f32.mrb[134].mxu1 }
 0x22d   : > { %v2946_v24 = vmul.f32 %v4835_v29, %v2629_v54  ;;  %v2632_v12 = vadd.f32 %v3925_v22, %v2086_v4  ;;  %v2088_v60 = vpop.f32.mrb[135].mxu0  ;;  %v2639_v17 = vpop.f32.mrb[135].mxu1 }
 0x22e   : > { %3333 = vst [vmem:[%s4860_s12 + $0x208] sm:$0xff] %v3205_v11 }
 0x22f   : > { %v3078_v28 = vadd.f32 %v4840_v53, %v2946_v24  ;;  %v2947_v25 = vmul.f32 %v4835_v29, %v2632_v12 }
 0x231   : > { %v3206_v30 = vmax.f32 %v3078_v28, 0.0  ;;  %v3079_v46 = vadd.f32 %v4840_v53, %v2947_v25 }
 0x232   : > { %v2091_v45 = vpop.f32.mrb[136].mxu0  ;;  %v3932_v18 = vpop.f32.mrb[136].mxu1 }
 0x233   : > { %3334 = vst [vmem:[%s4860_s12 + $0x210] sm:$0xff] %v3206_v30  ;;  %v3207_v27 = vmax.f32 %v3079_v46, 0.0  ;;  %v2637_v48 = vadd.f32 %v2636_v5, %v2091_v45  ;;  %v2093_v52 = vpop.f32.mrb[137].mxu0  ;;  %v2652_v19 = vpop.f32.mrb[137].mxu1 }
 0x234   : > { %v2094_v7 = vpop.f32.mrb[138].mxu0  ;;  %v3933_v39 = vpop.f32.mrb[138].mxu1 }
 0x235   : > { %3335 = vst [vmem:[%s4860_s12 + $0x218] sm:$0xff] %v3207_v27  ;;  %v2948_v61 = vmul.f32 %v4835_v29, %v2637_v48  ;;  %v2640_v0 = vadd.f32 %v2639_v17, %v2094_v7  ;;  %v2096_v41 = vpop.f32.mrb[139].mxu0  ;;  %v2655_v51 = vpop.f32.mrb[139].mxu1 }
 0x237   : > { %v3080_v37 = vadd.f32 %v4840_v53, %v2948_v61  ;;  %v2949_v58 = vmul.f32 %v4835_v29, %v2640_v0 }
 0x239   : > { %v3208_v36 = vmax.f32 %v3080_v37, 0.0  ;;  %v3081_v43 = vadd.f32 %v4840_v53, %v2949_v58 }
 0x23a   : > { %v2099_v34 = vpop.f32.mrb[140].mxu0  ;;  %v5184_v33 = vpop.f32.mrb[140].mxu1 }
 0x23b   : > { %3336 = vst [vmem:[%s4860_s12 + $0x220] sm:$0xff] %v3208_v36  ;;  %v3209_v42 = vmax.f32 %v3081_v43, 0.0  ;;  %v2645_v63 = vadd.f32 %v3928_v10, %v2099_v34  ;;  %v2101_v57 = vpop.f32.mrb[141].mxu0  ;;  %v2668_v49 = vpop.f32.mrb[141].mxu1 }
 0x23c   : > { %v2102_v23 = vpop.f32.mrb[142].mxu0  ;;  %v5187_v40 = vpop.f32.mrb[142].mxu1 }
 0x23d   : > { %3337 = vst [vmem:[%s4860_s12 + $0x228] sm:$0xff] %v3209_v42  ;;  %v2950_v35 = vmul.f32 %v4835_v29, %v2645_v63  ;;  %v2648_v22 = vadd.f32 %v3929_v55, %v2102_v23  ;;  %v2104_v31 = vpop.f32.mrb[143].mxu0  ;;  %v2671_v9 = vpop.f32.mrb[143].mxu1 }
 0x23f   : > { %v3082_v1 = vadd.f32 %v4840_v53, %v2950_v35  ;;  %v2951_v59 = vmul.f32 %v4835_v29, %v2648_v22 }
 0x241   : > { %v3210_v16 = vmax.f32 %v3082_v1, 0.0  ;;  %v3083_v15 = vadd.f32 %v4840_v53, %v2951_v59 }
 0x242   : > { %v2107_v3 = vpop.f32.mrb[144].mxu0  ;;  %v5194_v47 = vpop.f32.mrb[144].mxu1 }
 0x243   : > { %3338 = vst [vmem:[%s4860_s12 + $0x230] sm:$0xff] %v3210_v16  ;;  %v3211_v21 = vmax.f32 %v3083_v15, 0.0  ;;  %v2653_v10 = vadd.f32 %v2652_v19, %v2107_v3  ;;  %v2109_v54 = vpop.f32.mrb[145].mxu0  ;;  %v5197_v13 = vpop.f32.mrb[145].mxu1 }
 0x244   : > { %v2110_v5 = vpop.f32.mrb[146].mxu0  ;;  %v5199_v11 = vpop.f32.mrb[146].mxu1 }
 0x245   : > { %3339 = vst [vmem:[%s4860_s12 + $0x238] sm:$0xff] %v3211_v21  ;;  %v2952_v4 = vmul.f32 %v4835_v29, %v2653_v10  ;;  %v2656_v55 = vadd.f32 %v2655_v51, %v2110_v5  ;;  %v2112_v24 = vpop.f32.mrb[147].mxu0  ;;  %v5203_v12 = vpop.f32.mrb[147].mxu1 }
 0x247   : > { %v3084_v60 = vadd.f32 %v4840_v53, %v2952_v4  ;;  %v2953_v17 = vmul.f32 %v4835_v29, %v2656_v55 }
 0x249   : > { %v3212_v28 = vmax.f32 %v3084_v60, 0.0  ;;  %v3085_v25 = vadd.f32 %v4840_v53, %v2953_v17 }
 0x24a   : > { %v2115_v30 = vpop.f32.mrb[148].mxu0  ;;  %v5208_v46 = vpop.f32.mrb[148].mxu1 }
 0x24b   : > { %3340 = vst [vmem:[%s4860_s12 + $0x240] sm:$0xff] %v3212_v28  ;;  %v3213_v45 = vmax.f32 %v3085_v25, 0.0  ;;  %v2661_v27 = vadd.f32 %v3932_v18, %v2115_v30  ;;  %v2117_v48 = vpop.f32.mrb[149].mxu0  ;;  %v5211_v52 = vpop.f32.mrb[149].mxu1 }
 0x24c   : > { %v2118_v19 = vpop.f32.mrb[150].mxu0  ;;  %v5213_v7 = vpop.f32.mrb[150].mxu1 }
 0x24d   : > { %3341 = vst [vmem:[%s4860_s12 + $0x248] sm:$0xff] %v3213_v45  ;;  %v2954_v61 = vmul.f32 %v4835_v29, %v2661_v27  ;;  %v2664_v0 = vadd.f32 %v3933_v39, %v2118_v19  ;;  %v2120_v41 = vpop.f32.mrb[151].mxu0  ;;  %v5217_v51 = vpop.f32.mrb[151].mxu1 }
 0x24f   : > { %v3086_v37 = vadd.f32 %v4840_v53, %v2954_v61  ;;  %v2955_v58 = vmul.f32 %v4835_v29, %v2664_v0 }
 0x251   : > { %v3214_v18 = vmax.f32 %v3086_v37, 0.0  ;;  %v3087_v36 = vadd.f32 %v4840_v53, %v2955_v58 }
 0x252   : > { %v2123_v43 = vpop.f32.mrb[152].mxu0  ;;  %v5222_v34 = vpop.f32.mrb[152].mxu1 }
 0x253   : > { %3342 = vst [vmem:[%s4860_s12 + $0x250] sm:$0xff] %v3214_v18  ;;  %v3215_v42 = vmax.f32 %v3087_v36, 0.0  ;;  %v2669_v63 = vadd.f32 %v2668_v49, %v2123_v43  ;;  %v2125_v57 = vpop.f32.mrb[153].mxu0  ;;  %v5225_v39 = vpop.f32.mrb[153].mxu1 }
 0x254   : > { %v2126_v23 = vpop.f32.mrb[154].mxu0  ;;  %v5227_v35 = vpop.f32.mrb[154].mxu1 }
 0x255   : > { %3343 = vst [vmem:[%s4860_s12 + $0x258] sm:$0xff] %v3215_v42  ;;  %v2956_v22 = vmul.f32 %v4835_v29, %v2669_v63  ;;  %v2672_v31 = vadd.f32 %v2671_v9, %v2126_v23  ;;  %v2128_v1 = vpop.f32.mrb[155].mxu0  ;;  %v5231_v59 = vpop.f32.mrb[155].mxu1 }
 0x257   : > { %v3088_v16 = vadd.f32 %v4840_v53, %v2956_v22  ;;  %v2957_v15 = vmul.f32 %v4835_v29, %v2672_v31 }
 0x259   : > { %v3216_v49 = vmax.f32 %v3088_v16, 0.0  ;;  %v3089_v3 = vadd.f32 %v4840_v53, %v2957_v15 }
 0x25a   : > { %v2131_v21 = vpop.f32.mrb[156].mxu0  ;;  %v5236_v10 = vpop.f32.mrb[156].mxu1 }
 0x25b   : > { %3344 = vst [vmem:[%s4860_s12 + $0x260] sm:$0xff] %v3216_v49  ;;  %v3217_v54 = vmax.f32 %v3089_v3, 0.0  ;;  %v2677_v5 = vadd.f32 %v5184_v33, %v2131_v21  ;;  %v2133_v9 = vpop.f32.mrb[157].mxu0  ;;  %v5240_v4 = vpop.f32.mrb[157].mxu1 }
 0x25c   : > { %v2134_v55 = vpop.f32.mrb[158].mxu0  ;;  %v5242_v24 = vpop.f32.mrb[158].mxu1 }
 0x25d   : > { %3345 = vst [vmem:[%s4860_s12 + $0x268] sm:$0xff] %v3217_v54  ;;  %v2958_v60 = vmul.f32 %v4835_v29, %v2677_v5  ;;  %v2680_v17 = vadd.f32 %v5187_v40, %v2134_v55  ;;  %v2136_v28 = vpop.f32.mrb[159].mxu0  ;;  %v5247_v25 = vpop.f32.mrb[159].mxu1 }
 0x25f   : > { %v3090_v30 = vadd.f32 %v4840_v53, %v2958_v60  ;;  %v2959_v33 = vmul.f32 %v4835_v29, %v2680_v17 }
 0x261   : > { %v3218_v45 = vmax.f32 %v3090_v30, 0.0  ;;  %v3091_v27 = vadd.f32 %v4840_v53, %v2959_v33 }
 0x262   : > { %v2139_v48 = vpop.f32.mrb[160].mxu0  ;;  %v3956_v19 = vpop.f32.mrb[160].mxu1 }
 0x263   : > { %3346 = vst [vmem:[%s4860_s12 + $0x270] sm:$0xff] %v3218_v45  ;;  %v3219_v61 = vmax.f32 %v3091_v27, 0.0  ;;  %v2685_v0 = vadd.f32 %v5197_v13, %v2139_v48  ;;  %v2757_v41 = vadd.f32 %v3956_v19, %v4624_v14  ;;  %v2141_v40 = vpop.f32.mrb[161].mxu0  ;;  %v2748_v37 = vpop.f32.mrb[161].mxu1 }
 0x264   : > { %v2749_v58 = vadd.f32 %v2748_v37, %v4610_v2  ;;  %v2142_v18 = vpop.f32.mrb[162].mxu0  ;;  %v3957_v36 = vpop.f32.mrb[162].mxu1 }
 0x265   : > { %3347 = vst [vmem:[%s4860_s12 + $0x278] sm:$0xff] %v3219_v61  ;;  %v2960_v43 = vmul.f32 %v4835_v29, %v2685_v0  ;;  %v2978_v42 = vmul.f32 %v4835_v29, %v2757_v41  ;;  %v2688_v63 = vadd.f32 %v5203_v12, %v2142_v18  ;;  %v2760_v57 = vadd.f32 %v3957_v36, %v4630_v20  ;;  %v2144_v23 = vpop.f32.mrb[163].mxu0  ;;  %v2751_v22 = vpop.f32.mrb[163].mxu1 }
 0x266   : > { %v2976_v13 = vmul.f32 %v4835_v29, %v2749_v58  ;;  %v2752_v14 = vadd.f32 %v2751_v22, %v4616_v8 }
 0x267   : > { %v3092_v2 = vadd.f32 %v4840_v53, %v2960_v43  ;;  %v3110_v31 = vadd.f32 %v4840_v53, %v2978_v42  ;;  %v2961_v1 = vmul.f32 %v4835_v29, %v2688_v63  ;;  %v2979_v16 = vmul.f32 %v4835_v29, %v2760_v57 }
 0x268   : > { %v3108_v12 = vadd.f32 %v4840_v53, %v2976_v13  ;;  %v2977_v20 = vmul.f32 %v4835_v29, %v2752_v14 }
 0x269   : > { %v3220_v15 = vmax.f32 %v3092_v2, 0.0  ;;  %v3238_v49 = vmax.f32 %v3110_v31, 0.0  ;;  %v3093_v3 = vadd.f32 %v4840_v53, %v2961_v1  ;;  %v3111_v8 = vadd.f32 %v4840_v53, %v2979_v16 }
 0x26a   : > { %v3236_v21 = vmax.f32 %v3108_v12, 0.0  ;;  %v3109_v54 = vadd.f32 %v4840_v53, %v2977_v20  ;;  %v2147_v5 = vpop.f32.mrb[164].mxu0  ;;  %v3960_v9 = vpop.f32.mrb[164].mxu1 }
 0x26b   : > { %3348 = vst [vmem:[%s4860_s12 + $0x280] sm:$0xff] %v3220_v15  ;;  %3366 = vst [vmem:[%s4860_s12 + $0x310] sm:$0xff] %v3238_v49  ;;  %v3221_v55 = vmax.f32 %v3093_v3, 0.0  ;;  %v3239_v60 = vmax.f32 %v3111_v8, 0.0  ;;  %v2693_v17 = vadd.f32 %v5194_v47, %v2147_v5  ;;  %v2773_v28 = vadd.f32 %v3960_v9, %v4652_v38  ;;  %v2149_v30 = vpop.f32.mrb[165].mxu0  ;;  %v2764_v33 = vpop.f32.mrb[165].mxu1 }
 0x26c   : > { %3364 = vst [vmem:[%s4860_s12 + $0x300] sm:$0xff] %v3236_v21  ;;  %v3237_v45 = vmax.f32 %v3109_v54, 0.0  ;;  %v2765_v27 = vadd.f32 %v2764_v33, %v4638_v26  ;;  %v2150_v48 = vpop.f32.mrb[166].mxu0  ;;  %v3961_v19 = vpop.f32.mrb[166].mxu1 }
 0x26d   : > { %3349 = vst [vmem:[%s4860_s12 + $0x288] sm:$0xff] %v3221_v55  ;;  %3367 = vst [vmem:[%s4860_s12 + $0x318] sm:$0xff] %v3239_v60  ;;  %v2962_v61 = vmul.f32 %v4835_v29, %v2693_v17  ;;  %v2982_v0 = vmul.f32 %v4835_v29, %v2773_v28  ;;  %v2696_v41 = vadd.f32 %v5199_v11, %v2150_v48  ;;  %v2152_v38 = vpop.f32.mrb[167].mxu0  ;;  %v2767_v40 = vpop.f32.mrb[167].mxu1 }
 0x26e   : > { %v2776_v47 = vadd.f32 %v3961_v19, %v4658_v44  ;;  %3365 = vst [vmem:[%s4860_s12 + $0x308] sm:$0xff] %v3237_v45  ;;  %v2980_v37 = vmul.f32 %v4835_v29, %v2765_v27  ;;  %v2768_v26 = vadd.f32 %v2767_v40, %v4644_v32  ;;  %v5479_v40 = vld [vmem:[#allocation4_spill] sm:$0xff] }
 0x26f   : > { %v3094_v58 = vadd.f32 %v4840_v53, %v2962_v61  ;;  %v3114_v18 = vadd.f32 %v4840_v53, %v2982_v0  ;;  %v2963_v36 = vmul.f32 %v4835_v29, %v2696_v41 }
 0x270   : > { %v2983_v43 = vmul.f32 %v4835_v29, %v2776_v47  ;;  %v3112_v11 = vadd.f32 %v4840_v53, %v2980_v37  ;;  %v2981_v44 = vmul.f32 %v4835_v29, %v2768_v26 }
 0x271   : > { %v3222_v42 = vmax.f32 %v3094_v58, 0.0  ;;  %v3242_v63 = vmax.f32 %v3114_v18, 0.0  ;;  %v3095_v57 = vadd.f32 %v4840_v53, %v2963_v36  ;;  %v5480_v36 = vld [vmem:[#allocation2_spill] sm:$0xff] }
 0x272   : > { %v3115_v32 = vadd.f32 %v4840_v53, %v2983_v43  ;;  %v3240_v23 = vmax.f32 %v3112_v11, 0.0  ;;  %v3113_v22 = vadd.f32 %v4840_v53, %v2981_v44  ;;  %v2155_v13 = vpop.f32.mrb[168].mxu0  ;;  %v3964_v14 = vpop.f32.mrb[168].mxu1 }
 0x273   : > { %3350 = vst [vmem:[%s4860_s12 + $0x290] sm:$0xff] %v3222_v42  ;;  %3370 = vst [vmem:[%s4860_s12 + $0x330] sm:$0xff] %v3242_v63  ;;  %v3223_v2 = vmax.f32 %v3095_v57, 0.0  ;;  %v2701_v1 = vadd.f32 %v5211_v52, %v2155_v13  ;;  %v2789_v16 = vadd.f32 %v3964_v14, %v4680_v62  ;;  %v2157_v12 = vpop.f32.mrb[169].mxu0  ;;  %v2780_v20 = vpop.f32.mrb[169].mxu1  ;;  %v5482_v14 = vld [vmem:[#allocation3_spill] sm:$0xff] }
 0x274   : > { %v3243_v31 = vmax.f32 %v3115_v32, 0.0  ;;  %3368 = vst [vmem:[%s4860_s12 + $0x320] sm:$0xff] %v3240_v23  ;;  %v3241_v15 = vmax.f32 %v3113_v22, 0.0  ;;  %v2781_v49 = vadd.f32 %v2780_v20, %v4666_v50  ;;  %v2158_v3 = vpop.f32.mrb[170].mxu0  ;;  %v3965_v8 = vpop.f32.mrb[170].mxu1 }
 0x275   : > { %3351 = vst [vmem:[%s4860_s12 + $0x298] sm:$0xff] %v3223_v2  ;;  %v2964_v21 = vmul.f32 %v4835_v29, %v2701_v1  ;;  %v2986_v54 = vmul.f32 %v4835_v29, %v2789_v16  ;;  %v2704_v5 = vadd.f32 %v5217_v51, %v2158_v3  ;;  %v2792_v52 = vadd.f32 %v3965_v8, %v4686_v6  ;;  %v2160_v62 = vpop.f32.mrb[171].mxu0  ;;  %v2783_v9 = vpop.f32.mrb[171].mxu1 }
 0x276   : > { %3371 = vst [vmem:[%s4860_s12 + $0x338] sm:$0xff] %v3243_v31  ;;  %3369 = vst [vmem:[%s4860_s12 + $0x328] sm:$0xff] %v3241_v15  ;;  %v2984_v55 = vmul.f32 %v4835_v29, %v2781_v49  ;;  %v2784_v50 = vadd.f32 %v2783_v9, %v4672_v56 }
 0x277   : > { %v3096_v60 = vadd.f32 %v4840_v53, %v2964_v21  ;;  %v3118_v17 = vadd.f32 %v4840_v53, %v2986_v54  ;;  %v2965_v28 = vmul.f32 %v4835_v29, %v2704_v5  ;;  %v2987_v30 = vmul.f32 %v4835_v29, %v2792_v52 }
 0x278   : > { %v3116_v51 = vadd.f32 %v4840_v53, %v2984_v55  ;;  %v2985_v6 = vmul.f32 %v4835_v29, %v2784_v50  ;;  %v5483_v50 = vld [vmem:[#allocation8_spill] sm:$0xff] }
 0x279   : > { %v3224_v33 = vmax.f32 %v3096_v60, 0.0  ;;  %v3246_v45 = vmax.f32 %v3118_v17, 0.0  ;;  %v3097_v27 = vadd.f32 %v4840_v53, %v2965_v28  ;;  %v3119_v56 = vadd.f32 %v4840_v53, %v2987_v30 }
 0x27a   : > { %v3244_v48 = vmax.f32 %v3116_v51, 0.0  ;;  %v3117_v19 = vadd.f32 %v4840_v53, %v2985_v6  ;;  %v2163_v61 = vpop.f32.mrb[172].mxu0  ;;  %v3968_v0 = vpop.f32.mrb[172].mxu1  ;;  %v5484_v51 = vld [vmem:[#allocation6_spill] sm:$0xff] }
 0x27b   : > { %3352 = vst [vmem:[%s4860_s12 + $0x2a0] sm:$0xff] %v3224_v33  ;;  %3374 = vst [vmem:[%s4860_s12 + $0x350] sm:$0xff] %v3246_v45  ;;  %v3225_v41 = vmax.f32 %v3097_v27, 0.0  ;;  %v3247_v47 = vmax.f32 %v3119_v56, 0.0  ;;  %v2709_v38 = vadd.f32 %v5208_v46, %v2163_v61  ;;  %v2805_v37 = vadd.f32 %v3968_v0, %v5479_v40  ;;  %v2165_v26 = vpop.f32.mrb[173].mxu0  ;;  %v2796_v58 = vpop.f32.mrb[173].mxu1 }
 0x27c   : > { %3372 = vst [vmem:[%s4860_s12 + $0x340] sm:$0xff] %v3244_v48  ;;  %v3245_v18 = vmax.f32 %v3117_v19, 0.0  ;;  %v2797_v43 = vadd.f32 %v2796_v58, %v5480_v36  ;;  %v2166_v11 = vpop.f32.mrb[174].mxu0  ;;  %v3969_v44 = vpop.f32.mrb[174].mxu1  ;;  %v5481_v46 = vld [vmem:[#allocation5_spill] sm:$0xff] }
 0x27d   : > { %3353 = vst [vmem:[%s4860_s12 + $0x2a8] sm:$0xff] %v3225_v41  ;;  %3375 = vst [vmem:[%s4860_s12 + $0x358] sm:$0xff] %v3247_v47  ;;  %v2966_v42 = vmul.f32 %v4835_v29, %v2709_v38  ;;  %v2990_v63 = vmul.f32 %v4835_v29, %v2805_v37  ;;  %v2712_v57 = vadd.f32 %v5213_v7, %v2166_v11  ;;  %v2168_v23 = vpop.f32.mrb[175].mxu0  ;;  %v2799_v22 = vpop.f32.mrb[175].mxu1  ;;  %v5486_v47 = vld [vmem:[#allocation7_spill] sm:$0xff] }
 0x27e   : > { %v2808_v32 = vadd.f32 %v3969_v44, %v5481_v46  ;;  %3373 = vst [vmem:[%s4860_s12 + $0x348] sm:$0xff] %v3245_v18  ;;  %v2988_v13 = vmul.f32 %v4835_v29, %v2797_v43  ;;  %v2800_v2 = vadd.f32 %v2799_v22, %v5482_v14 }
 0x27f   : > { %v3098_v31 = vadd.f32 %v4840_v53, %v2966_v42  ;;  %v3122_v1 = vadd.f32 %v4840_v53, %v2990_v63  ;;  %v2967_v16 = vmul.f32 %v4835_v29, %v2712_v57 }
 0x280   : > { %v2991_v12 = vmul.f32 %v4835_v29, %v2808_v32  ;;  %v3120_v7 = vadd.f32 %v4840_v53, %v2988_v13  ;;  %v2989_v20 = vmul.f32 %v4835_v29, %v2800_v2  ;;  %v5487_v13 = vld [vmem:[#allocation12_spill] sm:$0xff] }
 0x281   : > { %v3226_v15 = vmax.f32 %v3098_v31, 0.0  ;;  %v3250_v49 = vmax.f32 %v3122_v1, 0.0  ;;  %v3099_v3 = vadd.f32 %v4840_v53, %v2967_v16  ;;  %v5488_v16 = vld [vmem:[#allocation10_spill] sm:$0xff] }
 0x282   : > { %v3123_v8 = vadd.f32 %v4840_v53, %v2991_v12  ;;  %v3248_v21 = vmax.f32 %v3120_v7, 0.0  ;;  %v3121_v54 = vadd.f32 %v4840_v53, %v2989_v20  ;;  %v2171_v5 = vpop.f32.mrb[176].mxu0  ;;  %v3972_v52 = vpop.f32.mrb[176].mxu1 }
 0x283   : > { %3354 = vst [vmem:[%s4860_s12 + $0x2b0] sm:$0xff] %v3226_v15  ;;  %3378 = vst [vmem:[%s4860_s12 + $0x370] sm:$0xff] %v3250_v49  ;;  %v3227_v62 = vmax.f32 %v3099_v3, 0.0  ;;  %v2717_v55 = vadd.f32 %v5225_v39, %v2171_v5  ;;  %v2821_v60 = vadd.f32 %v3972_v52, %v5483_v50  ;;  %v2173_v17 = vpop.f32.mrb[177].mxu0  ;;  %v2812_v28 = vpop.f32.mrb[177].mxu1  ;;  %v5485_v39 = vld [vmem:[#allocation9_spill] sm:$0xff] }
 0x284   : > { %v3251_v9 = vmax.f32 %v3123_v8, 0.0  ;;  %3376 = vst [vmem:[%s4860_s12 + $0x360] sm:$0xff] %v3248_v21  ;;  %v3249_v30 = vmax.f32 %v3121_v54, 0.0  ;;  %v2813_v6 = vadd.f32 %v2812_v28, %v5484_v51  ;;  %v2174_v33 = vpop.f32.mrb[178].mxu0  ;;  %v3973_v45 = vpop.f32.mrb[178].mxu1  ;;  %v5490_v52 = vld [vmem:[#allocation11_spill] sm:$0xff] }
 0x285   : > { %3355 = vst [vmem:[%s4860_s12 + $0x2b8] sm:$0xff] %v3227_v62  ;;  %v2968_v27 = vmul.f32 %v4835_v29, %v2717_v55  ;;  %v2994_v56 = vmul.f32 %v4835_v29, %v2821_v60  ;;  %v2720_v48 = vadd.f32 %v5231_v59, %v2174_v33  ;;  %v2824_v19 = vadd.f32 %v3973_v45, %v5485_v39  ;;  %v2176_v61 = vpop.f32.mrb[179].mxu0  ;;  %v2815_v0 = vpop.f32.mrb[179].mxu1 }
 0x286   : > { %3379 = vst [vmem:[%s4860_s12 + $0x378] sm:$0xff] %v3251_v9  ;;  %3377 = vst [vmem:[%s4860_s12 + $0x368] sm:$0xff] %v3249_v30  ;;  %v2992_v41 = vmul.f32 %v4835_v29, %v2813_v6  ;;  %v2816_v38 = vadd.f32 %v2815_v0, %v5486_v47  ;;  %v5491_v61 = vld [vmem:[#allocation16_spill] sm:$0xff] }
 0x287   : > { %v3100_v40 = vadd.f32 %v4840_v53, %v2968_v27  ;;  %v3126_v37 = vadd.f32 %v4840_v53, %v2994_v56  ;;  %v2969_v26 = vmul.f32 %v4835_v29, %v2720_v48  ;;  %v2995_v58 = vmul.f32 %v4835_v29, %v2824_v19 }
 0x288   : > { %v3124_v59 = vadd.f32 %v4840_v53, %v2992_v41  ;;  %v2993_v18 = vmul.f32 %v4835_v29, %v2816_v38 }
 0x289   : > { %v3228_v36 = vmax.f32 %v3100_v40, 0.0  ;;  %v3254_v43 = vmax.f32 %v3126_v37, 0.0  ;;  %v3101_v11 = vadd.f32 %v4840_v53, %v2969_v26  ;;  %v3127_v44 = vadd.f32 %v4840_v53, %v2995_v58  ;;  %v5492_v40 = vld [vmem:[#allocation14_spill] sm:$0xff] }
 0x28a   : > { %v3252_v42 = vmax.f32 %v3124_v59, 0.0  ;;  %v3125_v63 = vadd.f32 %v4840_v53, %v2993_v18  ;;  %v2179_v57 = vpop.f32.mrb[180].mxu0  ;;  %v3976_v46 = vpop.f32.mrb[180].mxu1 }
 0x28b   : > { %3356 = vst [vmem:[%s4860_s12 + $0x2c0] sm:$0xff] %v3228_v36  ;;  %3382 = vst [vmem:[%s4860_s12 + $0x390] sm:$0xff] %v3254_v43  ;;  %v3229_v32 = vmax.f32 %v3101_v11, 0.0  ;;  %v3255_v23 = vmax.f32 %v3127_v44, 0.0  ;;  %v2725_v22 = vadd.f32 %v5222_v34, %v2179_v57  ;;  %v2837_v14 = vadd.f32 %v3976_v46, %v5487_v13  ;;  %v2181_v2 = vpop.f32.mrb[181].mxu0  ;;  %v2828_v31 = vpop.f32.mrb[181].mxu1 }
 0x28c   : > { %3380 = vst [vmem:[%s4860_s12 + $0x380] sm:$0xff] %v3252_v42  ;;  %v3253_v1 = vmax.f32 %v3125_v63, 0.0  ;;  %v2829_v12 = vadd.f32 %v2828_v31, %v5488_v16  ;;  %v2182_v7 = vpop.f32.mrb[182].mxu0  ;;  %v3977_v20 = vpop.f32.mrb[182].mxu1  ;;  %v5489_v34 = vld [vmem:[#allocation13_spill] sm:$0xff]  ;;  %v5494_v63 = vld [vmem:[#allocation15_spill] sm:$0xff] }
 0x28d   : > { %3357 = vst [vmem:[%s4860_s12 + $0x2c8] sm:$0xff] %v3229_v32  ;;  %3383 = vst [vmem:[%s4860_s12 + $0x398] sm:$0xff] %v3255_v23  ;;  %v2970_v15 = vmul.f32 %v4835_v29, %v2725_v22  ;;  %v2998_v49 = vmul.f32 %v4835_v29, %v2837_v14  ;;  %v2728_v3 = vadd.f32 %v5227_v35, %v2182_v7  ;;  %v2184_v21 = vpop.f32.mrb[183].mxu0  ;;  %v2831_v54 = vpop.f32.mrb[183].mxu1 }
 0x28e   : > { %v2840_v8 = vadd.f32 %v3977_v20, %v5489_v34  ;;  %3381 = vst [vmem:[%s4860_s12 + $0x388] sm:$0xff] %v3253_v1  ;;  %v2996_v5 = vmul.f32 %v4835_v29, %v2829_v12  ;;  %v2832_v62 = vadd.f32 %v2831_v54, %v5490_v52  ;;  %v5495_v34 = vld [vmem:[#allocation20_spill] sm:$0xff]  ;;  %v5496_v52 = vld [vmem:[#allocation18_spill] sm:$0xff] }
 0x28f   : > { %v3102_v9 = vadd.f32 %v4840_v53, %v2970_v15  ;;  %v3130_v55 = vadd.f32 %v4840_v53, %v2998_v49  ;;  %v2971_v50 = vmul.f32 %v4835_v29, %v2728_v3 }
 0x290   : > { %v2999_v60 = vmul.f32 %v4835_v29, %v2840_v8  ;;  %v3128_v35 = vadd.f32 %v4840_v53, %v2996_v5  ;;  %v2997_v17 = vmul.f32 %v4835_v29, %v2832_v62 }
 0x291   : > { %v3230_v28 = vmax.f32 %v3102_v9, 0.0  ;;  %v3258_v30 = vmax.f32 %v3130_v55, 0.0  ;;  %v3103_v51 = vadd.f32 %v4840_v53, %v2971_v50 }
 0x292   : > { %v3131_v6 = vadd.f32 %v4840_v53, %v2999_v60  ;;  %v3256_v33 = vmax.f32 %v3128_v35, 0.0  ;;  %v3129_v45 = vadd.f32 %v4840_v53, %v2997_v17  ;;  %v2187_v27 = vpop.f32.mrb[184].mxu0  ;;  %v3980_v56 = vpop.f32.mrb[184].mxu1 }
 0x293   : > { %3358 = vst [vmem:[%s4860_s12 + $0x2d0] sm:$0xff] %v3230_v28  ;;  %3386 = vst [vmem:[%s4860_s12 + $0x3b0] sm:$0xff] %v3258_v30  ;;  %v3231_v48 = vmax.f32 %v3103_v51, 0.0  ;;  %v2733_v19 = vadd.f32 %v5240_v4, %v2187_v27  ;;  %v2853_v0 = vadd.f32 %v3980_v56, %v5491_v61  ;;  %v2189_v41 = vpop.f32.mrb[185].mxu0  ;;  %v2844_v47 = vpop.f32.mrb[185].mxu1  ;;  %v5493_v4 = vld [vmem:[#allocation17_spill] sm:$0xff] }
 0x294   : > { %v3259_v39 = vmax.f32 %v3131_v6, 0.0  ;;  %3384 = vst [vmem:[%s4860_s12 + $0x3a0] sm:$0xff] %v3256_v33  ;;  %v3257_v38 = vmax.f32 %v3129_v45, 0.0  ;;  %v2845_v37 = vadd.f32 %v2844_v47, %v5492_v40  ;;  %v2190_v26 = vpop.f32.mrb[186].mxu0  ;;  %v3981_v58 = vpop.f32.mrb[186].mxu1  ;;  %v5498_v6 = vld [vmem:[#allocation19_spill] sm:$0xff] }
 0x295   : > { %3359 = vst [vmem:[%s4860_s12 + $0x2d8] sm:$0xff] %v3231_v48  ;;  %v2972_v59 = vmul.f32 %v4835_v29, %v2733_v19  ;;  %v3002_v18 = vmul.f32 %v4835_v29, %v2853_v0  ;;  %v2736_v36 = vadd.f32 %v5247_v25, %v2190_v26  ;;  %v2856_v43 = vadd.f32 %v3981_v58, %v5493_v4  ;;  %v2192_v11 = vpop.f32.mrb[187].mxu0  ;;  %v2847_v44 = vpop.f32.mrb[187].mxu1 }
 0x296   : > { %3387 = vst [vmem:[%s4860_s12 + $0x3b8] sm:$0xff] %v3259_v39  ;;  %3385 = vst [vmem:[%s4860_s12 + $0x3a8] sm:$0xff] %v3257_v38  ;;  %v3000_v42 = vmul.f32 %v4835_v29, %v2845_v37  ;;  %v2848_v57 = vadd.f32 %v2847_v44, %v5494_v63 }
 0x297   : > { %v3104_v46 = vadd.f32 %v4840_v53, %v2972_v59  ;;  %v3134_v32 = vadd.f32 %v4840_v53, %v3002_v18  ;;  %v2973_v23 = vmul.f32 %v4835_v29, %v2736_v36  ;;  %v3003_v22 = vmul.f32 %v4835_v29, %v2856_v43 }
 0x298   : > { %v3132_v25 = vadd.f32 %v4840_v53, %v3000_v42  ;;  %v3001_v13 = vmul.f32 %v4835_v29, %v2848_v57 }
 0x299   : > { %v3232_v14 = vmax.f32 %v3104_v46, 0.0  ;;  %v3262_v2 = vmax.f32 %v3134_v32, 0.0  ;;  %v3105_v31 = vadd.f32 %v4840_v53, %v2973_v23  ;;  %v3135_v1 = vadd.f32 %v4840_v53, %v3003_v22 }
 0x29a   : > { %v3260_v16 = vmax.f32 %v3132_v25, 0.0  ;;  %v3133_v12 = vadd.f32 %v4840_v53, %v3001_v13  ;;  %v2195_v7 = vpop.f32.mrb[188].mxu0  ;;  %v3984_v20 = vpop.f32.mrb[188].mxu1 }
 0x29b   : > { %3360 = vst [vmem:[%s4860_s12 + $0x2e0] sm:$0xff] %v3232_v14  ;;  %3390 = vst [vmem:[%s4860_s12 + $0x3d0] sm:$0xff] %v3262_v2  ;;  %v3233_v15 = vmax.f32 %v3105_v31, 0.0  ;;  %v3263_v49 = vmax.f32 %v3135_v1, 0.0  ;;  %v2741_v3 = vadd.f32 %v5236_v10, %v2195_v7  ;;  %v2869_v8 = vadd.f32 %v3984_v20, %v5495_v34  ;;  %v2197_v21 = vpop.f32.mrb[189].mxu0  ;;  %v2860_v54 = vpop.f32.mrb[189].mxu1 }
 0x29c   : > { %3388 = vst [vmem:[%s4860_s12 + $0x3c0] sm:$0xff] %v3260_v16  ;;  %v3261_v5 = vmax.f32 %v3133_v12, 0.0  ;;  %v2861_v62 = vadd.f32 %v2860_v54, %v5496_v52  ;;  %v2198_v9 = vpop.f32.mrb[190].mxu0  ;;  %v3985_v55 = vpop.f32.mrb[190].mxu1  ;;  %v5497_v10 = vld [vmem:[#allocation21_spill] sm:$0xff] }
 0x29d   : > { %3361 = vst [vmem:[%s4860_s12 + $0x2e8] sm:$0xff] %v3233_v15  ;;  %3391 = vst [vmem:[%s4860_s12 + $0x3d8] sm:$0xff] %v3263_v49  ;;  %v2974_v50 = vmul.f32 %v4835_v29, %v2741_v3  ;;  %v3006_v60 = vmul.f32 %v4835_v29, %v2869_v8  ;;  %v2744_v35 = vadd.f32 %v5242_v24, %v2198_v9  ;;  %v2200_v28 = vpop.f32.mrb[191].mxu0  ;;  %v2863_v30 = vpop.f32.mrb[191].mxu1 }
 0x29e   : > { %v2872_v17 = vadd.f32 %v3985_v55, %v5497_v10  ;;  %3389 = vst [vmem:[%s4860_s12 + $0x3c8] sm:$0xff] %v3261_v5  ;;  %v3004_v51 = vmul.f32 %v4835_v29, %v2861_v62  ;;  %v2864_v33 = vadd.f32 %v2863_v30, %v5498_v6 }
 0x29f   : > { %v3106_v45 = vadd.f32 %v4840_v53, %v2974_v50  ;;  %v3138_v27 = vadd.f32 %v4840_v53, %v3006_v60  ;;  %v2975_v56 = vmul.f32 %v4835_v29, %v2744_v35 }
 0x2a0   : > { %v3007_v24 = vmul.f32 %v4835_v29, %v2872_v17  ;;  %v3136_v48 = vadd.f32 %v4840_v53, %v3004_v51  ;;  %v3005_v39 = vmul.f32 %v4835_v29, %v2864_v33 }
 0x2a1   : > { %v3234_v19 = vmax.f32 %v3106_v45, 0.0  ;;  %v3266_v61 = vmax.f32 %v3138_v27, 0.0  ;;  %v3107_v0 = vadd.f32 %v4840_v53, %v2975_v56 }
 0x2a2   : > { %v3139_v41 = vadd.f32 %v4840_v53, %v3007_v24  ;;  %v3264_v47 = vmax.f32 %v3136_v48, 0.0  ;;  %v3137_v38 = vadd.f32 %v4840_v53, %v3005_v39 }
 0x2a3   : > { %3362 = vst [vmem:[%s4860_s12 + $0x2f0] sm:$0xff] %v3234_v19  ;;  %3394 = vst [vmem:[%s4860_s12 + $0x3f0] sm:$0xff] %v3266_v61  ;;  %v3235_v40 = vmax.f32 %v3107_v0, 0.0 }
 0x2a4   : > { %v3267_v37 = vmax.f32 %v3139_v41, 0.0  ;;  %3392 = vst [vmem:[%s4860_s12 + $0x3e0] sm:$0xff] %v3264_v47  ;;  %v3265_v26 = vmax.f32 %v3137_v38, 0.0 }
 0x2a5   : > { %3363 = vst [vmem:[%s4860_s12 + $0x2f8] sm:$0xff] %v3235_v40 }
 0x2a6   : > { %3395 = vst [vmem:[%s4860_s12 + $0x3f8] sm:$0xff] %v3267_v37  ;;  %3393 = vst [vmem:[%s4860_s12 + $0x3e8] sm:$0xff] %v3265_v26 }
 0x2a7 PF: > { %s13_s14 = sadd.s32 1, %s4340_s14   ;;  %s5499_s12 = smov %s4336_s13 }
 0x2a8   : > { %p10_p5 = scmp.ge.s32.totalorder %s13_s14, 4   ;;  %s5500_s13 = smov %s5502_s15 }
 0x2aa   :  { %12 = sbr.rel (!%p10_p5) target bundleno = 2 (0x2), region = 68 }

</bundles_post_ra>
